<compile_context>
chip_gen: v5e
topology: v5e:2x2
jax: 0.10.0
libtpu: 0.0.40
codegen_flags: <defaults>
</compile_context>

<pallas_src>
import functools

import jax
import jax.numpy as jnp
from jax.experimental import pallas as pl
from jax.experimental.pallas import tpu as pltpu

MM_DTYPE = jnp.bfloat16  # MXU operand dtype (accumulation stays float32)


# ------------------------------------------------------------------
# Pallas kernel: one (tb_block, N, C) slab of the whole Block per grid step
# ------------------------------------------------------------------
def block_kernel(x_ref,
                 wqkv_ref, bqkv_ref,
                 wp_ref, bp_ref, w1_ref, b1_ref, w2_ref, b2_ref,
                 o_ref, y_scr, *, num_heads, head_dim):
    tb_blk, n_tok, c = x_ref.shape
    rows = tb_blk * n_tok

    x = x_ref[...].reshape(rows, c)                       # f32 (rows, C)

    def lin_relu(inp_mm, w_ref, b_ref):
        # bf16 x bf16 (or f32) -> f32 accumulate on the MXU; bias + ReLU on VPU.
        y = jnp.dot(inp_mm, w_ref[...], preferred_element_type=jnp.float32)
        return jnp.maximum(y + b_ref[...], 0.0)

    # --- SSA: fused q|k|v Linear (+ folded BN) + ReLU "LIF"; the fixed 0.125
    #     attention scale is folded into the q columns (ReLU-safe, scale > 0).
    qkv = lin_relu(x.astype(MM_DTYPE), wqkv_ref, bqkv_ref)   # f32 (rows, 3C)
    qkv3 = qkv.reshape(tb_blk, n_tok, 3 * c)                 # leading split only
    qkv3_mm = qkv3.astype(MM_DTYPE)                          # one cast, 192 lanes

    # --- Per-head attention, batched over the tb_blk slabs (contractions use
    #     the last dim of both operands; no materialized k^T).  Scores stay
    #     f32 for the attn @ v product.
    for h in range(num_heads):                               # static unroll
        lo = h * head_dim
        qh = qkv3_mm[:, :, lo:lo + head_dim]                 # (tb, N, D) bf16
        kh = qkv3_mm[:, :, c + lo:c + lo + head_dim]         # (tb, N, D) bf16
        vh = qkv3[:, :, 2 * c + lo:2 * c + lo + head_dim]    # (tb, N, D) f32
        attn = jnp.einsum('bnd,bmd->bnm', qh, kh,
                          preferred_element_type=jnp.float32)   # (tb, N, N) f32
        yh = jnp.einsum('bnm,bmd->bnd', attn, vh,
                        preferred_element_type=jnp.float32)     # (tb, N, D) f32
        # attn_lif (ReLU) per head, stored into this head's C lanes (bf16).
        y_scr[:, lo:lo + head_dim] = (
            jnp.maximum(yh, 0.0).reshape(rows, head_dim).astype(y_scr.dtype))

    # --- SSA projection (+ folded BN) + ReLU, residual 1.
    a = lin_relu(y_scr[...], wp_ref, bp_ref)                 # (rows, C) f32
    h1 = x + a

    # --- MLP: fc1 -> ReLU -> fc2 -> ReLU, residual 2.
    m = lin_relu(h1.astype(MM_DTYPE), w1_ref, b1_ref)        # (rows, Ch)
    m = lin_relu(m.astype(MM_DTYPE), w2_ref, b2_ref)         # (rows, C)

    o_ref[...] = (h1 + m).reshape(tb_blk, n_tok, c).astype(o_ref.dtype)


# ------------------------------------------------------------------
# Parameter folding + pallas_call wrapper
# ------------------------------------------------------------------
def fold_bn(w, b, gamma, beta, mean, var, eps=1e-5, scale=1.0, dtype=MM_DTYPE):
    """Fold inference-mode BatchNorm1d (running stats) into the preceding
    Linear, optionally folding a positive scalar `scale` (valid through the
    following ReLU since scale > 0).  Returns W^T (Cin, Cout) in the matmul
    dtype and the bias (1, Cout) in f32."""
    s = gamma / jnp.sqrt(var + eps)
    w_f = (w * s[:, None]) * scale                   # (Cout, Cin)
    b_f = ((b - mean) * s + beta) * scale            # (Cout,)
    return w_f.T.astype(dtype), b_f.reshape(1, -1).astype(jnp.float32)


def _pick_tb_block(tb, n, target_rows=2048, max_rows=4096):
    """Block of the T*B axis: the smallest divisor of TB whose slab reaches
    `target_rows` matmul rows (amortizes per-step overhead / fills MXU
    sublanes), subject to a `max_rows` VMEM cap (v7x 64 MiB/TC).  If the whole
    input is smaller than the target, take the largest fitting block, but keep
    >= 2 grid steps when that costs at most a 2x smaller slab."""
    divisors = [d for d in range(1, tb + 1) if tb % d == 0]
    fitting = [d for d in divisors if d * n <= max_rows] or divisors[:1]
    for d in fitting:
        if d * n >= target_rows:
            return d
    best = fitting[-1]
    two_step = [d for d in fitting if tb // d >= 2]
    if two_step and 2 * two_step[-1] >= best:
        return two_step[-1]
    return best


def block_forward(x, params, num_heads, tb_block=None):
    T, B, N, C = x.shape
    assert C % num_heads == 0
    TB = T * B
    head_dim = C // num_heads
    attn_scale = 0.125   # Spikformer's fixed scale (NOT 1/sqrt(head_dim))

    pa, pm = params["attn"], params["mlp"]
    wq, bq = fold_bn(*pa["q"], scale=attn_scale)   # scale folded (ReLU-safe)
    wk, bk = fold_bn(*pa["k"])
    wv, bv = fold_bn(*pa["v"])
    w_qkv = jnp.concatenate([wq, wk, wv], axis=1)  # (C, 3C) bf16, one matmul
    b_qkv = jnp.concatenate([bq, bk, bv], axis=1)  # (1, 3C) f32
    wp, bp = fold_bn(*pa["proj"])
    w1, b1 = fold_bn(*pm["fc1"])
    w2, b2 = fold_bn(*pm["fc2"])
    Ch = w1.shape[1]

    if tb_block is None:
        tb_block = _pick_tb_block(TB, N)
    grid = TB // tb_block

    kernel = functools.partial(block_kernel, num_heads=num_heads,
                               head_dim=head_dim)

    def const(shape):
        # constant index_map: weights stay VMEM-resident across grid steps
        return pl.BlockSpec(shape, lambda i, _n=len(shape): (0,) * _n)

    out_flat = pl.pallas_call(
        kernel,
        out_shape=jax.ShapeDtypeStruct((TB, N, C), x.dtype),
        grid_spec=pltpu.PrefetchScalarGridSpec(
            num_scalar_prefetch=0,
            grid=(grid,),
            in_specs=[
                pl.BlockSpec((tb_block, N, C), lambda i: (i, 0, 0)),
                const((C, 3 * C)), const((1, 3 * C)),   # fused q|k|v
                const((C, C)), const((1, C)),           # proj
                const((C, Ch)), const((1, Ch)),         # mlp fc1
                const((Ch, C)), const((1, C)),          # mlp fc2
            ],
            out_specs=pl.BlockSpec((tb_block, N, C), lambda i: (i, 0, 0)),
            scratch_shapes=[pltpu.VMEM((tb_block * N, C), MM_DTYPE)],
        ),
        compiler_params=pltpu.CompilerParams(
            dimension_semantics=("parallel",),
            vmem_limit_bytes=48 * 1024 * 1024),  # headroom under v7x 64 MiB/TC
    )(x.reshape(TB, N, C), w_qkv, b_qkv, wp, bp, w1, b1, w2, b2)

    return out_flat.reshape(T, B, N, C)


# ------------------------------------------------------------------
# Pure-JAX f32 reference (mirrors the PyTorch Block forward, eval-mode BN)
# ------------------------------------------------------------------
def _lin_bn_relu_ref(x2d, w, b, gamma, beta, mean, var, eps=1e-5):
    y = jnp.matmul(x2d, w.T, precision=jax.lax.Precision.HIGHEST) + b
    s = gamma / jnp.sqrt(var + eps)
    return jnp.maximum((y - mean) * s + beta, 0.0)


def ssa_reference(x, p, num_heads):
    T, B, N, C = x.shape
    D = C // num_heads
    scale = 0.125
    xf = x.reshape(T * B, N, C)
    q = _lin_bn_relu_ref(xf, *p["q"]).reshape(T, B, N, num_heads, D).transpose(0, 1, 3, 2, 4)
    k = _lin_bn_relu_ref(xf, *p["k"]).reshape(T, B, N, num_heads, D).transpose(0, 1, 3, 2, 4)
    v = _lin_bn_relu_ref(xf, *p["v"]).reshape(T, B, N, num_heads, D).transpose(0, 1, 3, 2, 4)
    attn = jnp.matmul(q, jnp.swapaxes(k, -2, -1),
                      precision=jax.lax.Precision.HIGHEST) * scale
    y = jnp.matmul(attn, v, precision=jax.lax.Precision.HIGHEST)
    y = jnp.maximum(y.transpose(0, 1, 3, 2, 4).reshape(T, B, N, C), 0.0)  # attn_lif
    out = _lin_bn_relu_ref(y.reshape(T * B, N, C), *p["proj"])
    return out.reshape(T, B, N, C)


def mlp_reference(x, p):
    T, B, N, C = x.shape
    xf = x.reshape(T * B, N, C)
    h = _lin_bn_relu_ref(xf, *p["fc1"])
    o = _lin_bn_relu_ref(h, *p["fc2"])
    return o.reshape(T, B, N, C)


def block_reference(x, params, num_heads):
    x = x + ssa_reference(x, params["attn"], num_heads)
    x = x + mlp_reference(x, params["mlp"])
    return x


# ------------------------------------------------------------------
# Deterministic parameter construction
# ------------------------------------------------------------------
def make_params(key, dim, hidden):
    def branch(k, out_dim, in_dim):
        k0, k1, k2, k3, k4, k5 = jax.random.split(k, 6)
        w = 0.05 * jax.random.normal(k0, (out_dim, in_dim), jnp.float32)
        b = 0.02 * jax.random.normal(k1, (out_dim,), jnp.float32)
        gamma = 1.0 + 0.1 * jax.random.normal(k2, (out_dim,), jnp.float32)
        beta = 0.05 * jax.random.normal(k3, (out_dim,), jnp.float32)
        mean = 0.01 * jax.random.normal(k4, (out_dim,), jnp.float32)
        var = 0.5 + 0.1 * jnp.abs(jax.random.normal(k5, (out_dim,), jnp.float32))
        return (w, b, gamma, beta, mean, var)

    kq, kk, kv, kp, k1, k2 = jax.random.split(key, 6)
    return {
        "attn": {"q": branch(kq, dim, dim), "k": branch(kk, dim, dim),
                 "v": branch(kv, dim, dim), "proj": branch(kp, dim, dim)},
        "mlp": {"fc1": branch(k1, hidden, dim), "fc2": branch(k2, dim, hidden)},
    }


if __name__ == "__main__":
    T, B, N, C = 2, 16, 16, 64
    num_heads = 8
    hidden = int(C * 4.0)   # mlp_ratio = 4

    key = jax.random.PRNGKey(0)
    kx, kp = jax.random.split(key)
    x = jax.random.normal(kx, (T, B, N, C), jnp.float32)
    params = make_params(kp, C, hidden)

    out = jax.block_until_ready(block_forward(x, params, num_heads))
    ref = jax.block_until_ready(block_reference(x, params, num_heads))

    assert out.shape == (T, B, N, C)
    # bf16 MXU operands (f32 accumulation, f32 attention scores) give
    # ~1e-2-level deviation vs the pure-f32 reference; structural bugs would
    # show up at >= 1e-1.
    err = jnp.max(jnp.abs(out - ref))
    assert jnp.allclose(out, ref, rtol=3e-2, atol=3e-2), f"max abs err {err}"

    print("KERNEL_OK")
</pallas_src>

<mosaic_0001>
module attributes {stable_mosaic.version = 11 : i64} {
  func.func @block_kernel(%arg0: i32, %arg1: memref<16x16x64xf32, #tpu.memory_space<vmem>>, %arg2: memref<64x192xbf16, #tpu.memory_space<vmem>>, %arg3: memref<1x192xf32, #tpu.memory_space<vmem>>, %arg4: memref<64x64xbf16, #tpu.memory_space<vmem>>, %arg5: memref<1x64xf32, #tpu.memory_space<vmem>>, %arg6: memref<64x256xbf16, #tpu.memory_space<vmem>>, %arg7: memref<1x256xf32, #tpu.memory_space<vmem>>, %arg8: memref<256x64xbf16, #tpu.memory_space<vmem>>, %arg9: memref<1x64xf32, #tpu.memory_space<vmem>>, %arg10: memref<16x16x64xf32, #tpu.memory_space<vmem>>, %arg11: memref<256x64xbf16, #tpu.memory_space<vmem>>) attributes {dimension_semantics = [#tpu.dimension_semantics<parallel>], iteration_bounds = array<i64: 2>, scalar_prefetch = 0 : i64, scratch_operands = 1 : i64, tpu.core_type = #tpu.core_type<tc>, window_params = [{transform_indices = @transform_0, window_bounds = array<i64: 16, 16, 64>}, {pipeline_mode = #tpu.pipeline_mode<synchronous>, transform_indices = @transform_1, window_bounds = array<i64: 64, 192>}, {pipeline_mode = #tpu.pipeline_mode<synchronous>, transform_indices = @transform_2, window_bounds = array<i64: 1, 192>}, {pipeline_mode = #tpu.pipeline_mode<synchronous>, transform_indices = @transform_3, window_bounds = array<i64: 64, 64>}, {pipeline_mode = #tpu.pipeline_mode<synchronous>, transform_indices = @transform_4, window_bounds = array<i64: 1, 64>}, {pipeline_mode = #tpu.pipeline_mode<synchronous>, transform_indices = @transform_5, window_bounds = array<i64: 64, 256>}, {pipeline_mode = #tpu.pipeline_mode<synchronous>, transform_indices = @transform_6, window_bounds = array<i64: 1, 256>}, {pipeline_mode = #tpu.pipeline_mode<synchronous>, transform_indices = @transform_7, window_bounds = array<i64: 256, 64>}, {pipeline_mode = #tpu.pipeline_mode<synchronous>, transform_indices = @transform_8, window_bounds = array<i64: 1, 64>}, {transform_indices = @transform_9, window_bounds = array<i64: 16, 16, 64>}]} {
    %c0 = arith.constant 0 : index
    %c0_0 = arith.constant 0 : index
    %c0_1 = arith.constant 0 : index
    %0 = vector.load %arg1[%c0, %c0_0, %c0_1] : memref<16x16x64xf32, #tpu.memory_space<vmem>>, vector<16x16x64xf32>
    %1 = vector.shape_cast %0 : vector<16x16x64xf32> to vector<256x64xf32>
    %2 = arith.truncf %1 : vector<256x64xf32> to vector<256x64xbf16>
    %c0_2 = arith.constant 0 : index
    %c0_3 = arith.constant 0 : index
    %3 = vector.load %arg2[%c0_2, %c0_3] : memref<64x192xbf16, #tpu.memory_space<vmem>>, vector<64x192xbf16>
    %cst = arith.constant dense<0.000000e+00> : vector<256x192xf32>
    %4 = tpu.matmul %2, %3, %cst {dimension_numbers = #tpu.dot_dimension_numbers<[1], [0], [0], [1], [0, 0, 1, 1], [], []>} : vector<256x64xbf16>, vector<64x192xbf16>, vector<256x192xf32> -> vector<256x192xf32>
    %c0_4 = arith.constant 0 : index
    %c0_5 = arith.constant 0 : index
    %5 = vector.load %arg3[%c0_4, %c0_5] : memref<1x192xf32, #tpu.memory_space<vmem>>, vector<1x192xf32>
    %6 = vector.broadcast %5 : vector<1x192xf32> to vector<256x192xf32>
    %7 = arith.addf %4, %6 : vector<256x192xf32>
    %cst_6 = arith.constant 0.000000e+00 : f32
    %8 = vector.broadcast %cst_6 : f32 to vector<256x192xf32>
    %9 = arith.maximumf %7, %8 : vector<256x192xf32>
    %10 = vector.shape_cast %9 : vector<256x192xf32> to vector<16x16x192xf32>
    %11 = arith.truncf %10 : vector<16x16x192xf32> to vector<16x16x192xbf16>
    %12 = vector.extract_strided_slice %11 {offsets = [0, 0, 0], sizes = [16, 16, 8], strides = [1, 1, 1]} : vector<16x16x192xbf16> to vector<16x16x8xbf16>
    %13 = vector.extract_strided_slice %11 {offsets = [0, 0, 64], sizes = [16, 16, 8], strides = [1, 1, 1]} : vector<16x16x192xbf16> to vector<16x16x8xbf16>
    %14 = vector.extract_strided_slice %10 {offsets = [0, 0, 128], sizes = [16, 16, 8], strides = [1, 1, 1]} : vector<16x16x192xf32> to vector<16x16x8xf32>
    "tpu.trace_start"() <{level = 10 : i32, message = "bnd,bmd->bnm"}> : () -> ()
    %cst_7 = arith.constant dense<0.000000e+00> : vector<16x16x16xf32>
    %15 = tpu.matmul %12, %13, %cst_7 {dimension_numbers = #tpu.dot_dimension_numbers<[2], [2], [1], [1], [0, 0, 0, 1, 1, 1], [0], [0]>} : vector<16x16x8xbf16>, vector<16x16x8xbf16>, vector<16x16x16xf32> -> vector<16x16x16xf32>
    "tpu.trace_stop"() : () -> ()
    "tpu.trace_start"() <{level = 10 : i32, message = "bnm,bmd->bnd"}> : () -> ()
    %cst_8 = arith.constant dense<0.000000e+00> : vector<16x16x8xf32>
    %16 = tpu.matmul %15, %14, %cst_8 {dimension_numbers = #tpu.dot_dimension_numbers<[2], [1], [1], [2], [0, 0, 0, 1, 1, 2], [0], [0]>} : vector<16x16x16xf32>, vector<16x16x8xf32>, vector<16x16x8xf32> -> vector<16x16x8xf32>
    "tpu.trace_stop"() : () -> ()
    %cst_9 = arith.constant 0.000000e+00 : f32
    %17 = vector.broadcast %cst_9 : f32 to vector<16x16x8xf32>
    %18 = arith.maximumf %16, %17 : vector<16x16x8xf32>
    %19 = vector.shape_cast %18 : vector<16x16x8xf32> to vector<256x8xf32>
    %20 = arith.truncf %19 : vector<256x8xf32> to vector<256x8xbf16>
    %c0_10 = arith.constant 0 : index
    %c0_11 = arith.constant 0 : index
    %21 = vector.load %arg11[%c0_10, %c0_11] : memref<256x64xbf16, #tpu.memory_space<vmem>>, vector<256x8xbf16>
    tpu.vector_store %arg11[%c0_10, %c0_11], %20 {strides = array<i32>} : memref<256x64xbf16, #tpu.memory_space<vmem>>, vector<256x8xbf16>,
    %22 = vector.extract_strided_slice %11 {offsets = [0, 0, 8], sizes = [16, 16, 8], strides = [1, 1, 1]} : vector<16x16x192xbf16> to vector<16x16x8xbf16>
    %23 = vector.extract_strided_slice %11 {offsets = [0, 0, 72], sizes = [16, 16, 8], strides = [1, 1, 1]} : vector<16x16x192xbf16> to vector<16x16x8xbf16>
    %24 = vector.extract_strided_slice %10 {offsets = [0, 0, 136], sizes = [16, 16, 8], strides = [1, 1, 1]} : vector<16x16x192xf32> to vector<16x16x8xf32>
    "tpu.trace_start"() <{level = 10 : i32, message = "bnd,bmd->bnm"}> : () -> ()
    %cst_12 = arith.constant dense<0.000000e+00> : vector<16x16x16xf32>
    %25 = tpu.matmul %22, %23, %cst_12 {dimension_numbers = #tpu.dot_dimension_numbers<[2], [2], [1], [1], [0, 0, 0, 1, 1, 1], [0], [0]>} : vector<16x16x8xbf16>, vector<16x16x8xbf16>, vector<16x16x16xf32> -> vector<16x16x16xf32>
    "tpu.trace_stop"() : () -> ()
    "tpu.trace_start"() <{level = 10 : i32, message = "bnm,bmd->bnd"}> : () -> ()
    %cst_13 = arith.constant dense<0.000000e+00> : vector<16x16x8xf32>
    %26 = tpu.matmul %25, %24, %cst_13 {dimension_numbers = #tpu.dot_dimension_numbers<[2], [1], [1], [2], [0, 0, 0, 1, 1, 2], [0], [0]>} : vector<16x16x16xf32>, vector<16x16x8xf32>, vector<16x16x8xf32> -> vector<16x16x8xf32>
    "tpu.trace_stop"() : () -> ()
    %cst_14 = arith.constant 0.000000e+00 : f32
    %27 = vector.broadcast %cst_14 : f32 to vector<16x16x8xf32>
    %28 = arith.maximumf %26, %27 : vector<16x16x8xf32>
    %29 = vector.shape_cast %28 : vector<16x16x8xf32> to vector<256x8xf32>
    %30 = arith.truncf %29 : vector<256x8xf32> to vector<256x8xbf16>
    %c0_15 = arith.constant 0 : index
    %c8 = arith.constant 8 : index
    %31 = vector.load %arg11[%c0_15, %c8] : memref<256x64xbf16, #tpu.memory_space<vmem>>, vector<256x8xbf16>
    tpu.vector_store %arg11[%c0_15, %c8], %30 {strides = array<i32>} : memref<256x64xbf16, #tpu.memory_space<vmem>>, vector<256x8xbf16>,
    %32 = vector.extract_strided_slice %11 {offsets = [0, 0, 16], sizes = [16, 16, 8], strides = [1, 1, 1]} : vector<16x16x192xbf16> to vector<16x16x8xbf16>
    %33 = vector.extract_strided_slice %11 {offsets = [0, 0, 80], sizes = [16, 16, 8], strides = [1, 1, 1]} : vector<16x16x192xbf16> to vector<16x16x8xbf16>
    %34 = vector.extract_strided_slice %10 {offsets = [0, 0, 144], sizes = [16, 16, 8], strides = [1, 1, 1]} : vector<16x16x192xf32> to vector<16x16x8xf32>
    "tpu.trace_start"() <{level = 10 : i32, message = "bnd,bmd->bnm"}> : () -> ()
    %cst_16 = arith.constant dense<0.000000e+00> : vector<16x16x16xf32>
    %35 = tpu.matmul %32, %33, %cst_16 {dimension_numbers = #tpu.dot_dimension_numbers<[2], [2], [1], [1], [0, 0, 0, 1, 1, 1], [0], [0]>} : vector<16x16x8xbf16>, vector<16x16x8xbf16>, vector<16x16x16xf32> -> vector<16x16x16xf32>
    "tpu.trace_stop"() : () -> ()
    "tpu.trace_start"() <{level = 10 : i32, message = "bnm,bmd->bnd"}> : () -> ()
    %cst_17 = arith.constant dense<0.000000e+00> : vector<16x16x8xf32>
    %36 = tpu.matmul %35, %34, %cst_17 {dimension_numbers = #tpu.dot_dimension_numbers<[2], [1], [1], [2], [0, 0, 0, 1, 1, 2], [0], [0]>} : vector<16x16x16xf32>, vector<16x16x8xf32>, vector<16x16x8xf32> -> vector<16x16x8xf32>
    "tpu.trace_stop"() : () -> ()
    %cst_18 = arith.constant 0.000000e+00 : f32
    %37 = vector.broadcast %cst_18 : f32 to vector<16x16x8xf32>
    %38 = arith.maximumf %36, %37 : vector<16x16x8xf32>
    %39 = vector.shape_cast %38 : vector<16x16x8xf32> to vector<256x8xf32>
    %40 = arith.truncf %39 : vector<256x8xf32> to vector<256x8xbf16>
    %c0_19 = arith.constant 0 : index
    %c16 = arith.constant 16 : index
    %41 = vector.load %arg11[%c0_19, %c16] : memref<256x64xbf16, #tpu.memory_space<vmem>>, vector<256x8xbf16>
    tpu.vector_store %arg11[%c0_19, %c16], %40 {strides = array<i32>} : memref<256x64xbf16, #tpu.memory_space<vmem>>, vector<256x8xbf16>,
    %42 = vector.extract_strided_slice %11 {offsets = [0, 0, 24], sizes = [16, 16, 8], strides = [1, 1, 1]} : vector<16x16x192xbf16> to vector<16x16x8xbf16>
    %43 = vector.extract_strided_slice %11 {offsets = [0, 0, 88], sizes = [16, 16, 8], strides = [1, 1, 1]} : vector<16x16x192xbf16> to vector<16x16x8xbf16>
    %44 = vector.extract_strided_slice %10 {offsets = [0, 0, 152], sizes = [16, 16, 8], strides = [1, 1, 1]} : vector<16x16x192xf32> to vector<16x16x8xf32>
    "tpu.trace_start"() <{level = 10 : i32, message = "bnd,bmd->bnm"}> : () -> ()
    %cst_20 = arith.constant dense<0.000000e+00> : vector<16x16x16xf32>
    %45 = tpu.matmul %42, %43, %cst_20 {dimension_numbers = #tpu.dot_dimension_numbers<[2], [2], [1], [1], [0, 0, 0, 1, 1, 1], [0], [0]>} : vector<16x16x8xbf16>, vector<16x16x8xbf16>, vector<16x16x16xf32> -> vector<16x16x16xf32>
    "tpu.trace_stop"() : () -> ()
    "tpu.trace_start"() <{level = 10 : i32, message = "bnm,bmd->bnd"}> : () -> ()
    %cst_21 = arith.constant dense<0.000000e+00> : vector<16x16x8xf32>
    %46 = tpu.matmul %45, %44, %cst_21 {dimension_numbers = #tpu.dot_dimension_numbers<[2], [1], [1], [2], [0, 0, 0, 1, 1, 2], [0], [0]>} : vector<16x16x16xf32>, vector<16x16x8xf32>, vector<16x16x8xf32> -> vector<16x16x8xf32>
    "tpu.trace_stop"() : () -> ()
    %cst_22 = arith.constant 0.000000e+00 : f32
    %47 = vector.broadcast %cst_22 : f32 to vector<16x16x8xf32>
    %48 = arith.maximumf %46, %47 : vector<16x16x8xf32>
    %49 = vector.shape_cast %48 : vector<16x16x8xf32> to vector<256x8xf32>
    %50 = arith.truncf %49 : vector<256x8xf32> to vector<256x8xbf16>
    %c0_23 = arith.constant 0 : index
    %c24 = arith.constant 24 : index
    %51 = vector.load %arg11[%c0_23, %c24] : memref<256x64xbf16, #tpu.memory_space<vmem>>, vector<256x8xbf16>
    tpu.vector_store %arg11[%c0_23, %c24], %50 {strides = array<i32>} : memref<256x64xbf16, #tpu.memory_space<vmem>>, vector<256x8xbf16>,
    %52 = vector.extract_strided_slice %11 {offsets = [0, 0, 32], sizes = [16, 16, 8], strides = [1, 1, 1]} : vector<16x16x192xbf16> to vector<16x16x8xbf16>
    %53 = vector.extract_strided_slice %11 {offsets = [0, 0, 96], sizes = [16, 16, 8], strides = [1, 1, 1]} : vector<16x16x192xbf16> to vector<16x16x8xbf16>
    %54 = vector.extract_strided_slice %10 {offsets = [0, 0, 160], sizes = [16, 16, 8], strides = [1, 1, 1]} : vector<16x16x192xf32> to vector<16x16x8xf32>
    "tpu.trace_start"() <{level = 10 : i32, message = "bnd,bmd->bnm"}> : () -> ()
    %cst_24 = arith.constant dense<0.000000e+00> : vector<16x16x16xf32>
    %55 = tpu.matmul %52, %53, %cst_24 {dimension_numbers = #tpu.dot_dimension_numbers<[2], [2], [1], [1], [0, 0, 0, 1, 1, 1], [0], [0]>} : vector<16x16x8xbf16>, vector<16x16x8xbf16>, vector<16x16x16xf32> -> vector<16x16x16xf32>
    "tpu.trace_stop"() : () -> ()
    "tpu.trace_start"() <{level = 10 : i32, message = "bnm,bmd->bnd"}> : () -> ()
    %cst_25 = arith.constant dense<0.000000e+00> : vector<16x16x8xf32>
    %56 = tpu.matmul %55, %54, %cst_25 {dimension_numbers = #tpu.dot_dimension_numbers<[2], [1], [1], [2], [0, 0, 0, 1, 1, 2], [0], [0]>} : vector<16x16x16xf32>, vector<16x16x8xf32>, vector<16x16x8xf32> -> vector<16x16x8xf32>
    "tpu.trace_stop"() : () -> ()
    %cst_26 = arith.constant 0.000000e+00 : f32
    %57 = vector.broadcast %cst_26 : f32 to vector<16x16x8xf32>
    %58 = arith.maximumf %56, %57 : vector<16x16x8xf32>
    %59 = vector.shape_cast %58 : vector<16x16x8xf32> to vector<256x8xf32>
    %60 = arith.truncf %59 : vector<256x8xf32> to vector<256x8xbf16>
    %c0_27 = arith.constant 0 : index
    %c32 = arith.constant 32 : index
    %61 = vector.load %arg11[%c0_27, %c32] : memref<256x64xbf16, #tpu.memory_space<vmem>>, vector<256x8xbf16>
    tpu.vector_store %arg11[%c0_27, %c32], %60 {strides = array<i32>} : memref<256x64xbf16, #tpu.memory_space<vmem>>, vector<256x8xbf16>,
    %62 = vector.extract_strided_slice %11 {offsets = [0, 0, 40], sizes = [16, 16, 8], strides = [1, 1, 1]} : vector<16x16x192xbf16> to vector<16x16x8xbf16>
    %63 = vector.extract_strided_slice %11 {offsets = [0, 0, 104], sizes = [16, 16, 8], strides = [1, 1, 1]} : vector<16x16x192xbf16> to vector<16x16x8xbf16>
    %64 = vector.extract_strided_slice %10 {offsets = [0, 0, 168], sizes = [16, 16, 8], strides = [1, 1, 1]} : vector<16x16x192xf32> to vector<16x16x8xf32>
    "tpu.trace_start"() <{level = 10 : i32, message = "bnd,bmd->bnm"}> : () -> ()
    %cst_28 = arith.constant dense<0.000000e+00> : vector<16x16x16xf32>
    %65 = tpu.matmul %62, %63, %cst_28 {dimension_numbers = #tpu.dot_dimension_numbers<[2], [2], [1], [1], [0, 0, 0, 1, 1, 1], [0], [0]>} : vector<16x16x8xbf16>, vector<16x16x8xbf16>, vector<16x16x16xf32> -> vector<16x16x16xf32>
    "tpu.trace_stop"() : () -> ()
    "tpu.trace_start"() <{level = 10 : i32, message = "bnm,bmd->bnd"}> : () -> ()
    %cst_29 = arith.constant dense<0.000000e+00> : vector<16x16x8xf32>
    %66 = tpu.matmul %65, %64, %cst_29 {dimension_numbers = #tpu.dot_dimension_numbers<[2], [1], [1], [2], [0, 0, 0, 1, 1, 2], [0], [0]>} : vector<16x16x16xf32>, vector<16x16x8xf32>, vector<16x16x8xf32> -> vector<16x16x8xf32>
    "tpu.trace_stop"() : () -> ()
    %cst_30 = arith.constant 0.000000e+00 : f32
    %67 = vector.broadcast %cst_30 : f32 to vector<16x16x8xf32>
    %68 = arith.maximumf %66, %67 : vector<16x16x8xf32>
    %69 = vector.shape_cast %68 : vector<16x16x8xf32> to vector<256x8xf32>
    %70 = arith.truncf %69 : vector<256x8xf32> to vector<256x8xbf16>
    %c0_31 = arith.constant 0 : index
    %c40 = arith.constant 40 : index
    %71 = vector.load %arg11[%c0_31, %c40] : memref<256x64xbf16, #tpu.memory_space<vmem>>, vector<256x8xbf16>
    tpu.vector_store %arg11[%c0_31, %c40], %70 {strides = array<i32>} : memref<256x64xbf16, #tpu.memory_space<vmem>>, vector<256x8xbf16>,
    %72 = vector.extract_strided_slice %11 {offsets = [0, 0, 48], sizes = [16, 16, 8], strides = [1, 1, 1]} : vector<16x16x192xbf16> to vector<16x16x8xbf16>
    %73 = vector.extract_strided_slice %11 {offsets = [0, 0, 112], sizes = [16, 16, 8], strides = [1, 1, 1]} : vector<16x16x192xbf16> to vector<16x16x8xbf16>
    %74 = vector.extract_strided_slice %10 {offsets = [0, 0, 176], sizes = [16, 16, 8], strides = [1, 1, 1]} : vector<16x16x192xf32> to vector<16x16x8xf32>
    "tpu.trace_start"() <{level = 10 : i32, message = "bnd,bmd->bnm"}> : () -> ()
    %cst_32 = arith.constant dense<0.000000e+00> : vector<16x16x16xf32>
    %75 = tpu.matmul %72, %73, %cst_32 {dimension_numbers = #tpu.dot_dimension_numbers<[2], [2], [1], [1], [0, 0, 0, 1, 1, 1], [0], [0]>} : vector<16x16x8xbf16>, vector<16x16x8xbf16>, vector<16x16x16xf32> -> vector<16x16x16xf32>
    "tpu.trace_stop"() : () -> ()
    "tpu.trace_start"() <{level = 10 : i32, message = "bnm,bmd->bnd"}> : () -> ()
    %cst_33 = arith.constant dense<0.000000e+00> : vector<16x16x8xf32>
    %76 = tpu.matmul %75, %74, %cst_33 {dimension_numbers = #tpu.dot_dimension_numbers<[2], [1], [1], [2], [0, 0, 0, 1, 1, 2], [0], [0]>} : vector<16x16x16xf32>, vector<16x16x8xf32>, vector<16x16x8xf32> -> vector<16x16x8xf32>
    "tpu.trace_stop"() : () -> ()
    %cst_34 = arith.constant 0.000000e+00 : f32
    %77 = vector.broadcast %cst_34 : f32 to vector<16x16x8xf32>
    %78 = arith.maximumf %76, %77 : vector<16x16x8xf32>
    %79 = vector.shape_cast %78 : vector<16x16x8xf32> to vector<256x8xf32>
    %80 = arith.truncf %79 : vector<256x8xf32> to vector<256x8xbf16>
    %c0_35 = arith.constant 0 : index
    %c48 = arith.constant 48 : index
    %81 = vector.load %arg11[%c0_35, %c48] : memref<256x64xbf16, #tpu.memory_space<vmem>>, vector<256x8xbf16>
    tpu.vector_store %arg11[%c0_35, %c48], %80 {strides = array<i32>} : memref<256x64xbf16, #tpu.memory_space<vmem>>, vector<256x8xbf16>,
    %82 = vector.extract_strided_slice %11 {offsets = [0, 0, 56], sizes = [16, 16, 8], strides = [1, 1, 1]} : vector<16x16x192xbf16> to vector<16x16x8xbf16>
    %83 = vector.extract_strided_slice %11 {offsets = [0, 0, 120], sizes = [16, 16, 8], strides = [1, 1, 1]} : vector<16x16x192xbf16> to vector<16x16x8xbf16>
    %84 = vector.extract_strided_slice %10 {offsets = [0, 0, 184], sizes = [16, 16, 8], strides = [1, 1, 1]} : vector<16x16x192xf32> to vector<16x16x8xf32>
    "tpu.trace_start"() <{level = 10 : i32, message = "bnd,bmd->bnm"}> : () -> ()
    %cst_36 = arith.constant dense<0.000000e+00> : vector<16x16x16xf32>
    %85 = tpu.matmul %82, %83, %cst_36 {dimension_numbers = #tpu.dot_dimension_numbers<[2], [2], [1], [1], [0, 0, 0, 1, 1, 1], [0], [0]>} : vector<16x16x8xbf16>, vector<16x16x8xbf16>, vector<16x16x16xf32> -> vector<16x16x16xf32>
    "tpu.trace_stop"() : () -> ()
    "tpu.trace_start"() <{level = 10 : i32, message = "bnm,bmd->bnd"}> : () -> ()
    %cst_37 = arith.constant dense<0.000000e+00> : vector<16x16x8xf32>
    %86 = tpu.matmul %85, %84, %cst_37 {dimension_numbers = #tpu.dot_dimension_numbers<[2], [1], [1], [2], [0, 0, 0, 1, 1, 2], [0], [0]>} : vector<16x16x16xf32>, vector<16x16x8xf32>, vector<16x16x8xf32> -> vector<16x16x8xf32>
    "tpu.trace_stop"() : () -> ()
    %cst_38 = arith.constant 0.000000e+00 : f32
    %87 = vector.broadcast %cst_38 : f32 to vector<16x16x8xf32>
    %88 = arith.maximumf %86, %87 : vector<16x16x8xf32>
    %89 = vector.shape_cast %88 : vector<16x16x8xf32> to vector<256x8xf32>
    %90 = arith.truncf %89 : vector<256x8xf32> to vector<256x8xbf16>
    %c0_39 = arith.constant 0 : index
    %c56 = arith.constant 56 : index
    %91 = vector.load %arg11[%c0_39, %c56] : memref<256x64xbf16, #tpu.memory_space<vmem>>, vector<256x8xbf16>
    tpu.vector_store %arg11[%c0_39, %c56], %90 {strides = array<i32>} : memref<256x64xbf16, #tpu.memory_space<vmem>>, vector<256x8xbf16>,
    %c0_40 = arith.constant 0 : index
    %c0_41 = arith.constant 0 : index
    %92 = vector.load %arg11[%c0_40, %c0_41] : memref<256x64xbf16, #tpu.memory_space<vmem>>, vector<256x64xbf16>
    %c0_42 = arith.constant 0 : index
    %c0_43 = arith.constant 0 : index
    %93 = vector.load %arg4[%c0_42, %c0_43] : memref<64x64xbf16, #tpu.memory_space<vmem>>, vector<64x64xbf16>
    %cst_44 = arith.constant dense<0.000000e+00> : vector<256x64xf32>
    %94 = tpu.matmul %92, %93, %cst_44 {dimension_numbers = #tpu.dot_dimension_numbers<[1], [0], [0], [1], [0, 0, 1, 1], [], []>} : vector<256x64xbf16>, vector<64x64xbf16>, vector<256x64xf32> -> vector<256x64xf32>
    %c0_45 = arith.constant 0 : index
    %c0_46 = arith.constant 0 : index
    %95 = vector.load %arg5[%c0_45, %c0_46] : memref<1x64xf32, #tpu.memory_space<vmem>>, vector<1x64xf32>
    %96 = vector.broadcast %95 : vector<1x64xf32> to vector<256x64xf32>
    %97 = arith.addf %94, %96 : vector<256x64xf32>
    %cst_47 = arith.constant 0.000000e+00 : f32
    %98 = vector.broadcast %cst_47 : f32 to vector<256x64xf32>
    %99 = arith.maximumf %97, %98 : vector<256x64xf32>
    %100 = arith.addf %1, %99 : vector<256x64xf32>
    %101 = arith.truncf %100 : vector<256x64xf32> to vector<256x64xbf16>
    %c0_48 = arith.constant 0 : index
    %c0_49 = arith.constant 0 : index
    %102 = vector.load %arg6[%c0_48, %c0_49] : memref<64x256xbf16, #tpu.memory_space<vmem>>, vector<64x256xbf16>
    %cst_50 = arith.constant dense<0.000000e+00> : vector<256x256xf32>
    %103 = tpu.matmul %101, %102, %cst_50 {dimension_numbers = #tpu.dot_dimension_numbers<[1], [0], [0], [1], [0, 0, 1, 1], [], []>} : vector<256x64xbf16>, vector<64x256xbf16>, vector<256x256xf32> -> vector<256x256xf32>
    %c0_51 = arith.constant 0 : index
    %c0_52 = arith.constant 0 : index
    %104 = vector.load %arg7[%c0_51, %c0_52] : memref<1x256xf32, #tpu.memory_space<vmem>>, vector<1x256xf32>
    %105 = vector.broadcast %104 : vector<1x256xf32> to vector<256x256xf32>
    %106 = arith.addf %103, %105 : vector<256x256xf32>
    %cst_53 = arith.constant 0.000000e+00 : f32
    %107 = vector.broadcast %cst_53 : f32 to vector<256x256xf32>
    %108 = arith.maximumf %106, %107 : vector<256x256xf32>
    %109 = arith.truncf %108 : vector<256x256xf32> to vector<256x256xbf16>
    %c0_54 = arith.constant 0 : index
    %c0_55 = arith.constant 0 : index
    %110 = vector.load %arg8[%c0_54, %c0_55] : memref<256x64xbf16, #tpu.memory_space<vmem>>, vector<256x64xbf16>
    %cst_56 = arith.constant dense<0.000000e+00> : vector<256x64xf32>
    %111 = tpu.matmul %109, %110, %cst_56 {dimension_numbers = #tpu.dot_dimension_numbers<[1], [0], [0], [1], [0, 0, 1, 1], [], []>} : vector<256x256xbf16>, vector<256x64xbf16>, vector<256x64xf32> -> vector<256x64xf32>
    %c0_57 = arith.constant 0 : index
    %c0_58 = arith.constant 0 : index
    %112 = vector.load %arg9[%c0_57, %c0_58] : memref<1x64xf32, #tpu.memory_space<vmem>>, vector<1x64xf32>
    %113 = vector.broadcast %112 : vector<1x64xf32> to vector<256x64xf32>
    %114 = arith.addf %111, %113 : vector<256x64xf32>
    %cst_59 = arith.constant 0.000000e+00 : f32
    %115 = vector.broadcast %cst_59 : f32 to vector<256x64xf32>
    %116 = arith.maximumf %114, %115 : vector<256x64xf32>
    %117 = arith.addf %100, %116 : vector<256x64xf32>
    %118 = vector.shape_cast %117 : vector<256x64xf32> to vector<16x16x64xf32>
    %c0_60 = arith.constant 0 : index
    %c0_61 = arith.constant 0 : index
    %c0_62 = arith.constant 0 : index
    %119 = vector.load %arg10[%c0_60, %c0_61, %c0_62] : memref<16x16x64xf32, #tpu.memory_space<vmem>>, vector<16x16x64xf32>
    tpu.vector_store %arg10[%c0_60, %c0_61, %c0_62], %118 {strides = array<i32>} : memref<16x16x64xf32, #tpu.memory_space<vmem>>, vector<16x16x64xf32>,
    return
  }
  func.func @transform_0(%arg0: i32) -> (i32, i32, i32) {
    %c0_i32 = arith.constant 0 : i32
    %c0_i32_0 = arith.constant 0 : i32
    %c0_i32_1 = arith.constant 0 : i32
    return %arg0, %c0_i32, %c0_i32_0 : i32, i32, i32
  }
  func.func @transform_1(%arg0: i32) -> (i32, i32) {
    %c0_i32 = arith.constant 0 : i32
    %c0_i32_0 = arith.constant 0 : i32
    %c0_i32_1 = arith.constant 0 : i32
    return %c0_i32, %c0_i32_0 : i32, i32
  }
  func.func @transform_2(%arg0: i32) -> (i32, i32) {
    %c0_i32 = arith.constant 0 : i32
    %c0_i32_0 = arith.constant 0 : i32
    %c0_i32_1 = arith.constant 0 : i32
    return %c0_i32, %c0_i32_0 : i32, i32
  }
  func.func @transform_3(%arg0: i32) -> (i32, i32) {
    %c0_i32 = arith.constant 0 : i32
    %c0_i32_0 = arith.constant 0 : i32
    %c0_i32_1 = arith.constant 0 : i32
    return %c0_i32, %c0_i32_0 : i32, i32
  }
  func.func @transform_4(%arg0: i32) -> (i32, i32) {
    %c0_i32 = arith.constant 0 : i32
    %c0_i32_0 = arith.constant 0 : i32
    %c0_i32_1 = arith.constant 0 : i32
    return %c0_i32, %c0_i32_0 : i32, i32
  }
  func.func @transform_5(%arg0: i32) -> (i32, i32) {
    %c0_i32 = arith.constant 0 : i32
    %c0_i32_0 = arith.constant 0 : i32
    %c0_i32_1 = arith.constant 0 : i32
    return %c0_i32, %c0_i32_0 : i32, i32
  }
  func.func @transform_6(%arg0: i32) -> (i32, i32) {
    %c0_i32 = arith.constant 0 : i32
    %c0_i32_0 = arith.constant 0 : i32
    %c0_i32_1 = arith.constant 0 : i32
    return %c0_i32, %c0_i32_0 : i32, i32
  }
  func.func @transform_7(%arg0: i32) -> (i32, i32) {
    %c0_i32 = arith.constant 0 : i32
    %c0_i32_0 = arith.constant 0 : i32
    %c0_i32_1 = arith.constant 0 : i32
    return %c0_i32, %c0_i32_0 : i32, i32
  }
  func.func @transform_8(%arg0: i32) -> (i32, i32) {
    %c0_i32 = arith.constant 0 : i32
    %c0_i32_0 = arith.constant 0 : i32
    %c0_i32_1 = arith.constant 0 : i32
    return %c0_i32, %c0_i32_0 : i32, i32
  }
  func.func @transform_9(%arg0: i32) -> (i32, i32, i32) {
    %c0_i32 = arith.constant 0 : i32
    %c0_i32_0 = arith.constant 0 : i32
    %c0_i32_1 = arith.constant 0 : i32
    return %arg0, %c0_i32, %c0_i32_0 : i32, i32, i32
  }
}

</mosaic_0001>

<bundles_post_ra>
// kernel: tpu_custom_call.1
= control target key start
LH: loop header
LB: loop body
LE: loop exit
PB: predicated region body
PF: predicated region fallthrough
CT: control target
= control target key end

     0   :  { %14 = vsyncpa [#allocation4], 0  ;;  %s17262_s0 = inlined_call_operand.hbm [shape: f32[32,16,64], index: 0, kind: input, shape index: {}]   ;;  %s17263_s1 = inlined_call_operand.vmem [shape: bf16[64,192], index: 1, kind: input, shape index: {}]   ;;  %s17264_s2 = inlined_call_operand.vmem [shape: f32[1,192], index: 2, kind: input, shape index: {}]   ;;  %s17265_s3 = inlined_call_operand.vmem [shape: bf16[64,64], index: 3, kind: input, shape index: {}]   ;;  %s17266_s4 = inlined_call_operand.vmem [shape: f32[1,64], index: 4, kind: input, shape index: {}]   ;;  %s17267_s5 = inlined_call_operand.vmem [shape: bf16[64,256], index: 5, kind: input, shape index: {}]   ;;  %s17268_s6 = inlined_call_operand.vmem [shape: f32[1,256], index: 6, kind: input, shape index: {}]   ;;  %s17269_s7 = inlined_call_operand.vmem [shape: bf16[256,64], index: 7, kind: input, shape index: {}]   ;;  %s17270_s8 = inlined_call_operand.vmem [shape: f32[1,64], index: 8, kind: input, shape index: {}]   ;;  %s17271_s9 = inlined_call_operand.hbm [shape: f32[32,16,64], index: 9, kind: output, shape index: {}]  }
   0x1   :  { %16 = vsyncpa [#allocation4 + $0x1], 0 }
   0x2   :  { %17 = vsyncpa [#allocation5], 0 }
   0x3   :  { %19 = vsyncpa [#allocation5 + $0x1], 0  ;;  %s12811_s30 = smov 0   ;;  %s12813_s10 = smov 0  }
   0x4   :  { %s12815_s11 = smov 0   ;;  %s12817_s12 = smov 0  }
   0x5 LB: > { %17400 = sst [smem:[#allocation9_spill]] %s12737_s11  ;;  %s12832_s13 = sadd.s32 4294967295, %s12741_s12   ;;  %s12741_s12 = sphi %s12817_s12, %s18032_s12   ;;  %s12737_s11 = sphi %s12815_s11, %s18034_s11   ;;  %s12733_s10 = sphi %s12813_s10, %s18036_s10   ;;  %s12729_s30 = sphi %s12811_s30, %s18035_s30  }
   0x6   : > { %s11229_s14 = sadd.s32 4294967294, %s12741_s12   ;;  %s12836_s15 = sadd.s32 1, %s12741_s12  }
   0x7   : > { %17401 = sst [smem:[#allocation10_spill]] %s12836_s15  ;;  %s32_s16 = sadd.s32 1, %s12737_s11 }
   0x8   : > { %s29_s17 = ssub.s32 %s12741_s12, %s12836_s15  ;;  %p39_p0 = scmp.ne.s32.totalorder %s12737_s11, %s12733_s10 }
   0x9   : > { %p30_p1 = scmp.eq.s32.totalorder %s29_s17, 0  ;;  %p40_p2 = scmp.eq.s32.totalorder %s12741_s12, 0 }
   0xa   : > { %p45_p3 = scmp.ne.s32.totalorder %s12733_s10, %s12729_s30  ;;  %p46_p4 = scmp.eq.s32.totalorder %s12832_s13, 0 }
   0xb   : > { %s12848_s18 = scalar_select %p30_p1, %s12737_s11, %s32_s16  }
   0xc   : > { %p12850_p5 = por %p40_p2, %p39_p0  ;;  %p12854_p6 = por %p46_p4, %p45_p3 }
   0xd   : > { %17402 = sst [smem:[#allocation11_spill]] %s12848_s18  ;;  %p237_p7 = scmp.eq.s32.totalorder %s12832_s13, 1 }
   0xe   : > { %p243_p8 = scmp.eq.s32.totalorder %s11229_s14, 1  ;;  %p11999_p10 = scmp.lt.s32.totalorder %s12741_s12, 2 }
   0xf   : > { %p12861_p11 = por %p237_p7, %p39_p0  ;;  %s287_s23 = sand.u32 1, %s12737_s11  }
  0x10   : > { %p12865_p12 = por %p243_p8, %p45_p3  ;;  %s11918_s24 = sshll.u32 %s12741_s12, 8 }
  0x11   : > { %s11232_s25 = sshll.u32 %s287_s23, 8  ;;  %s297_s28 = scalar_lea.hbm %s17262_s0, %s11918_s24 }
  0x12   : > { %s298_s29 = sshll.u32 %s297_s28, 4  ;;  %s291_s14 = scalar_lea.vmem [#allocation3], %s11232_s25  ;;  %s299_s29 = int_to_ptr.hbm [resolvable:$true] %s298_s29 }
  0x13   : > { %s300_s16 = sshll.u32 %s291_s14, 4  ;;  %p12876_p13 = pnand %p11999_p10, %p12850_p5  ;;  %s301_s16 = int_to_ptr.vmem [resolvable:$true] %s300_s16 }
  0x14   : > { %p11236_p0 = scmp.ge.s32.totalorder %s12741_s12, 1  ;;  %p308_p1 = scmp.lt.s32.totalorder %s12741_s12, 3 }
  0x15   : > { %s288_s18 = scalar_lea.sflag [#allocation4], %s287_s23  ;;  %s12645_s11 = sshra.s32 %s299_s29, 4  ;;  %s12646_s11 = int_to_ptr.hbm [resolvable:$true] %s12645_s11 }
  0x16   : > { %s12647_s15 = scalar_lea.hbm %s12646_s11, 256  ;;  %p12649_p3 = pneg %p12876_p13 }
  0x17   : > { %p12648_p2 = scmp.ne.s32.totalorder %s12646_s11, %s12647_s15  ;;  %s12652_s19 = scalar_lea.hbm %s17262_s0, 512 }
  0x18   : > { %p12653_p5 = scmp.lt.s32.totalorder %s12646_s11, %s17262_s0  ;;  %p12654_p8 = scmp.lt.s32.totalorder %s12652_s19, %s12647_s15 }
  0x19   : > { %p12650_p4 = pnand %p12649_p3, %p12648_p2 }
  0x1a   : > { %p12655_p10 = por %p12654_p8, %p12653_p5 }
  0x1b   : > { %p12651_p7 = pneg %p12650_p4 }
  0x1d   : > { %p12656_p9 = pnand %p12655_p10, %p12651_p7 }
  0x1f   : > { %12659 = shalt.err (!%p12656_p9)
}
  0x20   : > { %s12743_s23 = smov 128   ;;  %s12744_s28 = smov 8  }
  0x21   : > { %11994 = dma.hbm_to_vmem [thread:$0]  (!%p12876_p13), %s299_s29, 4096, %s301_s16, %s288_s18, %s12743_s23, %s12743_s23, %s12744_s28  }
  0x22   : > { %p309_p2 = pnand %p11236_p0, %p308_p1 }
  0x24   : > { %312 = sbr.rel (%p309_p2) target bundleno = 2993 (0xbb1), region = 56 }
  0x29   : > { %s12897_s14 = sand.u32 1, %s12733_s10  }
  0x2a   : > { %s17399_s11 = sshll.u32 %s12897_s14, 8  ;;  %s315_s15 = scalar_lea.sflag [#allocation4], %s12897_s14 }
  0x2b   : > { %s12903_s24 = scalar_lea.vmem [#allocation3], %s17399_s11 }
  0x2c   : > { %12720 = dma.done.wait (%p12854_p6), %s315_s15, 4096  }
  0x2d   : > { %12722 = vsyncadd (%p12854_p6), %s315_s15, 4294963200  ;;  %v11265_v0 = vld [vmem:[%s17263_s1 + $0x30] sm:$0xf]  ;;  %v11926_v1 = vld [vmem:[%s17263_s1 + $0x34] sm:$0xf0]  ;;  %vm459_vm0 = vcmask 523264  }
  0x2e   : > { %v11257_v2 = vld [vmem:[%s17263_s1 + $0x20] sm:$0xf]  ;;  %v11266_v3 = vor.u32 %v11926_v1, %v11265_v0  ;;  %v11924_v4 = vld [vmem:[%s17263_s1 + $0x24] sm:$0xf0]  ;;  %v11249_v6 = vld [vmem:[%s17263_s1 + $0x10] sm:$0xf] }
  0x2f   : > { %v11258_v5 = vor.u32 %v11924_v4, %v11257_v2  ;;  %v11922_v7 = vld [vmem:[%s17263_s1 + $0x14] sm:$0xf0]  ;;  %v11241_v9 = vld [vmem:[%s17263_s1] sm:$0xf]  ;;  %v11920_v10 = vld [vmem:[%s17263_s1 + $0x4] sm:$0xf0] }
  0x30   : > { %11973 = vmatpush.bf16.msra.mxu1 %v11266_v3  ;;  %512 = vmatpush.bf16.msra.mxu0 %v11266_v3  ;;  %v11250_v8 = vor.u32 %v11922_v7, %v11249_v6  ;;  %v11925_v11 = vld [vmem:[%s17263_s1 + $0x34] sm:$0xf]  ;;  %v11267_v12 = vld [vmem:[%s17263_s1 + $0x38] sm:$0xf0]  ;;  %v385_v13 = vld [vmem:[%s12903_s24 + $0xe0] sm:$0xff]  ;;  %v11242_v14 = vor.u32 %v11920_v10, %v11241_v9  ;;  %s12745_s28 = smov 64  }
  0x31   : > { %v386_v15 = vld [vmem:[%s12903_s24 + $0xe8] sm:$0xff]  ;;  %v357_v16 = vld [vmem:[%s12903_s24] sm:$0xff]  ;;  %v11270_v18 = vor.u32 %v11925_v11, %v11267_v12  ;;  %v11921_v24 = vld [vmem:[%s17263_s1 + $0x14] sm:$0xf]  ;;  %vm789_vm1 = vcmask 64512   ;;  %s12746_s15 = smov 120  }
  0x32   : > { %v358_v17 = vld [vmem:[%s12903_s24 + $0x8] sm:$0xff]  ;;  %v11923_v19 = vld [vmem:[%s17263_s1 + $0x24] sm:$0xf]  ;;  %v12949_v21 = vpack.c.bf16 %v386_v15, %v385_v13  ;;  %v11251_v25 = vld [vmem:[%s17263_s1 + $0x18] sm:$0xf0]  ;;  %s12747_s18 = smov 56  }
  0x33   : > { %v11259_v20 = vld [vmem:[%s17263_s1 + $0x28] sm:$0xf0]  ;;  %v389_v22 = vpack.c.bf16 %v358_v17, %v357_v16  ;;  %v11254_v26 = vor.u32 %v11921_v24, %v11251_v25  ;;  %v11919_v27 = vld [vmem:[%s17263_s1 + $0x4] sm:$0xf]  ;;  %v387_v30 = vld [vmem:[%s12903_s24 + $0xf0] sm:$0xff]  ;;  %s12748_s29 = smov 112  }
  0x34   : > { %11974 = vmatpush.bf16.msra.mxu1 %v11258_v5  ;;  %513 = vmatpush.bf16.msra.mxu0 %v11258_v5  ;;  %v11262_v23 = vor.u32 %v11923_v19, %v11259_v20  ;;  %v11243_v28 = vld [vmem:[%s17263_s1 + $0x8] sm:$0xf0]  ;;  %v388_v31 = vld [vmem:[%s12903_s24 + $0xf8] sm:$0xff]  ;;  %v359_v32 = vld [vmem:[%s12903_s24 + $0x10] sm:$0xff]  ;;  %s12749_s16 = smov 48   ;;  %vm1215_vm2 = vcmask 130048  }
  0x35   : > { %v11246_v29 = vor.u32 %v11919_v27, %v11243_v28  ;;  %v360_v33 = vld [vmem:[%s12903_s24 + $0x18] sm:$0xff]  ;;  %v12970_v34 = vpack.c.bf16 %v388_v31, %v387_v30  ;;  %v361_v36 = vld [vmem:[%s12903_s24 + $0x20] sm:$0xff]  ;;  %v362_v37 = vld [vmem:[%s12903_s24 + $0x28] sm:$0xff]  ;;  %s12750_s17 = smov 40   ;;  %s12751_s25 = smov 104   ;;  %vm1744_vm3 = vcmask 60416  }
  0x36   : > { %v390_v35 = vpack.c.bf16 %v360_v33, %v359_v32  ;;  %v391_v38 = vpack.c.bf16 %v362_v37, %v361_v36  ;;  %v363_v39 = vld [vmem:[%s12903_s24 + $0x30] sm:$0xff]  ;;  %v364_v40 = vld [vmem:[%s12903_s24 + $0x38] sm:$0xff]  ;;  %v365_v42 = vld [vmem:[%s12903_s24 + $0x40] sm:$0xff]  ;;  %s12752_s19 = smov 96   ;;  %s12753_s26 = smov 32   ;;  %vm2945_vm4 = vcmask 126016  }
  0x37   : > { %v392_v41 = vpack.c.bf16 %v364_v40, %v363_v39  ;;  %v366_v43 = vld [vmem:[%s12903_s24 + $0x48] sm:$0xff]  ;;  %v367_v45 = vld [vmem:[%s12903_s24 + $0x50] sm:$0xff]  ;;  %v368_v46 = vld [vmem:[%s12903_s24 + $0x58] sm:$0xff]  ;;  %s12754_s27 = smov 88   ;;  %s12755_s20 = smov 24   ;;  %vm4114_vm5 = vcmask 191616  }
  0x38   : > { %11975 = vmatpush.bf16.msra.mxu1 %v11250_v8  ;;  %514 = vmatpush.bf16.msra.mxu0 %v11250_v8  ;;  %v393_v44 = vpack.c.bf16 %v366_v43, %v365_v42  ;;  %v394_v47 = vpack.c.bf16 %v368_v46, %v367_v45  ;;  %v369_v48 = vld [vmem:[%s12903_s24 + $0x60] sm:$0xff]  ;;  %v370_v49 = vld [vmem:[%s12903_s24 + $0x68] sm:$0xff]  ;;  %v371_v51 = vld [vmem:[%s12903_s24 + $0x70] sm:$0xff]  ;;  %s12756_s23 = smov 16   ;;  %vm5283_vm6 = vcmask 257216   ;;  %vm6452_vm7 = vcmask 322816  }
  0x39   : > { %v395_v50 = vpack.c.bf16 %v370_v49, %v369_v48  ;;  %v372_v52 = vld [vmem:[%s12903_s24 + $0x78] sm:$0xff]  ;;  %v373_v56 = vld [vmem:[%s12903_s24 + $0x80] sm:$0xff]  ;;  %v374_v57 = vld [vmem:[%s12903_s24 + $0x88] sm:$0xff]  ;;  %vm7621_vm8 = vcmask 388416   ;;  %vm8790_vm9 = vcmask 454016   ;;  %vm9959_vm10 = vcmask 519616  }
  0x3a   : > { %v396_v53 = vpack.c.bf16 %v372_v52, %v371_v51  ;;  %v397_v58 = vpack.c.bf16 %v374_v57, %v373_v56  ;;  %v375_v63 = vld [vmem:[%s12903_s24 + $0x90] sm:$0xff]  ;;  %v376_v0 = vld [vmem:[%s12903_s24 + $0x98] sm:$0xff]  ;;  %v413_v4 = vld [vmem:[%s17264_s2] sm:$0x3] }
  0x3b   : > { %v398_v1 = vpack.c.bf16 %v376_v0, %v375_v63  ;;  %v13018_v5 = vperm.slane %v413_v4, 1  ;;  %v377_v8 = vld [vmem:[%s12903_s24 + $0xa0] sm:$0xff]  ;;  %v378_v9 = vld [vmem:[%s12903_s24 + $0xa8] sm:$0xff]  ;;  %v13022_v10 = vperm.slane %v413_v4, 0  ;;  %v380_v30 = vld [vmem:[%s12903_s24 + $0xb8] sm:$0xff] }
  0x3c   : > { %11976 = vmatpush.bf16.msra.mxu1 %v11242_v14  ;;  %515 = vmatpush.bf16.msra.mxu0 %v11242_v14  ;;  %v399_v11 = vpack.c.bf16 %v378_v9, %v377_v8  ;;  %v382_v51 = vld [vmem:[%s12903_s24 + $0xc8] sm:$0xff] }
  0x3f   : > { %11285 = vmatmul.msk.bf16.vlgmr.msra.gmra.mxu1 %vm459_vm0, %v12949_v21  ;;  %11271 = vmatmul.msk.bf16.vlgmr.msra.gmra.mxu0 %vm459_vm0, %v389_v22 }
  0x40   : > { %601 = vmatpush.bf16.msrb.mxu1 %v11270_v18 }
  0x44   : > { %602 = vmatpush.bf16.msrb.mxu1 %v11262_v23 }
  0x48   : > { %603 = vmatpush.bf16.msrb.mxu1 %v11254_v26 }
  0x4c   : > { %604 = vmatpush.bf16.msrb.mxu1 %v11246_v29  ;;  %v379_v29 = vld [vmem:[%s12903_s24 + $0xb0] sm:$0xff] }
  0x4d   : > { %v400_v32 = vpack.c.bf16 %v380_v30, %v379_v29 }
  0x4f   : > { %11286 = vmatmul.msk.bf16.gmra.mxu1 %vm459_vm0, %v12970_v34  ;;  %11272 = vmatmul.msk.bf16.gmra.mxu0 %vm459_vm0, %v390_v35 }
  0x5f   : > { %11287 = vmatmul.msk.bf16.vlgmr.msrb.gmra.mxu1 %vm459_vm0, %v389_v22  ;;  %11273 = vmatmul.msk.bf16.gmra.mxu0 %vm459_vm0, %v391_v38 }
  0x6f   : > { %11288 = vmatmul.msk.bf16.gmra.mxu1 %vm459_vm0, %v390_v35  ;;  %11274 = vmatmul.msk.bf16.gmra.mxu0 %vm459_vm0, %v392_v41 }
  0x7f   : > { %11289 = vmatmul.msk.bf16.gmra.mxu1 %vm459_vm0, %v391_v38  ;;  %11275 = vmatmul.msk.bf16.gmra.mxu0 %vm459_vm0, %v393_v44 }
  0x8f   : > { %11290 = vmatmul.msk.bf16.gmra.mxu1 %vm459_vm0, %v392_v41  ;;  %11276 = vmatmul.msk.bf16.gmra.mxu0 %vm459_vm0, %v394_v47 }
  0x9f   : > { %11291 = vmatmul.msk.bf16.gmra.mxu1 %vm459_vm0, %v393_v44  ;;  %11277 = vmatmul.msk.bf16.gmra.mxu0 %vm459_vm0, %v395_v50 }
  0xaf   : > { %11292 = vmatmul.msk.bf16.gmra.mxu1 %vm459_vm0, %v394_v47  ;;  %11278 = vmatmul.msk.bf16.gmra.mxu0 %vm459_vm0, %v396_v53 }
  0xbc   : > { %v12999_v54 = vpop.f32.mrf.mxu1  ;;  %v517_v55 = vpop.f32.mrf.mxu0 }
  0xbd   : > { %v518_v12 = vadd.f32 %v517_v55, %v13022_v10 }
  0xbf   : > { %11293 = vmatmul.msk.bf16.gmra.mxu1 %vm459_vm0, %v395_v50  ;;  %11279 = vmatmul.msk.bf16.gmra.mxu0 %vm459_vm0, %v397_v58  ;;  %v686_v15 = vmax.f32 %v518_v12, 0.0  ;;  %v381_v50 = vld [vmem:[%s12903_s24 + $0xc0] sm:$0xff]  ;;  %v383_v12 = vld [vmem:[%s12903_s24 + $0xd0] sm:$0xff] }
  0xc4   : > { %v13005_v59 = vpop.f32.mrf.mxu1  ;;  %v519_v60 = vpop.f32.mrf.mxu0 }
  0xc5   : > { %v520_v14 = vadd.f32 %v519_v60, %v13022_v10 }
  0xc7   : > { %v688_v19 = vmax.f32 %v520_v14, 0.0 }
  0xcc   : > { %v13007_v61 = vpop.f32.mrf.mxu1  ;;  %v522_v62 = vpop.f32.mrf.mxu0 }
  0xcd   : > { %v523_v33 = vadd.f32 %v522_v62, %v13022_v10 }
  0xcf   : > { %11294 = vmatmul.msk.bf16.gmra.mxu1 %vm459_vm0, %v396_v53  ;;  %11280 = vmatmul.msk.bf16.gmra.mxu0 %vm459_vm0, %v398_v1  ;;  %v690_v37 = vmax.f32 %v523_v33, 0.0  ;;  %v401_v53 = vpack.c.bf16 %v382_v51, %v381_v50 }
  0xd4   : > { %v13013_v2 = vpop.f32.mrf.mxu1  ;;  %v524_v3 = vpop.f32.mrf.mxu0 }
  0xd5   : > { %v525_v36 = vadd.f32 %v524_v3, %v13022_v10 }
  0xd7   : > { %v692_v41 = vmax.f32 %v525_v36, 0.0 }
  0xdc   : > { %v606_v6 = vpop.f32.mrf.mxu1  ;;  %v527_v7 = vpop.f32.mrf.mxu0 }
  0xdd   : > { %v607_v13 = vadd.f32 %v606_v6, %v13018_v5  ;;  %v528_v55 = vadd.f32 %v527_v7, %v13022_v10 }
  0xdf   : > { %11295 = vmatmul.msk.bf16.gmra.mxu1 %vm459_vm0, %v397_v58  ;;  %11281 = vmatmul.msk.bf16.gmra.mxu0 %vm459_vm0, %v399_v11  ;;  %v13029_v16 = vmax.f32 %v607_v13, 0.0  ;;  %v694_v58 = vmax.f32 %v528_v55, 0.0  ;;  %v384_v13 = vld [vmem:[%s12903_s24 + $0xd8] sm:$0xff] }
  0xe1   : > { %v750_v22 = vpack.c.bf16 %v13029_v16, %v686_v15  ;;  %v402_v15 = vpack.c.bf16 %v384_v13, %v383_v12 }
  0xe3   : > { %v784_v25 = vunpack.c.l.b16 %v750_v22 }
  0xe4   : > { %v608_v17 = vpop.f32.mrf.mxu1  ;;  %v529_v18 = vpop.f32.mrf.mxu0 }
  0xe5   : > { %v609_v20 = vadd.f32 %v608_v17, %v13018_v5  ;;  %v530_v57 = vadd.f32 %v529_v18, %v13022_v10 }
  0xe7   : > { %v13033_v23 = vmax.f32 %v609_v20, 0.0  ;;  %v696_v0 = vmax.f32 %v530_v57, 0.0 }
  0xe9   : > { %v751_v24 = vpack.c.bf16 %v13033_v23, %v688_v19 }
  0xeb   : > { %v785_v26 = vunpack.c.l.b16 %v751_v24 }
  0xec   : > { %v611_v27 = vpop.f32.mrf.mxu1  ;;  %v532_v28 = vpop.f32.mrf.mxu0 }
  0xed   : > { %v13038_v31 = vpack.c.b16 %v785_v26, %v784_v25  ;;  %v612_v35 = vadd.f32 %v611_v27, %v13018_v5  ;;  %v533_v17 = vadd.f32 %v532_v28, %v13022_v10 }
  0xef   : > { %11296 = vmatmul.msk.bf16.gmra.mxu1 %vm459_vm0, %v398_v1  ;;  %787 = vrot.lane.b32.xlu0 %v13038_v31, %s12745_s28  ;;  %v13047_v38 = vmax.f32 %v612_v35, 0.0  ;;  %v698_v20 = vmax.f32 %v533_v17, 0.0 }
  0xf0   : > { %11282 = vmatmul.msk.bf16.gmra.mxu0 %vm459_vm0, %v400_v32 }
  0xf1   : > { %17408 = vst [vmem:[#allocation12_spill] sm:$0xff] %v13047_v38  ;;  %v752_v43 = vpack.c.bf16 %v13047_v38, %v690_v37 }
  0xf3   : > { %v812_v46 = vunpack.c.l.b16 %v752_v43 }
  0xf4   : > { %v613_v39 = vpop.f32.mrf.mxu1  ;;  %v534_v40 = vpop.f32.mrf.mxu0 }
  0xf5   : > { %v614_v42 = vadd.f32 %v613_v39, %v13018_v5  ;;  %v535_v19 = vadd.f32 %v534_v40, %v13022_v10 }
  0xf7   : > { %v13051_v44 = vmax.f32 %v614_v42, 0.0  ;;  %v700_v26 = vmax.f32 %v535_v19, 0.0 }
  0xf9   : > { %17409 = vst [vmem:[#allocation13_spill] sm:$0xff] %v13051_v44  ;;  %v753_v45 = vpack.c.bf16 %v13051_v44, %v692_v41 }
  0xfb   : > { %v813_v47 = vunpack.c.l.b16 %v753_v45 }
  0xfc   : > { %v616_v48 = vpop.f32.mrf.mxu1  ;;  %v537_v49 = vpop.f32.mrf.mxu0 }
  0xfd   : > { %v13056_v52 = vpack.c.b16 %v813_v47, %v812_v46  ;;  %v617_v56 = vadd.f32 %v616_v48, %v13018_v5  ;;  %v538_v39 = vadd.f32 %v537_v49, %v13022_v10 }
  0xff   : > { %17410 = vst [vmem:[#allocation14_spill] sm:$0xff] %v13056_v52  ;;  %11297 = vmatmul.msk.bf16.gmra.mxu1 %vm459_vm0, %v399_v11  ;;  %815 = vrot.lane.b32.xlu0 %v13056_v52, %s12745_s28  ;;  %v13065_v60 = vmax.f32 %v617_v56, 0.0  ;;  %v702_v42 = vmax.f32 %v538_v39, 0.0 }
 0x100   : > { %11283 = vmatmul.msk.bf16.gmra.mxu0 %vm459_vm0, %v401_v53 }
 0x101   : > { %17411 = vst [vmem:[#allocation15_spill] sm:$0xff] %v13065_v60  ;;  %v754_v3 = vpack.c.bf16 %v13065_v60, %v694_v58 }
 0x103   : > { %v839_v7 = vunpack.c.l.b16 %v754_v3 }
 0x104   : > { %v618_v62 = vpop.f32.mrf.mxu1  ;;  %v539_v63 = vpop.f32.mrf.mxu0 }
 0x105   : > { %v619_v1 = vadd.f32 %v618_v62, %v13018_v5  ;;  %v540_v41 = vadd.f32 %v539_v63, %v13022_v10 }
 0x107   : > { %v13069_v4 = vmax.f32 %v619_v1, 0.0  ;;  %v704_v47 = vmax.f32 %v540_v41, 0.0 }
 0x109   : > { %17412 = vst [vmem:[#allocation16_spill] sm:$0xff] %v13069_v4  ;;  %v755_v6 = vpack.c.bf16 %v13069_v4, %v696_v0 }
 0x10b   : > { %v840_v8 = vunpack.c.l.b16 %v755_v6 }
 0x10c   : > { %v621_v9 = vpop.f32.mrf.mxu1  ;;  %v542_v11 = vpop.f32.mrf.mxu0 }
 0x10d   : > { %v13074_v14 = vpack.c.b16 %v840_v8, %v839_v7  ;;  %v622_v18 = vadd.f32 %v621_v9, %v13018_v5  ;;  %v543_v62 = vadd.f32 %v542_v11, %v13022_v10 }
 0x10f   : > { %11298 = vmatmul.msk.bf16.gmra.mxu1 %vm459_vm0, %v400_v32  ;;  %842 = vrot.lane.b32.xlu1 %v13074_v14, %s12745_s28  ;;  %v13083_v22 = vmax.f32 %v622_v18, 0.0  ;;  %v706_v1 = vmax.f32 %v543_v62, 0.0 }
 0x110   : > { %11284 = vmatmul.msk.bf16.gmra.mxu0 %vm459_vm0, %v402_v15 }
 0x111   : > { %17413 = vst [vmem:[#allocation17_spill] sm:$0xff] %v13083_v22  ;;  %v756_v28 = vpack.c.bf16 %v13083_v22, %v698_v20 }
 0x113   : > { %v866_v32 = vunpack.c.l.b16 %v756_v28 }
 0x114   : > { %v623_v24 = vpop.f32.mrf.mxu1  ;;  %v544_v25 = vpop.f32.mrf.mxu0 }
 0x115   : > { %v624_v27 = vadd.f32 %v623_v24, %v13018_v5  ;;  %v545_v0 = vadd.f32 %v544_v25, %v13022_v10 }
 0x117   : > { %v13087_v29 = vmax.f32 %v624_v27, 0.0  ;;  %v708_v7 = vmax.f32 %v545_v0, 0.0 }
 0x119   : > { %17414 = vst [vmem:[#allocation18_spill] sm:$0xff] %v13087_v29  ;;  %v757_v30 = vpack.c.bf16 %v13087_v29, %v700_v26 }
 0x11b   : > { %v867_v33 = vunpack.c.l.b16 %v757_v30 }
 0x11c   : > { %v626_v35 = vpop.f32.mrf.mxu1  ;;  %v547_v36 = vpop.f32.mrf.mxu0 }
 0x11d   : > { %v13090_v37 = vpack.c.b16 %v867_v33, %v866_v32  ;;  %v627_v40 = vadd.f32 %v626_v35, %v13018_v5  ;;  %v548_v20 = vadd.f32 %v547_v36, %v13022_v10 }
 0x11f   : > { %17415 = vst [vmem:[#allocation19_spill] sm:$0xff] %v13090_v37  ;;  %11299 = vmatmul.msk.bf16.gmra.mxu1 %vm459_vm0, %v401_v53  ;;  %869 = vrot.lane.b32.xlu2 %v13090_v37, %s12745_s28  ;;  %v13098_v43 = vmax.f32 %v627_v40, 0.0  ;;  %v710_v27 = vmax.f32 %v548_v20, 0.0 }
 0x121   : > { %17416 = vst [vmem:[#allocation20_spill] sm:$0xff] %v13098_v43  ;;  %v758_v50 = vpack.c.bf16 %v13098_v43, %v702_v42 }
 0x123   : > { %v893_v53 = vunpack.c.l.b16 %v758_v50 }
 0x124   : > { %v628_v45 = vpop.f32.mrf.mxu1  ;;  %v549_v46 = vpop.f32.mrf.mxu0 }
 0x125   : > { %v629_v48 = vadd.f32 %v628_v45, %v13018_v5  ;;  %v550_v26 = vadd.f32 %v549_v46, %v13022_v10 }
 0x127   : > { %v13102_v49 = vmax.f32 %v629_v48, 0.0  ;;  %v712_v32 = vmax.f32 %v550_v26, 0.0 }
 0x129   : > { %17417 = vst [vmem:[#allocation21_spill] sm:$0xff] %v13102_v49  ;;  %v759_v51 = vpack.c.bf16 %v13102_v49, %v704_v47 }
 0x12b   : > { %v894_v55 = vunpack.c.l.b16 %v759_v51 }
 0x12c   : > { %v631_v56 = vpop.f32.mrf.mxu1  ;;  %v552_v57 = vpop.f32.mrf.mxu0 }
 0x12d   : > { %v13105_v58 = vpack.c.b16 %v894_v55, %v893_v53  ;;  %v632_v63 = vadd.f32 %v631_v56, %v13018_v5  ;;  %v553_v46 = vadd.f32 %v552_v57, %v13022_v10 }
 0x12f   : > { %17418 = vst [vmem:[#allocation22_spill] sm:$0xff] %v13105_v58  ;;  %11300 = vmatmul.msk.bf16.gmra.mxu1 %vm459_vm0, %v402_v15  ;;  %896 = vrot.lane.b32.xlu1 %v13105_v58, %s12745_s28  ;;  %v13113_v3 = vmax.f32 %v632_v63, 0.0  ;;  %v714_v50 = vmax.f32 %v553_v46, 0.0 }
 0x131   : > { %v760_v12 = vpack.c.bf16 %v13113_v3, %v706_v1 }
 0x133   : > { %v920_v15 = vunpack.c.l.b16 %v760_v12 }
 0x134   : > { %v633_v6 = vpop.f32.mrf.mxu1  ;;  %v554_v9 = vpop.f32.mrf.mxu0 }
 0x135   : > { %v634_v8 = vadd.f32 %v633_v6, %v13018_v5  ;;  %v555_v48 = vadd.f32 %v554_v9, %v13022_v10 }
 0x137   : > { %v13117_v11 = vmax.f32 %v634_v8, 0.0  ;;  %v716_v56 = vmax.f32 %v555_v48, 0.0 }
 0x139   : > { %v761_v13 = vpack.c.bf16 %v13117_v11, %v708_v7 }
 0x13b   : > { %v921_v17 = vunpack.c.l.b16 %v761_v13 }
 0x13c   : > { %v636_v18 = vpop.f32.mrf.mxu1  ;;  %v557_v25 = vpop.f32.mrf.mxu0 }
 0x13d   : > { %v13120_v19 = vpack.c.b16 %v921_v17, %v920_v15  ;;  %v637_v24 = vadd.f32 %v636_v18, %v13018_v5  ;;  %v558_v9 = vadd.f32 %v557_v25, %v13022_v10 }
 0x13f   : > { %11301 = vmatmul.msk.bf16.gmra.mxu1 %vm459_vm0, %v12949_v21  ;;  %923 = vrot.lane.b32.xlu0 %v13120_v19, %s12745_s28  ;;  %v13129_v28 = vmax.f32 %v637_v24, 0.0  ;;  %v718_v18 = vmax.f32 %v558_v9, 0.0 }
 0x141   : > { %17419 = vst [vmem:[#allocation23_spill] sm:$0xff] %v13129_v28  ;;  %v762_v35 = vpack.c.bf16 %v13129_v28, %v710_v27 }
 0x143   : > { %v947_v40 = vunpack.c.l.b16 %v762_v35 }
 0x144   : > { %v638_v30 = vpop.f32.mrf.mxu1  ;;  %v559_v21 = vpop.f32.mrf.mxu0 }
 0x145   : > { %v639_v33 = vadd.f32 %v638_v30, %v13018_v5  ;;  %v560_v15 = vadd.f32 %v559_v21, %v13022_v10 }
 0x147   : > { %v13133_v36 = vmax.f32 %v639_v33, 0.0  ;;  %v720_v26 = vmax.f32 %v560_v15, 0.0 }
 0x149   : > { %17420 = vst [vmem:[#allocation24_spill] sm:$0xff] %v13133_v36  ;;  %v763_v39 = vpack.c.bf16 %v13133_v36, %v712_v32 }
 0x14b   : > { %v948_v41 = vunpack.c.l.b16 %v763_v39 }
 0x14c   : > { %v641_v42 = vpop.f32.mrf.mxu1  ;;  %v562_v55 = vpop.f32.mrf.mxu0 }
 0x14d   : > { %v13136_v45 = vpack.c.b16 %v948_v41, %v947_v40  ;;  %v642_v47 = vadd.f32 %v641_v42, %v13018_v5  ;;  %v563_v41 = vadd.f32 %v562_v55, %v13022_v10 }
 0x14f   : > { %11302 = vmatmul.msk.bf16.gmra.mxu1 %vm459_vm0, %v12970_v34  ;;  %950 = vrot.lane.b32.xlu2 %v13136_v45, %s12745_s28  ;;  %v13145_v51 = vmax.f32 %v642_v47, 0.0 }
 0x151   : > { %17421 = vst [vmem:[#allocation25_spill] sm:$0xff] %v13145_v51  ;;  %v764_v57 = vpack.c.bf16 %v13145_v51, %v714_v50 }
 0x153   : > { %v974_v34 = vunpack.c.l.b16 %v764_v57 }
 0x154   : > { %v643_v53 = vpop.f32.mrf.mxu1  ;;  %v564_v8 = vpop.f32.mrf.mxu0 }
 0x155   : > { %v644_v62 = vadd.f32 %v643_v53, %v13018_v5  ;;  %v565_v47 = vadd.f32 %v564_v8, %v13022_v10  ;;  %v722_v53 = vmax.f32 %v563_v41, 0.0 }
 0x157   : > { %v13149_v63 = vmax.f32 %v644_v62, 0.0  ;;  %v724_v57 = vmax.f32 %v565_v47, 0.0 }
 0x159   : > { %17422 = vst [vmem:[#allocation26_spill] sm:$0xff] %v13149_v63  ;;  %v765_v0 = vpack.c.bf16 %v13149_v63, %v716_v56 }
 0x15b   : > { %v975_v1 = vunpack.c.l.b16 %v765_v0 }
 0x15c   : > { %v646_v6 = vpop.f32.mrf.mxu1  ;;  %v567_v32 = vpop.f32.mrf.mxu0 }
 0x15d   : > { %v13152_v7 = vpack.c.b16 %v975_v1, %v974_v34  ;;  %v647_v12 = vadd.f32 %v646_v6, %v13018_v5 }
 0x15f   : > { %977 = vrot.lane.b32.xlu2 %v13152_v7, %s12745_s28  ;;  %v13160_v20 = vmax.f32 %v647_v12, 0.0 }
 0x161   : > { %v788_v13 = vpop.permute.xlu0 %787  ;;  %v766_v25 = vpack.c.bf16 %v13160_v20, %v718_v18  ;;  %v568_v18 = vadd.f32 %v567_v32, %v13022_v10 }
 0x162   : > { %v794_v17 = vsel %vm789_vm1, %v788_v13, 0 }
 0x163   : > { %803 = vmatpush.bf16.xpose.msra.mxu1 %v794_v17  ;;  %v1001_v35 = vunpack.c.l.b16 %v766_v25 }
 0x164   : > { %v648_v24 = vpop.f32.mrf.mxu1  ;;  %v569_v50 = vpop.f32.mrf.mxu0 }
 0x165   : > { %v649_v27 = vadd.f32 %v648_v24, %v13018_v5 }
 0x167   : > { %v13164_v30 = vmax.f32 %v649_v27, 0.0  ;;  %v570_v27 = vadd.f32 %v569_v50, %v13022_v10 }
 0x169   : > { %v767_v33 = vpack.c.bf16 %v13164_v30, %v720_v26 }
 0x16a   : > { %11303 = vmatmul.msk.bf16.vlgmr.msra.gmra.mxu1 %vm789_vm1, %v13038_v31 }
 0x16b   : > { %v1002_v39 = vunpack.c.l.b16 %v767_v33  ;;  %v726_v33 = vmax.f32 %v568_v18, 0.0 }
 0x16c   : > { %v651_v21 = vpop.f32.mrf.mxu1 }
 0x16d   : > { %v13169_v40 = vpack.c.b16 %v1002_v39, %v1001_v35  ;;  %v652_v42 = vadd.f32 %v651_v21, %v13018_v5  ;;  %v572_v15 = vpop.f32.mrf.mxu0  ;;  %v728_v21 = vmax.f32 %v570_v27, 0.0 }
 0x16f   : > { %1004 = vrot.lane.b32.xlu1 %v13169_v40, %s12745_s28  ;;  %v13177_v56 = vmax.f32 %v652_v42, 0.0 }
 0x171   : > { %v816_v46 = vpop.permute.xlu0 %815  ;;  %17423 = vst [vmem:[#allocation27_spill] sm:$0xff] %v13177_v56  ;;  %v768_v55 = vpack.c.bf16 %v13177_v56, %v722_v53 }
 0x172   : > { %v821_v48 = vsel %vm789_vm1, %v816_v46, 0 }
 0x173   : > { %830 = vmatpush.bf16.xpose.msra.mxu3 %v821_v48  ;;  %v1028_v9 = vunpack.c.l.b16 %v768_v55 }
 0x174   : > { %v653_v62 = vpop.f32.mrf.mxu1 }
 0x175   : > { %v654_v0 = vadd.f32 %v653_v62, %v13018_v5  ;;  %v574_v42 = vpop.f32.mrf.mxu0 }
 0x177   : > { %v13181_v34 = vmax.f32 %v654_v0, 0.0 }
 0x179   : > { %17424 = vst [vmem:[#allocation28_spill] sm:$0xff] %v13181_v34  ;;  %v769_v1 = vpack.c.bf16 %v13181_v34, %v724_v57  ;;  %v870_v6 = vpop.permute.xlu2 %869  ;;  %v573_v57 = vadd.f32 %v572_v15, %v13022_v10 }
 0x17a   : > { %11304 = vmatmul.msk.bf16.vlgmr.msra.gmra.mxu3 %vm789_vm1, %v13056_v52  ;;  %v875_v8 = vsel %vm789_vm1, %v870_v6, 0 }
 0x17b   : > { %v1029_v12 = vunpack.c.l.b16 %v769_v1  ;;  %884 = vmatpush.bf16.xpose.msrb.mxu3 %v875_v8  ;;  %v575_v1 = vadd.f32 %v574_v42, %v13022_v10  ;;  %v730_v6 = vmax.f32 %v573_v57, 0.0 }
 0x17c   : > { %v656_v13 = vpop.f32.mrf.mxu1 }
 0x17d   : > { %v13187_v17 = vpack.c.b16 %v1029_v12, %v1028_v9  ;;  %v657_v24 = vadd.f32 %v656_v13, %v13018_v5  ;;  %v577_v55 = vpop.f32.mrf.mxu0  ;;  %v732_v12 = vmax.f32 %v575_v1, 0.0 }
 0x17f   : > { %1031 = vrot.lane.b32.xlu1 %v13187_v17, %s12745_s28  ;;  %v13195_v35 = vmax.f32 %v657_v24, 0.0 }
 0x181   : > { %v843_v26 = vpop.permute.xlu1 %842  ;;  %17425 = vst [vmem:[#allocation29_spill] sm:$0xff] %v13195_v35  ;;  %v770_v32 = vpack.c.bf16 %v13195_v35, %v726_v33 }
 0x182   : > { %v848_v25 = vsel %vm789_vm1, %v843_v26, 0 }
 0x183   : > { %857 = vmatpush.bf16.xpose.msra.mxu2 %v848_v25  ;;  %v1055_v48 = vunpack.c.l.b16 %v770_v32 }
 0x184   : > { %v658_v39 = vpop.f32.mrf.mxu1 }
 0x185   : > { %v659_v41 = vadd.f32 %v658_v39, %v13018_v5  ;;  %v579_v26 = vpop.f32.mrf.mxu0 }
 0x186   : > { %v580_v32 = vadd.f32 %v579_v26, %v13022_v10 }
 0x187   : > { %v13199_v46 = vmax.f32 %v659_v41, 0.0 }
 0x189   : > { %17426 = vst [vmem:[#allocation30_spill] sm:$0xff] %v13199_v46  ;;  %v771_v47 = vpack.c.bf16 %v13199_v46, %v728_v21  ;;  %v578_v21 = vadd.f32 %v577_v55, %v13022_v10 }
 0x18a   : > { %11305 = vmatmul.msk.bf16.vlgmr.msra.gmra.mxu2 %vm789_vm1, %v13074_v14  ;;  %11306 = vmatmul.msk.bf16.vlgmr.msrb.gmra.mxu3 %vm789_vm1, %v13090_v37 }
 0x18b   : > { %v1056_v50 = vunpack.c.l.b16 %v771_v47 }
 0x18c   : > { %v661_v53 = vpop.f32.mrf.mxu1 }
 0x18d   : > { %v13206_v62 = vpack.c.b16 %v1056_v50, %v1055_v48  ;;  %v662_v0 = vadd.f32 %v661_v53, %v13018_v5  ;;  %v734_v48 = vmax.f32 %v578_v21, 0.0  ;;  %v582_v57 = vpop.f32.mrf.mxu0 }
 0x18f   : > { %1058 = vrot.lane.b32.xlu0 %v13206_v62, %s12745_s28  ;;  %v13213_v8 = vmax.f32 %v662_v0, 0.0  ;;  %v736_v0 = vmax.f32 %v580_v32, 0.0 }
 0x191   : > { %17427 = vst [vmem:[#allocation31_spill] sm:$0xff] %v13213_v8  ;;  %v772_v18 = vpack.c.bf16 %v13213_v8, %v730_v6 }
 0x193   : > { %v1082_v27 = vunpack.c.l.b16 %v772_v18 }
 0x194   : > { %v663_v9 = vpop.f32.mrf.mxu1 }
 0x195   : > { %v664_v13 = vadd.f32 %v663_v9, %v13018_v5 }
 0x197   : > { %v13217_v24 = vmax.f32 %v664_v13, 0.0 }
 0x199   : > { %17428 = vst [vmem:[#allocation32_spill] sm:$0xff] %v13217_v24  ;;  %v773_v15 = vpack.c.bf16 %v13217_v24, %v732_v12 }
 0x19b   : > { %v1083_v25 = vunpack.c.l.b16 %v773_v15 }
 0x19c   : > { %v666_v33 = vpop.f32.mrf.mxu1 }
 0x19d   : > { %v13220_v39 = vpack.c.b16 %v1083_v25, %v1082_v27  ;;  %v667_v41 = vadd.f32 %v666_v33, %v13018_v5  ;;  %v584_v25 = vpop.f32.mrf.mxu0  ;;  %v583_v33 = vadd.f32 %v582_v57, %v13022_v10 }
 0x19f   : > { %1085 = vrot.lane.b32.xlu0 %v13220_v39, %s12745_s28  ;;  %v13228_v50 = vmax.f32 %v667_v41, 0.0 }
 0x1a1   : > { %v897_v42 = vpop.permute.xlu1 %896  ;;  %17429 = vst [vmem:[#allocation33_spill] sm:$0xff] %v13228_v50  ;;  %v774_v55 = vpack.c.bf16 %v13228_v50, %v734_v48 }
 0x1a2   : > { %v902_v47 = vsel %vm789_vm1, %v897_v42, 0  ;;  %v585_v42 = vadd.f32 %v584_v25, %v13022_v10 }
 0x1a3   : > { %911 = vmatpush.bf16.xpose.msrb.mxu2 %v902_v47  ;;  %v1109_v18 = vunpack.c.l.b16 %v774_v55  ;;  %v738_v47 = vmax.f32 %v583_v33, 0.0 }
 0x1a4   : > { %v668_v53 = vpop.f32.mrf.mxu1 }
 0x1a5   : > { %v669_v1 = vadd.f32 %v668_v53, %v13018_v5 }
 0x1a7   : > { %v13232_v6 = vmax.f32 %v669_v1, 0.0 }
 0x1a9   : > { %17430 = vst [vmem:[#allocation34_spill] sm:$0xff] %v13232_v6  ;;  %v775_v9 = vpack.c.bf16 %v13232_v6, %v736_v0  ;;  %v951_v12 = vpop.permute.xlu2 %950  ;;  %v740_v0 = vmax.f32 %v585_v42, 0.0 }
 0x1aa   : > { %v956_v13 = vsel %vm789_vm1, %v951_v12, 0  ;;  %11307 = vmatmul.msk.bf16.vlgmr.msrb.gmra.mxu2 %vm789_vm1, %v13105_v58 }
 0x1ab   : > { %v1110_v15 = vunpack.c.l.b16 %v775_v9  ;;  %965 = vmatpush.bf16.xpose.msra.mxu2 %v956_v13 }
 0x1ac   : > { %v671_v26 = vpop.f32.mrf.mxu1 }
 0x1ad   : > { %v13238_v27 = vpack.c.b16 %v1110_v15, %v1109_v18  ;;  %v672_v21 = vadd.f32 %v671_v26, %v13018_v5 }
 0x1af   : > { %1112 = vrot.lane.b32.xlu2 %v13238_v27, %s12745_s28  ;;  %v13246_v48 = vmax.f32 %v672_v21, 0.0  ;;  %v588_v21 = vadd.f32 %v12999_v54, %v13022_v10 }
 0x1b1   : > { %v924_v41 = vpop.permute.xlu0 %923  ;;  %17431 = vst [vmem:[#allocation35_spill] sm:$0xff] %v13246_v48  ;;  %v776_v57 = vpack.c.bf16 %v13246_v48, %v738_v47  ;;  %v742_v47 = vmax.f32 %v588_v21, 0.0 }
 0x1b2   : > { %v929_v32 = vsel %vm789_vm1, %v924_v41, 0  ;;  %v590_v41 = vadd.f32 %v13005_v59, %v13022_v10 }
 0x1b3   : > { %938 = vmatpush.bf16.xpose.msra.mxu3 %v929_v32  ;;  %v1136_v18 = vunpack.c.l.b16 %v776_v57 }
 0x1b4   : > { %v673_v53 = vpop.f32.mrf.mxu1 }
 0x1b5   : > { %v674_v1 = vadd.f32 %v673_v53, %v13018_v5 }
 0x1b7   : > { %v13250_v55 = vmax.f32 %v674_v1, 0.0 }
 0x1b9   : > { %17432 = vst [vmem:[#allocation36_spill] sm:$0xff] %v13250_v55  ;;  %v777_v9 = vpack.c.bf16 %v13250_v55, %v740_v0  ;;  %v978_v12 = vpop.permute.xlu2 %977  ;;  %v744_v0 = vmax.f32 %v590_v41, 0.0 }
 0x1ba   : > { %v983_v13 = vsel %vm789_vm1, %v978_v12, 0  ;;  %11308 = vmatmul.msk.bf16.vlgmr.msra.gmra.mxu3 %vm789_vm1, %v13120_v19  ;;  %11309 = vmatmul.msk.bf16.vlgmr.msra.gmra.mxu2 %vm789_vm1, %v13136_v45 }
 0x1bb   : > { %v1137_v15 = vunpack.c.l.b16 %v777_v9  ;;  %992 = vmatpush.bf16.xpose.msrb.mxu3 %v983_v13 }
 0x1bc   : > { %v676_v26 = vpop.f32.mrf.mxu1 }
 0x1bd   : > { %v13258_v25 = vpack.c.b16 %v1137_v15, %v1136_v18  ;;  %v677_v33 = vadd.f32 %v676_v26, %v13018_v5  ;;  %v593_v15 = vadd.f32 %v13007_v61, %v13022_v10  ;;  %v595_v26 = vadd.f32 %v13013_v2, %v13022_v10 }
 0x1bf   : > { %1139 = vrot.lane.b32.xlu2 %v13258_v25, %s12745_s28  ;;  %v13267_v42 = vmax.f32 %v677_v33, 0.0  ;;  %v746_v41 = vmax.f32 %v593_v15, 0.0 }
 0x1c1   : > { %17433 = vst [vmem:[#allocation37_spill] sm:$0xff] %v13267_v42  ;;  %v778_v1 = vpack.c.bf16 %v13267_v42, %v742_v47  ;;  %v748_v47 = vmax.f32 %v595_v26, 0.0 }
 0x1c3   : > { %v1163_v59 = vunpack.c.l.b16 %v778_v1 }
 0x1c4   : > { %v678_v32 = vpop.f32.mrf.mxu1 }
 0x1c5   : > { %v679_v53 = vadd.f32 %v678_v32, %v13018_v5 }
 0x1c7   : > { %v13271_v57 = vmax.f32 %v679_v53, 0.0  ;;  %1777 = vrot.lane.b32.xlu2 %v13038_v31, %s12746_s15 }
 0x1c9   : > { %17434 = vst [vmem:[#allocation38_spill] sm:$0xff] %v13271_v57  ;;  %v779_v54 = vpack.c.bf16 %v13271_v57, %v744_v0 }
 0x1ca   : > { %11310 = vmatmul.msk.bf16.vlgmr.msrb.gmra.mxu3 %vm789_vm1, %v13152_v7 }
 0x1cb   : > { %v1164_v9 = vunpack.c.l.b16 %v779_v54 }
 0x1cc   : > { %v681_v12 = vpop.f32.mrf.mxu1 }
 0x1cd   : > { %v13278_v13 = vpack.c.b16 %v1164_v9, %v1163_v59  ;;  %v682_v18 = vadd.f32 %v681_v12, %v13018_v5 }
 0x1cf   : > { %1166 = vrot.lane.b32.xlu1 %v13278_v13, %s12745_s28  ;;  %1801 = vrot.lane.b32.xlu2 %v13056_v52, %s12746_s15  ;;  %v13289_v33 = vmax.f32 %v682_v18, 0.0 }
 0x1d1   : > { %17435 = vst [vmem:[#allocation39_spill] sm:$0xff] %v13289_v33  ;;  %v780_v53 = vpack.c.bf16 %v13289_v33, %v746_v41 }
 0x1d3   : > { %v1190_v2 = vunpack.c.l.b16 %v780_v53  ;;  %v13368_v53 = vpack.i.bf16 %v13098_v43, %v13047_v38 }
 0x1d4   : > { %v683_v21 = vpop.f32.mrf.mxu1 }
 0x1d5   : > { %v684_v32 = vadd.f32 %v683_v21, %v13018_v5 }
 0x1d7   : > { %v13293_v0 = vmax.f32 %v684_v32, 0.0  ;;  %1971 = vrot.lane.b32.xlu2 %v13169_v40, %s12747_s18  ;;  %1779 = vrot.lane.b32.xlu1 %v13038_v31, %s12747_s18 }
 0x1d9   : > { %17436 = vst [vmem:[#allocation40_spill] sm:$0xff] %v13293_v0  ;;  %v781_v61 = vpack.c.bf16 %v13293_v0, %v748_v47 }
 0x1db   : > { %v1191_v10 = vunpack.c.l.b16 %v781_v61 }
 0x1dd   : > { %v13300_v1 = vpack.c.b16 %v1191_v10, %v1190_v2  ;;  %v13380_v2 = vpack.i.bf16 %v13232_v6, %v13181_v34 }
 0x1df   : > { %1995 = vrot.lane.b32.xlu2 %v13187_v17, %s12747_s18  ;;  %1875 = vrot.lane.b32.xlu1 %v13105_v58, %s12747_s18  ;;  %17438 = vst [vmem:[#allocation42_spill] sm:$0xff] %v13380_v2 }
 0x1e0   : > { %1193 = vrot.lane.b32.xlu0 %v13300_v1, %s12745_s28  ;;  %s12757_s28 = smov 80  }
 0x1e1   : > { %v1005_v5 = vpop.permute.xlu1 %1004 }
 0x1e2   : > { %v1010_v54 = vsel %vm789_vm1, %v1005_v5, 0  ;;  %v13394_v5 = vpack.i.bf16 %v13246_v48, %v13250_v55 }
 0x1e3   : > { %1019 = vmatpush.bf16.xpose.msrb.mxu2 %v1010_v54  ;;  %v13398_v54 = vpack.i.bf16 %v13102_v49, %v13051_v44 }
 0x1e4   : > { %17440 = vst [vmem:[#allocation44_spill] sm:$0xff] %v13394_v5 }
 0x1e5   : > { %17441 = vst [vmem:[#allocation45_spill] sm:$0xff] %v13398_v54 }
 0x1e7   : > { %2065 = vrot.lane.b32.xlu2 %v13238_v27, %s12746_s15  ;;  %1899 = vrot.lane.b32.xlu1 %v13120_v19, %s12747_s18 }
 0x1e8   : > { %1803 = vrot.lane.b32.xlu0 %v13056_v52, %s12747_s18 }
 0x1ea   : > { %11311 = vmatmul.msk.bf16.vlgmr.msrb.gmra.mxu2 %vm789_vm1, %v13169_v40 }
 0x1ef   : > { %1851 = vrot.lane.b32.xlu2 %v13090_v37, %s12747_s18  ;;  %1969 = vrot.lane.b32.xlu1 %v13169_v40, %s12746_s15 }
 0x1f0   : > { %1873 = vrot.lane.b32.xlu0 %v13105_v58, %s12746_s15 }
 0x1f1   : > { %v1032_v59 = vpop.permute.xlu1 %1031 }
 0x1f2   : > { %v1037_v9 = vsel %vm789_vm1, %v1032_v59, 0 }
 0x1f3   : > { %1046 = vmatpush.bf16.xpose.msra.mxu3 %v1037_v9  ;;  %v13410_v9 = vpack.i.bf16 %v13065_v60, %v13083_v22 }
 0x1f5   : > { %17443 = vst [vmem:[#allocation47_spill] sm:$0xff] %v13410_v9 }
 0x1f7   : > { %1825 = vrot.lane.b32.xlu2 %v13074_v14, %s12746_s15  ;;  %1993 = vrot.lane.b32.xlu1 %v13187_v17, %s12746_s15 }
 0x1f8   : > { %1897 = vrot.lane.b32.xlu0 %v13120_v19, %s12746_s15 }
 0x1fa   : > { %11312 = vmatmul.msk.bf16.vlgmr.msra.gmra.mxu3 %vm789_vm1, %v13187_v17 }
 0x1ff   : > { %1945 = vrot.lane.b32.xlu2 %v13152_v7, %s12746_s15  ;;  %2089 = vrot.lane.b32.xlu1 %v13258_v25, %s12746_s15 }
 0x200   : > { %2067 = vrot.lane.b32.xlu0 %v13238_v27, %s12747_s18 }
 0x201   : > { %v1059_v12 = vpop.permute.xlu0 %1058 }
 0x202   : > { %v1064_v18 = vsel %vm789_vm1, %v1059_v12, 0  ;;  %v13414_v12 = vpack.i.bf16 %v13160_v20, %v13113_v3 }
 0x203   : > { %1073 = vmatpush.bf16.xpose.msra.mxu2 %v1064_v18  ;;  %v13418_v18 = vpack.i.bf16 %v13029_v16, %v13033_v23 }
 0x207   : > { %2019 = vrot.lane.b32.xlu2 %v13206_v62, %s12747_s18  ;;  %1849 = vrot.lane.b32.xlu1 %v13090_v37, %s12746_s15 }
 0x208   : > { %2091 = vrot.lane.b32.xlu0 %v13258_v25, %s12747_s18 }
 0x209   : > { %v1113_v15 = vpop.permute.xlu2 %1112 }
 0x20a   : > { %v1118_v26 = vsel %vm789_vm1, %v1113_v15, 0  ;;  %11313 = vmatmul.msk.bf16.vlgmr.msra.gmra.mxu2 %vm789_vm1, %v13206_v62 }
 0x20b   : > { %1127 = vmatpush.bf16.xpose.msrb.mxu2 %v1118_v26  ;;  %v13430_v26 = vpack.i.bf16 %v13164_v30, %v13117_v11 }
 0x20f   : > { %2139 = vrot.lane.b32.xlu2 %v13300_v1, %s12747_s18  ;;  %1923 = vrot.lane.b32.xlu1 %v13136_v45, %s12747_s18 }
 0x210   : > { %1827 = vrot.lane.b32.xlu0 %v13074_v14, %s12747_s18 }
 0x211   : > { %v1086_v21 = vpop.permute.xlu0 %1085 }
 0x212   : > { %v1091_v41 = vsel %vm789_vm1, %v1086_v21, 0 }
 0x213   : > { %1100 = vmatpush.bf16.xpose.msrb.mxu3 %v1091_v41 }
 0x217   : > { %2113 = vrot.lane.b32.xlu2 %v13278_v13, %s12746_s15  ;;  %2043 = vrot.lane.b32.xlu1 %v13220_v39, %s12747_s18 }
 0x218   : > { %1947 = vrot.lane.b32.xlu0 %v13152_v7, %s12747_s18 }
 0x219   : > { %v1140_v32 = vpop.permute.xlu2 %1139 }
 0x21a   : > { %v1145_v47 = vsel %vm789_vm1, %v1140_v32, 0  ;;  %11314 = vmatmul.msk.bf16.vlgmr.msrb.gmra.mxu3 %vm789_vm1, %v13220_v39  ;;  %11315 = vmatmul.msk.bf16.vlgmr.msrb.gmra.mxu2 %vm789_vm1, %v13238_v27 }
 0x21b   : > { %1154 = vmatpush.bf16.xpose.msra.mxu3 %v1145_v47  ;;  %v13444_v47 = vpack.i.bf16 %v13129_v28, %v13145_v51 }
 0x21f   : > { %12062 = vrot.lane.b32.xlu2 %v13368_v53, %s12746_s15  ;;  %2017 = vrot.lane.b32.xlu1 %v13206_v62, %s12746_s15 }
 0x220   : > { %1921 = vrot.lane.b32.xlu0 %v13136_v45, %s12746_s15 }
 0x221   : > { %v13376_v61 = vpop.permute.xlu2 %1777 }
 0x222   : > { %17437 = vst [vmem:[#allocation41_spill] sm:$0xff] %v13376_v61  ;;  %v805_v61 = vpop.f32.mrf.mxu1 }
 0x227   : > { %12077 = vrot.lane.b32.xlu2 %v13380_v2, %s12746_s15  ;;  %2137 = vrot.lane.b32.xlu1 %v13300_v1, %s12746_s15 }
 0x228   : > { %2041 = vrot.lane.b32.xlu0 %v13220_v39, %s12746_s15 }
 0x229   : > { %v13388_v10 = vpop.permute.xlu2 %1801 }
 0x22a   : > { %17439 = vst [vmem:[#allocation43_spill] sm:$0xff] %v13388_v10  ;;  %11316 = vmatmul.msk.bf16.vlgmr.msra.gmra.mxu3 %vm789_vm1, %v13258_v25  ;;  %v13453_v10 = vpack.i.bf16 %v13228_v50, %v13177_v56 }
 0x22c   : > { %17447 = vst [vmem:[#allocation51_spill] sm:$0xff] %v13453_v10 }
 0x22f   : > { %12087 = vrot.lane.b32.xlu2 %v13394_v5, %s12746_s15  ;;  %12057 = vrot.lane.b32.xlu1 %v13398_v54, %s12746_s15  ;;  %v13448_v5 = vpack.i.bf16 %v13069_v4, %v13087_v29 }
 0x230   : > { %2115 = vrot.lane.b32.xlu0 %v13278_v13, %s12747_s18 }
 0x231   : > { %v13406_v59 = vpop.permute.xlu2 %1971  ;;  %17446 = vst [vmem:[#allocation50_spill] sm:$0xff] %v13448_v5 }
 0x232   : > { %17442 = vst [vmem:[#allocation46_spill] sm:$0xff] %v13406_v59 }
 0x237   : > { %12097 = vrot.lane.b32.xlu2 %v13410_v9, %s12746_s15  ;;  %12072 = vrot.lane.b32.xlu1 %v13414_v12, %s12746_s15 }
 0x238   : > { %12052 = vrot.lane.b32.xlu0 %v13418_v18, %s12746_s15 }
 0x239   : > { %v13426_v15 = vpop.permute.xlu2 %1995 }
 0x23a   : > { %17444 = vst [vmem:[#allocation48_spill] sm:$0xff] %v13426_v15 }
 0x23f   : > { %3002 = vrot.lane.b32.xlu2 %v13056_v52, %s12748_s29  ;;  %2980 = vrot.lane.b32.xlu1 %v13038_v31, %s12749_s16 }
 0x240   : > { %12067 = vrot.lane.b32.xlu0 %v13430_v26, %s12746_s15 }
 0x241   : > { %v1167_v21 = vpop.permute.xlu1 %1166  ;;  %v13438_v41 = vpop.permute.xlu2 %2065 }
 0x242   : > { %17445 = vst [vmem:[#allocation49_spill] sm:$0xff] %v13438_v41  ;;  %v1172_v32 = vsel %vm789_vm1, %v1167_v21, 0 }
 0x243   : > { %1181 = vmatpush.bf16.xpose.msra.mxu2 %v1172_v32 }
 0x247   : > { %12107 = vrot.lane.b32.xlu2 %v13444_v47, %s12746_s15  ;;  %12092 = vrot.lane.b32.xlu1 %v13448_v5, %s12746_s15 }
 0x248   : > { %12082 = vrot.lane.b32.xlu0 %v13453_v10, %s12746_s15  ;;  %v13486_v10 = vpack.i.bf16 %v13133_v36, %v13149_v63 }
 0x249   : > { %v13461_v21 = vpop.permute.xlu1 %1779 }
 0x24a   : > { %11317 = vmatmul.msk.bf16.vlgmr.msra.gmra.mxu2 %vm789_vm1, %v13278_v13 }
 0x24b   : > { %1236 = vmatpush.msrb.mxu2 %v13033_v23  ;;  %v1852_v23 = vpop.permute.xlu2 %1851 }
 0x24c   : > { %v1857_v32 = vsel %vm789_vm1, %v1852_v23, 0 }
 0x24d   : > { %1237 = vmatpush.msrb.mxu2 %v13029_v16  ;;  %1866 = vmatpush.bf16.xpose.msrb.mxu1 %v1857_v32  ;;  %v832_v16 = vpop.f32.mrf.mxu3  ;;  %v13482_v32 = vpack.i.bf16 %v13195_v35, %v13213_v8 }
 0x24f   : > { %1265 = vmatpush.msra.mxu2 %v13051_v44  ;;  %3098 = vrot.lane.b32.xlu2 %v13120_v19, %s12748_s29  ;;  %17449 = vst [vmem:[#allocation53_spill] sm:$0xff] %v13482_v32 }
 0x250   : > { %3076 = vrot.lane.b32.xlu1 %v13105_v58, %s12749_s16  ;;  %2978 = vrot.lane.b32.xlu0 %v13038_v31, %s12748_s29 }
 0x251   : > { %1266 = vmatpush.msra.mxu2 %v13047_v38  ;;  %v13476_v23 = vpop.permute.xlu1 %1875 }
 0x252   : > { %17448 = vst [vmem:[#allocation52_spill] sm:$0xff] %v13476_v23  ;;  %v1194_v41 = vpop.permute.xlu0 %1193 }
 0x253   : > { %v13474_v5 = vpop.permute.xlu2 %1825  ;;  %v1199_v15 = vsel %vm789_vm1, %v1194_v41, 0 }
 0x254   : > { %1208 = vmatpush.bf16.xpose.msrb.mxu3 %v1199_v15 }
 0x255   : > { %v834_v59 = vpop.f32.mrf.mxu3 }
 0x257   : > { %12117 = vrot.lane.b32.xlu2 %v13482_v32, %s12746_s15 }
 0x258   : > { %12102 = vrot.lane.b32.xlu1 %v13486_v10, %s12746_s15  ;;  %3004 = vrot.lane.b32.xlu0 %v13056_v52, %s12749_s16 }
 0x259   : > { %v13497_v41 = vpop.permute.xlu1 %1899 }
 0x25a   : > { %17450 = vst [vmem:[#allocation54_spill] sm:$0xff] %v13497_v41  ;;  %11319 = vmatmul.msk.f32.vlgmr.msrb.gmra.mxu2 %vm1215_vm2, %v805_v61  ;;  %v807_v41 = vpop.f32.mrf.mxu1 }
 0x25b   : > { %v13495_v15 = vpop.permute.xlu2 %1945  ;;  %11318 = vmatmul.msk.bf16.vlgmr.msrb.gmra.mxu3 %vm789_vm1, %v13300_v1  ;;  %1294 = vmatpush.msrb.mxu2 %v13069_v4  ;;  %v13527_v4 = vpack.i.bf16 %v13199_v46, %v13217_v24 }
 0x25c   : > { %11977 = vmatpush.msra.mxu3 %v13051_v44  ;;  %v13499_v44 = vpop.permute.xlu0 %1803 }
 0x25d   : > { %1295 = vmatpush.msrb.mxu2 %v13065_v60  ;;  %v886_v52 = vpop.f32.mrf.mxu3 }
 0x25e   : > { %11978 = vmatpush.msra.mxu3 %v13047_v38  ;;  %v859_v38 = vpop.f32.mrf.mxu2 }
 0x25f   : > { %3194 = vrot.lane.b32.xlu2 %v13187_v17, %s12748_s29 }
 0x260   : > { %1323 = vmatpush.msrb.mxu3 %v13087_v29  ;;  %3172 = vrot.lane.b32.xlu1 %v13169_v40, %s12749_s16 }
 0x261   : > { %3074 = vrot.lane.b32.xlu0 %v13105_v58, %s12748_s29  ;;  %v13516_v32 = vpop.permute.xlu1 %1969 }
 0x262   : > { %1324 = vmatpush.msrb.mxu3 %v13083_v22  ;;  %17451 = vst [vmem:[#allocation55_spill] sm:$0xff] %v13516_v32  ;;  %11320 = vmatmul.msk.f32.gmra.mxu2 %vm1215_vm2, %v807_v41  ;;  %v13523_v22 = vpack.i.bf16 %v13267_v42, %v13289_v33 }
 0x263   : > { %v13514_v61 = vpop.permute.xlu2 %2019 }
 0x264   : > { %v13518_v23 = vpop.permute.xlu0 %1873  ;;  %17453 = vst [vmem:[#allocation57_spill] sm:$0xff] %v13523_v22 }
 0x265   : > { %17452 = vst [vmem:[#allocation56_spill] sm:$0xff] %v13518_v23  ;;  %v888_v23 = vpop.f32.mrf.mxu3 }
 0x266   : > { %v861_v60 = vpop.f32.mrf.mxu2 }
 0x267   : > { %12127 = vrot.lane.b32.xlu2 %v13523_v22, %s12746_s15 }
 0x268   : > { %12112 = vrot.lane.b32.xlu1 %v13527_v4, %s12746_s15 }
 0x269   : > { %3100 = vrot.lane.b32.xlu0 %v13120_v19, %s12749_s16  ;;  %v13537_v41 = vpop.permute.xlu1 %1993 }
 0x26a   : > { %11321 = vmatmul.msk.f32.vlgmr.msra.gmra.mxu2 %vm1215_vm2, %v832_v16 }
 0x26b   : > { %v13535_v32 = vpop.permute.xlu2 %2139  ;;  %11322 = vmatmul.msk.f32.vlgmr.msra.gmra.mxu3 %vm1215_vm2, %v834_v59  ;;  %1352 = vmatpush.msra.mxu2 %v13102_v49 }
 0x26c   : > { %v13539_v58 = vpop.permute.xlu0 %1897  ;;  %1381 = vmatpush.msra.mxu3 %v13117_v11 }
 0x26d   : > { %1353 = vmatpush.msra.mxu2 %v13098_v43  ;;  %v940_v49 = vpop.f32.mrf.mxu3 }
 0x26e   : > { %v913_v22 = vpop.f32.mrf.mxu2  ;;  %1382 = vmatpush.msra.mxu3 %v13113_v3  ;;  %v13567_v3 = vpack.i.bf16 %v13271_v57, %v13293_v0 }
 0x26f   : > { %3290 = vrot.lane.b32.xlu2 %v13258_v25, %s12748_s29 }
 0x270   : > { %3268 = vrot.lane.b32.xlu1 %v13238_v27, %s12749_s16 }
 0x271   : > { %3170 = vrot.lane.b32.xlu0 %v13169_v40, %s12748_s29  ;;  %v13555_v59 = vpop.permute.xlu1 %2089 }
 0x272   : > { %17454 = vst [vmem:[#allocation58_spill] sm:$0xff] %v13555_v59  ;;  %11323 = vmatmul.msk.f32.vlgmr.msrb.gmra.mxu2 %vm1215_vm2, %v859_v38 }
 0x273   : > { %v13553_v16 = vpop.permute.xlu2 %2113  ;;  %11325 = vmatmul.msk.f32.vlgmr.msrb.gmra.mxu3 %vm1215_vm2, %v886_v52  ;;  %1410 = vmatpush.msrb.mxu2 %v13133_v36 }
 0x274   : > { %v13557_v11 = vpop.permute.xlu0 %2067  ;;  %1439 = vmatpush.msrb.mxu3 %v13149_v63 }
 0x275   : > { %1411 = vmatpush.msrb.mxu2 %v13129_v28  ;;  %v942_v63 = vpop.f32.mrf.mxu3 }
 0x276   : > { %1440 = vmatpush.msrb.mxu3 %v13145_v51  ;;  %v915_v43 = vpop.f32.mrf.mxu2 }
 0x277   : > { %3026 = vrot.lane.b32.xlu2 %v13074_v14, %s12748_s29 }
 0x278   : > { %12122 = vrot.lane.b32.xlu1 %v13567_v3, %s12746_s15  ;;  %s12758_s15 = smov 72  }
 0x279   : > { %3196 = vrot.lane.b32.xlu0 %v13187_v17, %s12749_s16  ;;  %v1850_v52 = vpop.permute.xlu1 %1849 }
 0x27a   : > { %11324 = vmatmul.msk.f32.gmra.mxu2 %vm1215_vm2, %v861_v60  ;;  %11354 = vmatmul.msk.bf16.vlgmr.msrb.gmra.mxu1 %vm789_vm1, %v1850_v52 }
 0x27b   : > { %v13575_v38 = vpop.permute.xlu2 %12062  ;;  %11326 = vmatmul.msk.f32.gmra.mxu3 %vm1215_vm2, %v888_v23 }
 0x27c   : > { %17455 = vst [vmem:[#allocation59_spill] sm:$0xff] %v13575_v38  ;;  %v13577_v28 = vpop.permute.xlu0 %2091 }
 0x27d   : > { %v994_v52 = vpop.f32.mrf.mxu3 }
 0x27e   : > { %v967_v59 = vpop.f32.mrf.mxu2 }
 0x27f   : > { %3146 = vrot.lane.b32.xlu2 %v13152_v7, %s12748_s29 }
 0x280   : > { %3052 = vrot.lane.b32.xlu1 %v13090_v37, %s12749_s16 }
 0x281   : > { %3266 = vrot.lane.b32.xlu0 %v13238_v27, %s12748_s29  ;;  %v1924_v36 = vpop.permute.xlu1 %1923 }
 0x282   : > { %v1929_v60 = vsel %vm789_vm1, %v1924_v36, 0  ;;  %11327 = vmatmul.msk.f32.vlgmr.msra.gmra.mxu2 %vm1215_vm2, %v913_v22 }
 0x283   : > { %v13588_v51 = vpop.permute.xlu2 %12077  ;;  %11329 = vmatmul.msk.f32.vlgmr.msra.gmra.mxu3 %vm1215_vm2, %v940_v49  ;;  %1468 = vmatpush.msra.mxu2 %v13164_v30 }
 0x284   : > { %v1828_v38 = vpop.permute.xlu0 %1827  ;;  %1497 = vmatpush.msra.mxu3 %v13181_v34 }
 0x285   : > { %v1833_v23 = vsel %vm789_vm1, %v1828_v38, 0  ;;  %1469 = vmatpush.msra.mxu2 %v13160_v20  ;;  %v2025_v20 = vsel %vm789_vm1, %v13514_v61, 0 }
 0x286   : > { %1842 = vmatpush.bf16.xpose.msrb.mxu0 %v1833_v23  ;;  %1498 = vmatpush.msra.mxu3 %v13177_v56  ;;  %v996_v23 = vpop.f32.mrf.mxu3  ;;  %v17474_v56 = vld [vmem:[#allocation54_spill] sm:$0xff] }
 0x287   : > { %3220 = vrot.lane.b32.xlu2 %v13206_v62, %s12749_s16 }
 0x288   : > { %3050 = vrot.lane.b32.xlu1 %v13090_v37, %s12748_s29 }
 0x289   : > { %3292 = vrot.lane.b32.xlu0 %v13258_v25, %s12749_s16  ;;  %v2044_v49 = vpop.permute.xlu1 %2043 }
 0x28a   : > { %v2049_v36 = vsel %vm789_vm1, %v2044_v49, 0  ;;  %11328 = vmatmul.msk.f32.gmra.mxu2 %vm1215_vm2, %v915_v43 }
 0x28b   : > { %v13604_v22 = vpop.permute.xlu2 %12087  ;;  %11330 = vmatmul.msk.f32.gmra.mxu3 %vm1215_vm2, %v942_v63 }
 0x28c   : > { %17456 = vst [vmem:[#allocation60_spill] sm:$0xff] %v13604_v22  ;;  %v1948_v30 = vpop.permute.xlu0 %1947 }
 0x28d   : > { %v1953_v38 = vsel %vm789_vm1, %v1948_v30, 0  ;;  %11353 = vmatmul.msk.bf16.vlgmr.msrb.gmra.mxu0 %vm789_vm1, %v13474_v5  ;;  %v2145_v5 = vsel %vm789_vm1, %v13535_v32, 0 }
 0x28e   : > { %1938 = vmatpush.bf16.xpose.msra.mxu0 %v1929_v60  ;;  %v969_v60 = vpop.f32.mrf.mxu2  ;;  %1962 = vmatpush.bf16.xpose.msra.mxu1 %v1953_v38 }
 0x28f   : > { %3340 = vrot.lane.b32.xlu2 %v13300_v1, %s12749_s16 }
 0x290   : > { %3124 = vrot.lane.b32.xlu1 %v13136_v45, %s12749_s16 }
 0x291   : > { %3028 = vrot.lane.b32.xlu0 %v13074_v14, %s12749_s16  ;;  %v2018_v63 = vpop.permute.xlu1 %2017 }
 0x292   : > { %11331 = vmatmul.msk.f32.vlgmr.msrb.gmra.mxu2 %vm1215_vm2, %v967_v59  ;;  %v1048_v59 = vpop.f32.mrf.mxu3 }
 0x293   : > { %v13620_v43 = vpop.permute.xlu2 %12097  ;;  %11333 = vmatmul.msk.f32.vlgmr.msrb.gmra.mxu3 %vm1215_vm2, %v994_v52  ;;  %1526 = vmatpush.msrb.mxu2 %v13199_v46 }
 0x294   : > { %v1922_v61 = vpop.permute.xlu0 %1921  ;;  %1555 = vmatpush.msrb.mxu3 %v13217_v24  ;;  %v17466_v24 = vld [vmem:[#allocation16_spill] sm:$0xff] }
 0x295   : > { %11358 = vmatmul.msk.bf16.vlgmr.msra.gmra.mxu1 %vm789_vm1, %v13495_v15  ;;  %1527 = vmatpush.msrb.mxu2 %v13195_v35 }
 0x296   : > { %2034 = vmatpush.bf16.xpose.msrb.mxu0 %v2025_v20  ;;  %2058 = vmatpush.bf16.xpose.msrb.mxu1 %v2049_v36  ;;  %v1021_v49 = vpop.f32.mrf.mxu2 }
 0x297   : > { %1556 = vmatpush.msrb.mxu3 %v13213_v8  ;;  %3314 = vrot.lane.b32.xlu2 %v13278_v13, %s12748_s29 }
 0x298   : > { %3244 = vrot.lane.b32.xlu1 %v13220_v39, %s12749_s16 }
 0x299   : > { %3148 = vrot.lane.b32.xlu0 %v13152_v7, %s12749_s16  ;;  %v2138_v52 = vpop.permute.xlu1 %2137 }
 0x29a   : > { %11332 = vmatmul.msk.f32.gmra.mxu2 %vm1215_vm2, %v969_v60  ;;  %v1050_v60 = vpop.f32.mrf.mxu3 }
 0x29b   : > { %v13638_v32 = vpop.permute.xlu2 %3002  ;;  %11334 = vmatmul.msk.f32.gmra.mxu3 %vm1215_vm2, %v996_v23 }
 0x29c   : > { %17457 = vst [vmem:[#allocation61_spill] sm:$0xff] %v13638_v32  ;;  %v2042_v36 = vpop.permute.xlu0 %2041  ;;  %v17482_v32 = vld [vmem:[#allocation43_spill] sm:$0xff] }
 0x29d   : > { %11357 = vmatmul.msk.bf16.vlgmr.msra.gmra.mxu0 %vm789_vm1, %v1922_v61 }
 0x29e   : > { %2154 = vmatpush.bf16.xpose.msra.mxu1 %v2145_v5  ;;  %v1023_v15 = vpop.f32.mrf.mxu2 }
 0x29f   : > { %12142 = vrot.lane.b32.xlu2 %v13368_v53, %s12748_s29 }
 0x2a0   : > { %3218 = vrot.lane.b32.xlu1 %v13206_v62, %s12748_s29 }
 0x2a1   : > { %3122 = vrot.lane.b32.xlu0 %v13136_v45, %s12748_s29  ;;  %v13651_v20 = vpop.permute.xlu1 %12057 }
 0x2a2   : > { %11335 = vmatmul.msk.f32.vlgmr.msra.gmra.mxu2 %vm1215_vm2, %v1021_v49 }
 0x2a3   : > { %v13649_v30 = vpop.permute.xlu2 %12107  ;;  %11337 = vmatmul.msk.f32.vlgmr.msra.gmra.mxu3 %vm1215_vm2, %v1048_v59  ;;  %1584 = vmatpush.msra.mxu2 %v13232_v6  ;;  %v12171_v6 = vpack.i.bf16 %v17466_v24, %v13246_v48 }
 0x2a4   : > { %v2116_v38 = vpop.permute.xlu0 %2115  ;;  %1613 = vmatpush.msra.mxu3 %v13250_v55 }
 0x2a5   : > { %v2121_v23 = vsel %vm789_vm1, %v2116_v38, 0  ;;  %11362 = vmatmul.msk.bf16.vlgmr.msrb.gmra.mxu1 %vm789_vm1, %v2042_v36  ;;  %1585 = vmatpush.msra.mxu2 %v13228_v50  ;;  %v1102_v36 = vpop.f32.mrf.mxu3  ;;  %v12166_v38 = vpack.i.bf16 %v13087_v29, %v13250_v55  ;;  %v1905_v50 = vsel %vm789_vm1, %v17474_v56, 0 }
 0x2a6   : > { %2130 = vmatpush.bf16.xpose.msra.mxu0 %v2121_v23  ;;  %v1075_v61 = vpop.f32.mrf.mxu2  ;;  %1614 = vmatpush.msra.mxu3 %v13246_v48 }
 0x2a7   : > { %12157 = vrot.lane.b32.xlu2 %v13380_v2, %s12748_s29 }
 0x2a8   : > { %3338 = vrot.lane.b32.xlu1 %v13300_v1, %s12748_s29 }
 0x2a9   : > { %3242 = vrot.lane.b32.xlu0 %v13220_v39, %s12748_s29  ;;  %v13669_v49 = vpop.permute.xlu1 %12072 }
 0x2aa   : > { %11336 = vmatmul.msk.f32.gmra.mxu2 %vm1215_vm2, %v1023_v15 }
 0x2ab   : > { %v13667_v5 = vpop.permute.xlu2 %3098  ;;  %11338 = vmatmul.msk.f32.gmra.mxu3 %vm1215_vm2, %v1050_v60 }
 0x2ac   : > { %17458 = vst [vmem:[#allocation62_spill] sm:$0xff] %v13667_v5  ;;  %v13671_v59 = vpop.permute.xlu0 %12052 }
 0x2ad   : > { %11361 = vmatmul.msk.bf16.vlgmr.msrb.gmra.mxu0 %vm789_vm1, %v2018_v63  ;;  %v1104_v63 = vpop.f32.mrf.mxu3 }
 0x2ae   : > { %v1077_v23 = vpop.f32.mrf.mxu2 }
 0x2af   : > { %12167 = vrot.lane.b32.xlu2 %v12166_v38, %s12748_s29 }
 0x2b0   : > { %12137 = vrot.lane.b32.xlu1 %v13398_v54, %s12748_s29 }
 0x2b1   : > { %3316 = vrot.lane.b32.xlu0 %v13278_v13, %s12749_s16  ;;  %v13685_v15 = vpop.permute.xlu1 %2980 }
 0x2b2   : > { %17459 = vst [vmem:[#allocation63_spill] sm:$0xff] %v13685_v15  ;;  %11339 = vmatmul.msk.f32.vlgmr.msrb.gmra.mxu2 %vm1215_vm2, %v1075_v61 }
 0x2b3   : > { %v13683_v35 = vpop.permute.xlu2 %12117  ;;  %11341 = vmatmul.msk.f32.vlgmr.msrb.gmra.mxu3 %vm1215_vm2, %v1102_v36  ;;  %1642 = vmatpush.msrb.mxu2 %v13271_v57 }
 0x2b4   : > { %v13687_v46 = vpop.permute.xlu0 %12067  ;;  %1671 = vmatpush.msrb.mxu3 %v13293_v0 }
 0x2b5   : > { %11366 = vmatmul.msk.bf16.vlgmr.msra.gmra.mxu1 %vm789_vm1, %v2138_v52  ;;  %1643 = vmatpush.msrb.mxu2 %v13267_v42  ;;  %v12099_v42 = vunpack.i.l.bf16 %v13620_v43  ;;  %v1156_v57 = vpop.f32.mrf.mxu3 }
 0x2b6   : > { %1672 = vmatpush.msrb.mxu3 %v13289_v33  ;;  %v1129_v0 = vpop.f32.mrf.mxu2  ;;  %v12100_v33 = vunpack.i.h.bf16 %v13620_v43  ;;  %v1785_v43 = vsel %vm789_vm1, %v13461_v21, 0  ;;  %v17463_v21 = vld [vmem:[#allocation51_spill] sm:$0xff] }
 0x2b7   : > { %12177 = vrot.lane.b32.xlu2 %v13410_v9, %s12748_s29 }
 0x2b8   : > { %12152 = vrot.lane.b32.xlu1 %v13414_v12, %s12748_s29 }
 0x2b9   : > { %12132 = vrot.lane.b32.xlu0 %v13418_v18, %s12748_s29  ;;  %v12093_v61 = vpop.permute.xlu1 %12092 }
 0x2ba   : > { %v12095_v36 = vunpack.i.h.bf16 %v12093_v61  ;;  %v12094_v38 = vunpack.i.l.bf16 %v12093_v61  ;;  %11340 = vmatmul.msk.f32.gmra.mxu2 %vm1215_vm2, %v1077_v23 }
 0x2bb   : > { %v13702_v60 = vpop.permute.xlu2 %3194  ;;  %11342 = vmatmul.msk.f32.gmra.mxu3 %vm1215_vm2, %v1104_v63 }
 0x2bc   : > { %17460 = vst [vmem:[#allocation64_spill] sm:$0xff] %v13702_v60  ;;  %v13704_v52 = vpop.permute.xlu0 %12082  ;;  %2263 = vmatpush.msrb.mxu0 %v12095_v36  ;;  %2300 = vmatpush.msrb.mxu1 %v12094_v38 }
 0x2bd   : > { %11365 = vmatmul.msk.bf16.vlgmr.msra.gmra.mxu0 %vm789_vm1, %v13553_v16  ;;  %v1158_v61 = vpop.f32.mrf.mxu3 }
 0x2be   : > { %2264 = vmatpush.msrb.mxu0 %v12100_v33  ;;  %2301 = vmatpush.msrb.mxu1 %v12099_v42  ;;  %v1809_v42 = vsel %vm789_vm1, %v13499_v44, 0  ;;  %v1131_v63 = vpop.f32.mrf.mxu2 }
 0x2bf   : > { %12182 = vrot.lane.b32.xlu2 %v13486_v10, %s12748_s29 }
 0x2c0   : > { %4149 = vrot.lane.b32.xlu1 %v13038_v31, %s12750_s17 }
 0x2c1   : > { %12147 = vrot.lane.b32.xlu0 %v13430_v26, %s12748_s29 }
 0x2c2   : > { %v13720_v23 = vpop.permute.xlu1 %3076  ;;  %11343 = vmatmul.msk.f32.vlgmr.msra.gmra.mxu2 %vm1215_vm2, %v1129_v0 }
 0x2c3   : > { %v13718_v16 = vpop.permute.xlu2 %12127  ;;  %17461 = vst [vmem:[#allocation65_spill] sm:$0xff] %v13720_v23  ;;  %11345 = vmatmul.msk.f32.vlgmr.msra.gmra.mxu3 %vm1215_vm2, %v1156_v57  ;;  %1794 = vmatpush.bf16.xpose.msra.mxu2 %v1785_v43  ;;  %v12110_v43 = vunpack.i.h.bf16 %v13649_v30 }
 0x2c4   : > { %v13724_v33 = vpop.permute.xlu0 %2978  ;;  %1818 = vmatpush.bf16.xpose.msra.mxu3 %v1809_v42  ;;  %v12109_v42 = vunpack.i.l.bf16 %v13649_v30 }
 0x2c5   : > { %17462 = vst [vmem:[#allocation66_spill] sm:$0xff] %v13724_v33 }
 0x2c7   : > { %12187 = vrot.lane.b32.xlu2 %v13444_v47, %s12748_s29 }
 0x2c8   : > { %4147 = vrot.lane.b32.xlu1 %v13038_v31, %s12751_s25 }
 0x2c9   : > { %12162 = vrot.lane.b32.xlu0 %v17463_v21, %s12748_s29 }
 0x2ca   : > { %v12103_v36 = vpop.permute.xlu1 %12102  ;;  %11344 = vmatmul.msk.f32.gmra.mxu2 %vm1215_vm2, %v1131_v63  ;;  %v17467_v63 = vld [vmem:[#allocation22_spill] sm:$0xff] }
 0x2cb   : > { %v13736_v0 = vpop.permute.xlu2 %3290  ;;  %v12105_v57 = vunpack.i.h.bf16 %v12103_v36  ;;  %v12104_v38 = vunpack.i.l.bf16 %v12103_v36  ;;  %11346 = vmatmul.msk.f32.gmra.mxu3 %vm1215_vm2, %v1158_v61  ;;  %v17468_v36 = vld [vmem:[#allocation52_spill] sm:$0xff] }
 0x2cc   : > { %17464 = vst [vmem:[#allocation51_spill] sm:$0xff] %v13736_v0  ;;  %v13738_v44 = vpop.permute.xlu0 %3004  ;;  %v1881_v30 = vsel %vm789_vm1, %v17468_v36, 0 }
 0x2cd   : > { %17465 = vst [vmem:[#allocation67_spill] sm:$0xff] %v13738_v44  ;;  %2411 = vmatpush.msra.mxu0 %v12105_v57  ;;  %2448 = vmatpush.msra.mxu1 %v12104_v38  ;;  %v1183_v8 = vpop.f32.mrf.mxu2 }
 0x2cf   : > { %2412 = vmatpush.msra.mxu0 %v12110_v43  ;;  %2449 = vmatpush.msra.mxu1 %v12109_v42  ;;  %v17471_v42 = vld [vmem:[#allocation53_spill] sm:$0xff] }
 0x2d0   : > { %12192 = vrot.lane.b32.xlu2 %v13527_v4, %s12748_s29  ;;  %4245 = vrot.lane.b32.xlu1 %v17467_v63, %s12750_s17 }
 0x2d1   : > { %12172 = vrot.lane.b32.xlu0 %v12171_v6, %s12748_s29  ;;  %v17472_v6 = vld [vmem:[#allocation14_spill] sm:$0xff] }
 0x2d2   : > { %v13755_v57 = vpop.permute.xlu1 %3172  ;;  %11347 = vmatmul.msk.f32.vlgmr.msrb.gmra.mxu2 %vm1215_vm2, %v1183_v8 }
 0x2d3   : > { %v13751_v61 = vpop.permute.xlu2 %3026  ;;  %17469 = vst [vmem:[#allocation22_spill] sm:$0xff] %v13755_v57  ;;  %1890 = vmatpush.bf16.xpose.msrb.mxu2 %v1881_v30 }
 0x2d4   : > { %v13757_v38 = vpop.permute.xlu0 %3074 }
 0x2d5   : > { %17470 = vst [vmem:[#allocation52_spill] sm:$0xff] %v13757_v38  ;;  %v1185_v43 = vpop.f32.mrf.mxu2  ;;  %v17479_v38 = vld [vmem:[#allocation57_spill] sm:$0xff] }
 0x2d8   : > { %12197 = vrot.lane.b32.xlu2 %v17471_v42, %s12748_s29  ;;  %4243 = vrot.lane.b32.xlu1 %v17467_v63, %s12751_s25 }
 0x2d9   : > { %4173 = vrot.lane.b32.xlu0 %v17472_v6, %s12750_s17 }
 0x2da   : > { %v13768_v36 = vpop.permute.xlu1 %12112  ;;  %11348 = vmatmul.msk.f32.gmra.mxu2 %vm1215_vm2, %v1185_v43 }
 0x2db   : > { %v13766_v48 = vpop.permute.xlu2 %3146  ;;  %v12114_v23 = vunpack.i.l.bf16 %v13768_v36 }
 0x2dc   : > { %v13770_v24 = vpop.permute.xlu0 %3100 }
 0x2dd   : > { %17473 = vst [vmem:[#allocation53_spill] sm:$0xff] %v13770_v24  ;;  %v1239_v8 = vpop.f32.mrf.mxu2 }
 0x2de   : > { %v1210_v30 = vpop.f32.mrf.mxu3  ;;  %v1680_v55 = vmax.f32 %v1239_v8, 0.0  ;;  %v17475_v8 = vld [vmem:[#allocation46_spill] sm:$0xff] }
 0x2df   : > { %11349 = vmatmul.msk.f32.vlgmr.msrb.gmra.mxu3 %vm1215_vm2, %v1210_v30  ;;  %v1977_v29 = vsel %vm789_vm1, %v17475_v8, 0 }
 0x2e0   : > { %v1712_v34 = vpack.c.bf16 %v1680_v55, %v1680_v55  ;;  %1914 = vmatpush.bf16.xpose.msrb.mxu3 %v1905_v50  ;;  %12202 = vrot.lane.b32.xlu2 %v13567_v3, %s12748_s29  ;;  %v17478_v50 = vld [vmem:[#allocation41_spill] sm:$0xff] }
 0x2e1   : > { %4341 = vrot.lane.b32.xlu1 %v13169_v40, %s12750_s17  ;;  %4171 = vrot.lane.b32.xlu0 %v17472_v6, %s12751_s25 }
 0x2e2   : > { %1745 = vst.msk [vmem:[#allocation2] sm:$0xf] %vm1744_vm3, %v1712_v34  ;;  %v13787_v56 = vpop.permute.xlu1 %3268  ;;  %11351 = vmatmul.msk.bf16.vlgmr.msra.gmra.mxu2 %vm789_vm1, %v17478_v50 }
 0x2e3   : > { %v13782_v43 = vpop.permute.xlu2 %3220  ;;  %17476 = vst [vmem:[#allocation14_spill] sm:$0xff] %v13787_v56  ;;  %1986 = vmatpush.bf16.xpose.msra.mxu2 %v1977_v29 }
 0x2e4   : > { %v13789_v55 = vpop.permute.xlu0 %3170 }
 0x2e5   : > { %17477 = vst [vmem:[#allocation54_spill] sm:$0xff] %v13789_v55  ;;  %v1242_v30 = vpop.f32.mrf.mxu2 }
 0x2e6   : > { %v1212_v0 = vpop.f32.mrf.mxu3  ;;  %v1681_v60 = vmax.f32 %v1242_v30, 0.0  ;;  %v17481_v30 = vld [vmem:[#allocation48_spill] sm:$0xff] }
 0x2e7   : > { %11350 = vmatmul.msk.f32.gmra.mxu3 %vm1215_vm2, %v1212_v0  ;;  %v2001_v55 = vsel %vm789_vm1, %v17481_v30, 0 }
 0x2e8   : > { %v1713_v5 = vpack.c.bf16 %v1681_v60, %v1681_v60  ;;  %12207 = vrot.lane.b32.xlu2 %v17479_v38, %s12748_s29  ;;  %s12759_s29 = smov 8  }
 0x2e9   : > { %4339 = vrot.lane.b32.xlu1 %v13169_v40, %s12751_s25  ;;  %4269 = vrot.lane.b32.xlu0 %v13120_v19, %s12750_s17 }
 0x2ea   : > { %1746 = vst.msk [vmem:[#allocation2 + $0x4] sm:$0xf] %vm1744_vm3, %v1713_v5  ;;  %v13803_v29 = vpop.permute.xlu1 %12122 }
 0x2eb   : > { %v13800_v34 = vpop.permute.xlu2 %3340 }
 0x2ec   : > { %v13805_v8 = vpop.permute.xlu0 %3196 }
 0x2ed   : > { %17480 = vst [vmem:[#allocation46_spill] sm:$0xff] %v13805_v8  ;;  %v1268_v50 = vpop.f32.mrf.mxu2 }
 0x2ee   : > { %v1682_v0 = vmax.f32 %v1268_v50, 0.0  ;;  %v1271_v60 = vpop.f32.mrf.mxu3 }
 0x2ef   : > { %v1683_v56 = vmax.f32 %v1271_v60, 0.0  ;;  %11352 = vmatmul.msk.bf16.vlgmr.msra.gmra.mxu3 %vm789_vm1, %v17482_v32  ;;  %v2073_v60 = vsel %vm789_vm1, %v13557_v11, 0 }
 0x2f0   : > { %v1714_v33 = vpack.c.bf16 %v1682_v0, %v1682_v0  ;;  %2010 = vmatpush.bf16.xpose.msra.mxu3 %v2001_v55  ;;  %4197 = vrot.lane.b32.xlu2 %v13074_v14, %s12750_s17  ;;  %v17484_v0 = vld [vmem:[#allocation56_spill] sm:$0xff] }
 0x2f1   : > { %v1715_v5 = vpack.c.bf16 %v1683_v56, %v1683_v56  ;;  %4437 = vrot.lane.b32.xlu1 %v13238_v27, %s12750_s17  ;;  %4267 = vrot.lane.b32.xlu0 %v13120_v19, %s12751_s25 }
 0x2f2   : > { %1747 = vst.msk [vmem:[#allocation2 + $0x8] sm:$0xf] %vm1744_vm3, %v1714_v33  ;;  %v13822_v32 = vpop.permute.xlu1 %3052  ;;  %11355 = vmatmul.msk.bf16.vlgmr.msrb.gmra.mxu2 %vm789_vm1, %v17484_v0 }
 0x2f3   : > { %v13817_v50 = vpop.permute.xlu2 %3314  ;;  %1748 = vst.msk [vmem:[#allocation2 + $0xc] sm:$0xf] %vm1744_vm3, %v1715_v5  ;;  %2082 = vmatpush.bf16.xpose.msrb.mxu2 %v2073_v60 }
 0x2f4   : > { %v13824_v55 = vpop.permute.xlu0 %3266 }
 0x2f5   : > { %17483 = vst [vmem:[#allocation41_spill] sm:$0xff] %v13824_v55  ;;  %v1297_v56 = vpop.f32.mrf.mxu2 }
 0x2f6   : > { %v1684_v30 = vmax.f32 %v1297_v56, 0.0  ;;  %v1326_v8 = vpop.f32.mrf.mxu3 }
 0x2f7   : > { %v1686_v57 = vmax.f32 %v1326_v8, 0.0  ;;  %v1868_v24 = vpop.f32.mrf.mxu1  ;;  %v12119_v8 = vunpack.i.l.bf16 %v13683_v35 }
 0x2f8   : > { %v1716_v11 = vpack.c.bf16 %v1684_v30, %v1684_v30  ;;  %4195 = vrot.lane.b32.xlu2 %v13074_v14, %s12751_s25  ;;  %11373 = vmatmul.msk.f32.vlgmr.msrb.gmra.mxu1 %vm1215_vm2, %v1868_v24  ;;  %v2097_v30 = vsel %vm789_vm1, %v13577_v28, 0 }
 0x2f9   : > { %v1718_v33 = vpack.c.bf16 %v1686_v57, %v1686_v57  ;;  %4435 = vrot.lane.b32.xlu1 %v13238_v27, %s12751_s25  ;;  %4365 = vrot.lane.b32.xlu0 %v13187_v17, %s12750_s17 }
 0x2fa   : > { %1749 = vst.msk [vmem:[#allocation2 + $0x10] sm:$0xf] %vm1744_vm3, %v1716_v11  ;;  %2596 = vmatpush.msrb.mxu1 %v12114_v23  ;;  %v13841_v60 = vpop.permute.xlu1 %3050  ;;  %v12054_v23 = vunpack.i.l.bf16 %v13671_v59 }
 0x2fb   : > { %v13837_v5 = vpop.permute.xlu2 %12142  ;;  %1751 = vst.msk [vmem:[#allocation2 + $0x18] sm:$0xf] %vm1744_vm3, %v1718_v33 }
 0x2fc   : > { %17485 = vst [vmem:[#allocation57_spill] sm:$0xff] %v13837_v5  ;;  %v13843_v0 = vpop.permute.xlu0 %3292  ;;  %2597 = vmatpush.msrb.mxu1 %v12119_v8 }
 0x2fd   : > { %17486 = vst [vmem:[#allocation48_spill] sm:$0xff] %v13843_v0  ;;  %v1300_v24 = vpop.f32.mrf.mxu2  ;;  %v12115_v0 = vunpack.i.h.bf16 %v13768_v36 }
 0x2fe   : > { %v1685_v57 = vmax.f32 %v1300_v24, 0.0  ;;  %v1329_v56 = vpop.f32.mrf.mxu3  ;;  %v17488_v24 = vld [vmem:[#allocation55_spill] sm:$0xff] }
 0x2ff   : > { %v1687_v55 = vmax.f32 %v1329_v56, 0.0  ;;  %11356 = vmatmul.msk.bf16.vlgmr.msrb.gmra.mxu3 %vm789_vm1, %v13539_v58  ;;  %v1870_v5 = vpop.f32.mrf.mxu1 }
 0x300   : > { %v1717_v11 = vpack.c.bf16 %v1685_v57, %v1685_v57  ;;  %2106 = vmatpush.bf16.xpose.msrb.mxu3 %v2097_v30  ;;  %4315 = vrot.lane.b32.xlu2 %v13152_v7, %s12751_s25 }
 0x301   : > { %v1719_v33 = vpack.c.bf16 %v1687_v55, %v1687_v55  ;;  %4221 = vrot.lane.b32.xlu1 %v13090_v37, %s12750_s17  ;;  %4363 = vrot.lane.b32.xlu0 %v13187_v17, %s12751_s25  ;;  %v12055_v55 = vunpack.i.h.bf16 %v13671_v59 }
 0x302   : > { %1750 = vst.msk [vmem:[#allocation2 + $0x14] sm:$0xf] %vm1744_vm3, %v1717_v11  ;;  %11374 = vmatmul.msk.f32.gmra.mxu1 %vm1215_vm2, %v1870_v5  ;;  %v13861_v58 = vpop.permute.xlu1 %3124  ;;  %11359 = vmatmul.msk.bf16.vlgmr.msra.gmra.mxu2 %vm789_vm1, %v17488_v24  ;;  %v12120_v24 = vunpack.i.h.bf16 %v13683_v35 }
 0x303   : > { %v13857_v28 = vpop.permute.xlu2 %12157  ;;  %1752 = vst.msk [vmem:[#allocation2 + $0x1c] sm:$0xf] %vm1744_vm3, %v1719_v33  ;;  %2189 = vmatpush.msra.mxu2 %v12054_v23 }
 0x304   : > { %17487 = vst [vmem:[#allocation43_spill] sm:$0xff] %v13857_v28  ;;  %v13863_v8 = vpop.permute.xlu0 %3028 }
 0x305   : > { %2190 = vmatpush.msra.mxu2 %v12055_v55  ;;  %v1355_v57 = vpop.f32.mrf.mxu2 }
 0x306   : > { %v1688_v56 = vmax.f32 %v1355_v57, 0.0  ;;  %v1384_v30 = vpop.f32.mrf.mxu3 }
 0x307   : > { %v1690_v28 = vmax.f32 %v1384_v30, 0.0  ;;  %v17489_v30 = vld [vmem:[#allocation59_spill] sm:$0xff] }
 0x308   : > { %v1720_v11 = vpack.c.bf16 %v1688_v56, %v1688_v56  ;;  %4389 = vrot.lane.b32.xlu2 %v13206_v62, %s12750_s17 }
 0x309   : > { %v1722_v44 = vpack.c.bf16 %v1690_v28, %v1690_v28  ;;  %4219 = vrot.lane.b32.xlu1 %v13090_v37, %s12751_s25  ;;  %4461 = vrot.lane.b32.xlu0 %v13258_v25, %s12750_s17  ;;  %v12059_v28 = vunpack.i.l.bf16 %v13651_v20 }
 0x30a   : > { %v1844_v5 = vpop.f32.mrf.mxu0  ;;  %1753 = vst.msk [vmem:[#allocation2 + $0x20] sm:$0xf] %vm1744_vm3, %v1720_v11  ;;  %v13880_v23 = vpop.permute.xlu1 %3244  ;;  %v12064_v11 = vunpack.i.l.bf16 %v17489_v30 }
 0x30b   : > { %v13876_v59 = vpop.permute.xlu2 %12167  ;;  %11371 = vmatmul.msk.f32.vlgmr.msrb.gmra.mxu0 %vm1215_vm2, %v1844_v5  ;;  %1755 = vst.msk [vmem:[#allocation2 + $0x28] sm:$0xf] %vm1744_vm3, %v1722_v44 }
 0x30c   : > { %v13882_v33 = vpop.permute.xlu0 %3148  ;;  %2559 = vmatpush.msrb.mxu0 %v12115_v0 }
 0x30d   : > { %v1358_v36 = vpop.f32.mrf.mxu2 }
 0x30e   : > { %2560 = vmatpush.msrb.mxu0 %v12120_v24  ;;  %v1689_v55 = vmax.f32 %v1358_v36, 0.0  ;;  %v1387_v57 = vpop.f32.mrf.mxu3  ;;  %v12124_v36 = vunpack.i.l.bf16 %v13803_v29 }
 0x30f   : > { %v1691_v56 = vmax.f32 %v1387_v57, 0.0  ;;  %11360 = vmatmul.msk.bf16.vlgmr.msra.gmra.mxu3 %vm789_vm1, %v13537_v41  ;;  %v12060_v41 = vunpack.i.h.bf16 %v13651_v20  ;;  %v17490_v57 = vld [vmem:[#allocation49_spill] sm:$0xff]  ;;  %v12065_v20 = vunpack.i.h.bf16 %v17489_v30 }
 0x310   : > { %v1721_v5 = vpack.c.bf16 %v1689_v55, %v1689_v55  ;;  %2226 = vmatpush.msra.mxu3 %v12059_v28  ;;  %4483 = vrot.lane.b32.xlu2 %v13278_v13, %s12751_s25 }
 0x311   : > { %v1723_v44 = vpack.c.bf16 %v1691_v56, %v1691_v56  ;;  %4293 = vrot.lane.b32.xlu1 %v13136_v45, %s12750_s17  ;;  %4459 = vrot.lane.b32.xlu0 %v13258_v25, %s12751_s25  ;;  %v12129_v56 = vunpack.i.l.bf16 %v13718_v16 }
 0x312   : > { %v1846_v35 = vpop.f32.mrf.mxu0  ;;  %v1964_v0 = vpop.f32.mrf.mxu1  ;;  %1754 = vst.msk [vmem:[#allocation2 + $0x24] sm:$0xf] %vm1744_vm3, %v1721_v5  ;;  %2227 = vmatpush.msra.mxu3 %v12064_v11  ;;  %11363 = vmatmul.msk.bf16.vlgmr.msrb.gmra.mxu2 %vm789_vm1, %v17490_v57 }
 0x313   : > { %v13896_v24 = vpop.permute.xlu2 %12177  ;;  %11372 = vmatmul.msk.f32.gmra.mxu0 %vm1215_vm2, %v1846_v35  ;;  %v13902_v28 = vpop.permute.xlu1 %3218  ;;  %1756 = vst.msk [vmem:[#allocation2 + $0x2c] sm:$0xf] %vm1744_vm3, %v1723_v44  ;;  %11381 = vmatmul.msk.f32.vlgmr.msra.gmra.mxu1 %vm1215_vm2, %v1964_v0  ;;  %v12125_v0 = vunpack.i.h.bf16 %v13803_v29  ;;  %v12130_v29 = vunpack.i.h.bf16 %v13718_v16 }
 0x314   : > { %v13904_v55 = vpop.permute.xlu0 %3122  ;;  %2744 = vmatpush.msra.mxu1 %v12124_v36  ;;  %2337 = vmatpush.msrb.mxu2 %v12060_v41 }
 0x315   : > { %v1413_v11 = vpop.f32.mrf.mxu2 }
 0x316   : > { %2745 = vmatpush.msra.mxu1 %v12129_v56  ;;  %2338 = vmatpush.msrb.mxu2 %v12065_v20  ;;  %v1692_v5 = vmax.f32 %v1413_v11, 0.0  ;;  %v1442_v35 = vpop.f32.mrf.mxu3  ;;  %v12069_v56 = vunpack.i.l.bf16 %v13687_v46 }
 0x317   : > { %v1694_v37 = vmax.f32 %v1442_v35, 0.0  ;;  %v17491_v35 = vld [vmem:[#allocation58_spill] sm:$0xff] }
 0x318   : > { %v1724_v15 = vpack.c.bf16 %v1692_v5, %v1692_v5  ;;  %4509 = vrot.lane.b32.xlu2 %v13300_v1, %s12750_s17 }
 0x319   : > { %v1726_v57 = vpack.c.bf16 %v1694_v37, %v1694_v37  ;;  %4413 = vrot.lane.b32.xlu1 %v13220_v39, %s12750_s17  ;;  %4317 = vrot.lane.b32.xlu0 %v13152_v7, %s12750_s17 }
 0x31a   : > { %v1940_v44 = vpop.f32.mrf.mxu0  ;;  %v1966_v30 = vpop.f32.mrf.mxu1  ;;  %1757 = vst.msk [vmem:[#allocation2 + $0x30] sm:$0xf] %vm1744_vm3, %v1724_v15 }
 0x31b   : > { %v13919_v41 = vpop.permute.xlu2 %12182  ;;  %11379 = vmatmul.msk.f32.vlgmr.msra.gmra.mxu0 %vm1215_vm2, %v1940_v44  ;;  %v13923_v36 = vpop.permute.xlu1 %3338  ;;  %1759 = vst.msk [vmem:[#allocation2 + $0x38] sm:$0xf] %vm1744_vm3, %v1726_v57  ;;  %11382 = vmatmul.msk.f32.gmra.mxu1 %vm1215_vm2, %v1966_v30  ;;  %v12074_v44 = vunpack.i.l.bf16 %v13669_v49 }
 0x31c   : > { %v13925_v20 = vpop.permute.xlu0 %3242  ;;  %2707 = vmatpush.msra.mxu0 %v12125_v0 }
 0x31d   : > { %v1416_v37 = vpop.f32.mrf.mxu2 }
 0x31e   : > { %2708 = vmatpush.msra.mxu0 %v12130_v29  ;;  %v1693_v11 = vmax.f32 %v1416_v37, 0.0  ;;  %v1445_v5 = vpop.f32.mrf.mxu3 }
 0x31f   : > { %v1695_v15 = vmax.f32 %v1445_v5, 0.0  ;;  %11364 = vmatmul.msk.bf16.vlgmr.msrb.gmra.mxu3 %vm789_vm1, %v17491_v35 }
 0x320   : > { %v1725_v22 = vpack.c.bf16 %v1693_v11, %v1693_v11  ;;  %2374 = vmatpush.msrb.mxu3 %v12069_v56  ;;  %12222 = vrot.lane.b32.xlu2 %v13368_v53, %s12751_s25  ;;  %v3058_v56 = vsel %vm789_vm1, %v13822_v32, 0 }
 0x321   : > { %v1727_v57 = vpack.c.bf16 %v1695_v15, %v1695_v15  ;;  %4387 = vrot.lane.b32.xlu1 %v13206_v62, %s12751_s25  ;;  %4291 = vrot.lane.b32.xlu0 %v13136_v45, %s12751_s25 }
 0x322   : > { %v1942_v16 = vpop.f32.mrf.mxu0  ;;  %v2060_v0 = vpop.f32.mrf.mxu1  ;;  %1758 = vst.msk [vmem:[#allocation2 + $0x34] sm:$0xf] %vm1744_vm3, %v1725_v22  ;;  %2375 = vmatpush.msrb.mxu3 %v12074_v44 }
 0x323   : > { %v13940_v30 = vpop.permute.xlu2 %12187  ;;  %11380 = vmatmul.msk.f32.gmra.mxu0 %vm1215_vm2, %v1942_v16  ;;  %v13944_v29 = vpop.permute.xlu1 %12137  ;;  %1760 = vst.msk [vmem:[#allocation2 + $0x3c] sm:$0xf] %vm1744_vm3, %v1727_v57  ;;  %11389 = vmatmul.msk.f32.vlgmr.msrb.gmra.mxu1 %vm1215_vm2, %v2060_v0  ;;  %v3034_v57 = vsel %vm789_vm1, %v13863_v8, 0 }
 0x324   : > { %17492 = vst [vmem:[#allocation56_spill] sm:$0xff] %v13944_v29  ;;  %v13946_v37 = vpop.permute.xlu0 %3316  ;;  %3067 = vmatpush.bf16.xpose.msrb.mxu1 %v3058_v56 }
 0x325   : > { %v1471_v11 = vpop.f32.mrf.mxu2 }
 0x326   : > { %v1696_v5 = vmax.f32 %v1471_v11, 0.0  ;;  %v1500_v15 = vpop.f32.mrf.mxu3 }
 0x327   : > { %v1698_v35 = vmax.f32 %v1500_v15, 0.0 }
 0x328   : > { %v1728_v22 = vpack.c.bf16 %v1696_v5, %v1696_v5  ;;  %12237 = vrot.lane.b32.xlu2 %v13380_v2, %s12751_s25 }
 0x329   : > { %v1730_v16 = vpack.c.bf16 %v1698_v35, %v1698_v35  ;;  %12217 = vrot.lane.b32.xlu1 %v13398_v54, %s12751_s25  ;;  %4411 = vrot.lane.b32.xlu0 %v13220_v39, %s12751_s25 }
 0x32a   : > { %v2036_v44 = vpop.f32.mrf.mxu0  ;;  %v2062_v32 = vpop.f32.mrf.mxu1  ;;  %1761 = vst.msk [vmem:[#allocation2 + $0x40] sm:$0xf] %vm1744_vm3, %v1728_v22  ;;  %v17495_v22 = vld [vmem:[#allocation50_spill] sm:$0xff] }
 0x32b   : > { %11387 = vmatmul.msk.f32.vlgmr.msrb.gmra.mxu0 %vm1215_vm2, %v2036_v44  ;;  %v13962_v0 = vpop.permute.xlu2 %12192  ;;  %v13964_v56 = vpop.permute.xlu1 %12152  ;;  %1763 = vst.msk [vmem:[#allocation2 + $0x48] sm:$0xf] %vm1744_vm3, %v1730_v16  ;;  %11390 = vmatmul.msk.f32.gmra.mxu1 %vm1215_vm2, %v2062_v32 }
 0x32c   : > { %17493 = vst [vmem:[#allocation55_spill] sm:$0xff] %v13964_v56  ;;  %3043 = vmatpush.bf16.xpose.msrb.mxu0 %v3034_v57  ;;  %v13968_v11 = vpop.permute.xlu0 %12132 }
 0x32d   : > { %17494 = vst [vmem:[#allocation59_spill] sm:$0xff] %v13968_v11  ;;  %v1474_v5 = vpop.f32.mrf.mxu2 }
 0x32e   : > { %v1697_v15 = vmax.f32 %v1474_v5, 0.0  ;;  %v1503_v35 = vpop.f32.mrf.mxu3  ;;  %v3154_v5 = vsel %vm789_vm1, %v13882_v33, 0  ;;  %v3130_v33 = vsel %vm789_vm1, %v13861_v58, 0 }
 0x32f   : > { %v1699_v29 = vmax.f32 %v1503_v35, 0.0 }
 0x330   : > { %v1729_v8 = vpack.c.bf16 %v1697_v15, %v1697_v15  ;;  %12247 = vrot.lane.b32.xlu2 %v17495_v22, %s12751_s25 }
 0x331   : > { %v1731_v54 = vpack.c.bf16 %v1699_v29, %v1699_v29  ;;  %4507 = vrot.lane.b32.xlu1 %v13300_v1, %s12751_s25  ;;  %4485 = vrot.lane.b32.xlu0 %v13278_v13, %s12750_s17 }
 0x332   : > { %v2038_v44 = vpop.f32.mrf.mxu0  ;;  %v2156_v16 = vpop.f32.mrf.mxu1  ;;  %1762 = vst.msk [vmem:[#allocation2 + $0x44] sm:$0xf] %vm1744_vm3, %v1729_v8 }
 0x333   : > { %11388 = vmatmul.msk.f32.gmra.mxu0 %vm1215_vm2, %v2038_v44  ;;  %v13978_v32 = vpop.permute.xlu2 %12197  ;;  %v13980_v57 = vpop.permute.xlu1 %4149  ;;  %1764 = vst.msk [vmem:[#allocation2 + $0x4c] sm:$0xf] %vm1744_vm3, %v1731_v54  ;;  %11397 = vmatmul.msk.f32.vlgmr.msra.gmra.mxu1 %vm1215_vm2, %v2156_v16 }
 0x334   : > { %17496 = vst [vmem:[#allocation49_spill] sm:$0xff] %v13980_v57  ;;  %v13986_v29 = vpop.permute.xlu0 %12147  ;;  %3163 = vmatpush.bf16.xpose.msra.mxu1 %v3154_v5 }
 0x335   : > { %17497 = vst [vmem:[#allocation58_spill] sm:$0xff] %v13986_v29  ;;  %v1529_v15 = vpop.f32.mrf.mxu2 }
 0x336   : > { %v1700_v35 = vmax.f32 %v1529_v15, 0.0  ;;  %v1558_v56 = vpop.f32.mrf.mxu3 }
 0x337   : > { %v1702_v8 = vmax.f32 %v1558_v56, 0.0 }
 0x338   : > { %v1732_v11 = vpack.c.bf16 %v1700_v35, %v1700_v35  ;;  %5316 = vrot.lane.b32.xlu2 %v13038_v31, %s12752_s19 }
 0x339   : > { %v1734_v57 = vpack.c.bf16 %v1702_v8, %v1702_v8  ;;  %12232 = vrot.lane.b32.xlu1 %v13414_v12, %s12751_s25  ;;  %12212 = vrot.lane.b32.xlu0 %v13418_v18, %s12751_s25 }
 0x33a   : > { %v2132_v44 = vpop.f32.mrf.mxu0  ;;  %v2158_v54 = vpop.f32.mrf.mxu1  ;;  %1765 = vst.msk [vmem:[#allocation2 + $0x50] sm:$0xf] %vm1744_vm3, %v1732_v11 }
 0x33b   : > { %11395 = vmatmul.msk.f32.vlgmr.msra.gmra.mxu0 %vm1215_vm2, %v2132_v44  ;;  %v13998_v56 = vpop.permute.xlu2 %12202  ;;  %v14000_v16 = vpop.permute.xlu1 %4147  ;;  %1767 = vst.msk [vmem:[#allocation2 + $0x58] sm:$0xf] %vm1744_vm3, %v1734_v57  ;;  %11398 = vmatmul.msk.f32.gmra.mxu1 %vm1215_vm2, %v2158_v54 }
 0x33c   : > { %17498 = vst [vmem:[#allocation68_spill] sm:$0xff] %v14000_v16  ;;  %3139 = vmatpush.bf16.xpose.msra.mxu0 %v3130_v33  ;;  %v14004_v5 = vpop.permute.xlu0 %12162  ;;  %v3250_v33 = vsel %vm789_vm1, %v13880_v23, 0 }
 0x33d   : > { %17499 = vst [vmem:[#allocation69_spill] sm:$0xff] %v14004_v5  ;;  %v1532_v15 = vpop.f32.mrf.mxu2 }
 0x33e   : > { %v1701_v35 = vmax.f32 %v1532_v15, 0.0  ;;  %v1561_v8 = vpop.f32.mrf.mxu3 }
 0x33f   : > { %v1703_v29 = vmax.f32 %v1561_v8, 0.0 }
 0x340   : > { %v1733_v58 = vpack.c.bf16 %v1701_v35, %v1701_v35  ;;  %12262 = vrot.lane.b32.xlu2 %v13486_v10, %s12751_s25 }
 0x341   : > { %v1735_v44 = vpack.c.bf16 %v1703_v29, %v1703_v29  ;;  %5318 = vrot.lane.b32.xlu1 %v13038_v31, %s12753_s26  ;;  %12227 = vrot.lane.b32.xlu0 %v13430_v26, %s12751_s25 }
 0x342   : > { %v2134_v11 = vpop.f32.mrf.mxu0  ;;  %1766 = vst.msk [vmem:[#allocation2 + $0x54] sm:$0xf] %vm1744_vm3, %v1733_v58 }
 0x343   : > { %11396 = vmatmul.msk.f32.gmra.mxu0 %vm1215_vm2, %v2134_v11  ;;  %v14014_v57 = vpop.permute.xlu2 %12207  ;;  %v14016_v54 = vpop.permute.xlu1 %4245  ;;  %1768 = vst.msk [vmem:[#allocation2 + $0x5c] sm:$0xf] %vm1744_vm3, %v1735_v44  ;;  %11402 = vmatmul.msk.bf16.vlgmr.msrb.gmra.mxu1 %vm789_vm1, %v13841_v60  ;;  %v3226_v60 = vsel %vm789_vm1, %v13782_v43, 0 }
 0x344   : > { %17500 = vst [vmem:[#allocation70_spill] sm:$0xff] %v14016_v54  ;;  %v14023_v29 = vpop.permute.xlu0 %12172  ;;  %3259 = vmatpush.bf16.xpose.msrb.mxu1 %v3250_v33  ;;  %v17502_v54 = vld [vmem:[#allocation44_spill] sm:$0xff] }
 0x345   : > { %17501 = vst [vmem:[#allocation71_spill] sm:$0xff] %v14023_v29  ;;  %v1587_v15 = vpop.f32.mrf.mxu2 }
 0x346   : > { %v1704_v35 = vmax.f32 %v1587_v15, 0.0  ;;  %v1616_v8 = vpop.f32.mrf.mxu3 }
 0x347   : > { %v1706_v58 = vmax.f32 %v1616_v8, 0.0 }
 0x348   : > { %v1736_v11 = vpack.c.bf16 %v1704_v35, %v1704_v35  ;;  %5412 = vrot.lane.b32.xlu2 %v17467_v63, %s12752_s19 }
 0x349   : > { %v1738_v16 = vpack.c.bf16 %v1706_v58, %v1706_v58  ;;  %12257 = vrot.lane.b32.xlu1 %v17502_v54, %s12751_s25  ;;  %12242 = vrot.lane.b32.xlu0 %v17463_v21, %s12751_s25 }
 0x34a   : > { %1769 = vst.msk [vmem:[#allocation2 + $0x60] sm:$0xf] %vm1744_vm3, %v1736_v11 }
 0x34b   : > { %11401 = vmatmul.msk.bf16.vlgmr.msrb.gmra.mxu0 %vm789_vm1, %v13751_v61  ;;  %v14036_v23 = vpop.permute.xlu2 %4197  ;;  %v14038_v44 = vpop.permute.xlu1 %4243  ;;  %1771 = vst.msk [vmem:[#allocation2 + $0x68] sm:$0xf] %vm1744_vm3, %v1738_v16  ;;  %v3346_v16 = vsel %vm789_vm1, %v13800_v34, 0 }
 0x34c   : > { %17503 = vst [vmem:[#allocation44_spill] sm:$0xff] %v14038_v44  ;;  %3235 = vmatpush.bf16.xpose.msrb.mxu0 %v3226_v60  ;;  %v14041_v33 = vpop.permute.xlu0 %4173 }
 0x34d   : > { %17504 = vst [vmem:[#allocation72_spill] sm:$0xff] %v14041_v33  ;;  %v1590_v15 = vpop.f32.mrf.mxu2  ;;  %v17553_v33 = vld [vmem:[#allocation52_spill] sm:$0xff] }
 0x34e   : > { %v1705_v35 = vmax.f32 %v1590_v15, 0.0  ;;  %v1619_v8 = vpop.f32.mrf.mxu3 }
 0x34f   : > { %v1707_v58 = vmax.f32 %v1619_v8, 0.0 }
 0x350   : > { %v1737_v5 = vpack.c.bf16 %v1705_v35, %v1705_v35  ;;  %12272 = vrot.lane.b32.xlu2 %v13527_v4, %s12751_s25 }
 0x351   : > { %v1739_v43 = vpack.c.bf16 %v1707_v58, %v1707_v58  ;;  %5414 = vrot.lane.b32.xlu1 %v17467_v63, %s12753_s26  ;;  %12252 = vrot.lane.b32.xlu0 %v13410_v9, %s12751_s25 }
 0x352   : > { %1770 = vst.msk [vmem:[#allocation2 + $0x64] sm:$0xf] %vm1744_vm3, %v1737_v5 }
 0x353   : > { %v14050_v61 = vpop.permute.xlu2 %4195  ;;  %1772 = vst.msk [vmem:[#allocation2 + $0x6c] sm:$0xf] %vm1744_vm3, %v1739_v43  ;;  %11406 = vmatmul.msk.bf16.vlgmr.msra.gmra.mxu1 %vm789_vm1, %v13766_v48  ;;  %v14057_v11 = vpop.permute.xlu1 %4341  ;;  %v3322_v48 = vsel %vm789_vm1, %v13946_v37, 0 }
 0x354   : > { %17505 = vst [vmem:[#allocation73_spill] sm:$0xff] %v14057_v11  ;;  %v14059_v60 = vpop.permute.xlu0 %4171  ;;  %3355 = vmatpush.bf16.xpose.msra.mxu1 %v3346_v16 }
 0x355   : > { %17506 = vst [vmem:[#allocation74_spill] sm:$0xff] %v14059_v60  ;;  %v1645_v15 = vpop.f32.mrf.mxu2 }
 0x356   : > { %v1708_v35 = vmax.f32 %v1645_v15, 0.0 }
 0x358   : > { %v1740_v8 = vpack.c.bf16 %v1708_v35, %v1708_v35  ;;  %5508 = vrot.lane.b32.xlu2 %v13169_v40, %s12752_s19 }
 0x359   : > { %5340 = vrot.lane.b32.xlu1 %v17472_v6, %s12752_s19  ;;  %5342 = vrot.lane.b32.xlu0 %v17472_v6, %s12753_s26 }
 0x35a   : > { %1773 = vst.msk [vmem:[#allocation2 + $0x70] sm:$0xf] %vm1744_vm3, %v1740_v8 }
 0x35b   : > { %11405 = vmatmul.msk.bf16.vlgmr.msra.gmra.mxu0 %vm789_vm1, %v13904_v55  ;;  %v14072_v34 = vpop.permute.xlu2 %4315  ;;  %v14074_v5 = vpop.permute.xlu1 %4339  ;;  %v12170_v55 = vunpack.i.h.bf16 %v13876_v59 }
 0x35c   : > { %3331 = vmatpush.bf16.xpose.msra.mxu0 %v3322_v48  ;;  %17507 = vst [vmem:[#allocation75_spill] sm:$0xff] %v14074_v5  ;;  %v14076_v58 = vpop.permute.xlu0 %4269  ;;  %v12070_v5 = vunpack.i.h.bf16 %v13687_v46 }
 0x35d   : > { %17508 = vst [vmem:[#allocation76_spill] sm:$0xff] %v14076_v58  ;;  %v1648_v43 = vpop.f32.mrf.mxu2  ;;  %v17538_v58 = vld [vmem:[#allocation66_spill] sm:$0xff] }
 0x35e   : > { %v1709_v16 = vmax.f32 %v1648_v43, 0.0 }
 0x360   : > { %v1741_v15 = vpack.c.bf16 %v1709_v16, %v1709_v16  ;;  %12282 = vrot.lane.b32.xlu2 %v13567_v3, %s12751_s25  ;;  %v12179_v16 = vunpack.i.l.bf16 %v13896_v24 }
 0x361   : > { %5510 = vrot.lane.b32.xlu1 %v13169_v40, %s12753_s26  ;;  %12267 = vrot.lane.b32.xlu0 %v13444_v47, %s12751_s25 }
 0x362   : > { %1774 = vst.msk [vmem:[#allocation2 + $0x74] sm:$0xf] %vm1744_vm3, %v1741_v15  ;;  %v1674_v35 = vpop.f32.mrf.mxu3  ;;  %v12175_v15 = vunpack.i.h.bf16 %v14023_v29  ;;  %v17564_v29 = vld [vmem:[#allocation54_spill] sm:$0xff] }
 0x363   : > { %v14086_v37 = vpop.permute.xlu2 %4389  ;;  %11410 = vmatmul.msk.bf16.vlgmr.msrb.gmra.mxu1 %vm789_vm1, %v13925_v20  ;;  %v14090_v8 = vpop.permute.xlu1 %4437  ;;  %v1710_v48 = vmax.f32 %v1674_v35, 0.0  ;;  %v12075_v20 = vunpack.i.h.bf16 %v13669_v49  ;;  %v12180_v49 = vunpack.i.h.bf16 %v13896_v24  ;;  %v12079_v24 = vunpack.i.l.bf16 %v13588_v51 }
 0x364   : > { %17509 = vst [vmem:[#allocation77_spill] sm:$0xff] %v14090_v8  ;;  %v14092_v43 = vpop.permute.xlu0 %4267  ;;  %3493 = vmatpush.msrb.mxu1 %v12170_v55 }
 0x365   : > { %17510 = vst [vmem:[#allocation78_spill] sm:$0xff] %v14092_v43  ;;  %v1742_v44 = vpack.c.bf16 %v1710_v48, %v1710_v48  ;;  %v1796_v60 = vpop.f32.mrf.mxu2 }
 0x366   : > { %3494 = vmatpush.msrb.mxu1 %v12179_v16  ;;  %11367 = vmatmul.msk.f32.vlgmr.msra.gmra.mxu2 %vm1215_vm2, %v1796_v60 }
 0x367   : > { %1775 = vst.msk [vmem:[#allocation2 + $0x78] sm:$0xf] %vm1744_vm3, %v1742_v44  ;;  %2485 = vmatpush.msra.mxu2 %v12070_v5 }
 0x368   : > { %5604 = vrot.lane.b32.xlu2 %v13238_v27, %s12752_s19 }
 0x369   : > { %5436 = vrot.lane.b32.xlu1 %v13120_v19, %s12752_s19  ;;  %5438 = vrot.lane.b32.xlu0 %v13120_v19, %s12753_s26 }
 0x36a   : > { %2486 = vmatpush.msra.mxu2 %v12075_v20  ;;  %v1677_v44 = vpop.f32.mrf.mxu3 }
 0x36b   : > { %11409 = vmatmul.msk.bf16.vlgmr.msrb.gmra.mxu0 %vm789_vm1, %v13902_v28  ;;  %v14108_v46 = vpop.permute.xlu2 %4483  ;;  %v14111_v60 = vpop.permute.xlu1 %4435  ;;  %v1711_v5 = vmax.f32 %v1677_v44, 0.0  ;;  %v12184_v28 = vunpack.i.l.bf16 %v13919_v41 }
 0x36c   : > { %3458 = vmatpush.msrb.mxu0 %v12175_v15  ;;  %17511 = vst [vmem:[#allocation79_spill] sm:$0xff] %v14111_v60  ;;  %v14113_v55 = vpop.permute.xlu0 %4365 }
 0x36d   : > { %17512 = vst [vmem:[#allocation80_spill] sm:$0xff] %v14113_v55  ;;  %v1743_v35 = vpack.c.bf16 %v1711_v5, %v1711_v5  ;;  %v1798_v48 = vpop.f32.mrf.mxu2  ;;  %v12189_v5 = vunpack.i.l.bf16 %v13940_v30 }
 0x36e   : > { %3459 = vmatpush.msrb.mxu0 %v12180_v49  ;;  %11368 = vmatmul.msk.f32.gmra.mxu2 %vm1215_vm2, %v1798_v48  ;;  %v12084_v49 = vunpack.i.l.bf16 %v13704_v52  ;;  %v12080_v48 = vunpack.i.h.bf16 %v13588_v51 }
 0x36f   : > { %1776 = vst.msk [vmem:[#allocation2 + $0x7c] sm:$0xf] %vm1744_vm3, %v1743_v35 }
 0x370   : > { %5630 = vrot.lane.b32.xlu2 %v13258_v25, %s12753_s26 }
 0x371   : > { %5606 = vrot.lane.b32.xlu1 %v13238_v27, %s12753_s26  ;;  %12277 = vrot.lane.b32.xlu0 %v17471_v42, %s12751_s25 }
 0x372   : > { %v1820_v20 = vpop.f32.mrf.mxu3 }
 0x373   : > { %v14125_v16 = vpop.permute.xlu2 %4509  ;;  %11414 = vmatmul.msk.bf16.vlgmr.msra.gmra.mxu1 %vm789_vm1, %v13923_v36  ;;  %v14129_v15 = vpop.permute.xlu1 %4221  ;;  %11369 = vmatmul.msk.f32.vlgmr.msra.gmra.mxu3 %vm1215_vm2, %v1820_v20  ;;  %v12085_v36 = vunpack.i.h.bf16 %v13704_v52  ;;  %v12185_v20 = vunpack.i.h.bf16 %v13919_v41  ;;  %v12190_v52 = vunpack.i.h.bf16 %v13940_v30 }
 0x374   : > { %v14131_v44 = vpop.permute.xlu0 %4363  ;;  %3633 = vmatpush.msra.mxu1 %v12184_v28  ;;  %2522 = vmatpush.msra.mxu3 %v12079_v24 }
 0x375   : > { %17513 = vst [vmem:[#allocation81_spill] sm:$0xff] %v14131_v44  ;;  %v1892_v35 = vpop.f32.mrf.mxu2  ;;  %v17528_v44 = vld [vmem:[#allocation65_spill] sm:$0xff] }
 0x376   : > { %3634 = vmatpush.msra.mxu1 %v12189_v5  ;;  %2523 = vmatpush.msra.mxu3 %v12084_v49  ;;  %v14156_v5 = vpop.f32.mrf.mxu1  ;;  %v3082_v43 = vsel %vm789_vm1, %v17528_v44, 0 }
 0x377   : > { %11375 = vmatmul.msk.f32.vlgmr.msrb.gmra.mxu2 %vm1215_vm2, %v1892_v35  ;;  %17516 = vst [vmem:[#allocation84_spill] sm:$0xff] %v14156_v5 }
 0x378   : > { %2633 = vmatpush.msrb.mxu2 %v12080_v48  ;;  %5628 = vrot.lane.b32.xlu2 %v13258_v25, %s12752_s19 }
 0x379   : > { %5532 = vrot.lane.b32.xlu1 %v13187_v17, %s12752_s19  ;;  %5534 = vrot.lane.b32.xlu0 %v13187_v17, %s12753_s26 }
 0x37a   : > { %2634 = vmatpush.msrb.mxu2 %v12085_v36  ;;  %v1822_v24 = vpop.f32.mrf.mxu3 }
 0x37b   : > { %11413 = vmatmul.msk.bf16.vlgmr.msra.gmra.mxu0 %vm789_vm1, %v13817_v50  ;;  %v14148_v51 = vpop.permute.xlu2 %12222  ;;  %v14151_v28 = vpop.permute.xlu1 %4219  ;;  %11370 = vmatmul.msk.f32.gmra.mxu3 %vm1215_vm2, %v1822_v24  ;;  %v17517_v50 = vld [vmem:[#allocation60_spill] sm:$0xff] }
 0x37c   : > { %17514 = vst [vmem:[#allocation82_spill] sm:$0xff] %v14148_v51  ;;  %3598 = vmatpush.msra.mxu0 %v12185_v20  ;;  %v14153_v49 = vpop.permute.xlu0 %4461  ;;  %v12089_v30 = vunpack.i.l.bf16 %v17517_v50  ;;  %v12090_v24 = vunpack.i.h.bf16 %v17517_v50  ;;  %v17523_v50 = vld [vmem:[#allocation19_spill] sm:$0xff] }
 0x37d   : > { %17515 = vst [vmem:[#allocation83_spill] sm:$0xff] %v14153_v49  ;;  %v1894_v41 = vpop.f32.mrf.mxu2 }
 0x37e   : > { %3599 = vmatpush.msra.mxu0 %v12190_v52 }
 0x37f   : > { %11376 = vmatmul.msk.f32.gmra.mxu2 %vm1215_vm2, %v1894_v41  ;;  %v17520_v41 = vld [vmem:[#allocation63_spill] sm:$0xff] }
 0x380   : > { %5484 = vrot.lane.b32.xlu2 %v13152_v7, %s12752_s19  ;;  %v2986_v5 = vsel %vm789_vm1, %v17520_v41, 0 }
 0x381   : > { %5366 = vrot.lane.b32.xlu1 %v13074_v14, %s12753_s26  ;;  %12287 = vrot.lane.b32.xlu0 %v17479_v38, %s12751_s25 }
 0x382   : > { %v1916_v48 = vpop.f32.mrf.mxu3 }
 0x383   : > { %v14166_v35 = vpop.permute.xlu2 %12237  ;;  %v14168_v36 = vpop.permute.xlu1 %4293  ;;  %11377 = vmatmul.msk.f32.vlgmr.msrb.gmra.mxu3 %vm1215_vm2, %v1916_v48 }
 0x384   : > { %17518 = vst [vmem:[#allocation60_spill] sm:$0xff] %v14166_v35  ;;  %v14170_v20 = vpop.permute.xlu0 %4459  ;;  %2670 = vmatpush.msrb.mxu3 %v12089_v30  ;;  %v14179_v35 = vpop.f32.mrf.mxu1 }
 0x385   : > { %17519 = vst [vmem:[#allocation85_spill] sm:$0xff] %v14170_v20  ;;  %v1988_v52 = vpop.f32.mrf.mxu2 }
 0x386   : > { %2671 = vmatpush.msrb.mxu3 %v12090_v24  ;;  %17522 = vst [vmem:[#allocation86_spill] sm:$0xff] %v14179_v35 }
 0x387   : > { %11383 = vmatmul.msk.f32.vlgmr.msra.gmra.mxu2 %vm1215_vm2, %v1988_v52 }
 0x388   : > { %v14176_v60 = vpop.f32.mrf.mxu0  ;;  %2995 = vmatpush.bf16.xpose.msra.mxu2 %v2986_v5  ;;  %5558 = vrot.lane.b32.xlu2 %v13206_v62, %s12753_s26 }
 0x389   : > { %17521 = vst [vmem:[#allocation63_spill] sm:$0xff] %v14176_v60  ;;  %5364 = vrot.lane.b32.xlu1 %v13074_v14, %s12752_s19  ;;  %5390 = vrot.lane.b32.xlu0 %v17523_v50, %s12753_s26 }
 0x38a   : > { %v1918_v48 = vpop.f32.mrf.mxu3 }
 0x38b   : > { %v14187_v30 = vpop.permute.xlu2 %12247  ;;  %v14189_v24 = vpop.permute.xlu1 %4413  ;;  %11378 = vmatmul.msk.f32.gmra.mxu3 %vm1215_vm2, %v1918_v48  ;;  %v17527_v48 = vld [vmem:[#allocation67_spill] sm:$0xff] }
 0x38c   : > { %v14191_v41 = vpop.permute.xlu0 %4317  ;;  %v3010_v51 = vsel %vm789_vm1, %v17527_v48, 0 }
 0x38d   : > { %v1990_v52 = vpop.f32.mrf.mxu2 }
 0x38f   : > { %11384 = vmatmul.msk.f32.gmra.mxu2 %vm1215_vm2, %v1990_v52 }
 0x390   : > { %v14194_v5 = vpop.f32.mrf.mxu0  ;;  %v14197_v35 = vpop.f32.mrf.mxu1  ;;  %5678 = vrot.lane.b32.xlu2 %v13300_v1, %s12753_s26 }
 0x391   : > { %17524 = vst [vmem:[#allocation19_spill] sm:$0xff] %v14194_v5  ;;  %5462 = vrot.lane.b32.xlu1 %v13136_v45, %s12753_s26  ;;  %5388 = vrot.lane.b32.xlu0 %v17523_v50, %s12752_s19 }
 0x392   : > { %17525 = vst [vmem:[#allocation87_spill] sm:$0xff] %v14197_v35  ;;  %v2012_v20 = vpop.f32.mrf.mxu3 }
 0x393   : > { %v14205_v60 = vpop.permute.xlu2 %5316  ;;  %v14209_v5 = vpop.permute.xlu1 %4387  ;;  %11385 = vmatmul.msk.f32.vlgmr.msra.gmra.mxu3 %vm1215_vm2, %v2012_v20 }
 0x394   : > { %17526 = vst [vmem:[#allocation88_spill] sm:$0xff] %v14205_v60  ;;  %v14211_v52 = vpop.permute.xlu0 %4291  ;;  %3019 = vmatpush.bf16.xpose.msra.mxu3 %v3010_v51 }
 0x395   : > { %v2084_v35 = vpop.f32.mrf.mxu2 }
 0x397   : > { %11391 = vmatmul.msk.f32.vlgmr.msrb.gmra.mxu2 %vm1215_vm2, %v2084_v35 }
 0x398   : > { %v14216_v49 = vpop.f32.mrf.mxu0  ;;  %v14219_v60 = vpop.f32.mrf.mxu1  ;;  %3091 = vmatpush.bf16.xpose.msrb.mxu2 %v3082_v43  ;;  %5652 = vrot.lane.b32.xlu2 %v13278_v13, %s12752_s19 }
 0x399   : > { %17529 = vst [vmem:[#allocation67_spill] sm:$0xff] %v14216_v49  ;;  %5582 = vrot.lane.b32.xlu1 %v13220_v39, %s12753_s26  ;;  %5486 = vrot.lane.b32.xlu0 %v13152_v7, %s12753_s26 }
 0x39a   : > { %17530 = vst [vmem:[#allocation65_spill] sm:$0xff] %v14219_v60  ;;  %v2014_v20 = vpop.f32.mrf.mxu3 }
 0x39b   : > { %v14227_v51 = vpop.permute.xlu2 %12262  ;;  %v14229_v44 = vpop.permute.xlu1 %12217  ;;  %11386 = vmatmul.msk.f32.gmra.mxu3 %vm1215_vm2, %v2014_v20  ;;  %v17535_v20 = vld [vmem:[#allocation53_spill] sm:$0xff] }
 0x39c   : > { %17531 = vst [vmem:[#allocation89_spill] sm:$0xff] %v14229_v44  ;;  %v14231_v48 = vpop.permute.xlu0 %4411  ;;  %v3106_v8 = vsel %vm789_vm1, %v17535_v20, 0 }
 0x39d   : > { %v2086_v35 = vpop.f32.mrf.mxu2 }
 0x39f   : > { %11392 = vmatmul.msk.f32.gmra.mxu2 %vm1215_vm2, %v2086_v35 }
 0x3a0   : > { %v14234_v43 = vpop.f32.mrf.mxu0  ;;  %v14237_v60 = vpop.f32.mrf.mxu1  ;;  %12302 = vrot.lane.b32.xlu2 %v13368_v53, %s12752_s19 }
 0x3a1   : > { %17532 = vst [vmem:[#allocation90_spill] sm:$0xff] %v14234_v43  ;;  %5556 = vrot.lane.b32.xlu1 %v13206_v62, %s12752_s19  ;;  %5460 = vrot.lane.b32.xlu0 %v13136_v45, %s12752_s19 }
 0x3a2   : > { %17533 = vst [vmem:[#allocation91_spill] sm:$0xff] %v14237_v60  ;;  %v2108_v44 = vpop.f32.mrf.mxu3  ;;  %v17536_v60 = vld [vmem:[#allocation22_spill] sm:$0xff] }
 0x3a3   : > { %v14245_v49 = vpop.permute.xlu2 %5412  ;;  %v14249_v43 = vpop.permute.xlu1 %4507  ;;  %11393 = vmatmul.msk.f32.vlgmr.msrb.gmra.mxu3 %vm1215_vm2, %v2108_v44  ;;  %v3178_v55 = vsel %vm789_vm1, %v17536_v60, 0 }
 0x3a4   : > { %17534 = vst [vmem:[#allocation92_spill] sm:$0xff] %v14245_v49  ;;  %v14251_v35 = vpop.permute.xlu0 %4485  ;;  %3115 = vmatpush.bf16.xpose.msrb.mxu3 %v3106_v8 }
 0x3a7   : > { %11399 = vmatmul.msk.bf16.vlgmr.msra.gmra.mxu2 %vm789_vm1, %v17538_v58 }
 0x3a8   : > { %v14256_v11 = vpop.f32.mrf.mxu0  ;;  %v14260_v49 = vpop.f32.mrf.mxu1  ;;  %3187 = vmatpush.bf16.xpose.msra.mxu2 %v3178_v55  ;;  %12317 = vrot.lane.b32.xlu2 %v13380_v2, %s12752_s19  ;;  %v17547_v2 = vld [vmem:[#allocation46_spill] sm:$0xff] }
 0x3a9   : > { %17537 = vst [vmem:[#allocation53_spill] sm:$0xff] %v14256_v11  ;;  %5676 = vrot.lane.b32.xlu1 %v13300_v1, %s12752_s19  ;;  %5580 = vrot.lane.b32.xlu0 %v13220_v39, %s12752_s19  ;;  %v17545_v11 = vld [vmem:[#allocation45_spill] sm:$0xff] }
 0x3aa   : > { %17539 = vst [vmem:[#allocation22_spill] sm:$0xff] %v14260_v49  ;;  %v2110_v60 = vpop.f32.mrf.mxu3 }
 0x3ab   : > { %v14268_v8 = vpop.permute.xlu2 %12272  ;;  %v14270_v44 = vpop.permute.xlu1 %12232  ;;  %11394 = vmatmul.msk.f32.gmra.mxu3 %vm1215_vm2, %v2110_v60 }
 0x3ac   : > { %17540 = vst [vmem:[#allocation66_spill] sm:$0xff] %v14268_v8  ;;  %v14272_v20 = vpop.permute.xlu0 %12212 }
 0x3ad   : > { %17541 = vst [vmem:[#allocation93_spill] sm:$0xff] %v14270_v44  ;;  %v3202_v44 = vsel %vm789_vm1, %v17547_v2, 0 }
 0x3ae   : > { %17542 = vst [vmem:[#allocation94_spill] sm:$0xff] %v14272_v20 }
 0x3b0   : > { %v14275_v58 = vpop.f32.mrf.mxu0  ;;  %v14277_v55 = vpop.f32.mrf.mxu1  ;;  %12332 = vrot.lane.b32.xlu2 %v13410_v9, %s12752_s19 }
 0x3b1   : > { %17543 = vst [vmem:[#allocation95_spill] sm:$0xff] %v14275_v58  ;;  %12297 = vrot.lane.b32.xlu1 %v17545_v11, %s12752_s19  ;;  %5654 = vrot.lane.b32.xlu0 %v13278_v13, %s12753_s26  ;;  %v17550_v58 = vld [vmem:[#allocation61_spill] sm:$0xff] }
 0x3b2   : > { %17544 = vst [vmem:[#allocation96_spill] sm:$0xff] %v14277_v55  ;;  %v17551_v55 = vld [vmem:[#allocation14_spill] sm:$0xff] }
 0x3b3   : > { %v14285_v49 = vpop.permute.xlu2 %5508  ;;  %v14289_v20 = vpop.permute.xlu1 %5318  ;;  %11400 = vmatmul.msk.bf16.vlgmr.msra.gmra.mxu3 %vm789_vm1, %v17550_v58  ;;  %v3274_v9 = vsel %vm789_vm1, %v17551_v55, 0 }
 0x3b4   : > { %17546 = vst [vmem:[#allocation45_spill] sm:$0xff] %v14285_v49  ;;  %v14291_v60 = vpop.permute.xlu0 %12227  ;;  %3211 = vmatpush.bf16.xpose.msra.mxu3 %v3202_v44 }
 0x3b5   : > { %17548 = vst [vmem:[#allocation46_spill] sm:$0xff] %v14289_v20 }
 0x3b6   : > { %17549 = vst [vmem:[#allocation97_spill] sm:$0xff] %v14291_v60  ;;  %v17562_v60 = vld [vmem:[#allocation62_spill] sm:$0xff] }
 0x3b7   : > { %11403 = vmatmul.msk.bf16.vlgmr.msrb.gmra.mxu2 %vm789_vm1, %v17553_v33 }
 0x3b8   : > { %v14297_v8 = vpop.f32.mrf.mxu0  ;;  %v14301_v49 = vpop.f32.mrf.mxu1  ;;  %3283 = vmatpush.bf16.xpose.msrb.mxu2 %v3274_v9  ;;  %6485 = vrot.lane.b32.xlu2 %v13038_v31, %s12754_s27  ;;  %v12194_v9 = vunpack.i.l.bf16 %v13962_v0 }
 0x3b9   : > { %17552 = vst [vmem:[#allocation61_spill] sm:$0xff] %v14297_v8  ;;  %12312 = vrot.lane.b32.xlu1 %v13414_v12, %s12752_s19  ;;  %12292 = vrot.lane.b32.xlu0 %v13418_v18, %s12752_s19 }
 0x3ba   : > { %17554 = vst [vmem:[#allocation14_spill] sm:$0xff] %v14301_v49  ;;  %v12199_v49 = vunpack.i.l.bf16 %v13978_v32 }
 0x3bb   : > { %v14309_v2 = vpop.permute.xlu2 %12282  ;;  %v14311_v44 = vpop.permute.xlu1 %12257 }
 0x3bc   : > { %17555 = vst [vmem:[#allocation52_spill] sm:$0xff] %v14309_v2  ;;  %v14313_v58 = vpop.permute.xlu0 %12242 }
 0x3bd   : > { %17556 = vst [vmem:[#allocation98_spill] sm:$0xff] %v14311_v44 }
 0x3be   : > { %17557 = vst [vmem:[#allocation99_spill] sm:$0xff] %v14313_v58 }
 0x3c0   : > { %v14315_v33 = vpop.f32.mrf.mxu0  ;;  %v3069_v55 = vpop.f32.mrf.mxu1  ;;  %6511 = vrot.lane.b32.xlu2 %v17472_v6, %s12755_s20 }
 0x3c1   : > { %17558 = vst [vmem:[#allocation100_spill] sm:$0xff] %v14315_v33  ;;  %11421 = vmatmul.msk.f32.vlgmr.msrb.gmra.mxu1 %vm1215_vm2, %v3069_v55  ;;  %12327 = vrot.lane.b32.xlu1 %v17495_v22, %s12752_s19  ;;  %v17560_v33 = vld [vmem:[#allocation48_spill] sm:$0xff]  ;;  %v17563_v55 = vld [vmem:[#allocation59_spill] sm:$0xff] }
 0x3c2   : > { %3773 = vmatpush.msrb.mxu1 %v12194_v9  ;;  %12307 = vrot.lane.b32.xlu0 %v13430_v26, %s12752_s19  ;;  %v3298_v20 = vsel %vm789_vm1, %v17560_v33, 0  ;;  %v12134_v22 = vunpack.i.l.bf16 %v17563_v55  ;;  %v12195_v9 = vunpack.i.h.bf16 %v13962_v0  ;;  %v12135_v33 = vunpack.i.h.bf16 %v17563_v55  ;;  %v17569_v55 = vld [vmem:[#allocation56_spill] sm:$0xff] }
 0x3c3   : > { %v14326_v8 = vpop.permute.xlu2 %5604  ;;  %v14330_v44 = vpop.permute.xlu1 %5414  ;;  %11404 = vmatmul.msk.bf16.vlgmr.msrb.gmra.mxu3 %vm789_vm1, %v17562_v60  ;;  %v12209_v60 = vunpack.i.l.bf16 %v14014_v57 }
 0x3c4   : > { %17559 = vst [vmem:[#allocation101_spill] sm:$0xff] %v14326_v8  ;;  %v14332_v58 = vpop.permute.xlu0 %12252  ;;  %3774 = vmatpush.msrb.mxu1 %v12199_v49  ;;  %3307 = vmatpush.bf16.xpose.msrb.mxu3 %v3298_v20  ;;  %v12200_v49 = vunpack.i.h.bf16 %v13978_v32  ;;  %v12204_v32 = vunpack.i.l.bf16 %v13998_v56 }
 0x3c5   : > { %17561 = vst [vmem:[#allocation48_spill] sm:$0xff] %v14330_v44  ;;  %v17573_v44 = vld [vmem:[#allocation41_spill] sm:$0xff] }
 0x3c7   : > { %11407 = vmatmul.msk.bf16.vlgmr.msra.gmra.mxu2 %vm789_vm1, %v17564_v29 }
 0x3c8   : > { %v3045_v2 = vpop.f32.mrf.mxu0  ;;  %v3071_v8 = vpop.f32.mrf.mxu1  ;;  %3388 = vmatpush.msra.mxu2 %v12134_v22  ;;  %6581 = vrot.lane.b32.xlu2 %v17467_v63, %s12754_s27 }
 0x3c9   : > { %11419 = vmatmul.msk.f32.vlgmr.msrb.gmra.mxu0 %vm1215_vm2, %v3045_v2  ;;  %11422 = vmatmul.msk.f32.gmra.mxu1 %vm1215_vm2, %v3071_v8 }
 0x3ca   : > { %3738 = vmatpush.msrb.mxu0 %v12195_v9  ;;  %12337 = vrot.lane.b32.xlu1 %v17502_v54, %s12752_s19  ;;  %v12139_v9 = vunpack.i.l.bf16 %v17569_v55 }
 0x3cb   : > { %v14348_v0 = vpop.permute.xlu2 %5630  ;;  %12322 = vrot.lane.b32.xlu0 %v17463_v21, %s12752_s19  ;;  %3389 = vmatpush.msra.mxu2 %v12135_v33  ;;  %v14352_v22 = vpop.permute.xlu1 %5340 }
 0x3cc   : > { %17565 = vst [vmem:[#allocation62_spill] sm:$0xff] %v14348_v0  ;;  %v14354_v29 = vpop.permute.xlu0 %5342  ;;  %3739 = vmatpush.msrb.mxu0 %v12200_v49  ;;  %v12205_v0 = vunpack.i.h.bf16 %v13998_v56 }
 0x3cd   : > { %17566 = vst [vmem:[#allocation59_spill] sm:$0xff] %v14352_v22 }
 0x3ce   : > { %17567 = vst [vmem:[#allocation54_spill] sm:$0xff] %v14354_v29 }
 0x3d0   : > { %v3047_v8 = vpop.f32.mrf.mxu0  ;;  %v3165_v20 = vpop.f32.mrf.mxu1  ;;  %6607 = vrot.lane.b32.xlu2 %v13120_v19, %s12755_s20 }
 0x3d1   : > { %11420 = vmatmul.msk.f32.gmra.mxu0 %vm1215_vm2, %v3047_v8  ;;  %11429 = vmatmul.msk.f32.vlgmr.msra.gmra.mxu1 %vm1215_vm2, %v3165_v20  ;;  %v17571_v8 = vld [vmem:[#allocation64_spill] sm:$0xff] }
 0x3d2   : > { %3913 = vmatpush.msra.mxu1 %v12204_v32  ;;  %12347 = vrot.lane.b32.xlu1 %v13444_v47, %s12752_s19  ;;  %v17572_v32 = vld [vmem:[#allocation57_spill] sm:$0xff] }
 0x3d3   : > { %v14362_v2 = vpop.permute.xlu2 %5628  ;;  %6487 = vrot.lane.b32.xlu0 %v13038_v31, %s12755_s20  ;;  %v14369_v33 = vpop.permute.xlu1 %5510  ;;  %11408 = vmatmul.msk.bf16.vlgmr.msra.gmra.mxu3 %vm789_vm1, %v17571_v8  ;;  %v12144_v20 = vunpack.i.l.bf16 %v17572_v32 }
 0x3d4   : > { %17568 = vst [vmem:[#allocation102_spill] sm:$0xff] %v14362_v2  ;;  %v14371_v49 = vpop.permute.xlu0 %12267  ;;  %3914 = vmatpush.msra.mxu1 %v12209_v60  ;;  %3423 = vmatpush.msra.mxu3 %v12139_v9  ;;  %v12140_v2 = vunpack.i.h.bf16 %v17569_v55  ;;  %v12210_v60 = vunpack.i.h.bf16 %v14014_v57  ;;  %v4227_v57 = vsel %vm789_vm1, %v14129_v15, 0  ;;  %v17576_v55 = vld [vmem:[#allocation58_spill] sm:$0xff]  ;;  %v17578_v15 = vld [vmem:[#allocation51_spill] sm:$0xff] }
 0x3d5   : > { %17570 = vst [vmem:[#allocation56_spill] sm:$0xff] %v14369_v33  ;;  %v12145_v33 = vunpack.i.h.bf16 %v17572_v32  ;;  %v12149_v9 = vunpack.i.l.bf16 %v17576_v55  ;;  %v17579_v32 = vld [vmem:[#allocation55_spill] sm:$0xff] }
 0x3d6   : > { %3424 = vmatpush.msra.mxu3 %v12144_v20  ;;  %v12154_v20 = vunpack.i.l.bf16 %v17579_v32 }
 0x3d7   : > { %11411 = vmatmul.msk.bf16.vlgmr.msrb.gmra.mxu2 %vm789_vm1, %v17573_v44 }
 0x3d8   : > { %v3141_v22 = vpop.f32.mrf.mxu0  ;;  %v3167_v29 = vpop.f32.mrf.mxu1  ;;  %3528 = vmatpush.msrb.mxu2 %v12140_v2  ;;  %6677 = vrot.lane.b32.xlu2 %v13169_v40, %s12754_s27 }
 0x3d9   : > { %11427 = vmatmul.msk.f32.vlgmr.msra.gmra.mxu0 %vm1215_vm2, %v3141_v22  ;;  %11430 = vmatmul.msk.f32.gmra.mxu1 %vm1215_vm2, %v3167_v29 }
 0x3da   : > { %3878 = vmatpush.msra.mxu0 %v12205_v0  ;;  %3529 = vmatpush.msrb.mxu2 %v12145_v33 }
 0x3db   : > { %v14386_v56 = vpop.permute.xlu2 %5484  ;;  %6509 = vrot.lane.b32.xlu1 %v17472_v6, %s12754_s27  ;;  %12342 = vrot.lane.b32.xlu0 %v13486_v10, %s12752_s19  ;;  %v14392_v44 = vpop.permute.xlu1 %5436 }
 0x3dc   : > { %17574 = vst [vmem:[#allocation64_spill] sm:$0xff] %v14392_v44  ;;  %v14394_v22 = vpop.permute.xlu0 %5438  ;;  %3879 = vmatpush.msra.mxu0 %v12210_v60 }
 0x3dd   : > { %17575 = vst [vmem:[#allocation57_spill] sm:$0xff] %v14394_v22 }
 0x3e0   : > { %v3143_v0 = vpop.f32.mrf.mxu0  ;;  %v3261_v29 = vpop.f32.mrf.mxu1  ;;  %6703 = vrot.lane.b32.xlu2 %v13187_v17, %s12755_s20 }
 0x3e1   : > { %11428 = vmatmul.msk.f32.gmra.mxu0 %vm1215_vm2, %v3143_v0  ;;  %11437 = vmatmul.msk.f32.vlgmr.msrb.gmra.mxu1 %vm1215_vm2, %v3261_v29  ;;  %v4203_v0 = vsel %vm789_vm1, %v14036_v23, 0 }
 0x3e2   : > { %4236 = vmatpush.bf16.xpose.msrb.mxu1 %v4227_v57 }
 0x3e3   : > { %v14402_v2 = vpop.permute.xlu2 %5558  ;;  %12357 = vrot.lane.b32.xlu1 %v17471_v42, %s12752_s19  ;;  %6583 = vrot.lane.b32.xlu0 %v17467_v63, %s12755_s20  ;;  %v14409_v33 = vpop.permute.xlu1 %5606 }
 0x3e4   : > { %17577 = vst [vmem:[#allocation41_spill] sm:$0xff] %v14409_v33  ;;  %v14411_v8 = vpop.permute.xlu0 %12277  ;;  %11412 = vmatmul.msk.bf16.vlgmr.msrb.gmra.mxu3 %vm789_vm1, %v17578_v15 }
 0x3e5   : > { %3563 = vmatpush.msrb.mxu3 %v12149_v9 }
 0x3e7   : > { %3564 = vmatpush.msrb.mxu3 %v12154_v20 }
 0x3e8   : > { %v3237_v60 = vpop.f32.mrf.mxu0  ;;  %v3263_v29 = vpop.f32.mrf.mxu1  ;;  %6535 = vrot.lane.b32.xlu2 %v13074_v14, %s12755_s20 }
 0x3e9   : > { %11435 = vmatmul.msk.f32.vlgmr.msrb.gmra.mxu0 %vm1215_vm2, %v3237_v60  ;;  %11438 = vmatmul.msk.f32.gmra.mxu1 %vm1215_vm2, %v3263_v29  ;;  %v14420_v57 = vpop.f32.mrf.mxu2 }
 0x3ea   : > { %4212 = vmatpush.bf16.xpose.msrb.mxu0 %v4203_v0  ;;  %17580 = vst [vmem:[#allocation58_spill] sm:$0xff] %v14420_v57  ;;  %v4323_v0 = vsel %vm789_vm1, %v14191_v41, 0 }
 0x3eb   : > { %v14424_v15 = vpop.permute.xlu2 %5678  ;;  %6605 = vrot.lane.b32.xlu1 %v13120_v19, %s12754_s27  ;;  %12352 = vrot.lane.b32.xlu0 %v13527_v4, %s12752_s19  ;;  %v14430_v23 = vpop.permute.xlu1 %5532 }
 0x3ec   : > { %17581 = vst [vmem:[#allocation51_spill] sm:$0xff] %v14430_v23  ;;  %v14432_v9 = vpop.permute.xlu0 %5534 }
 0x3ed   : > { %17582 = vst [vmem:[#allocation55_spill] sm:$0xff] %v14432_v9 }
 0x3f0   : > { %v3239_v20 = vpop.f32.mrf.mxu0  ;;  %v3357_v60 = vpop.f32.mrf.mxu1  ;;  %6557 = vrot.lane.b32.xlu2 %v17523_v50, %s12754_s27 }
 0x3f1   : > { %11436 = vmatmul.msk.f32.gmra.mxu0 %vm1215_vm2, %v3239_v20  ;;  %11445 = vmatmul.msk.f32.vlgmr.msra.gmra.mxu1 %vm1215_vm2, %v3357_v60  ;;  %v14438_v29 = vpop.f32.mrf.mxu2 }
 0x3f2   : > { %17583 = vst [vmem:[#allocation103_spill] sm:$0xff] %v14438_v29  ;;  %4332 = vmatpush.bf16.xpose.msra.mxu1 %v4323_v0  ;;  %v4299_v0 = vsel %vm789_vm1, %v14168_v36, 0 }
 0x3f3   : > { %v14442_v57 = vpop.permute.xlu2 %5652  ;;  %12367 = vrot.lane.b32.xlu1 %v17479_v38, %s12752_s19  ;;  %6679 = vrot.lane.b32.xlu0 %v13169_v40, %s12755_s20  ;;  %v14448_v20 = vpop.permute.xlu1 %5366 }
 0x3f4   : > { %17584 = vst [vmem:[#allocation104_spill] sm:$0xff] %v14442_v57  ;;  %v14450_v23 = vpop.permute.xlu0 %12287  ;;  %v17607_v57 = vld [vmem:[#allocation28_spill] sm:$0xff] }
 0x3f6   : > { %v14452_v41 = vpop.f32.mrf.mxu3 }
 0x3f7   : > { %17585 = vst [vmem:[#allocation105_spill] sm:$0xff] %v14452_v41 }
 0x3f8   : > { %v3333_v60 = vpop.f32.mrf.mxu0  ;;  %v3359_v29 = vpop.f32.mrf.mxu1  ;;  %6655 = vrot.lane.b32.xlu2 %v13152_v7, %s12755_s20 }
 0x3f9   : > { %11443 = vmatmul.msk.f32.vlgmr.msra.gmra.mxu0 %vm1215_vm2, %v3333_v60  ;;  %11446 = vmatmul.msk.f32.gmra.mxu1 %vm1215_vm2, %v3359_v29 }
 0x3fa   : > { %4308 = vmatpush.bf16.xpose.msra.mxu0 %v4299_v0  ;;  %v14462_v33 = vpop.f32.mrf.mxu2  ;;  %v4419_v0 = vsel %vm789_vm1, %v14189_v24, 0 }
 0x3fb   : > { %v14460_v44 = vpop.permute.xlu2 %12302  ;;  %17587 = vst [vmem:[#allocation107_spill] sm:$0xff] %v14462_v33  ;;  %6559 = vrot.lane.b32.xlu1 %v17523_v50, %s12755_s20  ;;  %12362 = vrot.lane.b32.xlu0 %v13567_v3, %s12752_s19  ;;  %v14468_v36 = vpop.permute.xlu1 %5364  ;;  %s11972_s19 = sshll.u32 %s12832_s13, 8  ;;  %s11140_s13 = scalar_lea.sflag [#allocation5], %s12897_s14 }
 0x3fc   : > { %17586 = vst [vmem:[#allocation106_spill] sm:$0xff] %v14460_v44  ;;  %v14470_v41 = vpop.permute.xlu0 %5390 }
 0x3fe   : > { %v14472_v60 = vpop.f32.mrf.mxu3 }
 0x3ff   : > { %17588 = vst [vmem:[#allocation108_spill] sm:$0xff] %v14472_v60 }
 0x400   : > { %v3335_v29 = vpop.f32.mrf.mxu0  ;;  %6653 = vrot.lane.b32.xlu2 %v13152_v7, %s12754_s27 }
 0x401   : > { %11444 = vmatmul.msk.f32.gmra.mxu0 %vm1215_vm2, %v3335_v29  ;;  %11450 = vmatmul.msk.bf16.vlgmr.msrb.gmra.mxu1 %vm789_vm1, %v14151_v28  ;;  %v4395_v28 = vsel %vm789_vm1, %v14086_v37, 0 }
 0x402   : > { %4428 = vmatpush.bf16.xpose.msrb.mxu1 %v4419_v0  ;;  %v14483_v44 = vpop.f32.mrf.mxu2 }
 0x403   : > { %v14481_v33 = vpop.permute.xlu2 %12317  ;;  %17590 = vst [vmem:[#allocation110_spill] sm:$0xff] %v14483_v44  ;;  %6773 = vrot.lane.b32.xlu1 %v13238_v27, %s12754_s27  ;;  %6775 = vrot.lane.b32.xlu0 %v13238_v27, %s12755_s20  ;;  %v14489_v29 = vpop.permute.xlu1 %5462 }
 0x404   : > { %17589 = vst [vmem:[#allocation109_spill] sm:$0xff] %v14481_v33  ;;  %v14491_v24 = vpop.permute.xlu0 %5388 }
 0x406   : > { %v14493_v60 = vpop.f32.mrf.mxu3 }
 0x407   : > { %17591 = vst [vmem:[#allocation111_spill] sm:$0xff] %v14493_v60 }
 0x408   : > { %6727 = vrot.lane.b32.xlu2 %v13206_v62, %s12755_s20 }
 0x409   : > { %11449 = vmatmul.msk.bf16.vlgmr.msrb.gmra.mxu0 %vm789_vm1, %v14050_v61  ;;  %v4515_v61 = vsel %vm789_vm1, %v14125_v16, 0 }
 0x40a   : > { %4404 = vmatpush.bf16.xpose.msrb.mxu0 %v4395_v28  ;;  %v14503_v33 = vpop.f32.mrf.mxu2 }
 0x40b   : > { %v14501_v0 = vpop.permute.xlu2 %12332  ;;  %17592 = vst [vmem:[#allocation112_spill] sm:$0xff] %v14503_v33  ;;  %6799 = vrot.lane.b32.xlu1 %v13258_v25, %s12755_s20  ;;  %6701 = vrot.lane.b32.xlu0 %v13187_v17, %s12754_s27  ;;  %v14509_v60 = vpop.permute.xlu1 %5582 }
 0x40c   : > { %v14511_v37 = vpop.permute.xlu0 %5486 }
 0x40e   : > { %v14513_v44 = vpop.f32.mrf.mxu3 }
 0x40f   : > { %17593 = vst [vmem:[#allocation113_spill] sm:$0xff] %v14513_v44 }
 0x410   : > { %6847 = vrot.lane.b32.xlu2 %v13300_v1, %s12755_s20 }
 0x411   : > { %11454 = vmatmul.msk.bf16.vlgmr.msra.gmra.mxu1 %vm789_vm1, %v14072_v34  ;;  %v4491_v34 = vsel %vm789_vm1, %v14251_v35, 0 }
 0x412   : > { %4524 = vmatpush.bf16.xpose.msra.mxu1 %v4515_v61  ;;  %v14523_v33 = vpop.f32.mrf.mxu2 }
 0x413   : > { %v14521_v28 = vpop.permute.xlu2 %6485  ;;  %17595 = vst [vmem:[#allocation115_spill] sm:$0xff] %v14523_v33  ;;  %6797 = vrot.lane.b32.xlu1 %v13258_v25, %s12754_s27  ;;  %6533 = vrot.lane.b32.xlu0 %v13074_v14, %s12754_s27  ;;  %v14529_v44 = vpop.permute.xlu1 %5556 }
 0x414   : > { %17594 = vst [vmem:[#allocation114_spill] sm:$0xff] %v14521_v28  ;;  %v14531_v16 = vpop.permute.xlu0 %5460 }
 0x415   : > { %17596 = vst [vmem:[#allocation116_spill] sm:$0xff] %v14529_v44  ;;  %v12255_v44 = vunpack.i.h.bf16 %v14332_v58 }
 0x416   : > { %v14533_v9 = vpop.f32.mrf.mxu3 }
 0x417   : > { %17597 = vst [vmem:[#allocation117_spill] sm:$0xff] %v14533_v9 }
 0x418   : > { %6821 = vrot.lane.b32.xlu2 %v13278_v13, %s12754_s27 }
 0x419   : > { %11453 = vmatmul.msk.bf16.vlgmr.msra.gmra.mxu0 %vm789_vm1, %v14211_v52  ;;  %v12249_v52 = vunpack.i.l.bf16 %v14187_v30 }
 0x41a   : > { %4500 = vmatpush.bf16.xpose.msra.mxu0 %v4491_v34  ;;  %v14543_v28 = vpop.f32.mrf.mxu2  ;;  %v12254_v34 = vunpack.i.l.bf16 %v14332_v58  ;;  %v12155_v58 = vunpack.i.h.bf16 %v17579_v32 }
 0x41b   : > { %v14541_v61 = vpop.permute.xlu2 %6511  ;;  %17599 = vst [vmem:[#allocation119_spill] sm:$0xff] %v14543_v28  ;;  %6751 = vrot.lane.b32.xlu1 %v13220_v39, %s12755_s20  ;;  %6631 = vrot.lane.b32.xlu0 %v13136_v45, %s12755_s20  ;;  %v14549_v9 = vpop.permute.xlu1 %5676 }
 0x41c   : > { %17598 = vst [vmem:[#allocation118_spill] sm:$0xff] %v14541_v61  ;;  %v14551_v35 = vpop.permute.xlu0 %5580 }
 0x41d   : > { %17600 = vst [vmem:[#allocation120_spill] sm:$0xff] %v14549_v9 }
 0x41e   : > { %v14553_v33 = vpop.f32.mrf.mxu3 }
 0x41f   : > { %17601 = vst [vmem:[#allocation121_spill] sm:$0xff] %v14553_v33 }
 0x420   : > { %12382 = vrot.lane.b32.xlu2 %v13368_v53, %s12754_s27 }
 0x421   : > { %11458 = vmatmul.msk.bf16.vlgmr.msrb.gmra.mxu1 %vm789_vm1, %v14231_v48 }
 0x422   : > { %4662 = vmatpush.msrb.mxu1 %v12249_v52  ;;  %v14561_v61 = vpop.f32.mrf.mxu2  ;;  %v12250_v52 = vunpack.i.h.bf16 %v14187_v30 }
 0x423   : > { %17602 = vst [vmem:[#allocation122_spill] sm:$0xff] %v14561_v61  ;;  %6725 = vrot.lane.b32.xlu1 %v13206_v62, %s12754_s27  ;;  %6629 = vrot.lane.b32.xlu0 %v13136_v45, %s12754_s27  ;;  %v14567_v33 = vpop.permute.xlu1 %12297  ;;  %v14571_v48 = vpop.permute.xlu2 %6581  ;;  %v17606_v61 = vld [vmem:[#allocation18_spill] sm:$0xff] }
 0x424   : > { %17603 = vst [vmem:[#allocation123_spill] sm:$0xff] %v14567_v33  ;;  %v14569_v28 = vpop.permute.xlu0 %5654  ;;  %4663 = vmatpush.msrb.mxu1 %v12254_v34  ;;  %v12396_v9 = vpack.i.bf16 %v17607_v57, %v17606_v61  ;;  %v12150_v34 = vunpack.i.h.bf16 %v17576_v55  ;;  %v12264_v55 = vunpack.i.l.bf16 %v14227_v51  ;;  %v17612_v61 = vld [vmem:[#allocation33_spill] sm:$0xff] }
 0x425   : > { %17604 = vst [vmem:[#allocation124_spill] sm:$0xff] %v14571_v48 }
 0x426   : > { %v14573_v22 = vpop.f32.mrf.mxu3 }
 0x427   : > { %17605 = vst [vmem:[#allocation125_spill] sm:$0xff] %v14573_v22  ;;  %v17619_v22 = vld [vmem:[#allocation25_spill] sm:$0xff] }
 0x428   : > { %12397 = vrot.lane.b32.xlu2 %v12396_v9, %s12754_s27 }
 0x429   : > { %11457 = vmatmul.msk.bf16.vlgmr.msrb.gmra.mxu0 %vm789_vm1, %v14209_v5 }
 0x42a   : > { %4627 = vmatpush.msrb.mxu0 %v12250_v52  ;;  %v2997_v33 = vpop.f32.mrf.mxu2  ;;  %v17613_v52 = vld [vmem:[#allocation15_spill] sm:$0xff] }
 0x42b   : > { %6845 = vrot.lane.b32.xlu1 %v13300_v1, %s12754_s27  ;;  %6749 = vrot.lane.b32.xlu0 %v13220_v39, %s12754_s27  ;;  %v14587_v30 = vpop.permute.xlu1 %12312  ;;  %v14591_v57 = vpop.permute.xlu2 %6607  ;;  %v12411_v48 = vpack.i.bf16 %v17613_v52, %v17612_v61  ;;  %v17617_v52 = vld [vmem:[#allocation69_spill] sm:$0xff] }
 0x42c   : > { %17608 = vst [vmem:[#allocation18_spill] sm:$0xff] %v14587_v30  ;;  %v14589_v5 = vpop.permute.xlu0 %12292  ;;  %4628 = vmatpush.msrb.mxu0 %v12255_v44  ;;  %11415 = vmatmul.msk.f32.vlgmr.msra.gmra.mxu2 %vm1215_vm2, %v2997_v33  ;;  %v12269_v44 = vunpack.i.l.bf16 %v14371_v49  ;;  %v17633_v30 = vld [vmem:[#allocation16_spill] sm:$0xff] }
 0x42d   : > { %17609 = vst [vmem:[#allocation28_spill] sm:$0xff] %v14589_v5  ;;  %3668 = vmatpush.msra.mxu2 %v12150_v34 }
 0x42e   : > { %17610 = vst [vmem:[#allocation126_spill] sm:$0xff] %v14591_v57  ;;  %v14595_v9 = vpop.f32.mrf.mxu3  ;;  %v12164_v57 = vunpack.i.l.bf16 %v17617_v52 }
 0x42f   : > { %17611 = vst [vmem:[#allocation127_spill] sm:$0xff] %v14595_v9  ;;  %3669 = vmatpush.msra.mxu2 %v12155_v58  ;;  %v12270_v9 = vunpack.i.h.bf16 %v14371_v49  ;;  %v12165_v49 = vunpack.i.h.bf16 %v17617_v52 }
 0x430   : > { %12412 = vrot.lane.b32.xlu2 %v12411_v48, %s12754_s27  ;;  %v12265_v48 = vunpack.i.h.bf16 %v14227_v51 }
 0x431   : > { %11462 = vmatmul.msk.bf16.vlgmr.msra.gmra.mxu1 %vm789_vm1, %v14249_v43  ;;  %v17616_v43 = vld [vmem:[#allocation43_spill] sm:$0xff] }
 0x432   : > { %4802 = vmatpush.msra.mxu1 %v12264_v55  ;;  %v2999_v33 = vpop.f32.mrf.mxu2  ;;  %v12159_v55 = vunpack.i.l.bf16 %v17616_v43  ;;  %v12160_v51 = vunpack.i.h.bf16 %v17616_v43 }
 0x433   : > { %12377 = vrot.lane.b32.xlu1 %v17545_v11, %s12754_s27  ;;  %6823 = vrot.lane.b32.xlu0 %v13278_v13, %s12755_s20  ;;  %v14608_v32 = vpop.permute.xlu1 %12327  ;;  %v14610_v34 = vpop.permute.xlu2 %6677 }
 0x434   : > { %4803 = vmatpush.msra.mxu1 %v12269_v44  ;;  %17614 = vst [vmem:[#allocation33_spill] sm:$0xff] %v14610_v34  ;;  %v14612_v58 = vpop.permute.xlu0 %12307  ;;  %11416 = vmatmul.msk.f32.gmra.mxu2 %vm1215_vm2, %v2999_v33  ;;  %v17618_v44 = vld [vmem:[#allocation24_spill] sm:$0xff] }
 0x435   : > { %17615 = vst [vmem:[#allocation15_spill] sm:$0xff] %v14612_v58  ;;  %v12421_v34 = vpack.i.bf16 %v17619_v22, %v17618_v44  ;;  %v17634_v58 = vld [vmem:[#allocation71_spill] sm:$0xff] }
 0x436   : > { %v3021_v61 = vpop.f32.mrf.mxu3 }
 0x437   : > { %11417 = vmatmul.msk.f32.vlgmr.msra.gmra.mxu3 %vm1215_vm2, %v3021_v61  ;;  %v17624_v61 = vld [vmem:[#allocation17_spill] sm:$0xff] }
 0x438   : > { %3703 = vmatpush.msra.mxu3 %v12159_v55  ;;  %12422 = vrot.lane.b32.xlu2 %v12421_v34, %s12754_s27 }
 0x439   : > { %11461 = vmatmul.msk.bf16.vlgmr.msra.gmra.mxu0 %vm789_vm1, %v14108_v46 }
 0x43a   : > { %4767 = vmatpush.msra.mxu0 %v12265_v48  ;;  %3704 = vmatpush.msra.mxu3 %v12164_v57  ;;  %v3093_v33 = vpop.f32.mrf.mxu2  ;;  %v17625_v48 = vld [vmem:[#allocation27_spill] sm:$0xff] }
 0x43b   : > { %12392 = vrot.lane.b32.xlu1 %v13414_v12, %s12754_s27  ;;  %12372 = vrot.lane.b32.xlu0 %v13418_v18, %s12754_s27  ;;  %v14630_v46 = vpop.permute.xlu2 %6703 }
 0x43c   : > { %4768 = vmatpush.msra.mxu0 %v12270_v9  ;;  %17620 = vst [vmem:[#allocation43_spill] sm:$0xff] %v14630_v46  ;;  %v14632_v55 = vpop.permute.xlu1 %12337  ;;  %11423 = vmatmul.msk.f32.vlgmr.msrb.gmra.mxu2 %vm1215_vm2, %v3093_v33  ;;  %v12406_v9 = vpack.i.bf16 %v17625_v48, %v17624_v61  ;;  %v12169_v61 = vunpack.i.l.bf16 %v13876_v59  ;;  %v17635_v59 = vld [vmem:[#allocation49_spill] sm:$0xff] }
 0x43d   : > { %17621 = vst [vmem:[#allocation69_spill] sm:$0xff] %v14632_v55  ;;  %v14636_v34 = vpop.permute.xlu0 %12322  ;;  %3808 = vmatpush.msrb.mxu2 %v12160_v51  ;;  %v17631_v55 = vld [vmem:[#allocation36_spill] sm:$0xff] }
 0x43e   : > { %17622 = vst [vmem:[#allocation24_spill] sm:$0xff] %v14636_v34  ;;  %v14638_v57 = vpop.f32.mrf.mxu1  ;;  %v3023_v43 = vpop.f32.mrf.mxu3 }
 0x43f   : > { %17623 = vst [vmem:[#allocation25_spill] sm:$0xff] %v14638_v57  ;;  %3809 = vmatpush.msrb.mxu2 %v12165_v49  ;;  %11418 = vmatmul.msk.f32.gmra.mxu3 %vm1215_vm2, %v3023_v43  ;;  %v17632_v57 = vld [vmem:[#allocation34_spill] sm:$0xff] }
 0x440   : > { %7680 = vrot.lane.b32.xlu2 %v17472_v6, %s12756_s23 }
 0x442   : > { %v3095_v46 = vpop.f32.mrf.mxu2 }
 0x443   : > { %12407 = vrot.lane.b32.xlu1 %v12406_v9, %s12754_s27  ;;  %12387 = vrot.lane.b32.xlu0 %v13430_v26, %s12754_s27  ;;  %v14648_v52 = vpop.permute.xlu2 %6535  ;;  %v17630_v9 = vld [vmem:[#allocation26_spill] sm:$0xff] }
 0x444   : > { %17626 = vst [vmem:[#allocation17_spill] sm:$0xff] %v14648_v52  ;;  %11424 = vmatmul.msk.f32.gmra.mxu2 %vm1215_vm2, %v3095_v46  ;;  %v14651_v33 = vpop.permute.xlu1 %12347  ;;  %v12416_v34 = vpack.i.bf16 %v17631_v55, %v17630_v9  ;;  %v12401_v46 = vpack.i.bf16 %v17633_v30, %v17632_v57  ;;  %v12174_v52 = vunpack.i.l.bf16 %v17634_v58 }
 0x445   : > { %v14653_v51 = vpop.permute.xlu0 %6487 }
 0x446   : > { %17627 = vst [vmem:[#allocation27_spill] sm:$0xff] %v14653_v51  ;;  %v14655_v49 = vpop.f32.mrf.mxu0  ;;  %v14657_v43 = vpop.f32.mrf.mxu1 }
 0x447   : > { %17628 = vst [vmem:[#allocation128_spill] sm:$0xff] %v14655_v49  ;;  %v3117_v48 = vpop.f32.mrf.mxu3  ;;  %v17647_v49 = vld [vmem:[#allocation23_spill] sm:$0xff] }
 0x448   : > { %17629 = vst [vmem:[#allocation129_spill] sm:$0xff] %v14657_v43  ;;  %11425 = vmatmul.msk.f32.vlgmr.msrb.gmra.mxu3 %vm1215_vm2, %v3117_v48  ;;  %12437 = vrot.lane.b32.xlu2 %v17471_v42, %s12754_s27  ;;  %v4155_v48 = vsel %vm789_vm1, %v17635_v59, 0  ;;  %v17646_v43 = vld [vmem:[#allocation35_spill] sm:$0xff] }
 0x449   : > { %3843 = vmatpush.msrb.mxu3 %v12169_v61 }
 0x44a   : > { %v3189_v51 = vpop.f32.mrf.mxu2 }
 0x44b   : > { %12417 = vrot.lane.b32.xlu1 %v12416_v34, %s12754_s27  ;;  %12402 = vrot.lane.b32.xlu0 %v12401_v46, %s12754_s27  ;;  %v14672_v61 = vpop.permute.xlu2 %6557 }
 0x44c   : > { %3844 = vmatpush.msrb.mxu3 %v12174_v52  ;;  %17636 = vst [vmem:[#allocation26_spill] sm:$0xff] %v14672_v61  ;;  %11431 = vmatmul.msk.f32.vlgmr.msra.gmra.mxu2 %vm1215_vm2, %v3189_v51 }
 0x44d   : > { %v14675_v55 = vpop.permute.xlu1 %6509  ;;  %v14677_v30 = vpop.permute.xlu0 %12342  ;;  %4164 = vmatpush.bf16.xpose.msra.mxu2 %v4155_v48 }
 0x44e   : > { %17637 = vst [vmem:[#allocation36_spill] sm:$0xff] %v14675_v55  ;;  %v14679_v58 = vpop.f32.mrf.mxu0  ;;  %v14681_v57 = vpop.f32.mrf.mxu1 }
 0x44f   : > { %17638 = vst [vmem:[#allocation34_spill] sm:$0xff] %v14679_v58  ;;  %v3119_v34 = vpop.f32.mrf.mxu3 }
 0x450   : > { %17639 = vst [vmem:[#allocation16_spill] sm:$0xff] %v14681_v57  ;;  %11426 = vmatmul.msk.f32.gmra.mxu3 %vm1215_vm2, %v3119_v34  ;;  %7776 = vrot.lane.b32.xlu2 %v13120_v19, %s12756_s23  ;;  %v17645_v57 = vld [vmem:[#allocation72_spill] sm:$0xff] }
 0x451   : > { %v4179_v61 = vsel %vm789_vm1, %v17645_v57, 0 }
 0x452   : > { %v3191_v52 = vpop.f32.mrf.mxu2 }
 0x453   : > { %7654 = vrot.lane.b32.xlu1 %v13038_v31, %s12757_s28  ;;  %7656 = vrot.lane.b32.xlu0 %v13038_v31, %s12756_s23  ;;  %v14690_v51 = vpop.permute.xlu2 %6655 }
 0x454   : > { %17640 = vst [vmem:[#allocation71_spill] sm:$0xff] %v14690_v51  ;;  %11432 = vmatmul.msk.f32.gmra.mxu2 %vm1215_vm2, %v3191_v52  ;;  %v12426_v51 = vpack.i.bf16 %v17647_v49, %v17646_v43 }
 0x455   : > { %v14693_v46 = vpop.permute.xlu1 %12357  ;;  %v14695_v59 = vpop.permute.xlu0 %6583 }
 0x456   : > { %17641 = vst [vmem:[#allocation49_spill] sm:$0xff] %v14693_v46  ;;  %v14697_v48 = vpop.f32.mrf.mxu0  ;;  %v14699_v34 = vpop.f32.mrf.mxu1  ;;  %v12279_v46 = vunpack.i.l.bf16 %v14411_v8 }
 0x457   : > { %17642 = vst [vmem:[#allocation130_spill] sm:$0xff] %v14695_v59  ;;  %v3213_v55 = vpop.f32.mrf.mxu3  ;;  %v17648_v59 = vld [vmem:[#allocation70_spill] sm:$0xff] }
 0x458   : > { %17643 = vst [vmem:[#allocation131_spill] sm:$0xff] %v14697_v48  ;;  %11433 = vmatmul.msk.f32.vlgmr.msra.gmra.mxu3 %vm1215_vm2, %v3213_v55  ;;  %12447 = vrot.lane.b32.xlu2 %v17479_v38, %s12754_s27 }
 0x459   : > { %17644 = vst [vmem:[#allocation132_spill] sm:$0xff] %v14699_v34  ;;  %4188 = vmatpush.bf16.xpose.msra.mxu3 %v4179_v61  ;;  %v4251_v34 = vsel %vm789_vm1, %v17648_v59, 0 }
 0x45a   : > { %v3285_v52 = vpop.f32.mrf.mxu2 }
 0x45b   : > { %12432 = vrot.lane.b32.xlu1 %v13527_v4, %s12754_s27  ;;  %12427 = vrot.lane.b32.xlu0 %v12426_v51, %s12754_s27  ;;  %v14713_v48 = vpop.permute.xlu2 %6653 }
 0x45c   : > { %17649 = vst [vmem:[#allocation72_spill] sm:$0xff] %v14713_v48  ;;  %11439 = vmatmul.msk.f32.vlgmr.msrb.gmra.mxu2 %vm1215_vm2, %v3285_v52 }
 0x45d   : > { %v14716_v61 = vpop.permute.xlu1 %6605  ;;  %v14718_v55 = vpop.permute.xlu0 %12352  ;;  %4260 = vmatpush.bf16.xpose.msrb.mxu2 %v4251_v34 }
 0x45e   : > { %17650 = vst [vmem:[#allocation35_spill] sm:$0xff] %v14716_v61  ;;  %v14720_v43 = vpop.f32.mrf.mxu0  ;;  %v14722_v57 = vpop.f32.mrf.mxu1 }
 0x45f   : > { %17651 = vst [vmem:[#allocation23_spill] sm:$0xff] %v14720_v43  ;;  %v3215_v58 = vpop.f32.mrf.mxu3  ;;  %v17658_v43 = vld [vmem:[#allocation76_spill] sm:$0xff] }
 0x460   : > { %17652 = vst [vmem:[#allocation70_spill] sm:$0xff] %v14722_v57  ;;  %11434 = vmatmul.msk.f32.gmra.mxu3 %vm1215_vm2, %v3215_v58  ;;  %7728 = vrot.lane.b32.xlu2 %v17523_v50, %s12756_s23  ;;  %v4275_v57 = vsel %vm789_vm1, %v17658_v43, 0 }
 0x462   : > { %v3287_v51 = vpop.f32.mrf.mxu2 }
 0x463   : > { %7750 = vrot.lane.b32.xlu1 %v17467_v63, %s12757_s28  ;;  %7752 = vrot.lane.b32.xlu0 %v17467_v63, %s12756_s23  ;;  %v14731_v59 = vpop.permute.xlu2 %6727 }
 0x464   : > { %17653 = vst [vmem:[#allocation133_spill] sm:$0xff] %v14731_v59  ;;  %11440 = vmatmul.msk.f32.gmra.mxu2 %vm1215_vm2, %v3287_v51  ;;  %v17659_v51 = vld [vmem:[#allocation73_spill] sm:$0xff] }
 0x465   : > { %v14734_v34 = vpop.permute.xlu1 %12367  ;;  %v14736_v52 = vpop.permute.xlu0 %6679 }
 0x466   : > { %17654 = vst [vmem:[#allocation134_spill] sm:$0xff] %v14734_v34  ;;  %v14738_v61 = vpop.f32.mrf.mxu0  ;;  %v14740_v58 = vpop.f32.mrf.mxu1 }
 0x467   : > { %17655 = vst [vmem:[#allocation135_spill] sm:$0xff] %v14736_v52  ;;  %v3309_v48 = vpop.f32.mrf.mxu3 }
 0x468   : > { %17656 = vst [vmem:[#allocation136_spill] sm:$0xff] %v14738_v61  ;;  %11441 = vmatmul.msk.f32.vlgmr.msrb.gmra.mxu3 %vm1215_vm2, %v3309_v48  ;;  %7704 = vrot.lane.b32.xlu2 %v13074_v14, %s12756_s23  ;;  %v4347_v61 = vsel %vm789_vm1, %v17659_v51, 0 }
 0x469   : > { %17657 = vst [vmem:[#allocation137_spill] sm:$0xff] %v14740_v58  ;;  %4284 = vmatpush.bf16.xpose.msrb.mxu3 %v4275_v57  ;;  %v17661_v58 = vld [vmem:[#allocation68_spill] sm:$0xff] }
 0x46b   : > { %12442 = vrot.lane.b32.xlu1 %v13567_v3, %s12754_s27  ;;  %7678 = vrot.lane.b32.xlu0 %v17472_v6, %s12757_s28  ;;  %v14753_v52 = vpop.permute.xlu2 %6847 }
 0x46c   : > { %17660 = vst [vmem:[#allocation76_spill] sm:$0xff] %v14753_v52  ;;  %11447 = vmatmul.msk.bf16.vlgmr.msra.gmra.mxu2 %vm789_vm1, %v17661_v58 }
 0x46d   : > { %v14757_v43 = vpop.permute.xlu1 %6559  ;;  %v14759_v48 = vpop.permute.xlu0 %12362  ;;  %4356 = vmatpush.bf16.xpose.msra.mxu2 %v4347_v61 }
 0x46e   : > { %17662 = vst [vmem:[#allocation73_spill] sm:$0xff] %v14757_v43  ;;  %v14761_v57 = vpop.f32.mrf.mxu0  ;;  %v14763_v59 = vpop.f32.mrf.mxu1  ;;  %v17672_v43 = vld [vmem:[#allocation74_spill] sm:$0xff] }
 0x46f   : > { %17663 = vst [vmem:[#allocation68_spill] sm:$0xff] %v14759_v48  ;;  %v3311_v34 = vpop.f32.mrf.mxu3 }
 0x470   : > { %17664 = vst [vmem:[#allocation138_spill] sm:$0xff] %v14761_v57  ;;  %11442 = vmatmul.msk.f32.gmra.mxu3 %vm1215_vm2, %v3311_v34  ;;  %7942 = vrot.lane.b32.xlu2 %v13238_v27, %s12757_s28  ;;  %v17671_v34 = vld [vmem:[#allocation80_spill] sm:$0xff] }
 0x471   : > { %17665 = vst [vmem:[#allocation139_spill] sm:$0xff] %v14763_v59  ;;  %v4371_v52 = vsel %vm789_vm1, %v17671_v34, 0 }
 0x473   : > { %7846 = vrot.lane.b32.xlu1 %v13169_v40, %s12757_s28  ;;  %7848 = vrot.lane.b32.xlu0 %v13169_v40, %s12756_s23  ;;  %v14772_v58 = vpop.permute.xlu2 %6821 }
 0x474   : > { %17666 = vst [vmem:[#allocation140_spill] sm:$0xff] %v14772_v58 }
 0x475   : > { %v14774_v51 = vpop.permute.xlu1 %6773  ;;  %v14776_v61 = vpop.permute.xlu0 %6775 }
 0x476   : > { %17667 = vst [vmem:[#allocation141_spill] sm:$0xff] %v14774_v51  ;;  %v14778_v57 = vpop.f32.mrf.mxu0  ;;  %v14780_v59 = vpop.f32.mrf.mxu1  ;;  %v17673_v51 = vld [vmem:[#allocation77_spill] sm:$0xff] }
 0x477   : > { %17668 = vst [vmem:[#allocation142_spill] sm:$0xff] %v14776_v61  ;;  %v4443_v61 = vsel %vm789_vm1, %v17673_v51, 0 }
 0x478   : > { %17669 = vst [vmem:[#allocation143_spill] sm:$0xff] %v14778_v57  ;;  %11448 = vmatmul.msk.bf16.vlgmr.msra.gmra.mxu3 %vm789_vm1, %v17672_v43  ;;  %7968 = vrot.lane.b32.xlu2 %v13258_v25, %s12756_s23  ;;  %v17675_v57 = vld [vmem:[#allocation44_spill] sm:$0xff]  ;;  %v17678_v43 = vld [vmem:[#allocation66_spill] sm:$0xff] }
 0x479   : > { %17670 = vst [vmem:[#allocation144_spill] sm:$0xff] %v14780_v59  ;;  %4380 = vmatpush.bf16.xpose.msra.mxu3 %v4371_v52  ;;  %v12274_v58 = vunpack.i.l.bf16 %v17678_v43 }
 0x47b   : > { %7944 = vrot.lane.b32.xlu1 %v13238_v27, %s12756_s23  ;;  %7774 = vrot.lane.b32.xlu0 %v13120_v19, %s12757_s28  ;;  %v14794_v59 = vpop.permute.xlu2 %12382 }
 0x47c   : > { %17674 = vst [vmem:[#allocation80_spill] sm:$0xff] %v14794_v59  ;;  %11451 = vmatmul.msk.bf16.vlgmr.msrb.gmra.mxu2 %vm789_vm1, %v17675_v57 }
 0x47d   : > { %v14798_v34 = vpop.permute.xlu1 %6799  ;;  %v14800_v52 = vpop.permute.xlu0 %6701  ;;  %4452 = vmatpush.bf16.xpose.msrb.mxu2 %v4443_v61 }
 0x47e   : > { %17676 = vst [vmem:[#allocation74_spill] sm:$0xff] %v14798_v34  ;;  %v14803_v5 = vpop.f32.mrf.mxu0  ;;  %v4238_v48 = vpop.f32.mrf.mxu1  ;;  %v12280_v34 = vunpack.i.h.bf16 %v14411_v8  ;;  %v17687_v8 = vld [vmem:[#allocation75_spill] sm:$0xff] }
 0x47f   : > { %17677 = vst [vmem:[#allocation77_spill] sm:$0xff] %v14800_v52  ;;  %11469 = vmatmul.msk.f32.vlgmr.msrb.gmra.mxu1 %vm1215_vm2, %v4238_v48  ;;  %v12275_v48 = vunpack.i.h.bf16 %v17678_v43  ;;  %v17685_v43 = vld [vmem:[#allocation94_spill] sm:$0xff] }
 0x480   : > { %17679 = vst [vmem:[#allocation44_spill] sm:$0xff] %v14803_v5  ;;  %4942 = vmatpush.msrb.mxu1 %v12274_v58  ;;  %7966 = vrot.lane.b32.xlu2 %v13258_v25, %s12757_s28  ;;  %v17684_v5 = vld [vmem:[#allocation78_spill] sm:$0xff] }
 0x482   : > { %4943 = vmatpush.msrb.mxu1 %v12279_v46  ;;  %v17683_v46 = vld [vmem:[#allocation83_spill] sm:$0xff] }
 0x483   : > { %7870 = vrot.lane.b32.xlu1 %v13187_v17, %s12757_s28  ;;  %7872 = vrot.lane.b32.xlu0 %v13187_v17, %s12756_s23  ;;  %v14813_v57 = vpop.permute.xlu2 %12397  ;;  %v4467_v52 = vsel %vm789_vm1, %v17683_v46, 0  ;;  %v17689_v46 = vld [vmem:[#allocation52_spill] sm:$0xff] }
 0x484   : > { %17680 = vst [vmem:[#allocation66_spill] sm:$0xff] %v14813_v57  ;;  %v12284_v57 = vunpack.i.l.bf16 %v17689_v46 }
 0x485   : > { %v14815_v51 = vpop.permute.xlu1 %6797  ;;  %v14817_v61 = vpop.permute.xlu0 %6533 }
 0x486   : > { %17681 = vst [vmem:[#allocation145_spill] sm:$0xff] %v14815_v51  ;;  %v4214_v59 = vpop.f32.mrf.mxu0  ;;  %v4240_v58 = vpop.f32.mrf.mxu1  ;;  %v12214_v51 = vunpack.i.l.bf16 %v17685_v43 }
 0x487   : > { %17682 = vst [vmem:[#allocation146_spill] sm:$0xff] %v14817_v61  ;;  %11467 = vmatmul.msk.f32.vlgmr.msrb.gmra.mxu0 %vm1215_vm2, %v4214_v59  ;;  %11470 = vmatmul.msk.f32.gmra.mxu1 %vm1215_vm2, %v4240_v58  ;;  %v12290_v61 = vunpack.i.h.bf16 %v14450_v23 }
 0x488   : > { %4907 = vmatpush.msrb.mxu0 %v12275_v48  ;;  %11452 = vmatmul.msk.bf16.vlgmr.msrb.gmra.mxu3 %vm789_vm1, %v17684_v5  ;;  %v12215_v5 = vunpack.i.h.bf16 %v17685_v43 }
 0x489   : > { %4476 = vmatpush.bf16.xpose.msrb.mxu3 %v4467_v52  ;;  %7896 = vrot.lane.b32.xlu2 %v13206_v62, %s12756_s23 }
 0x48a   : > { %4908 = vmatpush.msrb.mxu0 %v12280_v34 }
 0x48b   : > { %7824 = vrot.lane.b32.xlu1 %v13152_v7, %s12756_s23  ;;  %7726 = vrot.lane.b32.xlu0 %v17523_v50, %s12757_s28  ;;  %v14834_v59 = vpop.permute.xlu2 %12412 }
 0x48c   : > { %17686 = vst [vmem:[#allocation83_spill] sm:$0xff] %v14834_v59  ;;  %11455 = vmatmul.msk.bf16.vlgmr.msra.gmra.mxu2 %vm789_vm1, %v17687_v8  ;;  %v12289_v59 = vunpack.i.l.bf16 %v14450_v23 }
 0x48d   : > { %v14839_v52 = vpop.permute.xlu1 %6751  ;;  %v14841_v34 = vpop.permute.xlu0 %6631  ;;  %4557 = vmatpush.msra.mxu2 %v12214_v51 }
 0x48e   : > { %17688 = vst [vmem:[#allocation78_spill] sm:$0xff] %v14839_v52  ;;  %v4216_v48 = vpop.f32.mrf.mxu0  ;;  %v4334_v58 = vpop.f32.mrf.mxu1  ;;  %v17693_v52 = vld [vmem:[#allocation81_spill] sm:$0xff] }
 0x48f   : > { %4558 = vmatpush.msra.mxu2 %v12215_v5  ;;  %11468 = vmatmul.msk.f32.gmra.mxu0 %vm1215_vm2, %v4216_v48  ;;  %v12285_v5 = vunpack.i.h.bf16 %v17689_v46 }
 0x490   : > { %11477 = vmatmul.msk.f32.vlgmr.msra.gmra.mxu1 %vm1215_vm2, %v4334_v58  ;;  %v17692_v58 = vld [vmem:[#allocation89_spill] sm:$0xff] }
 0x491   : > { %5082 = vmatpush.msra.mxu1 %v12284_v57  ;;  %8016 = vrot.lane.b32.xlu2 %v13300_v1, %s12756_s23  ;;  %v12220_v46 = vunpack.i.h.bf16 %v17692_v58 }
 0x493   : > { %5083 = vmatpush.msra.mxu1 %v12289_v59  ;;  %7822 = vrot.lane.b32.xlu1 %v13152_v7, %s12757_s28  ;;  %v14853_v51 = vpop.permute.xlu2 %12422  ;;  %v12219_v59 = vunpack.i.l.bf16 %v17692_v58  ;;  %v5396_v58 = vsel %vm789_vm1, %v14470_v41, 0 }
 0x494   : > { %7702 = vrot.lane.b32.xlu0 %v13074_v14, %s12757_s28  ;;  %17690 = vst [vmem:[#allocation94_spill] sm:$0xff] %v14853_v51  ;;  %v17694_v51 = vld [vmem:[#allocation82_spill] sm:$0xff] }
 0x495   : > { %v14855_v43 = vpop.permute.xlu1 %6725  ;;  %v14857_v8 = vpop.permute.xlu0 %6629 }
 0x496   : > { %17691 = vst [vmem:[#allocation75_spill] sm:$0xff] %v14855_v43  ;;  %v4310_v48 = vpop.f32.mrf.mxu0  ;;  %v4336_v57 = vpop.f32.mrf.mxu1  ;;  %v12224_v43 = vunpack.i.l.bf16 %v17694_v51 }
 0x497   : > { %11475 = vmatmul.msk.f32.vlgmr.msra.gmra.mxu0 %vm1215_vm2, %v4310_v48  ;;  %v17696_v48 = vld [vmem:[#allocation79_spill] sm:$0xff] }
 0x498   : > { %11478 = vmatmul.msk.f32.gmra.mxu1 %vm1215_vm2, %v4336_v57  ;;  %5047 = vmatpush.msra.mxu0 %v12285_v5 }
 0x499   : > { %11456 = vmatmul.msk.bf16.vlgmr.msra.gmra.mxu3 %vm789_vm1, %v17693_v52  ;;  %7990 = vrot.lane.b32.xlu2 %v13278_v13, %s12757_s28 }
 0x49a   : > { %4592 = vmatpush.msra.mxu3 %v12219_v59  ;;  %5048 = vmatpush.msra.mxu0 %v12290_v61  ;;  %v12225_v61 = vunpack.i.h.bf16 %v17694_v51 }
 0x49b   : > { %7920 = vrot.lane.b32.xlu1 %v13220_v39, %s12756_s23  ;;  %v14874_v23 = vpop.permute.xlu2 %7680 }
 0x49c   : > { %7800 = vrot.lane.b32.xlu0 %v13136_v45, %s12756_s23  ;;  %4593 = vmatpush.msra.mxu3 %v12224_v43  ;;  %17695 = vst [vmem:[#allocation52_spill] sm:$0xff] %v14874_v23 }
 0x49d   : > { %v14876_v5 = vpop.permute.xlu1 %6845  ;;  %v14878_v52 = vpop.permute.xlu0 %6749  ;;  %11459 = vmatmul.msk.bf16.vlgmr.msrb.gmra.mxu2 %vm789_vm1, %v17696_v48 }
 0x49e   : > { %4697 = vmatpush.msrb.mxu2 %v12220_v46  ;;  %v4312_v57 = vpop.f32.mrf.mxu0  ;;  %v4430_v59 = vpop.f32.mrf.mxu1 }
 0x49f   : > { %11476 = vmatmul.msk.f32.gmra.mxu0 %vm1215_vm2, %v4312_v57 }
 0x4a0   : > { %4698 = vmatpush.msrb.mxu2 %v12225_v61  ;;  %11485 = vmatmul.msk.f32.vlgmr.msrb.gmra.mxu1 %vm1215_vm2, %v4430_v59  ;;  %v5372_v61 = vsel %vm789_vm1, %v14448_v20, 0  ;;  %v17700_v59 = vld [vmem:[#allocation85_spill] sm:$0xff] }
 0x4a1   : > { %5405 = vmatpush.bf16.xpose.msrb.mxu1 %v5396_v58  ;;  %12462 = vrot.lane.b32.xlu2 %v13368_v53, %s12757_s28  ;;  %v17699_v53 = vld [vmem:[#allocation97_spill] sm:$0xff] }
 0x4a2   : > { %v12229_v57 = vunpack.i.l.bf16 %v17699_v53  ;;  %v17701_v58 = vld [vmem:[#allocation93_spill] sm:$0xff] }
 0x4a3   : > { %7894 = vrot.lane.b32.xlu1 %v13206_v62, %s12757_s28  ;;  %v14893_v51 = vpop.permute.xlu2 %12437  ;;  %v12234_v23 = vunpack.i.l.bf16 %v17701_v58 }
 0x4a4   : > { %7798 = vrot.lane.b32.xlu0 %v13136_v45, %s12757_s28  ;;  %17697 = vst [vmem:[#allocation89_spill] sm:$0xff] %v14893_v51  ;;  %v5492_v51 = vsel %vm789_vm1, %v14511_v37, 0 }
 0x4a5   : > { %v14895_v43 = vpop.permute.xlu1 %12377  ;;  %v14897_v46 = vpop.permute.xlu0 %6823 }
 0x4a6   : > { %17698 = vst [vmem:[#allocation81_spill] sm:$0xff] %v14895_v43  ;;  %v4406_v41 = vpop.f32.mrf.mxu0  ;;  %v4432_v48 = vpop.f32.mrf.mxu1  ;;  %v17702_v43 = vld [vmem:[#allocation50_spill] sm:$0xff] }
 0x4a7   : > { %11483 = vmatmul.msk.f32.vlgmr.msrb.gmra.mxu0 %vm1215_vm2, %v4406_v41 }
 0x4a8   : > { %11486 = vmatmul.msk.f32.gmra.mxu1 %vm1215_vm2, %v4432_v48  ;;  %5381 = vmatpush.bf16.xpose.msrb.mxu0 %v5372_v61 }
 0x4a9   : > { %11460 = vmatmul.msk.bf16.vlgmr.msrb.gmra.mxu3 %vm789_vm1, %v17700_v59  ;;  %12477 = vrot.lane.b32.xlu2 %v17702_v43, %s12757_s28 }
 0x4aa   : > { %4732 = vmatpush.msrb.mxu3 %v12229_v57 }
 0x4ab   : > { %8014 = vrot.lane.b32.xlu1 %v13300_v1, %s12757_s28  ;;  %v14913_v20 = vpop.permute.xlu2 %7776 }
 0x4ac   : > { %7918 = vrot.lane.b32.xlu0 %v13220_v39, %s12757_s28  ;;  %4733 = vmatpush.msrb.mxu3 %v12234_v23  ;;  %17703 = vst [vmem:[#allocation82_spill] sm:$0xff] %v14913_v20 }
 0x4ad   : > { %v14915_v41 = vpop.permute.xlu1 %12392  ;;  %v14917_v48 = vpop.permute.xlu0 %12372 }
 0x4ae   : > { %17704 = vst [vmem:[#allocation79_spill] sm:$0xff] %v14915_v41  ;;  %v4408_v61 = vpop.f32.mrf.mxu0  ;;  %v4526_v59 = vpop.f32.mrf.mxu1 }
 0x4af   : > { %17705 = vst [vmem:[#allocation97_spill] sm:$0xff] %v14917_v48  ;;  %11484 = vmatmul.msk.f32.gmra.mxu0 %vm1215_vm2, %v4408_v61  ;;  %v14920_v57 = vpop.f32.mrf.mxu2 }
 0x4b0   : > { %11493 = vmatmul.msk.f32.vlgmr.msra.gmra.mxu1 %vm1215_vm2, %v4526_v59 }
 0x4b1   : > { %5501 = vmatpush.bf16.xpose.msra.mxu1 %v5492_v51  ;;  %12492 = vrot.lane.b32.xlu2 %v17463_v21, %s12757_s28  ;;  %v5468_v51 = vsel %vm789_vm1, %v14489_v29, 0 }
 0x4b3   : > { %12457 = vrot.lane.b32.xlu1 %v17545_v11, %s12757_s28  ;;  %v14931_v23 = vpop.permute.xlu2 %12447 }
 0x4b4   : > { %7992 = vrot.lane.b32.xlu0 %v13278_v13, %s12756_s23  ;;  %17706 = vst [vmem:[#allocation85_spill] sm:$0xff] %v14931_v23 }
 0x4b5   : > { %v14933_v61 = vpop.permute.xlu1 %12407  ;;  %v14935_v20 = vpop.permute.xlu0 %12387 }
 0x4b6   : > { %17707 = vst [vmem:[#allocation93_spill] sm:$0xff] %v14933_v61  ;;  %v4502_v41 = vpop.f32.mrf.mxu0  ;;  %v4528_v37 = vpop.f32.mrf.mxu1 }
 0x4b7   : > { %17708 = vst [vmem:[#allocation50_spill] sm:$0xff] %v14935_v20  ;;  %11491 = vmatmul.msk.f32.vlgmr.msra.gmra.mxu0 %vm1215_vm2, %v4502_v41  ;;  %v14940_v59 = vpop.f32.mrf.mxu2 }
 0x4b8   : > { %11494 = vmatmul.msk.f32.gmra.mxu1 %vm1215_vm2, %v4528_v37  ;;  %5477 = vmatpush.bf16.xpose.msra.mxu0 %v5468_v51 }
 0x4b9   : > { %12502 = vrot.lane.b32.xlu2 %v13444_v47, %s12757_s28  ;;  %v5588_v47 = vsel %vm789_vm1, %v14509_v60, 0 }
 0x4ba   : > { %v14943_v11 = vpop.f32.mrf.mxu3 }
 0x4bb   : > { %12472 = vrot.lane.b32.xlu1 %v13414_v12, %s12757_s28  ;;  %v14951_v20 = vpop.permute.xlu2 %7728 }
 0x4bc   : > { %12452 = vrot.lane.b32.xlu0 %v13418_v18, %s12757_s28  ;;  %17709 = vst [vmem:[#allocation147_spill] sm:$0xff] %v14951_v20  ;;  %v17711_v20 = vld [vmem:[#allocation42_spill] sm:$0xff] }
 0x4bd   : > { %v14953_v29 = vpop.permute.xlu1 %12417  ;;  %v14955_v41 = vpop.permute.xlu0 %12402 }
 0x4be   : > { %17710 = vst [vmem:[#allocation148_spill] sm:$0xff] %v14955_v41  ;;  %v4504_v48 = vpop.f32.mrf.mxu0 }
 0x4bf   : > { %11492 = vmatmul.msk.f32.gmra.mxu0 %vm1215_vm2, %v4504_v48  ;;  %v14958_v37 = vpop.f32.mrf.mxu2 }
 0x4c0   : > { %11498 = vmatmul.msk.bf16.vlgmr.msrb.gmra.mxu1 %vm789_vm1, %v14491_v24  ;;  %v5564_v24 = vsel %vm789_vm1, %v14402_v2, 0 }
 0x4c1   : > { %5597 = vmatpush.bf16.xpose.msrb.mxu1 %v5588_v47  ;;  %12512 = vrot.lane.b32.xlu2 %v13527_v4, %s12757_s28 }
 0x4c2   : > { %v14964_v51 = vpop.f32.mrf.mxu3 }
 0x4c3   : > { %12487 = vrot.lane.b32.xlu1 %v17711_v20, %s12757_s28  ;;  %v14972_v48 = vpop.permute.xlu2 %7704 }
 0x4c4   : > { %12467 = vrot.lane.b32.xlu0 %v13430_v26, %s12757_s28  ;;  %17712 = vst [vmem:[#allocation42_spill] sm:$0xff] %v14972_v48  ;;  %v5684_v48 = vsel %vm789_vm1, %v14424_v15, 0 }
 0x4c5   : > { %v14974_v23 = vpop.permute.xlu1 %7654  ;;  %v14976_v60 = vpop.permute.xlu0 %7656 }
 0x4c6   : > { %17713 = vst [vmem:[#allocation149_spill] sm:$0xff] %v14974_v23  ;;  %v17715_v23 = vld [vmem:[#allocation47_spill] sm:$0xff] }
 0x4c7   : > { %17714 = vst [vmem:[#allocation150_spill] sm:$0xff] %v14976_v60  ;;  %11497 = vmatmul.msk.bf16.vlgmr.msrb.gmra.mxu0 %vm789_vm1, %v14468_v36  ;;  %v14982_v47 = vpop.f32.mrf.mxu2 }
 0x4c8   : > { %5573 = vmatpush.bf16.xpose.msrb.mxu0 %v5564_v24 }
 0x4c9   : > { %8847 = vrot.lane.b32.xlu2 %v17472_v6, %s12758_s15 }
 0x4cb   : > { %8825 = vrot.lane.b32.xlu1 %v13038_v31, %s12759_s29  ;;  %v14988_v4 = vpop.f32.mrf.mxu3  ;;  %v14992_v2 = vpop.permute.xlu2 %7942 }
 0x4cc   : > { %12482 = vrot.lane.b32.xlu0 %v17715_v23, %s12757_s28  ;;  %17716 = vst [vmem:[#allocation47_spill] sm:$0xff] %v14992_v2 }
 0x4cd   : > { %v14994_v60 = vpop.permute.xlu1 %12432  ;;  %v14996_v36 = vpop.permute.xlu0 %12427 }
 0x4ce   : > { %17717 = vst [vmem:[#allocation151_spill] sm:$0xff] %v14994_v60 }
 0x4cf   : > { %v14998_v24 = vpop.f32.mrf.mxu2 }
 0x4d0   : > { %17718 = vst [vmem:[#allocation152_spill] sm:$0xff] %v14998_v24  ;;  %11502 = vmatmul.msk.bf16.vlgmr.msra.gmra.mxu1 %vm789_vm1, %v14386_v56  ;;  %v5660_v56 = vsel %vm789_vm1, %v14569_v28, 0 }
 0x4d1   : > { %5693 = vmatpush.bf16.xpose.msra.mxu1 %v5684_v48  ;;  %8897 = vrot.lane.b32.xlu2 %v17523_v50, %s12759_s29 }
 0x4d3   : > { %8823 = vrot.lane.b32.xlu1 %v13038_v31, %s12758_s15  ;;  %v15008_v2 = vpop.f32.mrf.mxu3  ;;  %v15012_v60 = vpop.permute.xlu2 %7968 }
 0x4d4   : > { %12497 = vrot.lane.b32.xlu0 %v13486_v10, %s12757_s28  ;;  %17719 = vst [vmem:[#allocation153_spill] sm:$0xff] %v15012_v60 }
 0x4d5   : > { %v15014_v24 = vpop.permute.xlu1 %7750  ;;  %v15016_v15 = vpop.permute.xlu0 %7752 }
 0x4d6   : > { %17720 = vst [vmem:[#allocation154_spill] sm:$0xff] %v15014_v24 }
 0x4d7   : > { %17721 = vst [vmem:[#allocation155_spill] sm:$0xff] %v15016_v15  ;;  %11501 = vmatmul.msk.bf16.vlgmr.msra.gmra.mxu0 %vm789_vm1, %v14531_v16  ;;  %v15022_v48 = vpop.f32.mrf.mxu2  ;;  %v12329_v16 = vunpack.i.l.bf16 %v14608_v32 }
 0x4d8   : > { %5669 = vmatpush.bf16.xpose.msra.mxu0 %v5660_v56 }
 0x4d9   : > { %8895 = vrot.lane.b32.xlu2 %v17523_v50, %s12758_s15 }
 0x4db   : > { %12517 = vrot.lane.b32.xlu1 %v17471_v42, %s12757_s28  ;;  %v15028_v31 = vpop.f32.mrf.mxu3  ;;  %v15032_v10 = vpop.permute.xlu2 %7966  ;;  %v12334_v42 = vunpack.i.l.bf16 %v14501_v0 }
 0x4dc   : > { %17722 = vst [vmem:[#allocation156_spill] sm:$0xff] %v15028_v31  ;;  %12507 = vrot.lane.b32.xlu0 %v17502_v54, %s12757_s28 }
 0x4dd   : > { %17723 = vst [vmem:[#allocation157_spill] sm:$0xff] %v15032_v10  ;;  %v15034_v28 = vpop.permute.xlu1 %12442  ;;  %v15036_v60 = vpop.permute.xlu0 %7678 }
 0x4de   : > { %17724 = vst [vmem:[#allocation158_spill] sm:$0xff] %v15036_v60 }
 0x4df   : > { %v15039_v56 = vpop.f32.mrf.mxu2 }
 0x4e0   : > { %11506 = vmatmul.msk.bf16.vlgmr.msrb.gmra.mxu1 %vm789_vm1, %v14551_v35 }
 0x4e1   : > { %5831 = vmatpush.msrb.mxu1 %v12329_v16  ;;  %8993 = vrot.lane.b32.xlu2 %v13152_v7, %s12759_s29  ;;  %v12330_v16 = vunpack.i.h.bf16 %v14608_v32 }
 0x4e3   : > { %5832 = vmatpush.msrb.mxu1 %v12334_v42  ;;  %v15046_v50 = vpop.f32.mrf.mxu3  ;;  %12527 = vrot.lane.b32.xlu1 %v17479_v38, %s12757_s28  ;;  %v15052_v31 = vpop.permute.xlu2 %7896  ;;  %v17728_v42 = vld [vmem:[#allocation116_spill] sm:$0xff] }
 0x4e4   : > { %17725 = vst [vmem:[#allocation159_spill] sm:$0xff] %v15046_v50  ;;  %8849 = vrot.lane.b32.xlu0 %v17472_v6, %s12759_s29  ;;  %v12335_v50 = vunpack.i.h.bf16 %v14501_v0  ;;  %v12230_v0 = vunpack.i.h.bf16 %v17699_v53 }
 0x4e5   : > { %v15054_v10 = vpop.permute.xlu1 %7846  ;;  %v15056_v35 = vpop.permute.xlu0 %7848 }
 0x4e6   : > { %17726 = vst [vmem:[#allocation160_spill] sm:$0xff] %v15054_v10  ;;  %v12349_v10 = vunpack.i.l.bf16 %v14651_v33 }
 0x4e7   : > { %17727 = vst [vmem:[#allocation161_spill] sm:$0xff] %v15056_v35  ;;  %11505 = vmatmul.msk.bf16.vlgmr.msrb.gmra.mxu0 %vm789_vm1, %v17728_v42  ;;  %v15061_v24 = vpop.f32.mrf.mxu2 }
 0x4e8   : > { %5796 = vmatpush.msrb.mxu0 %v12330_v16 }
 0x4e9   : > { %8991 = vrot.lane.b32.xlu2 %v13152_v7, %s12758_s15  ;;  %v17732_v7 = vld [vmem:[#allocation120_spill] sm:$0xff] }
 0x4ea   : > { %5797 = vmatpush.msrb.mxu0 %v12335_v50  ;;  %v12344_v50 = vunpack.i.l.bf16 %v14677_v30 }
 0x4eb   : > { %v15066_v38 = vpop.f32.mrf.mxu3  ;;  %8921 = vrot.lane.b32.xlu1 %v17467_v63, %s12759_s29  ;;  %v15072_v6 = vpop.permute.xlu2 %8016 }
 0x4ec   : > { %12522 = vrot.lane.b32.xlu0 %v13567_v3, %s12757_s28  ;;  %17729 = vst [vmem:[#allocation116_spill] sm:$0xff] %v15072_v6  ;;  %v12235_v3 = vunpack.i.h.bf16 %v17701_v58  ;;  %v17752_v6 = vld [vmem:[#allocation48_spill] sm:$0xff]  ;;  %s12695_s28 = scalar_lea.hbm %s17271_s9, 512 }
 0x4ed   : > { %v15074_v32 = vpop.permute.xlu1 %7944  ;;  %v15076_v42 = vpop.permute.xlu0 %7774 }
 0x4ee   : > { %17730 = vst [vmem:[#allocation162_spill] sm:$0xff] %v15074_v32 }
 0x4ef   : > { %17731 = vst [vmem:[#allocation163_spill] sm:$0xff] %v15076_v42  ;;  %v4166_v16 = vpop.f32.mrf.mxu2 }
 0x4f0   : > { %11510 = vmatmul.msk.bf16.vlgmr.msra.gmra.mxu1 %vm789_vm1, %v17732_v7  ;;  %11463 = vmatmul.msk.f32.vlgmr.msra.gmra.mxu2 %vm1215_vm2, %v4166_v16  ;;  %v12350_v7 = vunpack.i.h.bf16 %v14651_v33 }
 0x4f1   : > { %5971 = vmatpush.msra.mxu1 %v12344_v50  ;;  %4837 = vmatpush.msra.mxu2 %v12230_v0  ;;  %v12345_v0 = vunpack.i.h.bf16 %v14677_v30 }
 0x4f2   : > { %9089 = vrot.lane.b32.xlu2 %v13220_v39, %s12759_s29 }
 0x4f3   : > { %5972 = vmatpush.msra.mxu1 %v12349_v10  ;;  %v15087_v42 = vpop.f32.mrf.mxu3  ;;  %8919 = vrot.lane.b32.xlu1 %v17467_v63, %s12758_s15  ;;  %v15093_v53 = vpop.permute.xlu2 %7990  ;;  %v17736_v10 = vld [vmem:[#allocation104_spill] sm:$0xff] }
 0x4f4   : > { %8873 = vrot.lane.b32.xlu0 %v13074_v14, %s12759_s29  ;;  %4838 = vmatpush.msra.mxu2 %v12235_v3  ;;  %17733 = vst [vmem:[#allocation120_spill] sm:$0xff] %v15093_v53  ;;  %v17737_v3 = vld [vmem:[#allocation60_spill] sm:$0xff] }
 0x4f5   : > { %v15095_v16 = vpop.permute.xlu1 %7870  ;;  %v15098_v58 = vpop.permute.xlu0 %7872 }
 0x4f6   : > { %17734 = vst [vmem:[#allocation164_spill] sm:$0xff] %v15095_v16  ;;  %v12239_v16 = vunpack.i.l.bf16 %v17737_v3 }
 0x4f7   : > { %17735 = vst [vmem:[#allocation165_spill] sm:$0xff] %v15098_v58  ;;  %11509 = vmatmul.msk.bf16.vlgmr.msra.gmra.mxu0 %vm789_vm1, %v17736_v10  ;;  %v4168_v50 = vpop.f32.mrf.mxu2 }
 0x4f8   : > { %5936 = vmatpush.msra.mxu0 %v12345_v0  ;;  %11464 = vmatmul.msk.f32.gmra.mxu2 %vm1215_vm2, %v4168_v50  ;;  %v17739_v0 = vld [vmem:[#allocation99_spill] sm:$0xff] }
 0x4f9   : > { %v12244_v50 = vunpack.i.l.bf16 %v17739_v0 }
 0x4fa   : > { %5937 = vmatpush.msra.mxu0 %v12350_v7  ;;  %9087 = vrot.lane.b32.xlu2 %v13220_v39, %s12758_s15  ;;  %v12240_v7 = vunpack.i.h.bf16 %v17737_v3 }
 0x4fb   : > { %v4190_v63 = vpop.f32.mrf.mxu3  ;;  %9017 = vrot.lane.b32.xlu1 %v13169_v40, %s12759_s29  ;;  %v15113_v10 = vpop.permute.xlu2 %12462 }
 0x4fc   : > { %8871 = vrot.lane.b32.xlu0 %v13074_v14, %s12758_s15  ;;  %v15111_v30 = vpop.f32.mrf.mxu1  ;;  %17738 = vst [vmem:[#allocation104_spill] sm:$0xff] %v15113_v10  ;;  %11465 = vmatmul.msk.f32.vlgmr.msra.gmra.mxu3 %vm1215_vm2, %v4190_v63  ;;  %v12245_v14 = vunpack.i.h.bf16 %v17739_v0 }
 0x4fd   : > { %v15115_v33 = vpop.permute.xlu1 %7824  ;;  %v15119_v39 = vpop.permute.xlu0 %7726  ;;  %4872 = vmatpush.msra.mxu3 %v12239_v16 }
 0x4ff   : > { %v4262_v32 = vpop.f32.mrf.mxu2  ;;  %4873 = vmatpush.msra.mxu3 %v12244_v50 }
 0x500   : > { %11471 = vmatmul.msk.f32.vlgmr.msrb.gmra.mxu2 %vm1215_vm2, %v4262_v32 }
 0x501   : > { %4977 = vmatpush.msrb.mxu2 %v12240_v7  ;;  %v17742_v7 = vld [vmem:[#allocation98_spill] sm:$0xff] }
 0x502   : > { %8969 = vrot.lane.b32.xlu2 %v13136_v45, %s12759_s29 }
 0x503   : > { %4978 = vmatpush.msrb.mxu2 %v12245_v14  ;;  %v4192_v10 = vpop.f32.mrf.mxu3  ;;  %9015 = vrot.lane.b32.xlu1 %v13169_v40, %s12758_s15  ;;  %v15134_v3 = vpop.permute.xlu2 %12477  ;;  %v12259_v14 = vunpack.i.l.bf16 %v17742_v7 }
 0x504   : > { %8945 = vrot.lane.b32.xlu0 %v13120_v19, %s12759_s29  ;;  %v15130_v16 = vpop.f32.mrf.mxu0  ;;  %v15132_v63 = vpop.f32.mrf.mxu1  ;;  %17740 = vst [vmem:[#allocation60_spill] sm:$0xff] %v15134_v3  ;;  %11466 = vmatmul.msk.f32.gmra.mxu3 %vm1215_vm2, %v4192_v10  ;;  %v17744_v3 = vld [vmem:[#allocation46_spill] sm:$0xff] }
 0x505   : > { %v15136_v32 = vpop.permute.xlu1 %7822 }
 0x506   : > { %17741 = vst [vmem:[#allocation99_spill] sm:$0xff] %v15136_v32  ;;  %v15139_v0 = vpop.permute.xlu0 %7702  ;;  %v5324_v32 = vsel %vm789_vm1, %v17744_v3, 0 }
 0x507   : > { %v4264_v50 = vpop.f32.mrf.mxu2 }
 0x508   : > { %11472 = vmatmul.msk.f32.gmra.mxu2 %vm1215_vm2, %v4264_v50  ;;  %v12260_v50 = vunpack.i.h.bf16 %v17742_v7 }
 0x50a   : > { %9135 = vrot.lane.b32.xlu2 %v13258_v25, %s12758_s15 }
 0x50b   : > { %v4286_v40 = vpop.f32.mrf.mxu3  ;;  %9113 = vrot.lane.b32.xlu1 %v13238_v27, %s12759_s29  ;;  %v15151_v10 = vpop.permute.xlu2 %12492 }
 0x50c   : > { %8943 = vrot.lane.b32.xlu0 %v13120_v19, %s12758_s15  ;;  %v15149_v60 = vpop.f32.mrf.mxu0  ;;  %17743 = vst [vmem:[#allocation98_spill] sm:$0xff] %v15151_v10  ;;  %11473 = vmatmul.msk.f32.vlgmr.msrb.gmra.mxu3 %vm1215_vm2, %v4286_v40 }
 0x50d   : > { %v15153_v58 = vpop.permute.xlu1 %7920  ;;  %v15159_v15 = vpop.f32.mrf.mxu1  ;;  %5012 = vmatpush.msrb.mxu3 %v12259_v14 }
 0x50e   : > { %v15157_v35 = vpop.permute.xlu0 %7800 }
 0x50f   : > { %v4358_v53 = vpop.f32.mrf.mxu2  ;;  %5013 = vmatpush.msrb.mxu3 %v12260_v50 }
 0x510   : > { %11479 = vmatmul.msk.f32.vlgmr.msra.gmra.mxu2 %vm1215_vm2, %v4358_v53 }
 0x511   : > { %5333 = vmatpush.bf16.xpose.msra.mxu2 %v5324_v32 }
 0x512   : > { %9161 = vrot.lane.b32.xlu2 %v13278_v13, %s12759_s29 }
 0x513   : > { %v4288_v19 = vpop.f32.mrf.mxu3  ;;  %9111 = vrot.lane.b32.xlu1 %v13238_v27, %s12758_s15  ;;  %v15172_v7 = vpop.permute.xlu2 %12502 }
 0x514   : > { %9041 = vrot.lane.b32.xlu0 %v13187_v17, %s12759_s29  ;;  %v15170_v40 = vpop.f32.mrf.mxu0  ;;  %17745 = vst [vmem:[#allocation46_spill] sm:$0xff] %v15172_v7  ;;  %11474 = vmatmul.msk.f32.gmra.mxu3 %vm1215_vm2, %v4288_v19  ;;  %v17748_v19 = vld [vmem:[#allocation54_spill] sm:$0xff] }
 0x515   : > { %v15174_v14 = vpop.permute.xlu1 %7894  ;;  %v15179_v3 = vpop.f32.mrf.mxu1  ;;  %v5348_v10 = vsel %vm789_vm1, %v17748_v19, 0 }
 0x516   : > { %17746 = vst [vmem:[#allocation166_spill] sm:$0xff] %v15174_v14  ;;  %v15177_v53 = vpop.permute.xlu0 %7798 }
 0x517   : > { %17747 = vst [vmem:[#allocation167_spill] sm:$0xff] %v15177_v53  ;;  %v4360_v32 = vpop.f32.mrf.mxu2 }
 0x518   : > { %11480 = vmatmul.msk.f32.gmra.mxu2 %vm1215_vm2, %v4360_v32 }
 0x51a   : > { %9185 = vrot.lane.b32.xlu2 %v13300_v1, %s12759_s29 }
 0x51b   : > { %8967 = vrot.lane.b32.xlu1 %v13136_v45, %s12758_s15  ;;  %v15192_v7 = vpop.permute.xlu2 %12512 }
 0x51c   : > { %9039 = vrot.lane.b32.xlu0 %v13187_v17, %s12758_s15  ;;  %v4382_v27 = vpop.f32.mrf.mxu3  ;;  %v15188_v50 = vpop.f32.mrf.mxu0  ;;  %17749 = vst [vmem:[#allocation54_spill] sm:$0xff] %v15192_v7  ;;  %v5420_v17 = vsel %vm789_vm1, %v17752_v6, 0 }
 0x51d   : > { %v15194_v14 = vpop.permute.xlu1 %8014  ;;  %11481 = vmatmul.msk.f32.vlgmr.msra.gmra.mxu3 %vm1215_vm2, %v4382_v27  ;;  %v15199_v53 = vpop.f32.mrf.mxu1 }
 0x51e   : > { %17750 = vst [vmem:[#allocation168_spill] sm:$0xff] %v15194_v14  ;;  %v15197_v32 = vpop.permute.xlu0 %7918  ;;  %5357 = vmatpush.bf16.xpose.msra.mxu3 %v5348_v10  ;;  %v17766_v14 = vld [vmem:[#allocation31_spill] sm:$0xff] }
 0x51f   : > { %17751 = vst [vmem:[#allocation169_spill] sm:$0xff] %v15197_v32  ;;  %v17768_v32 = vld [vmem:[#allocation12_spill] sm:$0xff] }
 0x520   : > { %v4454_v45 = vpop.f32.mrf.mxu2 }
 0x521   : > { %11487 = vmatmul.msk.f32.vlgmr.msrb.gmra.mxu2 %vm1215_vm2, %v4454_v45 }
 0x522   : > { %5429 = vmatpush.bf16.xpose.msrb.mxu2 %v5420_v17  ;;  %12542 = vrot.lane.b32.xlu2 %v17702_v43, %s12758_s15  ;;  %v12556_v17 = vpack.i.bf16 %v17619_v22, %v17630_v9 }
 0x523   : > { %9063 = vrot.lane.b32.xlu1 %v13206_v62, %s12758_s15  ;;  %v15212_v10 = vpop.permute.xlu2 %8847 }
 0x524   : > { %9137 = vrot.lane.b32.xlu0 %v13258_v25, %s12759_s29  ;;  %v4384_v27 = vpop.f32.mrf.mxu3  ;;  %v15210_v19 = vpop.f32.mrf.mxu0  ;;  %17754 = vst [vmem:[#allocation170_spill] sm:$0xff] %v15212_v10 }
 0x525   : > { %17753 = vst [vmem:[#allocation48_spill] sm:$0xff] %v15210_v19  ;;  %v15214_v7 = vpop.permute.xlu1 %12457  ;;  %11482 = vmatmul.msk.f32.gmra.mxu3 %vm1215_vm2, %v4384_v27  ;;  %v15219_v45 = vpop.f32.mrf.mxu1  ;;  %v17758_v19 = vld [vmem:[#allocation57_spill] sm:$0xff] }
 0x526   : > { %17755 = vst [vmem:[#allocation171_spill] sm:$0xff] %v15214_v7  ;;  %v15217_v6 = vpop.permute.xlu0 %7992  ;;  %v5444_v10 = vsel %vm789_vm1, %v17758_v19, 0 }
 0x527   : > { %17756 = vst [vmem:[#allocation172_spill] sm:$0xff] %v15217_v6 }
 0x528   : > { %v4456_v43 = vpop.f32.mrf.mxu2 }
 0x529   : > { %11488 = vmatmul.msk.f32.gmra.mxu2 %vm1215_vm2, %v4456_v43 }
 0x52a   : > { %12557 = vrot.lane.b32.xlu2 %v12556_v17, %s12758_s15  ;;  %v17764_v17 = vld [vmem:[#allocation88_spill] sm:$0xff] }
 0x52b   : > { %12532 = vrot.lane.b32.xlu1 %v13418_v18, %s12758_s15  ;;  %v15233_v7 = vpop.permute.xlu2 %8897  ;;  %v17763_v18 = vld [vmem:[#allocation56_spill] sm:$0xff] }
 0x52c   : > { %9065 = vrot.lane.b32.xlu0 %v13206_v62, %s12759_s29  ;;  %v4478_v25 = vpop.f32.mrf.mxu3  ;;  %v15229_v27 = vpop.f32.mrf.mxu0  ;;  %17759 = vst [vmem:[#allocation57_spill] sm:$0xff] %v15233_v7  ;;  %v5516_v62 = vsel %vm789_vm1, %v17763_v18, 0  ;;  %v17767_v7 = vld [vmem:[#allocation13_spill] sm:$0xff] }
 0x52d   : > { %17757 = vst [vmem:[#allocation173_spill] sm:$0xff] %v15229_v27  ;;  %v15235_v43 = vpop.permute.xlu1 %12472  ;;  %11489 = vmatmul.msk.f32.vlgmr.msrb.gmra.mxu3 %vm1215_vm2, %v4478_v25  ;;  %v15240_v9 = vpop.f32.mrf.mxu1  ;;  %v17765_v27 = vld [vmem:[#allocation32_spill] sm:$0xff] }
 0x52e   : > { %17760 = vst [vmem:[#allocation174_spill] sm:$0xff] %v15235_v43  ;;  %v15238_v22 = vpop.permute.xlu0 %12452  ;;  %5453 = vmatpush.bf16.xpose.msrb.mxu3 %v5444_v10  ;;  %v12571_v19 = vpack.i.bf16 %v17766_v14, %v17765_v27  ;;  %v12536_v43 = vpack.i.bf16 %v17768_v32, %v17767_v7  ;;  %v12586_v7 = vpack.i.bf16 %v17647_v49, %v17618_v44  ;;  %v17773_v32 = vld [vmem:[#allocation21_spill] sm:$0xff]  ;;  %v17778_v44 = vld [vmem:[#allocation59_spill] sm:$0xff]  ;;  %v12354_v49 = vunpack.i.l.bf16 %v14718_v55 }
 0x52f   : > { %17761 = vst [vmem:[#allocation175_spill] sm:$0xff] %v15238_v22 }
 0x530   : > { %17762 = vst [vmem:[#allocation176_spill] sm:$0xff] %v15240_v9 }
 0x531   : > { %11495 = vmatmul.msk.bf16.vlgmr.msra.gmra.mxu2 %vm789_vm1, %v17764_v17 }
 0x532   : > { %5525 = vmatpush.bf16.xpose.msra.mxu2 %v5516_v62  ;;  %12572 = vrot.lane.b32.xlu2 %v12571_v19, %s12758_s15  ;;  %v17775_v19 = vld [vmem:[#allocation55_spill] sm:$0xff] }
 0x533   : > { %12537 = vrot.lane.b32.xlu1 %v12536_v43, %s12758_s15  ;;  %v15256_v18 = vpop.permute.xlu2 %8895  ;;  %v17774_v43 = vld [vmem:[#allocation20_spill] sm:$0xff] }
 0x534   : > { %9159 = vrot.lane.b32.xlu0 %v13278_v13, %s12758_s15  ;;  %v4480_v10 = vpop.f32.mrf.mxu3  ;;  %v15254_v25 = vpop.f32.mrf.mxu0  ;;  %17769 = vst [vmem:[#allocation56_spill] sm:$0xff] %v15256_v18  ;;  %v12551_v62 = vpack.i.bf16 %v17774_v43, %v17773_v32  ;;  %v17784_v18 = vld [vmem:[#allocation37_spill] sm:$0xff] }
 0x535   : > { %v15258_v17 = vpop.permute.xlu1 %12487  ;;  %11490 = vmatmul.msk.f32.gmra.mxu3 %vm1215_vm2, %v4480_v10  ;;  %v15263_v27 = vpop.f32.mrf.mxu1  ;;  %v5540_v10 = vsel %vm789_vm1, %v17775_v19, 0 }
 0x536   : > { %17770 = vst [vmem:[#allocation88_spill] sm:$0xff] %v15258_v17  ;;  %v15261_v14 = vpop.permute.xlu0 %12467  ;;  %v17782_v17 = vld [vmem:[#allocation92_spill] sm:$0xff] }
 0x537   : > { %17771 = vst [vmem:[#allocation32_spill] sm:$0xff] %v15261_v14 }
 0x538   : > { %17772 = vst [vmem:[#allocation31_spill] sm:$0xff] %v15263_v27 }
 0x53a   : > { %12587 = vrot.lane.b32.xlu2 %v12586_v7, %s12758_s15 }
 0x53b   : > { %12552 = vrot.lane.b32.xlu1 %v12551_v62, %s12758_s15  ;;  %v15277_v9 = vpop.permute.xlu2 %8993  ;;  %v17781_v62 = vld [vmem:[#allocation41_spill] sm:$0xff] }
 0x53c   : > { %9183 = vrot.lane.b32.xlu0 %v13300_v1, %s12758_s15  ;;  %v15273_v13 = vpop.f32.mrf.mxu0  ;;  %17776 = vst [vmem:[#allocation13_spill] sm:$0xff] %v15277_v9  ;;  %v17780_v1 = vld [vmem:[#allocation49_spill] sm:$0xff]  ;;  %v5612_v19 = vsel %vm789_vm1, %v17781_v62, 0 }
 0x53d   : > { %v15279_v27 = vpop.permute.xlu1 %8825  ;;  %11496 = vmatmul.msk.bf16.vlgmr.msra.gmra.mxu3 %vm789_vm1, %v17778_v44  ;;  %v5407_v32 = vpop.f32.mrf.mxu1  ;;  %v12359_v43 = vunpack.i.l.bf16 %v17780_v1 }
 0x53e   : > { %17777 = vst [vmem:[#allocation12_spill] sm:$0xff] %v15279_v27  ;;  %v15284_v7 = vpop.permute.xlu0 %12482  ;;  %5549 = vmatpush.bf16.xpose.msra.mxu3 %v5540_v10  ;;  %11517 = vmatmul.msk.f32.vlgmr.msrb.gmra.mxu1 %vm1215_vm2, %v5407_v32  ;;  %v17783_v27 = vld [vmem:[#allocation38_spill] sm:$0xff]  ;;  %v12355_v10 = vunpack.i.h.bf16 %v14718_v55  ;;  %v17785_v32 = vld [vmem:[#allocation63_spill] sm:$0xff] }
 0x53f   : > { %17779 = vst [vmem:[#allocation21_spill] sm:$0xff] %v15284_v7  ;;  %6111 = vmatpush.msrb.mxu1 %v12354_v49  ;;  %v12601_v44 = vpack.i.bf16 %v17784_v18, %v17783_v27  ;;  %v2757_v62 = vmax.f32 %v17785_v32, 0.0  ;;  %v12360_v18 = vunpack.i.h.bf16 %v17780_v1  ;;  %v17790_v1 = vld [vmem:[#allocation62_spill] sm:$0xff]  ;;  %v17793_v32 = vld [vmem:[#allocation64_spill] sm:$0xff] }
 0x541   : > { %11499 = vmatmul.msk.bf16.vlgmr.msrb.gmra.mxu2 %vm789_vm1, %v17782_v17  ;;  %6112 = vmatpush.msrb.mxu1 %v12359_v43  ;;  %v17789_v43 = vld [vmem:[#allocation86_spill] sm:$0xff] }
 0x542   : > { %5621 = vmatpush.bf16.xpose.msrb.mxu2 %v5612_v19  ;;  %12602 = vrot.lane.b32.xlu2 %v12601_v44, %s12758_s15  ;;  %v2760_v19 = vmax.f32 %v17789_v43, 0.0  ;;  %v5636_v44 = vsel %vm789_vm1, %v17790_v1, 0  ;;  %v17797_v43 = vld [vmem:[#allocation134_spill] sm:$0xff] }
 0x543   : > { %12567 = vrot.lane.b32.xlu1 %v13414_v12, %s12758_s15  ;;  %v15301_v14 = vpop.permute.xlu2 %8991  ;;  %v2789_v12 = vpack.c.bf16 %v2757_v62, %v2757_v62  ;;  %v17794_v62 = vld [vmem:[#allocation68_spill] sm:$0xff]  ;;  %v12369_v1 = vunpack.i.l.bf16 %v17797_v43 }
 0x544   : > { %12547 = vrot.lane.b32.xlu0 %v17715_v23, %s12758_s15  ;;  %v5383_v49 = vpop.f32.mrf.mxu0  ;;  %17786 = vst [vmem:[#allocation20_spill] sm:$0xff] %v15301_v14  ;;  %v17798_v14 = vld [vmem:[#allocation45_spill] sm:$0xff] }
 0x545   : > { %v15303_v17 = vpop.permute.xlu1 %8823  ;;  %11515 = vmatmul.msk.f32.vlgmr.msrb.gmra.mxu0 %vm1215_vm2, %v5383_v49  ;;  %v5409_v55 = vpop.f32.mrf.mxu1 }
 0x546   : > { %17787 = vst [vmem:[#allocation55_spill] sm:$0xff] %v15303_v17  ;;  %v15307_v27 = vpop.permute.xlu0 %12497  ;;  %6076 = vmatpush.msrb.mxu0 %v12355_v10  ;;  %11518 = vmatmul.msk.f32.gmra.mxu1 %vm1215_vm2, %v5409_v55  ;;  %v17796_v55 = vld [vmem:[#allocation28_spill] sm:$0xff]  ;;  %v2792_v17 = vpack.c.bf16 %v2760_v19, %v2760_v19 }
 0x547   : > { %17788 = vst [vmem:[#allocation59_spill] sm:$0xff] %v15307_v27 }
 0x548   : > { %6077 = vmatpush.msrb.mxu0 %v12360_v18 }
 0x54a   : > { %2857 = vrot.lane.b32.xlu2 %v2789_v12, %s12759_s29  ;;  %v12294_v12 = vunpack.i.l.bf16 %v17796_v55 }
 0x54b   : > { %12582 = vrot.lane.b32.xlu1 %v17463_v21, %s12758_s15  ;;  %v12364_v21 = vunpack.i.l.bf16 %v17794_v62 }
 0x54c   : > { %12562 = vrot.lane.b32.xlu0 %v13430_v26, %s12758_s15  ;;  %v5385_v23 = vpop.f32.mrf.mxu0  ;;  %v15318_v49 = vpop.permute.xlu2 %9089 }
 0x54d   : > { %17791 = vst [vmem:[#allocation49_spill] sm:$0xff] %v15318_v49  ;;  %v15320_v10 = vpop.permute.xlu1 %12517  ;;  %11500 = vmatmul.msk.bf16.vlgmr.msrb.gmra.mxu3 %vm789_vm1, %v17793_v32  ;;  %11516 = vmatmul.msk.f32.gmra.mxu0 %vm1215_vm2, %v5385_v23  ;;  %v5503_v26 = vpop.f32.mrf.mxu1  ;;  %v17799_v23 = vld [vmem:[#allocation30_spill] sm:$0xff]  ;;  %v17800_v32 = vld [vmem:[#allocation29_spill] sm:$0xff] }
 0x54e   : > { %17792 = vst [vmem:[#allocation41_spill] sm:$0xff] %v15320_v10  ;;  %v15326_v18 = vpop.permute.xlu0 %12507  ;;  %5645 = vmatpush.bf16.xpose.msrb.mxu3 %v5636_v44  ;;  %11525 = vmatmul.msk.f32.vlgmr.msra.gmra.mxu1 %vm1215_vm2, %v5503_v26  ;;  %v12596_v49 = vpack.i.bf16 %v17800_v32, %v17799_v23  ;;  %v12365_v44 = vunpack.i.h.bf16 %v17794_v62 }
 0x54f   : > { %17795 = vst [vmem:[#allocation92_spill] sm:$0xff] %v15326_v18  ;;  %6251 = vmatpush.msra.mxu1 %v12364_v21  ;;  %v12295_v18 = vunpack.i.h.bf16 %v17796_v55  ;;  %v17801_v21 = vld [vmem:[#allocation34_spill] sm:$0xff]  ;;  %v12370_v55 = vunpack.i.h.bf16 %v17797_v43 }
 0x550   : > { %v3927_v26 = vmax.f32 %v17801_v21, 0.0 }
 0x551   : > { %11503 = vmatmul.msk.bf16.vlgmr.msra.gmra.mxu2 %vm789_vm1, %v17798_v14  ;;  %6252 = vmatpush.msra.mxu1 %v12369_v1 }
 0x552   : > { %5726 = vmatpush.msra.mxu2 %v12294_v12  ;;  %2863 = vrot.lane.b32.xlu2 %v2792_v17, %s12759_s29  ;;  %v17803_v12 = vld [vmem:[#allocation84_spill] sm:$0xff] }
 0x553   : > { %12597 = vrot.lane.b32.xlu1 %v12596_v49, %s12758_s15  ;;  %v2759_v1 = vmax.f32 %v17803_v12, 0.0 }
 0x554   : > { %12577 = vrot.lane.b32.xlu0 %v17711_v20, %s12758_s15  ;;  %v5479_v19 = vpop.f32.mrf.mxu0  ;;  %5727 = vmatpush.msra.mxu2 %v12295_v18  ;;  %v15342_v14 = vpop.permute.xlu2 %9087  ;;  %v3959_v20 = vpack.c.bf16 %v3927_v26, %v3927_v26  ;;  %v17806_v18 = vld [vmem:[#allocation123_spill] sm:$0xff]  ;;  %v17810_v26 = vld [vmem:[#allocation106_spill] sm:$0xff] }
 0x555   : > { %17802 = vst [vmem:[#allocation38_spill] sm:$0xff] %v15342_v14  ;;  %11523 = vmatmul.msk.f32.vlgmr.msra.gmra.mxu0 %vm1215_vm2, %v5479_v19  ;;  %v15347_v17 = vpop.permute.xlu1 %12527  ;;  %v5505_v49 = vpop.f32.mrf.mxu1  ;;  %v2791_v23 = vpack.c.bf16 %v2759_v1, %v2759_v1  ;;  %v12299_v32 = vunpack.i.l.bf16 %v17806_v18  ;;  %v17807_v19 = vld [vmem:[#allocation67_spill] sm:$0xff]  ;;  %v12304_v1 = vunpack.i.l.bf16 %v17810_v26 }
 0x556   : > { %17804 = vst [vmem:[#allocation37_spill] sm:$0xff] %v15347_v17  ;;  %v15349_v62 = vpop.permute.xlu0 %8849  ;;  %6216 = vmatpush.msra.mxu0 %v12365_v44  ;;  %11526 = vmatmul.msk.f32.gmra.mxu1 %vm1215_vm2, %v5505_v49  ;;  %v2765_v21 = vmax.f32 %v17807_v19, 0.0  ;;  %v17809_v44 = vld [vmem:[#allocation51_spill] sm:$0xff]  ;;  %v17814_v19 = vld [vmem:[#allocation73_spill] sm:$0xff]  ;;  %v17852_v17 = vld [vmem:[#allocation146_spill] sm:$0xff] }
 0x557   : > { %17805 = vst [vmem:[#allocation63_spill] sm:$0xff] %v15349_v62  ;;  %v12300_v62 = vunpack.i.h.bf16 %v17806_v18  ;;  %v6565_v14 = vsel %vm789_vm1, %v17814_v19, 0 }
 0x558   : > { %6217 = vmatpush.msra.mxu0 %v12370_v55  ;;  %v17811_v55 = vld [vmem:[#allocation128_spill] sm:$0xff] }
 0x559   : > { %v3926_v49 = vmax.f32 %v17811_v55, 0.0 }
 0x55a   : > { %4028 = vrot.lane.b32.xlu2 %v3959_v20, %s12756_s23 }
 0x55b   : > { %2861 = vrot.lane.b32.xlu1 %v2791_v23, %s12759_s29  ;;  %v3958_v55 = vpack.c.bf16 %v3926_v49, %v3926_v49 }
 0x55c   : > { %12592 = vrot.lane.b32.xlu0 %v17502_v54, %s12758_s15  ;;  %v5481_v43 = vpop.f32.mrf.mxu0  ;;  %v15358_v12 = vpop.permute.xlu2 %8969 }
 0x55d   : > { %17808 = vst [vmem:[#allocation86_spill] sm:$0xff] %v15358_v12  ;;  %11504 = vmatmul.msk.bf16.vlgmr.msra.gmra.mxu3 %vm789_vm1, %v17809_v44  ;;  %11524 = vmatmul.msk.f32.gmra.mxu0 %vm1215_vm2, %v5481_v43  ;;  %v15365_v20 = vpop.permute.xlu1 %8921  ;;  %v5599_v54 = vpop.f32.mrf.mxu1  ;;  %v2797_v44 = vpack.c.bf16 %v2765_v21, %v2765_v21  ;;  %v17815_v43 = vld [vmem:[#allocation101_spill] sm:$0xff]  ;;  %v17817_v12 = vld [vmem:[#allocation39_spill] sm:$0xff] }
 0x55e   : > { %17812 = vst [vmem:[#allocation62_spill] sm:$0xff] %v15365_v20  ;;  %v15367_v23 = vpop.permute.xlu0 %12522  ;;  %5761 = vmatpush.msra.mxu3 %v12299_v32  ;;  %11533 = vmatmul.msk.f32.vlgmr.msrb.gmra.mxu1 %vm1215_vm2, %v5599_v54  ;;  %v17816_v20 = vld [vmem:[#allocation40_spill] sm:$0xff]  ;;  %v12305_v32 = vunpack.i.h.bf16 %v17810_v26  ;;  %v17822_v26 = vld [vmem:[#allocation22_spill] sm:$0xff] }
 0x55f   : > { %17813 = vst [vmem:[#allocation64_spill] sm:$0xff] %v15367_v23  ;;  %6574 = vmatpush.bf16.xpose.msrb.mxu1 %v6565_v14  ;;  %v12606_v9 = vpack.i.bf16 %v17817_v12, %v17816_v20  ;;  %v17819_v14 = vld [vmem:[#allocation17_spill] sm:$0xff]  ;;  %v2776_v20 = vmax.f32 %v17822_v26, 0.0 }
 0x560   : > { %5762 = vmatpush.msra.mxu3 %v12304_v1  ;;  %v17818_v1 = vld [vmem:[#allocation103_spill] sm:$0xff]  ;;  %v6541_v54 = vsel %vm789_vm1, %v17819_v14, 0 }
 0x561   : > { %11507 = vmatmul.msk.bf16.vlgmr.msrb.gmra.mxu2 %vm789_vm1, %v17815_v43  ;;  %v2754_v21 = vmax.f32 %v17818_v1, 0.0  ;;  %v2808_v1 = vpack.c.bf16 %v2776_v20, %v2776_v20  ;;  %v17830_v20 = vld [vmem:[#allocation58_spill] sm:$0xff] }
 0x562   : > { %5866 = vmatpush.msrb.mxu2 %v12300_v62  ;;  %2873 = vrot.lane.b32.xlu2 %v2797_v44, %s12759_s29  ;;  %v17821_v62 = vld [vmem:[#allocation19_spill] sm:$0xff] }
 0x563   : > { %4026 = vrot.lane.b32.xlu1 %v3958_v55, %s12756_s23  ;;  %v2758_v12 = vmax.f32 %v17821_v62, 0.0  ;;  %v2786_v43 = vpack.c.bf16 %v2754_v21, %v2754_v21  ;;  %v17826_v62 = vld [vmem:[#allocation110_spill] sm:$0xff]  ;;  %v17829_v21 = vld [vmem:[#allocation91_spill] sm:$0xff] }
 0x564   : > { %12607 = vrot.lane.b32.xlu0 %v12606_v9, %s12758_s15  ;;  %v5575_v18 = vpop.f32.mrf.mxu0  ;;  %5867 = vmatpush.msrb.mxu2 %v12305_v32  ;;  %v15384_v49 = vpop.permute.xlu2 %9135  ;;  %v17825_v32 = vld [vmem:[#allocation15_spill] sm:$0xff]  ;;  %v2762_v26 = vmax.f32 %v17826_v62, 0.0  ;;  %s18030_s15 = sshll.u32 %s12897_s14, 8 }
 0x565   : > { %17820 = vst [vmem:[#allocation68_spill] sm:$0xff] %v15384_v49  ;;  %11531 = vmatmul.msk.f32.vlgmr.msrb.gmra.mxu0 %vm1215_vm2, %v5575_v18  ;;  %v15389_v19 = vpop.permute.xlu1 %8919  ;;  %v5601_v44 = vpop.f32.mrf.mxu1  ;;  %v2790_v55 = vpack.c.bf16 %v2758_v12, %v2758_v12  ;;  %v12309_v14 = vunpack.i.l.bf16 %v17825_v32  ;;  %v2775_v12 = vmax.f32 %v17829_v21, 0.0  ;;  %v17834_v62 = vld [vmem:[#allocation71_spill] sm:$0xff]  ;;  %s17073_s25 = scalar_lea.vmem [#allocation6], %s18030_s15 }
 0x566   : > { %17823 = vst [vmem:[#allocation28_spill] sm:$0xff] %v15389_v19  ;;  %v15391_v9 = vpop.permute.xlu0 %8873  ;;  %6550 = vmatpush.bf16.xpose.msrb.mxu0 %v6541_v54  ;;  %11534 = vmatmul.msk.f32.gmra.mxu1 %vm1215_vm2, %v5601_v44  ;;  %v17828_v54 = vld [vmem:[#allocation102_spill] sm:$0xff]  ;;  %v2753_v44 = vmax.f32 %v17830_v20, 0.0 }
 0x567   : > { %17824 = vst [vmem:[#allocation134_spill] sm:$0xff] %v15391_v9 }
 0x568   : > { %v2785_v21 = vpack.c.bf16 %v2753_v44, %v2753_v44 }
 0x56a   : > { %2851 = vrot.lane.b32.xlu2 %v2786_v43, %s12759_s29  ;;  %v17831_v43 = vld [vmem:[#allocation18_spill] sm:$0xff] }
 0x56b   : > { %2895 = vrot.lane.b32.xlu1 %v2808_v1, %s12759_s29  ;;  %v12314_v19 = vunpack.i.l.bf16 %v17831_v43 }
 0x56c   : > { %2859 = vrot.lane.b32.xlu0 %v2790_v55, %s12759_s29  ;;  %v5577_v18 = vpop.f32.mrf.mxu0  ;;  %v15399_v49 = vpop.permute.xlu2 %9161 }
 0x56d   : > { %17827 = vst [vmem:[#allocation45_spill] sm:$0xff] %v15399_v49  ;;  %11508 = vmatmul.msk.bf16.vlgmr.msrb.gmra.mxu3 %vm789_vm1, %v17828_v54  ;;  %11532 = vmatmul.msk.f32.gmra.mxu0 %vm1215_vm2, %v5577_v18  ;;  %v15407_v9 = vpop.permute.xlu1 %9017  ;;  %v5695_v1 = vpop.f32.mrf.mxu1  ;;  %v6661_v49 = vsel %vm789_vm1, %v17834_v62, 0  ;;  %v2794_v54 = vpack.c.bf16 %v2762_v26, %v2762_v26  ;;  %v2807_v18 = vpack.c.bf16 %v2775_v12, %v2775_v12  ;;  %v6637_v62 = vsel %vm789_vm1, %v14841_v34, 0  ;;  %v17838_v26 = vld [vmem:[#allocation129_spill] sm:$0xff] }
 0x56e   : > { %17832 = vst [vmem:[#allocation30_spill] sm:$0xff] %v15407_v9  ;;  %v15409_v55 = vpop.permute.xlu0 %8871  ;;  %5901 = vmatpush.msrb.mxu3 %v12309_v14  ;;  %11541 = vmatmul.msk.f32.vlgmr.msra.gmra.mxu1 %vm1215_vm2, %v5695_v1  ;;  %v17835_v9 = vld [vmem:[#allocation70_spill] sm:$0xff]  ;;  %v3929_v12 = vmax.f32 %v17838_v26, 0.0 }
 0x56f   : > { %17833 = vst [vmem:[#allocation29_spill] sm:$0xff] %v15409_v55  ;;  %6670 = vmatpush.bf16.xpose.msra.mxu1 %v6661_v49  ;;  %v3944_v55 = vmax.f32 %v17835_v9, 0.0  ;;  %v17837_v49 = vld [vmem:[#allocation25_spill] sm:$0xff] }
 0x570   : > { %5902 = vmatpush.msrb.mxu3 %v12314_v19  ;;  %v3928_v19 = vmax.f32 %v17837_v49, 0.0  ;;  %v3961_v22 = vpack.c.bf16 %v3929_v12, %v3929_v12  ;;  %v17841_v49 = vld [vmem:[#allocation111_spill] sm:$0xff] }
 0x571   : > { %v3976_v9 = vpack.c.bf16 %v3944_v55, %v3944_v55  ;;  %v2763_v26 = vmax.f32 %v17841_v49, 0.0  ;;  %v17844_v55 = vld [vmem:[#allocation107_spill] sm:$0xff] }
 0x572   : > { %2867 = vrot.lane.b32.xlu2 %v2794_v54, %s12759_s29 }
 0x573   : > { %v15415_v20 = vpop.f32.mrf.mxu2  ;;  %2849 = vrot.lane.b32.xlu1 %v2785_v21, %s12759_s29  ;;  %v3960_v21 = vpack.c.bf16 %v3928_v19, %v3928_v19  ;;  %v2761_v19 = vmax.f32 %v17844_v55, 0.0  ;;  %v2795_v49 = vpack.c.bf16 %v2763_v26, %v2763_v26  ;;  %v17849_v55 = vld [vmem:[#allocation23_spill] sm:$0xff]  ;;  %v17853_v26 = vld [vmem:[#allocation105_spill] sm:$0xff] }
 0x574   : > { %2893 = vrot.lane.b32.xlu0 %v2807_v18, %s12759_s29  ;;  %v5671_v14 = vpop.f32.mrf.mxu0  ;;  %v15422_v1 = vpop.permute.xlu2 %9185 }
 0x575   : > { %17836 = vst [vmem:[#allocation34_spill] sm:$0xff] %v15422_v1  ;;  %11539 = vmatmul.msk.f32.vlgmr.msra.gmra.mxu0 %vm1215_vm2, %v5671_v14  ;;  %v15427_v44 = vpop.permute.xlu1 %9015  ;;  %v5697_v18 = vpop.f32.mrf.mxu1  ;;  %v17848_v1 = vld [vmem:[#allocation26_spill] sm:$0xff] }
 0x576   : > { %17839 = vst [vmem:[#allocation84_spill] sm:$0xff] %v15427_v44  ;;  %v15429_v54 = vpop.permute.xlu0 %8945  ;;  %6646 = vmatpush.bf16.xpose.msra.mxu0 %v6637_v62  ;;  %11542 = vmatmul.msk.f32.gmra.mxu1 %vm1215_vm2, %v5697_v18  ;;  %v17843_v62 = vld [vmem:[#allocation90_spill] sm:$0xff] }
 0x577   : > { %17840 = vst [vmem:[#allocation123_spill] sm:$0xff] %v15429_v54  ;;  %v2766_v18 = vmax.f32 %v17843_v62, 0.0  ;;  %v17847_v54 = vld [vmem:[#allocation78_spill] sm:$0xff] }
 0x57a   : > { %4062 = vrot.lane.b32.xlu2 %v3976_v9, %s12756_s23 }
 0x57b   : > { %v15433_v34 = vpop.f32.mrf.mxu2  ;;  %4032 = vrot.lane.b32.xlu1 %v3961_v22, %s12756_s23 }
 0x57c   : > { %4030 = vrot.lane.b32.xlu0 %v3960_v21, %s12756_s23  ;;  %v5673_v14 = vpop.f32.mrf.mxu0  ;;  %v15438_v44 = vpop.permute.xlu2 %12542  ;;  %v6757_v21 = vsel %vm789_vm1, %v17847_v54, 0  ;;  %v17850_v54 = vld [vmem:[#allocation133_spill] sm:$0xff] }
 0x57d   : > { %17842 = vst [vmem:[#allocation67_spill] sm:$0xff] %v15438_v44  ;;  %11540 = vmatmul.msk.f32.gmra.mxu0 %vm1215_vm2, %v5673_v14  ;;  %v15443_v12 = vpop.permute.xlu1 %9113  ;;  %v2798_v44 = vpack.c.bf16 %v2766_v18, %v2766_v18  ;;  %v2793_v14 = vpack.c.bf16 %v2761_v19, %v2761_v19  ;;  %v2755_v18 = vmax.f32 %v17853_v26, 0.0  ;;  %v17854_v19 = vld [vmem:[#allocation108_spill] sm:$0xff] }
 0x57e   : > { %17845 = vst [vmem:[#allocation51_spill] sm:$0xff] %v15443_v12  ;;  %v15445_v9 = vpop.permute.xlu0 %8943  ;;  %11546 = vmatmul.msk.bf16.vlgmr.msrb.gmra.mxu1 %vm789_vm1, %v17848_v1  ;;  %v6733_v12 = vsel %vm789_vm1, %v17850_v54, 0 }
 0x57f   : > { %17846 = vst [vmem:[#allocation106_spill] sm:$0xff] %v15445_v9  ;;  %v15451_v22 = vpop.f32.mrf.mxu3  ;;  %6766 = vmatpush.bf16.xpose.msrb.mxu1 %v6757_v21  ;;  %v3935_v9 = vmax.f32 %v17849_v55, 0.0  ;;  %v2756_v21 = vmax.f32 %v17854_v19, 0.0  ;;  %v2787_v55 = vpack.c.bf16 %v2755_v18, %v2755_v18  ;;  %v17863_v18 = vld [vmem:[#allocation76_spill] sm:$0xff] }
 0x581   : > { %v2788_v10 = vpack.c.bf16 %v2756_v21, %v2756_v21  ;;  %v6853_v21 = vsel %vm789_vm1, %v17863_v18, 0  ;;  %v6829_v18 = vsel %vm789_vm1, %v14897_v46, 0 }
 0x582   : > { %2869 = vrot.lane.b32.xlu2 %v2795_v49, %s12759_s29 }
 0x583   : > { %v15454_v62 = vpop.f32.mrf.mxu2  ;;  %2865 = vrot.lane.b32.xlu1 %v2793_v14, %s12759_s29  ;;  %v3967_v14 = vpack.c.bf16 %v3935_v9, %v3935_v9 }
 0x584   : > { %2875 = vrot.lane.b32.xlu0 %v2798_v44, %s12759_s29  ;;  %v15461_v1 = vpop.permute.xlu2 %12557 }
 0x585   : > { %17851 = vst [vmem:[#allocation128_spill] sm:$0xff] %v15461_v1  ;;  %11545 = vmatmul.msk.bf16.vlgmr.msrb.gmra.mxu0 %vm789_vm1, %v17852_v17  ;;  %v15467_v49 = vpop.permute.xlu1 %9111  ;;  %v17857_v17 = vld [vmem:[#allocation16_spill] sm:$0xff] }
 0x586   : > { %17855 = vst [vmem:[#allocation73_spill] sm:$0xff] %v15467_v49  ;;  %v15469_v23 = vpop.permute.xlu0 %9041  ;;  %6742 = vmatpush.bf16.xpose.msrb.mxu0 %v6733_v12  ;;  %v3936_v26 = vmax.f32 %v17857_v17, 0.0  ;;  %v17859_v49 = vld [vmem:[#allocation87_spill] sm:$0xff] }
 0x587   : > { %17856 = vst [vmem:[#allocation101_spill] sm:$0xff] %v15469_v23  ;;  %v15471_v44 = vpop.f32.mrf.mxu3  ;;  %v2767_v23 = vmax.f32 %v17859_v49, 0.0  ;;  %v17860_v12 = vld [vmem:[#allocation131_spill] sm:$0xff] }
 0x588   : > { %v3934_v1 = vmax.f32 %v17860_v12, 0.0  ;;  %v17865_v12 = vld [vmem:[#allocation61_spill] sm:$0xff] }
 0x589   : > { %v2799_v17 = vpack.c.bf16 %v2767_v23, %v2767_v23  ;;  %v17867_v23 = vld [vmem:[#allocation65_spill] sm:$0xff] }
 0x58a   : > { %4044 = vrot.lane.b32.xlu2 %v3967_v14, %s12756_s23  ;;  %v17864_v14 = vld [vmem:[#allocation72_spill] sm:$0xff] }
 0x58b   : > { %v15474_v54 = vpop.f32.mrf.mxu2  ;;  %2855 = vrot.lane.b32.xlu1 %v2788_v10, %s12759_s29  ;;  %v3968_v10 = vpack.c.bf16 %v3936_v26, %v3936_v26  ;;  %v17868_v26 = vld [vmem:[#allocation137_spill] sm:$0xff] }
 0x58c   : > { %2853 = vrot.lane.b32.xlu0 %v2787_v55, %s12759_s29  ;;  %v15479_v19 = vpop.permute.xlu2 %12572 }
 0x58d   : > { %17858 = vst [vmem:[#allocation40_spill] sm:$0xff] %v15479_v19  ;;  %v15483_v27 = vpop.permute.xlu1 %8967  ;;  %v3966_v19 = vpack.c.bf16 %v3934_v1, %v3934_v1  ;;  %v2768_v1 = vmax.f32 %v17867_v23, 0.0 }
 0x58e   : > { %17861 = vst [vmem:[#allocation39_spill] sm:$0xff] %v15483_v27  ;;  %v15485_v9 = vpop.permute.xlu0 %9039  ;;  %11550 = vmatmul.msk.bf16.vlgmr.msra.gmra.mxu1 %vm789_vm1, %v17864_v14 }
 0x58f   : > { %17862 = vst [vmem:[#allocation103_spill] sm:$0xff] %v15485_v9  ;;  %v15491_v55 = vpop.f32.mrf.mxu3  ;;  %6862 = vmatpush.bf16.xpose.msra.mxu1 %v6853_v21  ;;  %v2781_v9 = vmax.f32 %v17865_v12, 0.0  ;;  %v3945_v21 = vmax.f32 %v17868_v26, 0.0  ;;  %v2800_v12 = vpack.c.bf16 %v2768_v1, %v2768_v1  ;;  %v17877_v1 = vld [vmem:[#allocation66_spill] sm:$0xff] }
 0x591   : > { %v3977_v7 = vpack.c.bf16 %v3945_v21, %v3945_v21  ;;  %v12399_v21 = vunpack.i.l.bf16 %v17877_v1 }
 0x592   : > { %4046 = vrot.lane.b32.xlu2 %v3968_v10, %s12756_s23 }
 0x593   : > { %v15494_v49 = vpop.f32.mrf.mxu2  ;;  %4042 = vrot.lane.b32.xlu1 %v3966_v19, %s12756_s23 }
 0x594   : > { %2877 = vrot.lane.b32.xlu0 %v2799_v17, %s12759_s29  ;;  %v15501_v14 = vpop.permute.xlu2 %12587  ;;  %v2813_v17 = vpack.c.bf16 %v2781_v9, %v2781_v9 }
 0x595   : > { %17866 = vst [vmem:[#allocation17_spill] sm:$0xff] %v15501_v14  ;;  %11549 = vmatmul.msk.bf16.vlgmr.msra.gmra.mxu0 %vm789_vm1, %v14857_v8  ;;  %v15507_v10 = vpop.permute.xlu1 %9063  ;;  %v17871_v8 = vld [vmem:[#allocation122_spill] sm:$0xff]  ;;  %v17873_v14 = vld [vmem:[#allocation113_spill] sm:$0xff] }
 0x596   : > { %17869 = vst [vmem:[#allocation19_spill] sm:$0xff] %v15507_v10  ;;  %v15509_v27 = vpop.permute.xlu0 %9137  ;;  %6838 = vmatpush.bf16.xpose.msra.mxu0 %v6829_v18  ;;  %v2778_v23 = vmax.f32 %v17871_v8, 0.0  ;;  %v17874_v18 = vld [vmem:[#allocation44_spill] sm:$0xff] }
 0x597   : > { %17870 = vst [vmem:[#allocation22_spill] sm:$0xff] %v15509_v27  ;;  %v15511_v19 = vpop.f32.mrf.mxu3  ;;  %v2764_v27 = vmax.f32 %v17873_v14, 0.0  ;;  %v3951_v10 = vmax.f32 %v17874_v18, 0.0  ;;  %v12405_v14 = vunpack.i.h.bf16 %v14955_v41 }
 0x599   : > { %v2796_v8 = vpack.c.bf16 %v2764_v27, %v2764_v27  ;;  %v17881_v27 = vld [vmem:[#allocation119_spill] sm:$0xff] }
 0x59a   : > { %2905 = vrot.lane.b32.xlu2 %v2813_v17, %s12759_s29  ;;  %v2810_v17 = vpack.c.bf16 %v2778_v23, %v2778_v23 }
 0x59b   : > { %v15514_v46 = vpop.f32.mrf.mxu2  ;;  %2879 = vrot.lane.b32.xlu1 %v2800_v12, %s12759_s29  ;;  %v12409_v12 = vunpack.i.l.bf16 %v14933_v61 }
 0x59c   : > { %4064 = vrot.lane.b32.xlu0 %v3977_v7, %s12756_s23  ;;  %v15519_v26 = vpop.permute.xlu2 %12602 }
 0x59d   : > { %17872 = vst [vmem:[#allocation15_spill] sm:$0xff] %v15519_v26  ;;  %v15523_v6 = vpop.permute.xlu1 %12532  ;;  %v3983_v26 = vpack.c.bf16 %v3951_v10, %v3951_v10  ;;  %v2777_v10 = vmax.f32 %v17881_v27, 0.0  ;;  %v17887_v27 = vld [vmem:[#allocation115_spill] sm:$0xff] }
 0x59e   : > { %17875 = vst [vmem:[#allocation110_spill] sm:$0xff] %v15523_v6  ;;  %v15525_v9 = vpop.permute.xlu0 %9065  ;;  %11554 = vmatmul.msk.bf16.vlgmr.msrb.gmra.mxu1 %vm789_vm1, %v14878_v52  ;;  %v17879_v52 = vld [vmem:[#allocation127_spill] sm:$0xff] }
 0x59f   : > { %17876 = vst [vmem:[#allocation102_spill] sm:$0xff] %v15525_v9  ;;  %7000 = vmatpush.msrb.mxu1 %v12399_v21  ;;  %v17880_v6 = vld [vmem:[#allocation75_spill] sm:$0xff]  ;;  %v17882_v21 = vld [vmem:[#allocation132_spill] sm:$0xff]  ;;  %v2809_v41 = vpack.c.bf16 %v2777_v10, %v2777_v10  ;;  %v12419_v10 = vunpack.i.l.bf16 %v14953_v29 }
 0x5a0   : > { %v15530_v7 = vpop.f32.mrf.mxu3 }
 0x5a1   : > { %17878 = vst [vmem:[#allocation91_spill] sm:$0xff] %v15530_v7  ;;  %7001 = vmatpush.msrb.mxu1 %v12409_v12  ;;  %v2780_v7 = vmax.f32 %v17879_v52, 0.0  ;;  %v3937_v12 = vmax.f32 %v17882_v21, 0.0  ;;  %v2770_v21 = vmax.f32 %v17887_v27, 0.0 }
 0x5a2   : > { %2899 = vrot.lane.b32.xlu2 %v2810_v17, %s12759_s29  ;;  %v17883_v17 = vld [vmem:[#allocation83_spill] sm:$0xff] }
 0x5a3   : > { %4076 = vrot.lane.b32.xlu1 %v3983_v26, %s12756_s23  ;;  %v12415_v9 = vunpack.i.h.bf16 %v17883_v17  ;;  %v2812_v52 = vpack.c.bf16 %v2780_v7, %v2780_v7  ;;  %v3969_v1 = vpack.c.bf16 %v3937_v12, %v3937_v12  ;;  %v17891_v12 = vld [vmem:[#allocation94_spill] sm:$0xff] }
 0x5a4   : > { %2871 = vrot.lane.b32.xlu0 %v2796_v8, %s12759_s29  ;;  %v15537_v18 = vpop.f32.mrf.mxu2  ;;  %v2858_v23 = vpop.permute.xlu2 %2857 }
 0x5a5   : > { %11553 = vmatmul.msk.bf16.vlgmr.msrb.gmra.mxu0 %vm789_vm1, %v17880_v6  ;;  %v15545_v61 = vpop.permute.xlu1 %12537  ;;  %2950 = vst.msk [vmem:[#allocation2 + $0x10] sm:$0xf] %vm2945_vm4, %v2858_v23 }
 0x5a6   : > { %17884 = vst [vmem:[#allocation58_spill] sm:$0xff] %v15545_v61  ;;  %v15548_v8 = vpop.permute.xlu0 %9159  ;;  %6965 = vmatpush.msrb.mxu0 %v12405_v14  ;;  %v17888_v61 = vld [vmem:[#allocation100_spill] sm:$0xff]  ;;  %v17889_v14 = vld [vmem:[#allocation125_spill] sm:$0xff] }
 0x5a7   : > { %17885 = vst [vmem:[#allocation18_spill] sm:$0xff] %v15548_v8  ;;  %v2782_v8 = vmax.f32 %v17888_v61, 0.0 }
 0x5a8   : > { %6966 = vmatpush.msrb.mxu0 %v12415_v9  ;;  %v15550_v26 = vpop.f32.mrf.mxu3  ;;  %v2779_v9 = vmax.f32 %v17889_v14, 0.0  ;;  %v12424_v14 = vunpack.i.l.bf16 %v17891_v12 }
 0x5a9   : > { %17886 = vst [vmem:[#allocation71_spill] sm:$0xff] %v15550_v26  ;;  %v2814_v61 = vpack.c.bf16 %v2782_v8, %v2782_v8  ;;  %v5097_v26 = vmax.f32 %v15111_v30, 0.0  ;;  %v17892_v8 = vld [vmem:[#allocation140_spill] sm:$0xff] }
 0x5aa   : > { %2903 = vrot.lane.b32.xlu2 %v2812_v52, %s12759_s29  ;;  %v12425_v52 = vunpack.i.h.bf16 %v17891_v12  ;;  %v2811_v27 = vpack.c.bf16 %v2779_v9, %v2779_v9  ;;  %v17893_v9 = vld [vmem:[#allocation112_spill] sm:$0xff] }
 0x5ab   : > { %2897 = vrot.lane.b32.xlu1 %v2809_v41, %s12759_s29 }
 0x5ac   : > { %4048 = vrot.lane.b32.xlu0 %v3969_v1, %s12756_s23  ;;  %v15555_v6 = vpop.f32.mrf.mxu2  ;;  %v2864_v23 = vpop.permute.xlu2 %2863  ;;  %v2802_v1 = vpack.c.bf16 %v2770_v21, %v2770_v21 }
 0x5ad   : > { %v15560_v17 = vpop.permute.xlu1 %12552  ;;  %2953 = vst.msk [vmem:[#allocation2 + $0x1c] sm:$0xf] %vm2945_vm4, %v2864_v23  ;;  %v12310_v23 = vunpack.i.h.bf16 %v17825_v32  ;;  %v12315_v32 = vunpack.i.h.bf16 %v17831_v43 }
 0x5ae   : > { %17890 = vst [vmem:[#allocation70_spill] sm:$0xff] %v15560_v17  ;;  %v15563_v7 = vpop.permute.xlu0 %9183  ;;  %11558 = vmatmul.msk.bf16.vlgmr.msra.gmra.mxu1 %vm789_vm1, %v14876_v5 }
 0x5af   : > { %7140 = vmatpush.msra.mxu1 %v12419_v10  ;;  %v2769_v10 = vmax.f32 %v17893_v9, 0.0 }
 0x5b0   : > { %v15568_v41 = vpop.f32.mrf.mxu3 }
 0x5b1   : > { %7141 = vmatpush.msra.mxu1 %v12425_v52  ;;  %v12430_v52 = vunpack.i.h.bf16 %v14996_v36 }
 0x5b2   : > { %2883 = vrot.lane.b32.xlu2 %v2802_v1, %s12759_s29  ;;  %v17894_v1 = vld [vmem:[#allocation143_spill] sm:$0xff] }
 0x5b3   : > { %2901 = vrot.lane.b32.xlu1 %v2811_v27, %s12759_s29  ;;  %v3950_v12 = vmax.f32 %v17894_v1, 0.0  ;;  %v3924_v1 = vmax.f32 %v14943_v11, 0.0 }
 0x5b4   : > { %2907 = vrot.lane.b32.xlu0 %v2814_v61, %s12759_s29  ;;  %v5335_v5 = vpop.f32.mrf.mxu2  ;;  %v15577_v21 = vpop.permute.xlu2 %4028 }
 0x5b5   : > { %11511 = vmatmul.msk.f32.vlgmr.msra.gmra.mxu2 %vm1215_vm2, %v5335_v5  ;;  %11557 = vmatmul.msk.bf16.vlgmr.msra.gmra.mxu0 %vm789_vm1, %v17892_v8  ;;  %v15586_v61 = vpop.permute.xlu1 %12567  ;;  %v5129_v5 = vpack.c.bf16 %v5097_v26, %v5097_v26  ;;  %v2801_v8 = vpack.c.bf16 %v2769_v10, %v2769_v10  ;;  %v3982_v17 = vpack.c.bf16 %v3950_v12, %v3950_v12  ;;  %v5096_v26 = vmax.f32 %v15149_v60, 0.0  ;;  %v17897_v12 = vld [vmem:[#allocation109_spill] sm:$0xff] }
 0x5b6   : > { %17895 = vst [vmem:[#allocation25_spill] sm:$0xff] %v15586_v61  ;;  %v15588_v27 = vpop.permute.xlu0 %12547  ;;  %6006 = vmatpush.msra.mxu2 %v12310_v23  ;;  %7105 = vmatpush.msra.mxu0 %v12424_v14  ;;  %v5095_v14 = vmax.f32 %v15130_v16, 0.0  ;;  %v17898_v16 = vld [vmem:[#allocation24_spill] sm:$0xff]  ;;  %v12320_v60 = vunpack.i.h.bf16 %v17897_v12 }
 0x5b7   : > { %v12324_v61 = vunpack.i.l.bf16 %v17898_v16 }
 0x5b8   : > { %6007 = vmatpush.msra.mxu2 %v12315_v32  ;;  %7106 = vmatpush.msra.mxu0 %v12430_v52  ;;  %v15590_v30 = vpop.f32.mrf.mxu3  ;;  %v5127_v11 = vpack.c.bf16 %v5095_v14, %v5095_v14 }
 0x5ba   : > { %5199 = vrot.lane.b32.xlu2 %v5129_v5, %s12755_s20  ;;  %v3956_v5 = vpack.c.bf16 %v3924_v1, %v3924_v1 }
 0x5bb   : > { %v15593_v43 = vpop.f32.mrf.mxu1  ;;  %2881 = vrot.lane.b32.xlu1 %v2801_v8, %s12759_s29  ;;  %v5128_v8 = vpack.c.bf16 %v5096_v26, %v5096_v26  ;;  %v12325_v26 = vunpack.i.h.bf16 %v17898_v16  ;;  %v3930_v16 = vmax.f32 %v14958_v37, 0.0 }
 0x5bc   : > { %4074 = vrot.lane.b32.xlu0 %v3982_v17, %s12756_s23  ;;  %v5337_v9 = vpop.f32.mrf.mxu2  ;;  %v2874_v23 = vpop.permute.xlu2 %2873  ;;  %v12319_v17 = vunpack.i.l.bf16 %v17897_v12 }
 0x5bd   : > { %11512 = vmatmul.msk.f32.gmra.mxu2 %vm1215_vm2, %v5337_v9  ;;  %v15601_v10 = vpop.permute.xlu1 %12582  ;;  %2958 = vst.msk [vmem:[#allocation2 + $0x30] sm:$0xf] %vm2945_vm4, %v2874_v23  ;;  %v5106_v23 = vmax.f32 %v15179_v3, 0.0 }
 0x5be   : > { %17896 = vst [vmem:[#allocation129_spill] sm:$0xff] %v15601_v10  ;;  %v15603_v32 = vpop.permute.xlu0 %12562 }
 0x5bf   : > { %v5138_v3 = vpack.c.bf16 %v5106_v23, %v5106_v23  ;;  %v5098_v23 = vmax.f32 %v15132_v63, 0.0 }
 0x5c0   : > { %v5359_v52 = vpop.f32.mrf.mxu3 }
 0x5c1   : > { %11513 = vmatmul.msk.f32.vlgmr.msra.gmra.mxu3 %vm1215_vm2, %v5359_v52  ;;  %v5104_v52 = vmax.f32 %v15188_v50, 0.0  ;;  %v5130_v37 = vpack.c.bf16 %v5098_v23, %v5098_v23 }
 0x5c2   : > { %6041 = vmatpush.msra.mxu3 %v12319_v17  ;;  %v15608_v9 = vpop.f32.mrf.mxu0  ;;  %4022 = vrot.lane.b32.xlu2 %v3956_v5, %s12756_s23  ;;  %v5103_v17 = vmax.f32 %v15170_v40, 0.0 }
 0x5c3   : > { %v15613_v10 = vpop.f32.mrf.mxu1  ;;  %5197 = vrot.lane.b32.xlu1 %v5128_v8, %s12755_s20  ;;  %v5136_v8 = vpack.c.bf16 %v5104_v52, %v5104_v52  ;;  %v17899_v52 = vld [vmem:[#allocation69_spill] sm:$0xff] }
 0x5c4   : > { %5195 = vrot.lane.b32.xlu0 %v5127_v11, %s12755_s20  ;;  %v5431_v1 = vpop.f32.mrf.mxu2  ;;  %6042 = vmatpush.msra.mxu3 %v12324_v61  ;;  %v2852_v14 = vpop.permute.xlu2 %2851  ;;  %v5135_v61 = vpack.c.bf16 %v5103_v17, %v5103_v17 }
 0x5c5   : > { %11519 = vmatmul.msk.f32.vlgmr.msrb.gmra.mxu2 %vm1215_vm2, %v5431_v1  ;;  %v15622_v12 = vpop.permute.xlu1 %12597  ;;  %2947 = vst.msk [vmem:[#allocation2 + $0x4] sm:$0xf] %vm2945_vm4, %v2852_v14  ;;  %v5105_v14 = vmax.f32 %v15159_v15, 0.0  ;;  %v12340_v15 = vunpack.i.h.bf16 %v17899_v52 }
 0x5c6   : > { %v15624_v5 = vpop.permute.xlu0 %12577  ;;  %6146 = vmatpush.msrb.mxu2 %v12320_v60 }
 0x5c8   : > { %6147 = vmatpush.msrb.mxu2 %v12325_v26  ;;  %v5361_v11 = vpop.f32.mrf.mxu3 }
 0x5c9   : > { %11514 = vmatmul.msk.f32.gmra.mxu3 %vm1215_vm2, %v5361_v11  ;;  %v12339_v11 = vunpack.i.l.bf16 %v17899_v52  ;;  %v3922_v52 = vmax.f32 %v14920_v57, 0.0 }
 0x5ca   : > { %v15628_v1 = vpop.f32.mrf.mxu0  ;;  %5217 = vrot.lane.b32.xlu2 %v5138_v3, %s12755_s20 }
 0x5cb   : > { %v15631_v40 = vpop.f32.mrf.mxu1  ;;  %5213 = vrot.lane.b32.xlu1 %v5136_v8, %s12755_s20  ;;  %v5137_v8 = vpack.c.bf16 %v5105_v14, %v5105_v14 }
 0x5cc   : > { %5211 = vrot.lane.b32.xlu0 %v5135_v61, %s12755_s20  ;;  %v5433_v50 = vpop.f32.mrf.mxu2  ;;  %v2868_v60 = vpop.permute.xlu2 %2867  ;;  %v3962_v61 = vpack.c.bf16 %v3930_v16, %v3930_v16 }
 0x5cd   : > { %11520 = vmatmul.msk.f32.gmra.mxu2 %vm1215_vm2, %v5433_v50  ;;  %v2862_v26 = vpop.permute.xlu1 %2861  ;;  %2955 = vst.msk [vmem:[#allocation2 + $0x24] sm:$0xf] %vm2945_vm4, %v2868_v60  ;;  %v17900_v60 = vld [vmem:[#allocation27_spill] sm:$0xff] }
 0x5ce   : > { %v15639_v17 = vpop.permute.xlu0 %12592  ;;  %2952 = vst.msk [vmem:[#allocation2 + $0x18] sm:$0xf] %vm2945_vm4, %v2862_v26  ;;  %v6493_v16 = vsel %vm789_vm1, %v17900_v60, 0  ;;  %v5120_v26 = vmax.f32 %v15273_v13, 0.0  ;;  %v3954_v13 = vpack.c.bf16 %v3922_v52, %v3922_v52  ;;  %v5119_v52 = vmax.f32 %v15254_v25, 0.0 }
 0x5d0   : > { %v5455_v3 = vpop.f32.mrf.mxu3  ;;  %v5151_v25 = vpack.c.bf16 %v5119_v52, %v5119_v52  ;;  %v5114_v52 = vmax.f32 %v15219_v45, 0.0 }
 0x5d1   : > { %11521 = vmatmul.msk.f32.vlgmr.msrb.gmra.mxu3 %vm1215_vm2, %v5455_v3 }
 0x5d2   : > { %6181 = vmatpush.msrb.mxu3 %v12339_v11  ;;  %v15645_v50 = vpop.f32.mrf.mxu0  ;;  %4034 = vrot.lane.b32.xlu2 %v3962_v61, %s12756_s23  ;;  %v3923_v11 = vmax.f32 %v14940_v59, 0.0  ;;  %v3948_v59 = vmax.f32 %v15066_v38, 0.0  ;;  %v17901_v38 = vld [vmem:[#allocation118_spill] sm:$0xff] }
 0x5d3   : > { %5215 = vrot.lane.b32.xlu1 %v5137_v8, %s12755_s20  ;;  %v15654_v23 = vpop.f32.mrf.mxu1  ;;  %v5152_v8 = vpack.c.bf16 %v5120_v26, %v5120_v26  ;;  %v3925_v26 = vmax.f32 %v14964_v51, 0.0  ;;  %v6272_v45 = vmax.f32 %v15645_v50, 0.0 }
 0x5d4   : > { %5201 = vrot.lane.b32.xlu0 %v5130_v37, %s12755_s20  ;;  %v5527_v63 = vpop.f32.mrf.mxu2  ;;  %6182 = vmatpush.msrb.mxu3 %v12340_v15  ;;  %v4063_v14 = vpop.permute.xlu2 %4062  ;;  %v3955_v60 = vpack.c.bf16 %v3923_v11, %v3923_v11 }
 0x5d5   : > { %11527 = vmatmul.msk.f32.vlgmr.msra.gmra.mxu2 %vm1215_vm2, %v5527_v63  ;;  %v4027_v61 = vpop.permute.xlu1 %4026  ;;  %v3957_v51 = vpack.c.bf16 %v3925_v26, %v3925_v26  ;;  %v5113_v26 = vmax.f32 %v15199_v53, 0.0 }
 0x5d6   : > { %v15659_v3 = vpop.permute.xlu0 %12607  ;;  %6502 = vmatpush.bf16.xpose.msra.mxu2 %v6493_v16  ;;  %4119 = vst.msk [vmem:[#allocation2 + $0x10] sm:$0xf] %vm4114_vm5, %v4027_v61 }
 0x5d8   : > { %v5457_v37 = vpop.f32.mrf.mxu3 }
 0x5d9   : > { %11522 = vmatmul.msk.f32.gmra.mxu3 %vm1215_vm2, %v5457_v37 }
 0x5da   : > { %v15663_v15 = vpop.f32.mrf.mxu0  ;;  %5245 = vrot.lane.b32.xlu2 %v5152_v8, %s12755_s20  ;;  %v6517_v8 = vsel %vm789_vm1, %v17901_v38, 0 }
 0x5db   : > { %4020 = vrot.lane.b32.xlu1 %v3955_v60, %s12756_s23  ;;  %v15669_v63 = vpop.f32.mrf.mxu1 }
 0x5dc   : > { %4018 = vrot.lane.b32.xlu0 %v3954_v13, %s12756_s23  ;;  %v5529_v57 = vpop.f32.mrf.mxu2  ;;  %v2870_v16 = vpop.permute.xlu2 %2869  ;;  %v3980_v13 = vpack.c.bf16 %v3948_v59, %v3948_v59  ;;  %v6264_v59 = vmax.f32 %v15608_v9, 0.0  ;;  %v5145_v9 = vpack.c.bf16 %v5113_v26, %v5113_v26 }
 0x5dd   : > { %11528 = vmatmul.msk.f32.gmra.mxu2 %vm1215_vm2, %v5529_v57  ;;  %v2896_v61 = vpop.permute.xlu1 %2895  ;;  %2956 = vst.msk [vmem:[#allocation2 + $0x28] sm:$0xf] %vm2945_vm4, %v2870_v16  ;;  %v17902_v57 = vld [vmem:[#allocation130_spill] sm:$0xff] }
 0x5de   : > { %v2860_v11 = vpop.permute.xlu0 %2859  ;;  %2969 = vst.msk [vmem:[#allocation2 + $0x5c] sm:$0xf] %vm2945_vm4, %v2896_v61  ;;  %v6589_v16 = vsel %vm789_vm1, %v17902_v57, 0  ;;  %v3931_v57 = vmax.f32 %v14982_v47, 0.0  ;;  %v17904_v47 = vld [vmem:[#allocation135_spill] sm:$0xff] }
 0x5df   : > { %2951 = vst.msk [vmem:[#allocation2 + $0x14] sm:$0xf] %vm2945_vm4, %v2860_v11 }
 0x5e0   : > { %4120 = vst.msk [vmem:[#allocation2 + $0x14] sm:$0xf] %vm4114_vm5, %v15577_v21  ;;  %v5551_v37 = vpop.f32.mrf.mxu3 }
 0x5e1   : > { %11529 = vmatmul.msk.f32.vlgmr.msra.gmra.mxu3 %vm1215_vm2, %v5551_v37 }
 0x5e2   : > { %6526 = vmatpush.bf16.xpose.msra.mxu3 %v6517_v8  ;;  %v15682_v60 = vpop.f32.mrf.mxu0  ;;  %4070 = vrot.lane.b32.xlu2 %v3980_v13, %s12756_s23  ;;  %v6296_v13 = vpack.c.bf16 %v6264_v59, %v6264_v59 }
 0x5e3   : > { %5243 = vrot.lane.b32.xlu1 %v5151_v25, %s12755_s20  ;;  %v15690_v11 = vpop.f32.mrf.mxu1 }
 0x5e4   : > { %4024 = vrot.lane.b32.xlu0 %v3957_v51, %s12756_s23  ;;  %v5623_v21 = vpop.f32.mrf.mxu2  ;;  %v4045_v61 = vpop.permute.xlu2 %4044  ;;  %v5146_v51 = vpack.c.bf16 %v5114_v52, %v5114_v52 }
 0x5e5   : > { %11535 = vmatmul.msk.f32.vlgmr.msrb.gmra.mxu2 %vm1215_vm2, %v5623_v21  ;;  %v2850_v38 = vpop.permute.xlu1 %2849 }
 0x5e6   : > { %v2894_v37 = vpop.permute.xlu0 %2893  ;;  %6598 = vmatpush.bf16.xpose.msrb.mxu2 %v6589_v16  ;;  %2946 = vst.msk [vmem:[#allocation2] sm:$0xf] %vm2945_vm4, %v2850_v38  ;;  %v3933_v16 = vmax.f32 %v15008_v2, 0.0  ;;  %v6304_v38 = vpack.c.bf16 %v6272_v45, %v6272_v45  ;;  %v6685_v2 = vsel %vm789_vm1, %v17904_v47, 0 }
 0x5e7   : > { %2968 = vst.msk [vmem:[#allocation2 + $0x58] sm:$0xf] %vm2945_vm4, %v2894_v37  ;;  %v17903_v37 = vld [vmem:[#allocation126_spill] sm:$0xff] }
 0x5e8   : > { %4137 = vst.msk [vmem:[#allocation2 + $0x58] sm:$0xf] %vm4114_vm5, %v4063_v14  ;;  %v5553_v8 = vpop.f32.mrf.mxu3  ;;  %v6613_v50 = vsel %vm789_vm1, %v17903_v37, 0 }
 0x5e9   : > { %11530 = vmatmul.msk.f32.gmra.mxu3 %vm1215_vm2, %v5553_v8  ;;  %v3963_v8 = vpack.c.bf16 %v3931_v57, %v3931_v57  ;;  %v3932_v57 = vmax.f32 %v14988_v4, 0.0 }
 0x5ea   : > { %v15699_v25 = vpop.f32.mrf.mxu0  ;;  %6364 = vrot.lane.b32.xlu2 %v6296_v13, %s12753_s26  ;;  %v3965_v13 = vpack.c.bf16 %v3933_v16, %v3933_v16  ;;  %v3939_v16 = vmax.f32 %v15022_v48, 0.0  ;;  %v17906_v48 = vld [vmem:[#allocation151_spill] sm:$0xff] }
 0x5eb   : > { %5233 = vrot.lane.b32.xlu1 %v5146_v51, %s12755_s20  ;;  %v15705_v14 = vpop.f32.mrf.mxu1  ;;  %v6267_v51 = vmax.f32 %v15613_v10, 0.0 }
 0x5ec   : > { %5231 = vrot.lane.b32.xlu0 %v5145_v9, %s12755_s20  ;;  %v5625_v53 = vpop.f32.mrf.mxu2  ;;  %v15707_v21 = vpop.permute.xlu2 %4046 }
 0x5ed   : > { %11536 = vmatmul.msk.f32.gmra.mxu2 %vm1215_vm2, %v5625_v53  ;;  %v4033_v26 = vpop.permute.xlu1 %4032  ;;  %v6299_v37 = vpack.c.bf16 %v6267_v51, %v6267_v51 }
 0x5ee   : > { %v4031_v59 = vpop.permute.xlu0 %4030  ;;  %4122 = vst.msk [vmem:[#allocation2 + $0x1c] sm:$0xf] %vm4114_vm5, %v4033_v26 }
 0x5ef   : > { %4121 = vst.msk [vmem:[#allocation2 + $0x18] sm:$0xf] %vm4114_vm5, %v4031_v59  ;;  %v17905_v59 = vld [vmem:[#allocation114_spill] sm:$0xff] }
 0x5f0   : > { %v5647_v52 = vpop.f32.mrf.mxu3 }
 0x5f1   : > { %11537 = vmatmul.msk.f32.vlgmr.msrb.gmra.mxu3 %vm1215_vm2, %v5647_v52 }
 0x5f2   : > { %6622 = vmatpush.bf16.xpose.msrb.mxu3 %v6613_v50  ;;  %v15717_v9 = vpop.f32.mrf.mxu0  ;;  %6380 = vrot.lane.b32.xlu2 %v6304_v38, %s12753_s26  ;;  %v3964_v50 = vpack.c.bf16 %v3932_v57, %v3932_v57  ;;  %v3971_v38 = vpack.c.bf16 %v3939_v16, %v3939_v16  ;;  %v17908_v16 = vld [vmem:[#allocation89_spill] sm:$0xff] }
 0x5f3   : > { %4040 = vrot.lane.b32.xlu1 %v3965_v13, %s12756_s23  ;;  %v15725_v53 = vpop.f32.mrf.mxu1 }
 0x5f4   : > { %4036 = vrot.lane.b32.xlu0 %v3963_v8, %s12756_s23  ;;  %v2906_v45 = vpop.permute.xlu2 %2905  ;;  %v12434_v8 = vunpack.i.l.bf16 %v17906_v48 }
 0x5f5   : > { %11543 = vmatmul.msk.bf16.vlgmr.msra.gmra.mxu2 %vm789_vm1, %v17905_v59  ;;  %v2866_v52 = vpop.permute.xlu1 %2865  ;;  %2974 = vst.msk [vmem:[#allocation2 + $0x70] sm:$0xf] %vm2945_vm4, %v2906_v45  ;;  %v3947_v45 = vmax.f32 %v15061_v24, 0.0 }
 0x5f6   : > { %v2876_v26 = vpop.permute.xlu0 %2875  ;;  %6694 = vmatpush.bf16.xpose.msra.mxu2 %v6685_v2  ;;  %2954 = vst.msk [vmem:[#allocation2 + $0x20] sm:$0xf] %vm2945_vm4, %v2866_v52  ;;  %v17907_v2 = vld [vmem:[#allocation152_spill] sm:$0xff] }
 0x5f7   : > { %2959 = vst.msk [vmem:[#allocation2 + $0x34] sm:$0xf] %vm2945_vm4, %v2876_v26  ;;  %v3938_v51 = vmax.f32 %v17907_v2, 0.0  ;;  %v12439_v26 = vunpack.i.l.bf16 %v17908_v16  ;;  %v6288_v2 = vmax.f32 %v15717_v9, 0.0 }
 0x5f8   : > { %4128 = vst.msk [vmem:[#allocation2 + $0x34] sm:$0xf] %vm4114_vm5, %v4045_v61  ;;  %v5649_v10 = vpop.f32.mrf.mxu3  ;;  %v5091_v61 = vmax.f32 %v15415_v20, 0.0  ;;  %v17909_v20 = vld [vmem:[#allocation43_spill] sm:$0xff] }
 0x5f9   : > { %11538 = vmatmul.msk.f32.gmra.mxu3 %vm1215_vm2, %v5649_v10  ;;  %v6709_v52 = vsel %vm789_vm1, %v17909_v20, 0  ;;  %v3970_v24 = vpack.c.bf16 %v3938_v51, %v3938_v51  ;;  %v6320_v9 = vpack.c.bf16 %v6288_v2, %v6288_v2 }
 0x5fa   : > { %v15736_v4 = vpop.f32.mrf.mxu0  ;;  %6370 = vrot.lane.b32.xlu2 %v6299_v37, %s12753_s26  ;;  %v5123_v10 = vpack.c.bf16 %v5091_v61, %v5091_v61  ;;  %v17910_v37 = vld [vmem:[#allocation36_spill] sm:$0xff] }
 0x5fb   : > { %4052 = vrot.lane.b32.xlu1 %v3971_v38, %s12756_s23  ;;  %v6576_v13 = vpop.f32.mrf.mxu1 }
 0x5fc   : > { %4038 = vrot.lane.b32.xlu0 %v3964_v50, %s12756_s23  ;;  %v2900_v47 = vpop.permute.xlu2 %2899  ;;  %11565 = vmatmul.msk.f32.vlgmr.msrb.gmra.mxu1 %vm1215_vm2, %v6576_v13  ;;  %v3979_v50 = vpack.c.bf16 %v3947_v45, %v3947_v45  ;;  %v12435_v13 = vunpack.i.h.bf16 %v17906_v48  ;;  %v3946_v48 = vmax.f32 %v15039_v56, 0.0 }
 0x5fd   : > { %v2856_v57 = vpop.permute.xlu1 %2855  ;;  %2971 = vst.msk [vmem:[#allocation2 + $0x64] sm:$0xf] %vm2945_vm4, %v2900_v47  ;;  %7280 = vmatpush.msrb.mxu1 %v12434_v8  ;;  %v17911_v8 = vld [vmem:[#allocation142_spill] sm:$0xff]  ;;  %v12440_v47 = vunpack.i.h.bf16 %v17908_v16 }
 0x5fe   : > { %v2854_v59 = vpop.permute.xlu0 %2853  ;;  %2949 = vst.msk [vmem:[#allocation2 + $0xc] sm:$0xf] %vm2945_vm4, %v2856_v57  ;;  %v6781_v61 = vsel %vm789_vm1, %v17911_v8, 0  ;;  %v6266_v57 = vmax.f32 %v15593_v43, 0.0  ;;  %v3978_v16 = vpack.c.bf16 %v3946_v48, %v3946_v48  ;;  %v12444_v43 = vunpack.i.l.bf16 %v15034_v28  ;;  %v17913_v8 = vld [vmem:[#allocation85_spill] sm:$0xff] }
 0x5ff   : > { %2948 = vst.msk [vmem:[#allocation2 + $0x8] sm:$0xf] %vm2945_vm4, %v2854_v59  ;;  %7281 = vmatpush.msrb.mxu1 %v12439_v26  ;;  %v17912_v59 = vld [vmem:[#allocation124_spill] sm:$0xff]  ;;  %v17916_v48 = vld [vmem:[#allocation97_spill] sm:$0xff] }
 0x600   : > { %v6298_v56 = vpack.c.bf16 %v6266_v57, %v6266_v57  ;;  %v12374_v57 = vunpack.i.l.bf16 %v17916_v48 }
 0x601   : > { %11544 = vmatmul.msk.bf16.vlgmr.msra.gmra.mxu3 %vm789_vm1, %v17910_v37 }
 0x602   : > { %6718 = vmatpush.bf16.xpose.msra.mxu3 %v6709_v52  ;;  %v6552_v38 = vpop.f32.mrf.mxu0  ;;  %5187 = vrot.lane.b32.xlu2 %v5123_v10, %s12755_s20  ;;  %v5094_v10 = vmax.f32 %v15471_v44, 0.0  ;;  %v17914_v44 = vld [vmem:[#allocation74_spill] sm:$0xff] }
 0x603   : > { %11563 = vmatmul.msk.f32.vlgmr.msrb.gmra.mxu0 %vm1215_vm2, %v6552_v38  ;;  %4068 = vrot.lane.b32.xlu1 %v3979_v50, %s12756_s23  ;;  %v6578_v51 = vpop.f32.mrf.mxu1  ;;  %v6275_v50 = vmax.f32 %v15654_v23, 0.0 }
 0x604   : > { %4050 = vrot.lane.b32.xlu0 %v3970_v24, %s12756_s23  ;;  %7245 = vmatpush.msrb.mxu0 %v12435_v13  ;;  %v2904_v45 = vpop.permute.xlu2 %2903  ;;  %v3949_v24 = vmax.f32 %v15087_v42, 0.0  ;;  %v5126_v2 = vpack.c.bf16 %v5094_v10, %v5094_v10  ;;  %v17915_v42 = vld [vmem:[#allocation35_spill] sm:$0xff] }
 0x605   : > { %11547 = vmatmul.msk.bf16.vlgmr.msrb.gmra.mxu2 %vm789_vm1, %v17912_v59  ;;  %11566 = vmatmul.msk.f32.gmra.mxu1 %vm1215_vm2, %v6578_v51  ;;  %v4043_v20 = vpop.permute.xlu1 %4042  ;;  %2973 = vst.msk [vmem:[#allocation2 + $0x6c] sm:$0xf] %vm2945_vm4, %v2904_v45  ;;  %v6307_v51 = vpack.c.bf16 %v6275_v50, %v6275_v50  ;;  %v12445_v59 = vunpack.i.h.bf16 %v15034_v28  ;;  %v12375_v28 = vunpack.i.h.bf16 %v17916_v48 }
 0x606   : > { %v2878_v26 = vpop.permute.xlu0 %2877  ;;  %6790 = vmatpush.bf16.xpose.msrb.mxu2 %v6781_v61  ;;  %7246 = vmatpush.msrb.mxu0 %v12440_v47  ;;  %4127 = vst.msk [vmem:[#allocation2 + $0x30] sm:$0xf] %vm4114_vm5, %v4043_v20  ;;  %v12449_v61 = vunpack.i.l.bf16 %v17913_v8  ;;  %v6805_v47 = vsel %vm789_vm1, %v17914_v44, 0  ;;  %v3981_v23 = vpack.c.bf16 %v3949_v24, %v3949_v24  ;;  %v6283_v20 = vmax.f32 %v15690_v11, 0.0 }
 0x607   : > { %2960 = vst.msk [vmem:[#allocation2 + $0x38] sm:$0xf] %vm2945_vm4, %v2878_v26  ;;  %v12450_v26 = vunpack.i.h.bf16 %v17913_v8  ;;  %v6282_v44 = vmax.f32 %v15669_v63, 0.0 }
 0x608   : > { %4129 = vst.msk [vmem:[#allocation2 + $0x38] sm:$0xf] %vm4114_vm5, %v15707_v21  ;;  %v6315_v11 = vpack.c.bf16 %v6283_v20, %v6283_v20 }
 0x60a   : > { %v6554_v52 = vpop.f32.mrf.mxu0  ;;  %6412 = vrot.lane.b32.xlu2 %v6320_v9, %s12753_s26 }
 0x60b   : > { %11564 = vmatmul.msk.f32.gmra.mxu0 %vm1215_vm2, %v6554_v52  ;;  %6368 = vrot.lane.b32.xlu1 %v6298_v56, %s12753_s26  ;;  %v6672_v37 = vpop.f32.mrf.mxu1  ;;  %v17917_v56 = vld [vmem:[#allocation33_spill] sm:$0xff]  ;;  %v5093_v52 = vmax.f32 %v15451_v22, 0.0  ;;  %v5107_v22 = vmax.f32 %v15494_v49, 0.0 }
 0x60c   : > { %4066 = vrot.lane.b32.xlu0 %v3978_v16, %s12756_s23  ;;  %v2884_v21 = vpop.permute.xlu2 %2883 }
 0x60d   : > { %11573 = vmatmul.msk.f32.vlgmr.msra.gmra.mxu1 %vm1215_vm2, %v6672_v37  ;;  %v2880_v13 = vpop.permute.xlu1 %2879  ;;  %2963 = vst.msk [vmem:[#allocation2 + $0x44] sm:$0xf] %vm2945_vm4, %v2884_v21  ;;  %v5125_v21 = vpack.c.bf16 %v5093_v52, %v5093_v52  ;;  %v6274_v52 = vmax.f32 %v15631_v40, 0.0 }
 0x60e   : > { %v4065_v38 = vpop.permute.xlu0 %4064  ;;  %7420 = vmatpush.msra.mxu1 %v12444_v43  ;;  %2961 = vst.msk [vmem:[#allocation2 + $0x3c] sm:$0xf] %vm2945_vm4, %v2880_v13  ;;  %v6265_v43 = vmax.f32 %v15628_v1, 0.0  ;;  %v17918_v13 = vld [vmem:[#allocation147_spill] sm:$0xff] }
 0x60f   : > { %4138 = vst.msk [vmem:[#allocation2 + $0x5c] sm:$0xf] %vm4114_vm5, %v4065_v38  ;;  %v7734_v8 = vsel %vm789_vm1, %v17918_v13, 0  ;;  %v6306_v40 = vpack.c.bf16 %v6274_v52, %v6274_v52  ;;  %v5101_v13 = vmax.f32 %v15491_v55, 0.0 }
 0x610   : > { %7421 = vmatpush.msra.mxu1 %v12449_v61  ;;  %v6297_v24 = vpack.c.bf16 %v6265_v43, %v6265_v43  ;;  %v6273_v61 = vmax.f32 %v15663_v15, 0.0 }
 0x611   : > { %11548 = vmatmul.msk.bf16.vlgmr.msrb.gmra.mxu3 %vm789_vm1, %v17915_v42  ;;  %v17919_v42 = vld [vmem:[#allocation81_spill] sm:$0xff] }
 0x612   : > { %6814 = vmatpush.bf16.xpose.msrb.mxu3 %v6805_v47  ;;  %v6648_v45 = vpop.f32.mrf.mxu0  ;;  %5193 = vrot.lane.b32.xlu2 %v5126_v2, %s12755_s20  ;;  %v12379_v49 = vunpack.i.l.bf16 %v17919_v42  ;;  %v6305_v15 = vpack.c.bf16 %v6273_v61, %v6273_v61  ;;  %v12380_v20 = vunpack.i.h.bf16 %v17919_v42  ;;  %v17926_v42 = vld [vmem:[#allocation79_spill] sm:$0xff] }
 0x613   : > { %11571 = vmatmul.msk.f32.vlgmr.msra.gmra.mxu0 %vm1215_vm2, %v6648_v45  ;;  %6386 = vrot.lane.b32.xlu1 %v6307_v51, %s12753_s26  ;;  %v6674_v9 = vpop.f32.mrf.mxu1  ;;  %v17920_v51 = vld [vmem:[#allocation77_spill] sm:$0xff]  ;;  %v6314_v45 = vpack.c.bf16 %v6282_v44, %v6282_v44  ;;  %v17924_v44 = vld [vmem:[#allocation50_spill] sm:$0xff] }
 0x614   : > { %4072 = vrot.lane.b32.xlu0 %v3981_v23, %s12756_s23  ;;  %7385 = vmatpush.msra.mxu0 %v12445_v59  ;;  %v5200_v16 = vpop.permute.xlu2 %5199  ;;  %v5139_v23 = vpack.c.bf16 %v5107_v22, %v5107_v22  ;;  %v17921_v59 = vld [vmem:[#allocation80_spill] sm:$0xff] }
 0x615   : > { %11551 = vmatmul.msk.bf16.vlgmr.msra.gmra.mxu2 %vm789_vm1, %v17917_v56  ;;  %11574 = vmatmul.msk.f32.gmra.mxu1 %vm1215_vm2, %v6674_v9  ;;  %v4077_v37 = vpop.permute.xlu1 %4076  ;;  %5290 = vst.msk [vmem:[#allocation2 + $0x18] sm:$0xf] %vm5283_vm6, %v5200_v16  ;;  %v12384_v48 = vunpack.i.l.bf16 %v17921_v59  ;;  %v5102_v9 = vmax.f32 %v15511_v19, 0.0 }
 0x616   : > { %v2872_v10 = vpop.permute.xlu0 %2871  ;;  %6895 = vmatpush.msra.mxu2 %v12374_v57  ;;  %7386 = vmatpush.msra.mxu0 %v12450_v26  ;;  %v17922_v57 = vld [vmem:[#allocation42_spill] sm:$0xff] }
 0x617   : > { %2957 = vst.msk [vmem:[#allocation2 + $0x2c] sm:$0xf] %vm2945_vm4, %v2872_v10  ;;  %v7710_v26 = vsel %vm789_vm1, %v17922_v57, 0  ;;  %v5134_v19 = vpack.c.bf16 %v5102_v9, %v5102_v9  ;;  %v5118_v9 = vmax.f32 %v15590_v30, 0.0 }
 0x618   : > { %6896 = vmatpush.msra.mxu2 %v12375_v28  ;;  %v5100_v28 = vmax.f32 %v15474_v54, 0.0 }
 0x61a   : > { %v6650_v50 = vpop.f32.mrf.mxu0  ;;  %6402 = vrot.lane.b32.xlu2 %v6315_v11, %s12753_s26  ;;  %v17923_v11 = vld [vmem:[#allocation141_spill] sm:$0xff]  ;;  %v5132_v54 = vpack.c.bf16 %v5100_v28, %v5100_v28 }
 0x61b   : > { %11572 = vmatmul.msk.f32.gmra.mxu0 %vm1215_vm2, %v6650_v50  ;;  %5191 = vrot.lane.b32.xlu1 %v5125_v21, %s12755_s20  ;;  %v6768_v1 = vpop.f32.mrf.mxu1  ;;  %v12385_v21 = vunpack.i.h.bf16 %v17921_v59  ;;  %v5116_v50 = vmax.f32 %v15555_v6, 0.0  ;;  %v12389_v6 = vunpack.i.l.bf16 %v17924_v44 }
 0x61c   : > { %6366 = vrot.lane.b32.xlu0 %v6297_v24, %s12753_s26  ;;  %v4023_v38 = vpop.permute.xlu2 %4022 }
 0x61d   : > { %11581 = vmatmul.msk.f32.vlgmr.msrb.gmra.mxu1 %vm1215_vm2, %v6768_v1  ;;  %v2898_v2 = vpop.permute.xlu1 %2897  ;;  %4117 = vst.msk [vmem:[#allocation2 + $0x8] sm:$0xf] %vm4114_vm5, %v4023_v38  ;;  %v5092_v38 = vmax.f32 %v15433_v34, 0.0  ;;  %v5133_v34 = vpack.c.bf16 %v5101_v13, %v5101_v13  ;;  %v17929_v13 = vld [vmem:[#allocation172_spill] sm:$0xff] }
 0x61e   : > { %v4049_v47 = vpop.permute.xlu0 %4048  ;;  %7743 = vmatpush.bf16.xpose.msrb.mxu1 %v7734_v8  ;;  %2970 = vst.msk [vmem:[#allocation2 + $0x60] sm:$0xf] %vm2945_vm4, %v2898_v2  ;;  %v17925_v2 = vld [vmem:[#allocation145_spill] sm:$0xff] }
 0x61f   : > { %4130 = vst.msk [vmem:[#allocation2 + $0x3c] sm:$0xf] %vm4114_vm5, %v4049_v47  ;;  %v5148_v47 = vpack.c.bf16 %v5116_v50, %v5116_v50  ;;  %v17928_v50 = vld [vmem:[#allocation99_spill] sm:$0xff] }
 0x621   : > { %11552 = vmatmul.msk.bf16.vlgmr.msra.gmra.mxu3 %vm789_vm1, %v17920_v51 }
 0x622   : > { %6930 = vmatpush.msra.mxu3 %v12379_v49  ;;  %v6744_v63 = vpop.f32.mrf.mxu0  ;;  %5219 = vrot.lane.b32.xlu2 %v5139_v23, %s12755_s20  ;;  %v12394_v49 = vunpack.i.l.bf16 %v17926_v42  ;;  %v7806_v23 = vsel %vm789_vm1, %v15157_v35, 0 }
 0x623   : > { %11579 = vmatmul.msk.f32.vlgmr.msrb.gmra.mxu0 %vm1215_vm2, %v6744_v63  ;;  %6400 = vrot.lane.b32.xlu1 %v6314_v45, %s12753_s26  ;;  %v6770_v16 = vpop.f32.mrf.mxu1  ;;  %v5099_v45 = vmax.f32 %v15454_v62, 0.0  ;;  %v5115_v63 = vmax.f32 %v15537_v18, 0.0  ;;  %v7926_v18 = vsel %vm789_vm1, %v15153_v58, 0 }
 0x624   : > { %6382 = vrot.lane.b32.xlu0 %v6305_v15, %s12753_s26  ;;  %6931 = vmatpush.msra.mxu3 %v12384_v48  ;;  %v5218_v56 = vpop.permute.xlu2 %5217 }
 0x625   : > { %7719 = vmatpush.bf16.xpose.msrb.mxu0 %v7710_v26  ;;  %11582 = vmatmul.msk.f32.gmra.mxu1 %vm1215_vm2, %v6770_v16  ;;  %v2902_v10 = vpop.permute.xlu1 %2901  ;;  %5299 = vst.msk [vmem:[#allocation2 + $0x3c] sm:$0xf] %vm5283_vm6, %v5218_v56  ;;  %v5131_v57 = vpack.c.bf16 %v5099_v45, %v5099_v45  ;;  %v5147_v26 = vpack.c.bf16 %v5115_v63, %v5115_v63  ;;  %v6289_v16 = vmax.f32 %v15736_v4, 0.0  ;;  %v17933_v63 = vld [vmem:[#allocation21_spill] sm:$0xff] }
 0x626   : > { %v2908_v43 = vpop.permute.xlu0 %2907  ;;  %11555 = vmatmul.msk.bf16.vlgmr.msrb.gmra.mxu2 %vm789_vm1, %v17923_v11  ;;  %2972 = vst.msk [vmem:[#allocation2 + $0x68] sm:$0xf] %vm2945_vm4, %v2902_v10  ;;  %v5108_v10 = vmax.f32 %v15514_v46, 0.0  ;;  %v5117_v46 = vmax.f32 %v15568_v41, 0.0 }
 0x627   : > { %2975 = vst.msk [vmem:[#allocation2 + $0x74] sm:$0xf] %vm2945_vm4, %v2908_v43  ;;  %7035 = vmatpush.msrb.mxu2 %v12380_v20  ;;  %v5150_v43 = vpack.c.bf16 %v5118_v9, %v5118_v9  ;;  %v6321_v58 = vpack.c.bf16 %v6289_v16, %v6289_v16 }
 0x628   : > { %4144 = vst.msk [vmem:[#allocation2 + $0x74] sm:$0xf] %vm4114_vm5, %v4077_v37  ;;  %v7830_v37 = vsel %vm789_vm1, %v15115_v33, 0  ;;  %v5124_v33 = vpack.c.bf16 %v5092_v38, %v5092_v38  ;;  %v5149_v38 = vpack.c.bf16 %v5117_v46, %v5117_v46 }
 0x629   : > { %7036 = vmatpush.msrb.mxu2 %v12385_v21 }
 0x62a   : > { %v6746_v24 = vpop.f32.mrf.mxu0  ;;  %5209 = vrot.lane.b32.xlu2 %v5134_v19, %s12755_s20 }
 0x62b   : > { %11580 = vmatmul.msk.f32.gmra.mxu0 %vm1215_vm2, %v6746_v24  ;;  %5205 = vrot.lane.b32.xlu1 %v5132_v54, %s12755_s20  ;;  %v6864_v22 = vpop.f32.mrf.mxu1 }
 0x62c   : > { %6384 = vrot.lane.b32.xlu0 %v6306_v40, %s12753_s26  ;;  %v4035_v1 = vpop.permute.xlu2 %4034  ;;  %v17927_v40 = vld [vmem:[#allocation116_spill] sm:$0xff] }
 0x62d   : > { %11589 = vmatmul.msk.f32.vlgmr.msra.gmra.mxu1 %vm1215_vm2, %v6864_v22  ;;  %v2882_v61 = vpop.permute.xlu1 %2881  ;;  %4123 = vst.msk [vmem:[#allocation2 + $0x20] sm:$0xf] %vm4114_vm5, %v4035_v1  ;;  %v8022_v24 = vsel %vm789_vm1, %v17927_v40, 0 }
 0x62e   : > { %v4075_v8 = vpop.permute.xlu0 %4074  ;;  %7839 = vmatpush.bf16.xpose.msra.mxu1 %v7830_v37  ;;  %2962 = vst.msk [vmem:[#allocation2 + $0x40] sm:$0xf] %vm2945_vm4, %v2882_v61  ;;  %v17930_v61 = vld [vmem:[#allocation167_spill] sm:$0xff] }
 0x62f   : > { %4143 = vst.msk [vmem:[#allocation2 + $0x70] sm:$0xf] %vm4114_vm5, %v4075_v8  ;;  %v7998_v8 = vsel %vm789_vm1, %v17929_v13, 0  ;;  %v12390_v13 = vunpack.i.h.bf16 %v17924_v44 }
 0x631   : > { %11556 = vmatmul.msk.bf16.vlgmr.msrb.gmra.mxu3 %vm789_vm1, %v17925_v2 }
 0x632   : > { %7070 = vmatpush.msrb.mxu3 %v12389_v6  ;;  %v6840_v55 = vpop.f32.mrf.mxu0  ;;  %5237 = vrot.lane.b32.xlu2 %v5148_v47, %s12755_s20 }
 0x633   : > { %11587 = vmatmul.msk.f32.vlgmr.msra.gmra.mxu0 %vm1215_vm2, %v6840_v55  ;;  %5207 = vrot.lane.b32.xlu1 %v5133_v34, %s12755_s20  ;;  %v6866_v51 = vpop.f32.mrf.mxu1  ;;  %v17931_v55 = vld [vmem:[#allocation60_spill] sm:$0xff] }
 0x634   : > { %5189 = vrot.lane.b32.xlu0 %v5124_v33, %s12755_s20  ;;  %7071 = vmatpush.msrb.mxu3 %v12394_v49  ;;  %v5246_v15 = vpop.permute.xlu2 %5245  ;;  %v12479_v49 = vunpack.i.l.bf16 %v17931_v55 }
 0x635   : > { %7815 = vmatpush.bf16.xpose.msra.mxu0 %v7806_v23  ;;  %11590 = vmatmul.msk.f32.gmra.mxu1 %vm1215_vm2, %v6866_v51  ;;  %v5198_v48 = vpop.permute.xlu1 %5197  ;;  %5313 = vst.msk [vmem:[#allocation2 + $0x74] sm:$0xf] %vm5283_vm6, %v5246_v15  ;;  %v17932_v51 = vld [vmem:[#allocation169_spill] sm:$0xff] }
 0x636   : > { %v5196_v59 = vpop.permute.xlu0 %5195  ;;  %5289 = vst.msk [vmem:[#allocation2 + $0x14] sm:$0xf] %vm5283_vm6, %v5198_v48 }
 0x637   : > { %5288 = vst.msk [vmem:[#allocation2 + $0x10] sm:$0xf] %vm5283_vm6, %v5196_v59  ;;  %v12484_v59 = vunpack.i.l.bf16 %v17933_v63 }
 0x638   : > { %v15870_v35 = vpop.f32.mrf.mxu2 }
 0x63a   : > { %v6842_v20 = vpop.f32.mrf.mxu0 }
 0x63b   : > { %11588 = vmatmul.msk.f32.gmra.mxu0 %vm1215_vm2, %v6842_v20  ;;  %5235 = vrot.lane.b32.xlu1 %v5147_v26, %s12755_s20  ;;  %v17934_v26 = vld [vmem:[#allocation166_spill] sm:$0xff]  ;;  %v12485_v20 = vunpack.i.h.bf16 %v17933_v63 }
 0x63c   : > { %5203 = vrot.lane.b32.xlu0 %v5131_v57, %s12755_s20  ;;  %v4071_v62 = vpop.permute.xlu2 %4070  ;;  %v12480_v57 = vunpack.i.h.bf16 %v17931_v55 }
 0x63d   : > { %11594 = vmatmul.msk.bf16.vlgmr.msrb.gmra.mxu1 %vm789_vm1, %v15119_v39  ;;  %v5214_v28 = vpop.permute.xlu1 %5213  ;;  %4141 = vst.msk [vmem:[#allocation2 + $0x68] sm:$0xf] %vm4114_vm5, %v4071_v62  ;;  %v7902_v39 = vsel %vm789_vm1, %v15052_v31, 0  ;;  %v5140_v31 = vpack.c.bf16 %v5108_v10, %v5108_v10 }
 0x63e   : > { %v5212_v56 = vpop.permute.xlu0 %5211  ;;  %7935 = vmatpush.bf16.xpose.msrb.mxu1 %v7926_v18  ;;  %5297 = vst.msk [vmem:[#allocation2 + $0x34] sm:$0xf] %vm5283_vm6, %v5214_v28 }
 0x63f   : > { %5296 = vst.msk [vmem:[#allocation2 + $0x30] sm:$0xf] %vm5283_vm6, %v5212_v56 }
 0x640   : > { %v15884_v52 = vpop.f32.mrf.mxu2 }
 0x643   : > { %11593 = vmatmul.msk.bf16.vlgmr.msrb.gmra.mxu0 %vm789_vm1, %v15139_v0  ;;  %5241 = vrot.lane.b32.xlu1 %v5150_v43, %s12755_s20  ;;  %v17935_v43 = vld [vmem:[#allocation59_spill] sm:$0xff] }
 0x644   : > { %6414 = vrot.lane.b32.xlu0 %v6321_v58, %s12753_s26  ;;  %v15892_v30 = vpop.f32.mrf.mxu3  ;;  %7911 = vmatpush.bf16.xpose.msrb.mxu0 %v7902_v39  ;;  %v6365_v4 = vpop.permute.xlu2 %6364  ;;  %v12499_v58 = vunpack.i.l.bf16 %v17935_v43  ;;  %v12500_v40 = vunpack.i.h.bf16 %v17935_v43 }
 0x645   : > { %v5216_v21 = vpop.permute.xlu1 %5215  ;;  %6457 = vst.msk [vmem:[#allocation2 + $0x10] sm:$0xf] %vm6452_vm7, %v6365_v4  ;;  %v17936_v4 = vld [vmem:[#allocation168_spill] sm:$0xff] }
 0x646   : > { %v5202_v11 = vpop.permute.xlu0 %5201  ;;  %5298 = vst.msk [vmem:[#allocation2 + $0x38] sm:$0xf] %vm5283_vm6, %v5216_v21  ;;  %v17937_v21 = vld [vmem:[#allocation46_spill] sm:$0xff] }
 0x647   : > { %5291 = vst.msk [vmem:[#allocation2 + $0x1c] sm:$0xf] %vm5283_vm6, %v5202_v11  ;;  %v12505_v46 = vunpack.i.h.bf16 %v17937_v21 }
 0x648   : > { %v15898_v0 = vpop.f32.mrf.mxu2 }
 0x64c   : > { %5221 = vrot.lane.b32.xlu0 %v5140_v31, %s12755_s20  ;;  %v15901_v19 = vpop.f32.mrf.mxu3  ;;  %v6381_v54 = vpop.permute.xlu2 %6380  ;;  %v12504_v31 = vunpack.i.l.bf16 %v17937_v21 }
 0x64d   : > { %11598 = vmatmul.msk.bf16.vlgmr.msra.gmra.mxu1 %vm789_vm1, %v17928_v50  ;;  %v4021_v1 = vpop.permute.xlu1 %4020  ;;  %6465 = vst.msk [vmem:[#allocation2 + $0x30] sm:$0xf] %vm6452_vm7, %v6381_v54 }
 0x64e   : > { %v4019_v22 = vpop.permute.xlu0 %4018  ;;  %8031 = vmatpush.bf16.xpose.msra.mxu1 %v8022_v24  ;;  %4116 = vst.msk [vmem:[#allocation2 + $0x4] sm:$0xf] %vm4114_vm5, %v4021_v1  ;;  %v17938_v24 = vld [vmem:[#allocation120_spill] sm:$0xff] }
 0x64f   : > { %4115 = vst.msk [vmem:[#allocation2] sm:$0xf] %vm4114_vm5, %v4019_v22 }
 0x650   : > { %v15911_v37 = vpop.f32.mrf.mxu2 }
 0x653   : > { %11597 = vmatmul.msk.bf16.vlgmr.msra.gmra.mxu0 %vm789_vm1, %v17930_v61  ;;  %v12395_v61 = vunpack.i.h.bf16 %v17926_v42 }
 0x654   : > { %5239 = vrot.lane.b32.xlu0 %v5149_v38, %s12755_s20  ;;  %8007 = vmatpush.bf16.xpose.msra.mxu0 %v7998_v8  ;;  %v15918_v41 = vpop.f32.mrf.mxu3  ;;  %v6371_v6 = vpop.permute.xlu2 %6370 }
 0x655   : > { %v5244_v2 = vpop.permute.xlu1 %5243  ;;  %6460 = vst.msk [vmem:[#allocation2 + $0x1c] sm:$0xf] %vm6452_vm7, %v6371_v6 }
 0x656   : > { %v4025_v47 = vpop.permute.xlu0 %4024  ;;  %5312 = vst.msk [vmem:[#allocation2 + $0x70] sm:$0xf] %vm5283_vm6, %v5244_v2 }
 0x657   : > { %4118 = vst.msk [vmem:[#allocation2 + $0xc] sm:$0xf] %vm4114_vm5, %v4025_v47 }
 0x658   : > { %v15923_v33 = vpop.f32.mrf.mxu2 }
 0x65c   : > { %v15925_v34 = vpop.f32.mrf.mxu3  ;;  %v5188_v23 = vpop.permute.xlu2 %5187 }
 0x65d   : > { %11602 = vmatmul.msk.bf16.vlgmr.msrb.gmra.mxu1 %vm789_vm1, %v17932_v51  ;;  %v5234_v45 = vpop.permute.xlu1 %5233  ;;  %5284 = vst.msk [vmem:[#allocation2] sm:$0xf] %vm5283_vm6, %v5188_v23 }
 0x65e   : > { %v5232_v15 = vpop.permute.xlu0 %5231  ;;  %8169 = vmatpush.msrb.mxu1 %v12479_v49  ;;  %5307 = vst.msk [vmem:[#allocation2 + $0x5c] sm:$0xf] %vm5283_vm6, %v5234_v45 }
 0x65f   : > { %5306 = vst.msk [vmem:[#allocation2 + $0x58] sm:$0xf] %vm5283_vm6, %v5232_v15 }
 0x660   : > { %v15934_v48 = vpop.f32.mrf.mxu2  ;;  %8170 = vmatpush.msrb.mxu1 %v12484_v59  ;;  %v17939_v59 = vld [vmem:[#allocation66_spill] sm:$0xff] }
 0x663   : > { %11601 = vmatmul.msk.bf16.vlgmr.msrb.gmra.mxu0 %vm789_vm1, %v17934_v26 }
 0x664   : > { %8134 = vmatpush.msrb.mxu0 %v12480_v57  ;;  %v15940_v62 = vpop.f32.mrf.mxu3  ;;  %v6413_v18 = vpop.permute.xlu2 %6412  ;;  %v12400_v57 = vunpack.i.h.bf16 %v17939_v59  ;;  %v6262_v59 = vmax.f32 %v15892_v30, 0.0 }
 0x665   : > { %v4041_v9 = vpop.permute.xlu1 %4040  ;;  %6481 = vst.msk [vmem:[#allocation2 + $0x70] sm:$0xf] %vm6452_vm7, %v6413_v18  ;;  %v17940_v18 = vld [vmem:[#allocation93_spill] sm:$0xff] }
 0x666   : > { %v4037_v16 = vpop.permute.xlu0 %4036  ;;  %8135 = vmatpush.msrb.mxu0 %v12485_v20  ;;  %4126 = vst.msk [vmem:[#allocation2 + $0x2c] sm:$0xf] %vm4114_vm5, %v4041_v9  ;;  %v12410_v9 = vunpack.i.h.bf16 %v17940_v18 }
 0x667   : > { %4124 = vst.msk [vmem:[#allocation2 + $0x24] sm:$0xf] %vm4114_vm5, %v4037_v16 }
 0x668   : > { %v15945_v56 = vpop.f32.mrf.mxu2 }
 0x66c   : > { %v15947_v28 = vpop.f32.mrf.mxu3  ;;  %v5194_v39 = vpop.permute.xlu2 %5193 }
 0x66d   : > { %11606 = vmatmul.msk.bf16.vlgmr.msra.gmra.mxu1 %vm789_vm1, %v17936_v4  ;;  %v4053_v11 = vpop.permute.xlu1 %4052  ;;  %5287 = vst.msk [vmem:[#allocation2 + $0xc] sm:$0xf] %vm5283_vm6, %v5194_v39  ;;  %v17941_v39 = vld [vmem:[#allocation148_spill] sm:$0xff] }
 0x66e   : > { %v4039_v10 = vpop.permute.xlu0 %4038  ;;  %8309 = vmatpush.msra.mxu1 %v12499_v58  ;;  %4132 = vst.msk [vmem:[#allocation2 + $0x44] sm:$0xf] %vm4114_vm5, %v4053_v11  ;;  %v12404_v4 = vunpack.i.l.bf16 %v17941_v39 }
 0x66f   : > { %4125 = vst.msk [vmem:[#allocation2 + $0x28] sm:$0xf] %vm4114_vm5, %v4039_v10 }
 0x670   : > { %v15956_v54 = vpop.f32.mrf.mxu2  ;;  %8310 = vmatpush.msra.mxu1 %v12504_v31  ;;  %v17942_v31 = vld [vmem:[#allocation83_spill] sm:$0xff] }
 0x673   : > { %11605 = vmatmul.msk.bf16.vlgmr.msra.gmra.mxu0 %vm789_vm1, %v17938_v24 }
 0x674   : > { %8274 = vmatpush.msra.mxu0 %v12500_v40  ;;  %v15962_v50 = vpop.f32.mrf.mxu3  ;;  %v6403_v22 = vpop.permute.xlu2 %6402  ;;  %v12414_v40 = vunpack.i.l.bf16 %v17942_v31 }
 0x675   : > { %v4069_v38 = vpop.permute.xlu1 %4068  ;;  %6476 = vst.msk [vmem:[#allocation2 + $0x5c] sm:$0xf] %vm6452_vm7, %v6403_v22 }
 0x676   : > { %v4051_v1 = vpop.permute.xlu0 %4050  ;;  %8275 = vmatpush.msra.mxu0 %v12505_v46  ;;  %4140 = vst.msk [vmem:[#allocation2 + $0x64] sm:$0xf] %vm4114_vm5, %v4069_v38 }
 0x677   : > { %4131 = vst.msk [vmem:[#allocation2 + $0x40] sm:$0xf] %vm4114_vm5, %v4051_v1 }
 0x678   : > { %v6504_v8 = vpop.f32.mrf.mxu2 }
 0x679   : > { %11559 = vmatmul.msk.f32.vlgmr.msra.gmra.mxu2 %vm1215_vm2, %v6504_v8  ;;  %v7003_v6 = vpop.f32.mrf.mxu1 }
 0x67a   : > { %7175 = vmatpush.msra.mxu2 %v12390_v13  ;;  %v7435_v47 = vmax.f32 %v7003_v6, 0.0 }
 0x67c   : > { %7176 = vmatpush.msra.mxu2 %v12395_v61  ;;  %v15970_v2 = vpop.f32.mrf.mxu3  ;;  %v5220_v55 = vpop.permute.xlu2 %5219  ;;  %v7467_v49 = vpack.c.bf16 %v7435_v47, %v7435_v47 }
 0x67d   : > { %v6369_v51 = vpop.permute.xlu1 %6368  ;;  %5300 = vst.msk [vmem:[#allocation2 + $0x40] sm:$0xf] %vm5283_vm6, %v5220_v55 }
 0x67e   : > { %v4067_v23 = vpop.permute.xlu0 %4066  ;;  %6459 = vst.msk [vmem:[#allocation2 + $0x18] sm:$0xf] %vm6452_vm7, %v6369_v51  ;;  %7537 = vrot.lane.b32.xlu0 %v7467_v49, %s12750_s17 }
 0x67f   : > { %4139 = vst.msk [vmem:[#allocation2 + $0x60] sm:$0xf] %vm4114_vm5, %v4067_v23  ;;  %v12420_v23 = vunpack.i.h.bf16 %v14953_v29 }
 0x680   : > { %v6506_v44 = vpop.f32.mrf.mxu2  ;;  %v6968_v42 = vpop.f32.mrf.mxu0 }
 0x681   : > { %v7433_v15 = vmax.f32 %v6968_v42, 0.0  ;;  %11560 = vmatmul.msk.f32.gmra.mxu2 %vm1215_vm2, %v6506_v44  ;;  %v12429_v42 = vunpack.i.l.bf16 %v14996_v36  ;;  %v6261_v36 = vmax.f32 %v15884_v52, 0.0 }
 0x682   : > { %v7006_v63 = vpop.f32.mrf.mxu1 }
 0x683   : > { %v7465_v45 = vpack.c.bf16 %v7433_v15, %v7433_v15  ;;  %v7436_v58 = vmax.f32 %v7006_v63, 0.0 }
 0x684   : > { %v6528_v26 = vpop.f32.mrf.mxu3  ;;  %v5210_v20 = vpop.permute.xlu2 %5209 }
 0x685   : > { %11561 = vmatmul.msk.f32.vlgmr.msra.gmra.mxu3 %vm1215_vm2, %v6528_v26  ;;  %7533 = vrot.lane.b32.xlu1 %v7465_v45, %s12750_s17  ;;  %v6387_v43 = vpop.permute.xlu1 %6386  ;;  %5295 = vst.msk [vmem:[#allocation2 + $0x2c] sm:$0xf] %vm5283_vm6, %v5210_v20  ;;  %v7468_v24 = vpack.c.bf16 %v7436_v58, %v7436_v58  ;;  %v17943_v26 = vld [vmem:[#allocation150_spill] sm:$0xff]  ;;  %v6293_v58 = vpack.c.bf16 %v6261_v36, %v6261_v36 }
 0x686   : > { %v4073_v16 = vpop.permute.xlu0 %4072  ;;  %7210 = vmatpush.msra.mxu3 %v12400_v57  ;;  %6468 = vst.msk [vmem:[#allocation2 + $0x3c] sm:$0xf] %vm6452_vm7, %v6387_v43  ;;  %v7662_v20 = vsel %vm789_vm1, %v17943_v26, 0  ;;  %v17946_v36 = vld [vmem:[#allocation82_spill] sm:$0xff] }
 0x687   : > { %4142 = vst.msk [vmem:[#allocation2 + $0x6c] sm:$0xf] %vm4114_vm5, %v4073_v16 }
 0x688   : > { %7211 = vmatpush.msra.mxu3 %v12410_v9  ;;  %v6600_v10 = vpop.f32.mrf.mxu2  ;;  %v6971_v11 = vpop.f32.mrf.mxu0  ;;  %v6294_v9 = vpack.c.bf16 %v6262_v59, %v6262_v59 }
 0x689   : > { %v7434_v21 = vmax.f32 %v6971_v11, 0.0  ;;  %11567 = vmatmul.msk.f32.vlgmr.msrb.gmra.mxu2 %vm1215_vm2, %v6600_v10 }
 0x68a   : > { %7315 = vmatpush.msrb.mxu2 %v12404_v4  ;;  %v7143_v22 = vpop.f32.mrf.mxu1 }
 0x68b   : > { %v7466_v46 = vpack.c.bf16 %v7434_v21, %v7434_v21  ;;  %v7443_v10 = vmax.f32 %v7143_v22, 0.0 }
 0x68c   : > { %7316 = vmatpush.msrb.mxu2 %v12414_v40  ;;  %v6530_v1 = vpop.f32.mrf.mxu3  ;;  %v5238_v38 = vpop.permute.xlu2 %5237 }
 0x68d   : > { %11562 = vmatmul.msk.f32.gmra.mxu3 %vm1215_vm2, %v6530_v1  ;;  %7539 = vrot.lane.b32.xlu1 %v7468_v24, %s12750_s17  ;;  %v5192_v8 = vpop.permute.xlu1 %5191  ;;  %5309 = vst.msk [vmem:[#allocation2 + $0x64] sm:$0xf] %vm5283_vm6, %v5238_v38  ;;  %v7475_v40 = vpack.c.bf16 %v7443_v10, %v7443_v10  ;;  %v17944_v1 = vld [vmem:[#allocation52_spill] sm:$0xff] }
 0x68e   : > { %v6367_v13 = vpop.permute.xlu0 %6366  ;;  %7535 = vrot.lane.b32.xlu2 %v7466_v46, %s12750_s17  ;;  %5286 = vst.msk [vmem:[#allocation2 + $0x8] sm:$0xf] %vm5283_vm6, %v5192_v8  ;;  %v7686_v38 = vsel %vm789_vm1, %v17944_v1, 0  ;;  %v17950_v1 = vld [vmem:[#allocation41_spill] sm:$0xff] }
 0x68f   : > { %6458 = vst.msk [vmem:[#allocation2 + $0x14] sm:$0xf] %vm6452_vm7, %v6367_v13 }
 0x690   : > { %v6602_v61 = vpop.f32.mrf.mxu2  ;;  %v7108_v6 = vpop.f32.mrf.mxu0 }
 0x691   : > { %v7441_v47 = vmax.f32 %v7108_v6, 0.0  ;;  %11568 = vmatmul.msk.f32.gmra.mxu2 %vm1215_vm2, %v6602_v61  ;;  %v6260_v6 = vmax.f32 %v15870_v35, 0.0 }
 0x692   : > { %v7146_v49 = vpop.f32.mrf.mxu1 }
 0x693   : > { %v7473_v55 = vpack.c.bf16 %v7441_v47, %v7441_v47  ;;  %v7444_v51 = vmax.f32 %v7146_v49, 0.0  ;;  %v17945_v49 = vld [vmem:[#allocation155_spill] sm:$0xff]  ;;  %v6292_v35 = vpack.c.bf16 %v6260_v6, %v6260_v6  ;;  %v6269_v6 = vmax.f32 %v15911_v37, 0.0 }
 0x694   : > { %v6624_v44 = vpop.f32.mrf.mxu3  ;;  %v6286_v37 = vmax.f32 %v15962_v50, 0.0 }
 0x695   : > { %11569 = vmatmul.msk.f32.vlgmr.msrb.gmra.mxu3 %vm1215_vm2, %v6624_v44  ;;  %7549 = vrot.lane.b32.xlu0 %v7473_v55, %s12750_s17  ;;  %v7476_v15 = vpack.c.bf16 %v7444_v51, %v7444_v51  ;;  %v6401_v63 = vpop.permute.xlu1 %6400  ;;  %v6271_v51 = vmax.f32 %v15925_v34, 0.0 }
 0x696   : > { %v6383_v45 = vpop.permute.xlu0 %6382  ;;  %7350 = vmatpush.msrb.mxu3 %v12420_v23  ;;  %6475 = vst.msk [vmem:[#allocation2 + $0x58] sm:$0xf] %vm6452_vm7, %v6401_v63  ;;  %v7758_v23 = vsel %vm789_vm1, %v17945_v49, 0 }
 0x697   : > { %6466 = vst.msk [vmem:[#allocation2 + $0x34] sm:$0xf] %vm6452_vm7, %v6383_v45  ;;  %7555 = vrot.lane.b32.xlu2 %v7476_v15, %s12750_s17  ;;  %v6303_v15 = vpack.c.bf16 %v6271_v51, %v6271_v51  ;;  %v17951_v51 = vld [vmem:[#allocation165_spill] sm:$0xff] }
 0x698   : > { %7351 = vmatpush.msrb.mxu3 %v12429_v42  ;;  %v6696_v29 = vpop.f32.mrf.mxu2  ;;  %v7111_v57 = vpop.f32.mrf.mxu0 }
 0x699   : > { %v7442_v18 = vmax.f32 %v7111_v57, 0.0  ;;  %11575 = vmatmul.msk.f32.vlgmr.msra.gmra.mxu2 %vm1215_vm2, %v6696_v29  ;;  %v6285_v57 = vmax.f32 %v15956_v54, 0.0  ;;  %v6268_v54 = vmax.f32 %v15898_v0, 0.0 }
 0x69a   : > { %7671 = vmatpush.bf16.xpose.msra.mxu2 %v7662_v20  ;;  %v7283_v16 = vpop.f32.mrf.mxu1 }
 0x69b   : > { %v7474_v30 = vpack.c.bf16 %v7442_v18, %v7442_v18  ;;  %v7451_v21 = vmax.f32 %v7283_v16, 0.0 }
 0x69c   : > { %v6626_v43 = vpop.f32.mrf.mxu3 }
 0x69d   : > { %11570 = vmatmul.msk.f32.gmra.mxu3 %vm1215_vm2, %v6626_v43  ;;  %6360 = vrot.lane.b32.xlu0 %v6294_v9, %s12753_s26  ;;  %v5206_v4 = vpop.permute.xlu1 %5205  ;;  %v7483_v22 = vpack.c.bf16 %v7451_v21, %v7451_v21  ;;  %v7782_v9 = vsel %vm789_vm1, %v17946_v36, 0  ;;  %v17949_v21 = vld [vmem:[#allocation54_spill] sm:$0xff]  ;;  %v6318_v36 = vpack.c.bf16 %v6286_v37, %v6286_v37 }
 0x69e   : > { %v6385_v39 = vpop.permute.xlu0 %6384  ;;  %7551 = vrot.lane.b32.xlu1 %v7474_v30, %s12750_s17  ;;  %5293 = vst.msk [vmem:[#allocation2 + $0x24] sm:$0xf] %vm5283_vm6, %v5206_v4  ;;  %v6317_v30 = vpack.c.bf16 %v6285_v57, %v6285_v57  ;;  %v17947_v4 = vld [vmem:[#allocation161_spill] sm:$0xff]  ;;  %v17955_v57 = vld [vmem:[#allocation64_spill] sm:$0xff] }
 0x69f   : > { %6467 = vst.msk [vmem:[#allocation2 + $0x38] sm:$0xf] %vm6452_vm7, %v6385_v39  ;;  %6358 = vrot.lane.b32.xlu2 %v6293_v58, %s12753_s26  ;;  %v7854_v10 = vsel %vm789_vm1, %v17947_v4, 0 }
 0x6a0   : > { %v6698_v52 = vpop.f32.mrf.mxu2  ;;  %v16012_v11 = vpop.f32.mrf.mxu0 }
 0x6a1   : > { %11576 = vmatmul.msk.f32.gmra.mxu2 %vm1215_vm2, %v6698_v52  ;;  %v17948_v52 = vld [vmem:[#allocation149_spill] sm:$0xff] }
 0x6a2   : > { %v7286_v31 = vpop.f32.mrf.mxu1 }
 0x6a3   : > { %v7452_v24 = vmax.f32 %v7286_v31, 0.0  ;;  %v12514_v31 = vunpack.i.l.bf16 %v17949_v21 }
 0x6a4   : > { %v6720_v46 = vpop.f32.mrf.mxu3 }
 0x6a5   : > { %11577 = vmatmul.msk.f32.vlgmr.msra.gmra.mxu3 %vm1215_vm2, %v6720_v46  ;;  %v7484_v13 = vpack.c.bf16 %v7452_v24, %v7452_v24  ;;  %v5208_v61 = vpop.permute.xlu1 %5207  ;;  %v6300_v46 = vpack.c.bf16 %v6268_v54, %v6268_v54 }
 0x6a6   : > { %v5190_v8 = vpop.permute.xlu0 %5189  ;;  %7695 = vmatpush.bf16.xpose.msra.mxu3 %v7686_v38  ;;  %7553 = vrot.lane.b32.xlu1 %v7475_v40, %s12750_s17  ;;  %5294 = vst.msk [vmem:[#allocation2 + $0x28] sm:$0xf] %vm5283_vm6, %v5208_v61  ;;  %v12519_v38 = vunpack.i.l.bf16 %v17950_v1 }
 0x6a7   : > { %5285 = vst.msk [vmem:[#allocation2 + $0x4] sm:$0xf] %vm5283_vm6, %v5190_v8  ;;  %7571 = vrot.lane.b32.xlu0 %v7484_v13, %s12750_s17  ;;  %7569 = vrot.lane.b32.xlu2 %v7483_v22, %s12750_s17  ;;  %v12515_v13 = vunpack.i.h.bf16 %v17949_v21  ;;  %v6263_v8 = vmax.f32 %v15901_v19, 0.0  ;;  %v17959_v21 = vld [vmem:[#allocation175_spill] sm:$0xff] }
 0x6a8   : > { %v16024_v47 = vpop.f32.mrf.mxu0 }
 0x6a9   : > { %v6792_v55 = vpop.f32.mrf.mxu2 }
 0x6aa   : > { %11583 = vmatmul.msk.f32.vlgmr.msrb.gmra.mxu2 %vm1215_vm2, %v6792_v55  ;;  %v16030_v44 = vpop.f32.mrf.mxu1  ;;  %v12520_v55 = vunpack.i.h.bf16 %v17950_v1  ;;  %v17961_v1 = vld [vmem:[#allocation57_spill] sm:$0xff] }
 0x6ab   : > { %7767 = vmatpush.bf16.xpose.msrb.mxu2 %v7758_v23  ;;  %v6295_v23 = vpack.c.bf16 %v6263_v8, %v6263_v8 }
 0x6ac   : > { %v6722_v42 = vpop.f32.mrf.mxu3 }
 0x6ad   : > { %11578 = vmatmul.msk.f32.gmra.mxu3 %vm1215_vm2, %v6722_v42  ;;  %v5236_v63 = vpop.permute.xlu1 %5235  ;;  %v6301_v42 = vpack.c.bf16 %v6269_v6, %v6269_v6  ;;  %v17963_v6 = vld [vmem:[#allocation171_spill] sm:$0xff] }
 0x6ae   : > { %v5204_v45 = vpop.permute.xlu0 %5203  ;;  %6356 = vrot.lane.b32.xlu1 %v6292_v35, %s12753_s26  ;;  %5308 = vst.msk [vmem:[#allocation2 + $0x60] sm:$0xf] %vm5283_vm6, %v5236_v63  ;;  %v7878_v35 = vsel %vm789_vm1, %v17951_v51, 0  ;;  %v6270_v63 = vmax.f32 %v15918_v41, 0.0  ;;  %v12525_v41 = vunpack.i.h.bf16 %v17955_v57 }
 0x6af   : > { %5292 = vst.msk [vmem:[#allocation2 + $0x20] sm:$0xf] %vm5283_vm6, %v5204_v45  ;;  %6378 = vrot.lane.b32.xlu0 %v6303_v15, %s12753_s26  ;;  %v17952_v15 = vld [vmem:[#allocation158_spill] sm:$0xff] }
 0x6b0   : > { %v7388_v34 = vpop.f32.mrf.mxu0 }
 0x6b1   : > { %v6794_v59 = vpop.f32.mrf.mxu2  ;;  %v7457_v29 = vmax.f32 %v7388_v34, 0.0  ;;  %v17953_v34 = vld [vmem:[#allocation162_spill] sm:$0xff] }
 0x6b2   : > { %11584 = vmatmul.msk.f32.gmra.mxu2 %vm1215_vm2, %v6794_v59  ;;  %v16039_v20 = vpop.f32.mrf.mxu1  ;;  %v7950_v59 = vsel %vm789_vm1, %v17953_v34, 0 }
 0x6b3   : > { %v7489_v26 = vpack.c.bf16 %v7457_v29, %v7457_v29  ;;  %v17954_v29 = vld [vmem:[#allocation154_spill] sm:$0xff] }
 0x6b4   : > { %v6816_v18 = vpop.f32.mrf.mxu3 }
 0x6b5   : > { %11585 = vmatmul.msk.f32.vlgmr.msrb.gmra.mxu3 %vm1215_vm2, %v6816_v18  ;;  %v5242_v43 = vpop.permute.xlu1 %5241 }
 0x6b6   : > { %v6415_v16 = vpop.permute.xlu0 %6414  ;;  %7791 = vmatpush.bf16.xpose.msrb.mxu3 %v7782_v9  ;;  %7581 = vrot.lane.b32.xlu1 %v7489_v26, %s12750_s17  ;;  %5311 = vst.msk [vmem:[#allocation2 + $0x6c] sm:$0xf] %vm5283_vm6, %v5242_v43  ;;  %v12524_v26 = vunpack.i.l.bf16 %v17955_v57  ;;  %v17956_v9 = vld [vmem:[#allocation37_spill] sm:$0xff]  ;;  %v6284_v43 = vmax.f32 %v15945_v56, 0.0 }
 0x6b7   : > { %6482 = vst.msk [vmem:[#allocation2 + $0x74] sm:$0xf] %vm6452_vm7, %v6415_v16  ;;  %6406 = vrot.lane.b32.xlu0 %v6317_v30, %s12753_s26  ;;  %v12529_v50 = vunpack.i.l.bf16 %v17956_v9  ;;  %v6302_v30 = vpack.c.bf16 %v6270_v63, %v6270_v63  ;;  %v12530_v54 = vunpack.i.h.bf16 %v17956_v9  ;;  %v17967_v63 = vld [vmem:[#allocation13_spill] sm:$0xff]  ;;  %v17969_v9 = vld [vmem:[#allocation32_spill] sm:$0xff] }
 0x6b8   : > { %v7391_v58 = vpop.f32.mrf.mxu0  ;;  %v8999_v34 = vsel %vm789_vm1, %v17967_v63, 0  ;;  %v17981_v63 = vld [vmem:[#allocation38_spill] sm:$0xff] }
 0x6b9   : > { %v7458_v39 = vmax.f32 %v7391_v58, 0.0 }
 0x6ba   : > { %11591 = vmatmul.msk.bf16.vlgmr.msra.gmra.mxu2 %vm789_vm1, %v17948_v52  ;;  %v7745_v24 = vpop.f32.mrf.mxu1  ;;  %v17958_v52 = vld [vmem:[#allocation163_spill] sm:$0xff] }
 0x6bb   : > { %v7490_v40 = vpack.c.bf16 %v7458_v39, %v7458_v39  ;;  %7863 = vmatpush.bf16.xpose.msra.mxu2 %v7854_v10  ;;  %11613 = vmatmul.msk.f32.vlgmr.msrb.gmra.mxu1 %vm1215_vm2, %v7745_v24  ;;  %v17957_v39 = vld [vmem:[#allocation153_spill] sm:$0xff]  ;;  %v6316_v10 = vpack.c.bf16 %v6284_v43, %v6284_v43  ;;  %v17960_v24 = vld [vmem:[#allocation160_spill] sm:$0xff] }
 0x6bc   : > { %v6818_v0 = vpop.f32.mrf.mxu3  ;;  %8449 = vmatpush.msrb.mxu1 %v12514_v31  ;;  %v7974_v4 = vsel %vm789_vm1, %v17957_v39, 0  ;;  %v12454_v31 = vunpack.i.l.bf16 %v17959_v21  ;;  %v17972_v39 = vld [vmem:[#allocation49_spill] sm:$0xff] }
 0x6bd   : > { %11586 = vmatmul.msk.f32.gmra.mxu3 %vm1215_vm2, %v6818_v0  ;;  %7583 = vrot.lane.b32.xlu2 %v7490_v40, %s12750_s17  ;;  %v6287_v40 = vmax.f32 %v15970_v2, 0.0 }
 0x6be   : > { %v5222_v22 = vpop.permute.xlu0 %5221  ;;  %6372 = vrot.lane.b32.xlu1 %v6300_v46, %s12753_s26  ;;  %8450 = vmatpush.msrb.mxu1 %v12519_v38  ;;  %v12455_v46 = vunpack.i.h.bf16 %v17959_v21  ;;  %v8903_v38 = vsel %vm789_vm1, %v17961_v1, 0  ;;  %v17974_v21 = vld [vmem:[#allocation102_spill] sm:$0xff] }
 0x6bf   : > { %5301 = vst.msk [vmem:[#allocation2 + $0x44] sm:$0xf] %vm5283_vm6, %v5222_v22  ;;  %v6319_v22 = vpack.c.bf16 %v6287_v40, %v6287_v40  ;;  %v17975_v40 = vld [vmem:[#allocation29_spill] sm:$0xff] }
 0x6c0   : > { %v7721_v61 = vpop.f32.mrf.mxu0 }
 0x6c1   : > { %11611 = vmatmul.msk.f32.vlgmr.msrb.gmra.mxu0 %vm1215_vm2, %v7721_v61 }
 0x6c2   : > { %8414 = vmatpush.msrb.mxu0 %v12515_v13  ;;  %v7747_v49 = vpop.f32.mrf.mxu1  ;;  %v17962_v13 = vld [vmem:[#allocation134_spill] sm:$0xff] }
 0x6c3   : > { %11614 = vmatmul.msk.f32.gmra.mxu1 %vm1215_vm2, %v7747_v49  ;;  %v8879_v8 = vsel %vm789_vm1, %v17962_v13, 0  ;;  %v17964_v49 = vld [vmem:[#allocation164_spill] sm:$0xff] }
 0x6c4   : > { %8415 = vmatpush.msrb.mxu0 %v12520_v55  ;;  %v12459_v55 = vunpack.i.l.bf16 %v17963_v6 }
 0x6c5   : > { %11592 = vmatmul.msk.bf16.vlgmr.msra.gmra.mxu3 %vm789_vm1, %v17952_v15  ;;  %6374 = vrot.lane.b32.xlu2 %v6301_v42, %s12753_s26  ;;  %v12460_v15 = vunpack.i.h.bf16 %v17963_v6 }
 0x6c6   : > { %v5240_v19 = vpop.permute.xlu0 %5239  ;;  %7887 = vmatpush.bf16.xpose.msra.mxu3 %v7878_v35  ;;  %6362 = vrot.lane.b32.xlu1 %v6295_v23, %s12753_s26  ;;  %v17965_v23 = vld [vmem:[#allocation104_spill] sm:$0xff] }
 0x6c7   : > { %5310 = vst.msk [vmem:[#allocation2 + $0x68] sm:$0xf] %vm5283_vm6, %v5240_v19  ;;  %v12464_v51 = vunpack.i.l.bf16 %v17965_v23  ;;  %v17966_v19 = vld [vmem:[#allocation47_spill] sm:$0xff]  ;;  %v12465_v37 = vunpack.i.h.bf16 %v17965_v23 }
 0x6c8   : > { %v7723_v45 = vpop.f32.mrf.mxu0  ;;  %v17979_v23 = vld [vmem:[#allocation39_spill] sm:$0xff] }
 0x6c9   : > { %11612 = vmatmul.msk.f32.gmra.mxu0 %vm1215_vm2, %v7723_v45 }
 0x6ca   : > { %11595 = vmatmul.msk.bf16.vlgmr.msrb.gmra.mxu2 %vm789_vm1, %v17954_v29  ;;  %v7841_v18 = vpop.f32.mrf.mxu1  ;;  %v17968_v29 = vld [vmem:[#allocation86_spill] sm:$0xff] }
 0x6cb   : > { %7959 = vmatpush.bf16.xpose.msrb.mxu2 %v7950_v59  ;;  %11621 = vmatmul.msk.f32.vlgmr.msra.gmra.mxu1 %vm1215_vm2, %v7841_v18  ;;  %v8975_v57 = vsel %vm789_vm1, %v17968_v29, 0 }
 0x6cc   : > { %8589 = vmatpush.msra.mxu1 %v12524_v26 }
 0x6cd   : > { %6376 = vrot.lane.b32.xlu2 %v6302_v30, %s12753_s26  ;;  %v17970_v30 = vld [vmem:[#allocation157_spill] sm:$0xff] }
 0x6ce   : > { %6408 = vrot.lane.b32.xlu1 %v6318_v36, %s12753_s26  ;;  %8590 = vmatpush.msra.mxu1 %v12529_v50  ;;  %v12469_v50 = vunpack.i.l.bf16 %v17969_v9 }
 0x6d0   : > { %v7817_v16 = vpop.f32.mrf.mxu0 }
 0x6d1   : > { %11619 = vmatmul.msk.f32.vlgmr.msra.gmra.mxu0 %vm1215_vm2, %v7817_v16 }
 0x6d2   : > { %8554 = vmatpush.msra.mxu0 %v12525_v41  ;;  %v7843_v58 = vpop.f32.mrf.mxu1  ;;  %v17971_v41 = vld [vmem:[#allocation174_spill] sm:$0xff] }
 0x6d3   : > { %11622 = vmatmul.msk.f32.gmra.mxu1 %vm1215_vm2, %v7843_v58  ;;  %v12474_v16 = vunpack.i.l.bf16 %v17971_v41 }
 0x6d4   : > { %8555 = vmatpush.msra.mxu0 %v12530_v54 }
 0x6d5   : > { %11596 = vmatmul.msk.bf16.vlgmr.msrb.gmra.mxu3 %vm789_vm1, %v17958_v52  ;;  %6404 = vrot.lane.b32.xlu2 %v6316_v10, %s12753_s26  ;;  %v17973_v10 = vld [vmem:[#allocation56_spill] sm:$0xff] }
 0x6d6   : > { %7983 = vmatpush.bf16.xpose.msrb.mxu3 %v7974_v4  ;;  %v9095_v4 = vsel %vm789_vm1, %v17972_v39, 0 }
 0x6d8   : > { %v7819_v56 = vpop.f32.mrf.mxu0 }
 0x6d9   : > { %11620 = vmatmul.msk.f32.gmra.mxu0 %vm1215_vm2, %v7819_v56 }
 0x6da   : > { %11599 = vmatmul.msk.bf16.vlgmr.msra.gmra.mxu2 %vm789_vm1, %v17960_v24  ;;  %v7937_v0 = vpop.f32.mrf.mxu1 }
 0x6db   : > { %8064 = vmatpush.msra.mxu2 %v12454_v31  ;;  %11629 = vmatmul.msk.f32.vlgmr.msrb.gmra.mxu1 %vm1215_vm2, %v7937_v0  ;;  %v9071_v31 = vsel %vm789_vm1, %v17974_v21, 0  ;;  %v17984_v21 = vld [vmem:[#allocation17_spill] sm:$0xff] }
 0x6dc   : > { %8912 = vmatpush.bf16.xpose.msrb.mxu1 %v8903_v38  ;;  %v17976_v38 = vld [vmem:[#allocation34_spill] sm:$0xff] }
 0x6dd   : > { %8065 = vmatpush.msra.mxu2 %v12455_v46  ;;  %6410 = vrot.lane.b32.xlu2 %v6319_v22, %s12753_s26  ;;  %v9191_v22 = vsel %vm789_vm1, %v17976_v38, 0  ;;  %v17985_v38 = vld [vmem:[#allocation18_spill] sm:$0xff] }
 0x6e0   : > { %v7913_v2 = vpop.f32.mrf.mxu0 }
 0x6e1   : > { %11627 = vmatmul.msk.f32.vlgmr.msrb.gmra.mxu0 %vm1215_vm2, %v7913_v2  ;;  %v17977_v2 = vld [vmem:[#allocation20_spill] sm:$0xff] }
 0x6e2   : > { %8888 = vmatpush.bf16.xpose.msrb.mxu0 %v8879_v8  ;;  %v7939_v61 = vpop.f32.mrf.mxu1 }
 0x6e3   : > { %11630 = vmatmul.msk.f32.gmra.mxu1 %vm1215_vm2, %v7939_v61 }
 0x6e5   : > { %11600 = vmatmul.msk.bf16.vlgmr.msra.gmra.mxu3 %vm789_vm1, %v17964_v49 }
 0x6e6   : > { %8099 = vmatpush.msra.mxu3 %v12459_v55  ;;  %v17978_v55 = vld [vmem:[#allocation45_spill] sm:$0xff] }
 0x6e7   : > { %v9167_v49 = vsel %vm789_vm1, %v17978_v55, 0 }
 0x6e8   : > { %8100 = vmatpush.msra.mxu3 %v12464_v51  ;;  %v7536_v35 = vpop.permute.xlu2 %7535  ;;  %v7915_v42 = vpop.f32.mrf.mxu0 }
 0x6e9   : > { %7627 = vst.msk [vmem:[#allocation2 + $0x14] sm:$0xf] %vm7621_vm8, %v7536_v35  ;;  %11628 = vmatmul.msk.f32.gmra.mxu0 %vm1215_vm2, %v7915_v42 }
 0x6ea   : > { %11603 = vmatmul.msk.bf16.vlgmr.msrb.gmra.mxu2 %vm789_vm1, %v17966_v19  ;;  %v8033_v45 = vpop.f32.mrf.mxu1 }
 0x6eb   : > { %8204 = vmatpush.msrb.mxu2 %v12460_v15  ;;  %11637 = vmatmul.msk.f32.vlgmr.msra.gmra.mxu1 %vm1215_vm2, %v8033_v45 }
 0x6ec   : > { %9008 = vmatpush.bf16.xpose.msra.mxu1 %v8999_v34 }
 0x6ed   : > { %8205 = vmatpush.msrb.mxu2 %v12465_v37  ;;  %v17980_v37 = vld [vmem:[#allocation67_spill] sm:$0xff] }
 0x6ee   : > { %v12544_v45 = vunpack.i.l.bf16 %v17980_v37  ;;  %v12545_v29 = vunpack.i.h.bf16 %v17980_v37  ;;  %v12475_v37 = vunpack.i.h.bf16 %v17971_v41 }
 0x6f0   : > { %v8009_v59 = vpop.f32.mrf.mxu0  ;;  %v7538_v26 = vpop.permute.xlu0 %7537 }
 0x6f1   : > { %11635 = vmatmul.msk.f32.vlgmr.msra.gmra.mxu0 %vm1215_vm2, %v8009_v59  ;;  %v7556_v18 = vpop.permute.xlu2 %7555  ;;  %7628 = vst.msk [vmem:[#allocation2 + $0x18] sm:$0xf] %vm7621_vm8, %v7538_v26  ;;  %v12549_v59 = vunpack.i.l.bf16 %v15588_v27 }
 0x6f2   : > { %8984 = vmatpush.bf16.xpose.msra.mxu0 %v8975_v57  ;;  %v8035_v36 = vpop.f32.mrf.mxu1  ;;  %7637 = vst.msk [vmem:[#allocation2 + $0x3c] sm:$0xf] %vm7621_vm8, %v7556_v18 }
 0x6f3   : > { %11638 = vmatmul.msk.f32.gmra.mxu1 %vm1215_vm2, %v8035_v36  ;;  %v17982_v36 = vld [vmem:[#allocation19_spill] sm:$0xff] }
 0x6f5   : > { %11604 = vmatmul.msk.bf16.vlgmr.msrb.gmra.mxu3 %vm789_vm1, %v17970_v30 }
 0x6f6   : > { %8239 = vmatpush.msrb.mxu3 %v12469_v50  ;;  %v12550_v50 = vunpack.i.h.bf16 %v15588_v27 }
 0x6f7   : > { %v7534_v43 = vpop.permute.xlu1 %7533 }
 0x6f8   : > { %8240 = vmatpush.msrb.mxu3 %v12474_v16  ;;  %7626 = vst.msk [vmem:[#allocation2 + $0x10] sm:$0xf] %vm7621_vm8, %v7534_v43  ;;  %v8011_v54 = vpop.f32.mrf.mxu0 }
 0x6f9   : > { %11636 = vmatmul.msk.f32.gmra.mxu0 %vm1215_vm2, %v8011_v54  ;;  %v6359_v58 = vpop.permute.xlu2 %6358 }
 0x6fa   : > { %6454 = vst.msk [vmem:[#allocation2 + $0x4] sm:$0xf] %vm6452_vm7, %v6359_v58 }
 0x6fb   : > { %11642 = vmatmul.msk.bf16.vlgmr.msrb.gmra.mxu1 %vm789_vm1, %v17973_v10 }
 0x6fc   : > { %v16139_v52 = vpop.f32.mrf.mxu2  ;;  %9104 = vmatpush.bf16.xpose.msrb.mxu1 %v9095_v4  ;;  %v17983_v4 = vld [vmem:[#allocation128_spill] sm:$0xff] }
 0x6fd   : > { %v12559_v27 = vunpack.i.l.bf16 %v17983_v4  ;;  %v12560_v10 = vunpack.i.h.bf16 %v17983_v4 }
 0x6ff   : > { %v7540_v56 = vpop.permute.xlu1 %7539 }
 0x700   : > { %7629 = vst.msk [vmem:[#allocation2 + $0x1c] sm:$0xf] %vm7621_vm8, %v7540_v56 }
 0x701   : > { %11641 = vmatmul.msk.bf16.vlgmr.msrb.gmra.mxu0 %vm789_vm1, %v17975_v40  ;;  %v7570_v24 = vpop.permute.xlu2 %7569 }
 0x702   : > { %9080 = vmatpush.bf16.xpose.msrb.mxu0 %v9071_v31  ;;  %7644 = vst.msk [vmem:[#allocation2 + $0x58] sm:$0xf] %vm7621_vm8, %v7570_v24  ;;  %v12589_v31 = vunpack.i.l.bf16 %v17984_v21 }
 0x704   : > { %v16147_v46 = vpop.f32.mrf.mxu2 }
 0x707   : > { %v7550_v0 = vpop.permute.xlu0 %7549 }
 0x708   : > { %7634 = vst.msk [vmem:[#allocation2 + $0x30] sm:$0xf] %vm7621_vm8, %v7550_v0  ;;  %v16150_v1 = vpop.f32.mrf.mxu3 }
 0x70b   : > { %11646 = vmatmul.msk.bf16.vlgmr.msra.gmra.mxu1 %vm789_vm1, %v17977_v2 }
 0x70c   : > { %v16156_v13 = vpop.f32.mrf.mxu2  ;;  %9200 = vmatpush.bf16.xpose.msra.mxu1 %v9191_v22  ;;  %v12590_v22 = vunpack.i.h.bf16 %v17984_v21 }
 0x70f   : > { %v6361_v8 = vpop.permute.xlu0 %6360 }
 0x710   : > { %6455 = vst.msk [vmem:[#allocation2 + $0x8] sm:$0xf] %vm6452_vm7, %v6361_v8  ;;  %v7552_v61 = vpop.permute.xlu1 %7551  ;;  %v16159_v6 = vpop.f32.mrf.mxu3 }
 0x711   : > { %7635 = vst.msk [vmem:[#allocation2 + $0x34] sm:$0xf] %vm7621_vm8, %v7552_v61  ;;  %11645 = vmatmul.msk.bf16.vlgmr.msra.gmra.mxu0 %vm789_vm1, %v17979_v23 }
 0x712   : > { %9176 = vmatpush.bf16.xpose.msra.mxu0 %v9167_v49 }
 0x714   : > { %v16166_v51 = vpop.f32.mrf.mxu2 }
 0x717   : > { %v7584_v42 = vpop.permute.xlu2 %7583 }
 0x718   : > { %v7554_v35 = vpop.permute.xlu1 %7553  ;;  %v16169_v15 = vpop.f32.mrf.mxu3  ;;  %7651 = vst.msk [vmem:[#allocation2 + $0x74] sm:$0xf] %vm7621_vm8, %v7584_v42 }
 0x719   : > { %7636 = vst.msk [vmem:[#allocation2 + $0x38] sm:$0xf] %vm7621_vm8, %v7554_v35  ;;  %v7572_v19 = vpop.permute.xlu0 %7571  ;;  %v12470_v35 = vunpack.i.h.bf16 %v17969_v9 }
 0x71a   : > { %7645 = vst.msk [vmem:[#allocation2 + $0x5c] sm:$0xf] %vm7621_vm8, %v7572_v19 }
 0x71b   : > { %11650 = vmatmul.msk.bf16.vlgmr.msrb.gmra.mxu1 %vm789_vm1, %v17981_v63 }
 0x71c   : > { %v16176_v34 = vpop.f32.mrf.mxu2  ;;  %9338 = vmatpush.msrb.mxu1 %v12544_v45 }
 0x71e   : > { %9339 = vmatpush.msrb.mxu1 %v12549_v59 }
 0x71f   : > { %v6375_v26 = vpop.permute.xlu2 %6374 }
 0x720   : > { %v6357_v57 = vpop.permute.xlu1 %6356  ;;  %v16181_v18 = vpop.f32.mrf.mxu3  ;;  %6462 = vst.msk [vmem:[#allocation2 + $0x24] sm:$0xf] %vm6452_vm7, %v6375_v26 }
 0x721   : > { %6453 = vst.msk [vmem:[#allocation2] sm:$0xf] %vm6452_vm7, %v6357_v57  ;;  %11649 = vmatmul.msk.bf16.vlgmr.msrb.gmra.mxu0 %vm789_vm1, %v17982_v36  ;;  %v6379_v30 = vpop.permute.xlu0 %6378 }
 0x722   : > { %9303 = vmatpush.msrb.mxu0 %v12545_v29  ;;  %6464 = vst.msk [vmem:[#allocation2 + $0x2c] sm:$0xf] %vm6452_vm7, %v6379_v30 }
 0x724   : > { %9304 = vmatpush.msrb.mxu0 %v12550_v50  ;;  %v16188_v16 = vpop.f32.mrf.mxu2 }
 0x727   : > { %v6377_v54 = vpop.permute.xlu2 %6376 }
 0x728   : > { %v7582_v43 = vpop.permute.xlu1 %7581  ;;  %v16191_v58 = vpop.f32.mrf.mxu3  ;;  %6463 = vst.msk [vmem:[#allocation2 + $0x28] sm:$0xf] %vm6452_vm7, %v6377_v54  ;;  %v17986_v54 = vld [vmem:[#allocation88_spill] sm:$0xff] }
 0x729   : > { %7650 = vst.msk [vmem:[#allocation2 + $0x70] sm:$0xf] %vm7621_vm8, %v7582_v43  ;;  %v6407_v39 = vpop.permute.xlu0 %6406  ;;  %v12490_v21 = vunpack.i.h.bf16 %v17986_v54 }
 0x72a   : > { %6478 = vst.msk [vmem:[#allocation2 + $0x64] sm:$0xf] %vm6452_vm7, %v6407_v39  ;;  %v12489_v39 = vunpack.i.l.bf16 %v17986_v54 }
 0x72b   : > { %11654 = vmatmul.msk.bf16.vlgmr.msra.gmra.mxu1 %vm789_vm1, %v15563_v7 }
 0x72c   : > { %9478 = vmatpush.msra.mxu1 %v12559_v27  ;;  %v17987_v27 = vld [vmem:[#allocation98_spill] sm:$0xff] }
 0x72d   : > { %v16199_v56 = vpop.f32.mrf.mxu2 }
 0x72e   : > { %9479 = vmatpush.msra.mxu1 %v12560_v10  ;;  %v12494_v10 = vunpack.i.l.bf16 %v17987_v27 }
 0x72f   : > { %v6405_v24 = vpop.permute.xlu2 %6404 }
 0x730   : > { %v6373_v40 = vpop.permute.xlu1 %6372  ;;  %v16203_v0 = vpop.f32.mrf.mxu3  ;;  %6477 = vst.msk [vmem:[#allocation2 + $0x60] sm:$0xf] %vm6452_vm7, %v6405_v24  ;;  %v12495_v24 = vunpack.i.h.bf16 %v17987_v27 }
 0x731   : > { %6461 = vst.msk [vmem:[#allocation2 + $0x20] sm:$0xf] %vm6452_vm7, %v6373_v40  ;;  %11653 = vmatmul.msk.bf16.vlgmr.msra.gmra.mxu0 %vm789_vm1, %v17985_v38 }
 0x732   : > { %9443 = vmatpush.msra.mxu0 %v12589_v31 }
 0x734   : > { %9444 = vmatpush.msra.mxu0 %v12590_v22 }
 0x735   : > { %v16209_v7 = vpop.f32.mrf.mxu2 }
 0x737   : > { %v6411_v61 = vpop.permute.xlu2 %6410 }
 0x738   : > { %v6363_v2 = vpop.permute.xlu1 %6362  ;;  %v8172_v8 = vpop.f32.mrf.mxu1  ;;  %6480 = vst.msk [vmem:[#allocation2 + $0x6c] sm:$0xf] %vm6452_vm7, %v6411_v61 }
 0x739   : > { %6456 = vst.msk [vmem:[#allocation2 + $0xc] sm:$0xf] %vm6452_vm7, %v6363_v2  ;;  %v8604_v55 = vmax.f32 %v8172_v8, 0.0  ;;  %v16213_v49 = vpop.f32.mrf.mxu3 }
 0x73b   : > { %v8636_v23 = vpack.c.bf16 %v8604_v55, %v8604_v55 }
 0x73d   : > { %v7673_v42 = vpop.f32.mrf.mxu2  ;;  %8706 = vrot.lane.b32.xlu2 %v8636_v23, %s12749_s16 }
 0x73e   : > { %11607 = vmatmul.msk.f32.vlgmr.msra.gmra.mxu2 %vm1215_vm2, %v7673_v42  ;;  %v8137_v19 = vpop.f32.mrf.mxu0 }
 0x73f   : > { %8344 = vmatpush.msra.mxu2 %v12470_v35  ;;  %v8602_v45 = vmax.f32 %v8137_v19, 0.0  ;;  %v7430_v35 = vmax.f32 %v16147_v46, 0.0 }
 0x740   : > { %v6409_v63 = vpop.permute.xlu1 %6408  ;;  %v8175_v29 = vpop.f32.mrf.mxu1 }
 0x741   : > { %v8634_v59 = vpack.c.bf16 %v8602_v45, %v8602_v45  ;;  %8345 = vmatpush.msra.mxu2 %v12475_v37  ;;  %6479 = vst.msk [vmem:[#allocation2 + $0x68] sm:$0xf] %vm6452_vm7, %v6409_v63  ;;  %v16220_v57 = vpop.f32.mrf.mxu3  ;;  %v8605_v9 = vmax.f32 %v8175_v29, 0.0  ;;  %v7429_v37 = vmax.f32 %v16139_v52, 0.0 }
 0x743   : > { %8702 = vrot.lane.b32.xlu0 %v8634_v59, %s12749_s16  ;;  %v8637_v30 = vpack.c.bf16 %v8605_v9, %v8605_v9  ;;  %v17988_v59 = vld [vmem:[#allocation92_spill] sm:$0xff]  ;;  %v7462_v9 = vpack.c.bf16 %v7430_v35, %v7430_v35 }
 0x744   : > { %v12509_v29 = vunpack.i.l.bf16 %v17988_v59  ;;  %v12510_v46 = vunpack.i.h.bf16 %v17988_v59 }
 0x745   : > { %v7675_v26 = vpop.f32.mrf.mxu2 }
 0x746   : > { %11608 = vmatmul.msk.f32.gmra.mxu2 %vm1215_vm2, %v7675_v26  ;;  %v8140_v36 = vpop.f32.mrf.mxu0 }
 0x747   : > { %v8603_v50 = vmax.f32 %v8140_v36, 0.0  ;;  %v7461_v36 = vpack.c.bf16 %v7429_v37, %v7429_v37 }
 0x748   : > { %v8312_v43 = vpop.f32.mrf.mxu1 }
 0x749   : > { %v8635_v41 = vpack.c.bf16 %v8603_v50, %v8603_v50  ;;  %v7697_v4 = vpop.f32.mrf.mxu3  ;;  %v8612_v50 = vmax.f32 %v8312_v43, 0.0 }
 0x74a   : > { %11609 = vmatmul.msk.f32.vlgmr.msra.gmra.mxu3 %vm1215_vm2, %v7697_v4 }
 0x74b   : > { %8708 = vrot.lane.b32.xlu0 %v8637_v30, %s12749_s16  ;;  %8379 = vmatpush.msra.mxu3 %v12489_v39  ;;  %v8644_v4 = vpack.c.bf16 %v8612_v50, %v8612_v50 }
 0x74c   : > { %8704 = vrot.lane.b32.xlu1 %v8635_v41, %s12749_s16  ;;  %v17989_v41 = vld [vmem:[#allocation12_spill] sm:$0xff] }
 0x74d   : > { %v7769_v31 = vpop.f32.mrf.mxu2  ;;  %8380 = vmatpush.msra.mxu3 %v12494_v10  ;;  %v8831_v54 = vsel %vm789_vm1, %v17989_v41, 0 }
 0x74e   : > { %11615 = vmatmul.msk.f32.vlgmr.msrb.gmra.mxu2 %vm1215_vm2, %v7769_v31  ;;  %v8277_v40 = vpop.f32.mrf.mxu0 }
 0x74f   : > { %8484 = vmatpush.msrb.mxu2 %v12490_v21  ;;  %v8610_v38 = vmax.f32 %v8277_v40, 0.0  ;;  %v7431_v40 = vmax.f32 %v16150_v1, 0.0 }
 0x750   : > { %v8315_v2 = vpop.f32.mrf.mxu1 }
 0x751   : > { %v8642_v22 = vpack.c.bf16 %v8610_v38, %v8610_v38  ;;  %8485 = vmatpush.msrb.mxu2 %v12495_v24  ;;  %v8613_v8 = vmax.f32 %v8315_v2, 0.0  ;;  %v7699_v61 = vpop.f32.mrf.mxu3 }
 0x752   : > { %11610 = vmatmul.msk.f32.gmra.mxu3 %vm1215_vm2, %v7699_v61  ;;  %v17990_v61 = vld [vmem:[#allocation63_spill] sm:$0xff] }
 0x753   : > { %v8645_v55 = vpack.c.bf16 %v8613_v8, %v8613_v8 }
 0x754   : > { %8718 = vrot.lane.b32.xlu1 %v8642_v22, %s12749_s16  ;;  %v7463_v22 = vpack.c.bf16 %v7431_v40, %v7431_v40 }
 0x755   : > { %v7771_v23 = vpop.f32.mrf.mxu2  ;;  %8724 = vrot.lane.b32.xlu0 %v8645_v55, %s12749_s16  ;;  %v8855_v55 = vsel %vm789_vm1, %v17990_v61, 0 }
 0x756   : > { %11616 = vmatmul.msk.f32.gmra.mxu2 %vm1215_vm2, %v7771_v23  ;;  %v8280_v42 = vpop.f32.mrf.mxu0  ;;  %v7437_v23 = vmax.f32 %v16156_v13, 0.0 }
 0x757   : > { %v8611_v19 = vmax.f32 %v8280_v42, 0.0  ;;  %v17991_v42 = vld [vmem:[#allocation62_spill] sm:$0xff] }
 0x758   : > { %v8452_v63 = vpop.f32.mrf.mxu1  ;;  %v7469_v59 = vpack.c.bf16 %v7437_v23, %v7437_v23 }
 0x759   : > { %v8643_v45 = vpack.c.bf16 %v8611_v19, %v8611_v19  ;;  %v7793_v26 = vpop.f32.mrf.mxu3  ;;  %v8620_v39 = vmax.f32 %v8452_v63, 0.0  ;;  %v8927_v19 = vsel %vm789_vm1, %v17991_v42, 0 }
 0x75a   : > { %11617 = vmatmul.msk.f32.vlgmr.msrb.gmra.mxu3 %vm1215_vm2, %v7793_v26 }
 0x75b   : > { %8720 = vrot.lane.b32.xlu2 %v8643_v45, %s12749_s16  ;;  %8519 = vmatpush.msrb.mxu3 %v12509_v29  ;;  %v8652_v43 = vpack.c.bf16 %v8620_v39, %v8620_v39 }
 0x75c   : > { %7527 = vrot.lane.b32.xlu1 %v7462_v9, %s12750_s17  ;;  %v7432_v9 = vmax.f32 %v16159_v6, 0.0  ;;  %v12599_v6 = vunpack.i.l.bf16 %v15622_v12 }
 0x75d   : > { %v7865_v30 = vpop.f32.mrf.mxu2  ;;  %8520 = vmatpush.msrb.mxu3 %v12510_v46  ;;  %7525 = vrot.lane.b32.xlu0 %v7461_v36, %s12750_s17  ;;  %v17992_v36 = vld [vmem:[#allocation40_spill] sm:$0xff] }
 0x75e   : > { %v16244_v52 = vpop.f32.mrf.mxu0  ;;  %11623 = vmatmul.msk.f32.vlgmr.msra.gmra.mxu2 %vm1215_vm2, %v7865_v30  ;;  %v12574_v50 = vunpack.i.l.bf16 %v17992_v36 }
 0x75f   : > { %8840 = vmatpush.bf16.xpose.msra.mxu2 %v8831_v54  ;;  %v7464_v54 = vpack.c.bf16 %v7432_v9, %v7432_v9  ;;  %v7453_v9 = vmax.f32 %v16199_v56, 0.0 }
 0x760   : > { %v8455_v27 = vpop.f32.mrf.mxu1 }
 0x761   : > { %v8621_v10 = vmax.f32 %v8455_v27, 0.0  ;;  %v7795_v21 = vpop.f32.mrf.mxu3 }
 0x762   : > { %11618 = vmatmul.msk.f32.gmra.mxu3 %vm1215_vm2, %v7795_v21  ;;  %v7438_v21 = vmax.f32 %v16166_v51, 0.0 }
 0x763   : > { %8722 = vrot.lane.b32.xlu2 %v8644_v4, %s12749_s16  ;;  %v8653_v31 = vpack.c.bf16 %v8621_v10, %v8621_v10  ;;  %v17993_v4 = vld [vmem:[#allocation123_spill] sm:$0xff]  ;;  %v12575_v10 = vunpack.i.h.bf16 %v17992_v36 }
 0x764   : > { %v8951_v27 = vsel %vm789_vm1, %v17993_v4, 0 }
 0x765   : > { %v7867_v24 = vpop.f32.mrf.mxu2  ;;  %8738 = vrot.lane.b32.xlu0 %v8652_v43, %s12749_s16  ;;  %8740 = vrot.lane.b32.xlu1 %v8653_v31, %s12749_s16  ;;  %v17994_v31 = vld [vmem:[#allocation30_spill] sm:$0xff] }
 0x766   : > { %v16254_v38 = vpop.f32.mrf.mxu0  ;;  %11624 = vmatmul.msk.f32.gmra.mxu2 %vm1215_vm2, %v7867_v24  ;;  %v9023_v40 = vsel %vm789_vm1, %v17994_v31, 0  ;;  %v7440_v24 = vmax.f32 %v16181_v18, 0.0  ;;  %v7439_v18 = vmax.f32 %v16169_v15, 0.0  ;;  %v17998_v15 = vld [vmem:[#allocation15_spill] sm:$0xff] }
 0x768   : > { %v16257_v2 = vpop.f32.mrf.mxu1 }
 0x769   : > { %v7889_v8 = vpop.f32.mrf.mxu3 }
 0x76a   : > { %11625 = vmatmul.msk.f32.vlgmr.msra.gmra.mxu3 %vm1215_vm2, %v7889_v8  ;;  %v12600_v8 = vunpack.i.h.bf16 %v15622_v12  ;;  %v7454_v12 = vmax.f32 %v16209_v7, 0.0  ;;  %v12604_v7 = vunpack.i.l.bf16 %v17998_v15 }
 0x76b   : > { %7529 = vrot.lane.b32.xlu2 %v7463_v22, %s12750_s17  ;;  %8864 = vmatpush.bf16.xpose.msra.mxu3 %v8855_v55  ;;  %v17995_v22 = vld [vmem:[#allocation55_spill] sm:$0xff]  ;;  %v7470_v55 = vpack.c.bf16 %v7438_v21, %v7438_v21 }
 0x76d   : > { %v7961_v1 = vpop.f32.mrf.mxu2 }
 0x76e   : > { %v8557_v35 = vpop.f32.mrf.mxu0  ;;  %11631 = vmatmul.msk.f32.vlgmr.msrb.gmra.mxu2 %vm1215_vm2, %v7961_v1  ;;  %v7472_v1 = vpack.c.bf16 %v7440_v24, %v7440_v24  ;;  %v18004_v24 = vld [vmem:[#allocation84_spill] sm:$0xff] }
 0x76f   : > { %v8626_v37 = vmax.f32 %v8557_v35, 0.0  ;;  %8936 = vmatpush.bf16.xpose.msrb.mxu2 %v8927_v19  ;;  %v12609_v35 = vunpack.i.l.bf16 %v15659_v3  ;;  %v7471_v19 = vpack.c.bf16 %v7439_v18, %v7439_v18  ;;  %v18006_v18 = vld [vmem:[#allocation103_spill] sm:$0xff] }
 0x770   : > { %v16267_v63 = vpop.f32.mrf.mxu1 }
 0x771   : > { %v8658_v45 = vpack.c.bf16 %v8626_v37, %v8626_v37  ;;  %v7891_v29 = vpop.f32.mrf.mxu3  ;;  %v17996_v37 = vld [vmem:[#allocation101_spill] sm:$0xff] }
 0x772   : > { %11626 = vmatmul.msk.f32.gmra.mxu3 %vm1215_vm2, %v7891_v29  ;;  %v7486_v29 = vpack.c.bf16 %v7454_v12, %v7454_v12  ;;  %v18007_v12 = vld [vmem:[#allocation70_spill] sm:$0xff] }
 0x773   : > { %8750 = vrot.lane.b32.xlu0 %v8658_v45, %s12749_s16  ;;  %7541 = vrot.lane.b32.xlu2 %v7469_v59, %s12750_s17  ;;  %v9047_v45 = vsel %vm789_vm1, %v17996_v37, 0  ;;  %v12610_v59 = vunpack.i.h.bf16 %v15659_v3  ;;  %v7456_v3 = vmax.f32 %v16220_v57, 0.0  ;;  %v7455_v57 = vmax.f32 %v16213_v49, 0.0  ;;  %v18003_v49 = vld [vmem:[#allocation110_spill] sm:$0xff] }
 0x774   : > { %v12534_v31 = vunpack.i.l.bf16 %v18003_v49  ;;  %v12555_v37 = vunpack.i.h.bf16 %v18007_v12 }
 0x775   : > { %v7963_v13 = vpop.f32.mrf.mxu2  ;;  %v7488_v56 = vpack.c.bf16 %v7456_v3, %v7456_v3 }
 0x776   : > { %v8560_v26 = vpop.f32.mrf.mxu0  ;;  %11632 = vmatmul.msk.f32.gmra.mxu2 %vm1215_vm2, %v7963_v13  ;;  %v17997_v13 = vld [vmem:[#allocation170_spill] sm:$0xff] }
 0x777   : > { %v8627_v46 = vmax.f32 %v8560_v26, 0.0 }
 0x778   : > { %v8914_v41 = vpop.f32.mrf.mxu1 }
 0x779   : > { %v8659_v30 = vpack.c.bf16 %v8627_v46, %v8627_v46  ;;  %11661 = vmatmul.msk.f32.vlgmr.msrb.gmra.mxu1 %vm1215_vm2, %v8914_v41  ;;  %v7985_v39 = vpop.f32.mrf.mxu3  ;;  %v17999_v46 = vld [vmem:[#allocation51_spill] sm:$0xff] }
 0x77a   : > { %9618 = vmatpush.msrb.mxu1 %v12574_v50  ;;  %11633 = vmatmul.msk.f32.vlgmr.msrb.gmra.mxu3 %vm1215_vm2, %v7985_v39  ;;  %v9119_v36 = vsel %vm789_vm1, %v17999_v46, 0  ;;  %v18000_v50 = vld [vmem:[#allocation28_spill] sm:$0xff] }
 0x77b   : > { %8960 = vmatpush.bf16.xpose.msrb.mxu3 %v8951_v27  ;;  %7531 = vrot.lane.b32.xlu0 %v7464_v54, %s12750_s17  ;;  %v7485_v54 = vpack.c.bf16 %v7453_v9, %v7453_v9  ;;  %v18010_v9 = vld [vmem:[#allocation25_spill] sm:$0xff] }
 0x77c   : > { %9619 = vmatpush.msrb.mxu1 %v12575_v10  ;;  %8752 = vrot.lane.b32.xlu1 %v8659_v30, %s12749_s16  ;;  %v12605_v30 = vunpack.i.h.bf16 %v17998_v15  ;;  %v7487_v10 = vpack.c.bf16 %v7455_v57, %v7455_v57  ;;  %v12564_v15 = vunpack.i.l.bf16 %v15603_v32 }
 0x77e   : > { %v8890_v43 = vpop.f32.mrf.mxu0  ;;  %11639 = vmatmul.msk.bf16.vlgmr.msra.gmra.mxu2 %vm789_vm1, %v17995_v22  ;;  %v12535_v22 = vunpack.i.h.bf16 %v18003_v49 }
 0x77f   : > { %11659 = vmatmul.msk.f32.vlgmr.msrb.gmra.mxu0 %vm1215_vm2, %v8890_v43  ;;  %9032 = vmatpush.bf16.xpose.msra.mxu2 %v9023_v40  ;;  %v18002_v43 = vld [vmem:[#allocation106_spill] sm:$0xff] }
 0x780   : > { %9583 = vmatpush.msrb.mxu0 %v12599_v6  ;;  %v8916_v61 = vpop.f32.mrf.mxu1  ;;  %v18001_v6 = vld [vmem:[#allocation22_spill] sm:$0xff] }
 0x781   : > { %11662 = vmatmul.msk.f32.gmra.mxu1 %vm1215_vm2, %v8916_v61  ;;  %v7987_v51 = vpop.f32.mrf.mxu3  ;;  %v9143_v21 = vsel %vm789_vm1, %v18001_v6, 0 }
 0x782   : > { %9584 = vmatpush.msrb.mxu0 %v12600_v8  ;;  %11634 = vmatmul.msk.f32.gmra.mxu3 %vm1215_vm2, %v7987_v51  ;;  %v18005_v51 = vld [vmem:[#allocation58_spill] sm:$0xff] }
 0x783   : > { %7543 = vrot.lane.b32.xlu0 %v7470_v55, %s12750_s17 }
 0x784   : > { %7547 = vrot.lane.b32.xlu1 %v7472_v1, %s12750_s17  ;;  %v12539_v1 = vunpack.i.l.bf16 %v18005_v51 }
 0x786   : > { %v8892_v23 = vpop.f32.mrf.mxu0 }
 0x787   : > { %11660 = vmatmul.msk.f32.gmra.mxu0 %vm1215_vm2, %v8892_v23  ;;  %v12540_v23 = vunpack.i.h.bf16 %v18005_v51 }
 0x788   : > { %v9010_v42 = vpop.f32.mrf.mxu1 }
 0x789   : > { %11669 = vmatmul.msk.f32.vlgmr.msra.gmra.mxu1 %vm1215_vm2, %v9010_v42 }
 0x78a   : > { %9758 = vmatpush.msra.mxu1 %v12609_v35  ;;  %11640 = vmatmul.msk.bf16.vlgmr.msra.gmra.mxu3 %vm789_vm1, %v17997_v13  ;;  %v12554_v35 = vunpack.i.l.bf16 %v18007_v12 }
 0x78b   : > { %9056 = vmatpush.bf16.xpose.msra.mxu3 %v9047_v45  ;;  %7545 = vrot.lane.b32.xlu0 %v7471_v19, %s12750_s17  ;;  %v18008_v19 = vld [vmem:[#allocation73_spill] sm:$0xff] }
 0x78c   : > { %9759 = vmatpush.msra.mxu1 %v12610_v59  ;;  %7575 = vrot.lane.b32.xlu1 %v7486_v29, %s12750_s17 }
 0x78e   : > { %v8986_v26 = vpop.f32.mrf.mxu0  ;;  %11643 = vmatmul.msk.bf16.vlgmr.msrb.gmra.mxu2 %vm789_vm1, %v18000_v50 }
 0x78f   : > { %11667 = vmatmul.msk.f32.vlgmr.msra.gmra.mxu0 %vm1215_vm2, %v8986_v26  ;;  %9128 = vmatpush.bf16.xpose.msrb.mxu2 %v9119_v36  ;;  %v12569_v26 = vunpack.i.l.bf16 %v18010_v9 }
 0x790   : > { %9723 = vmatpush.msra.mxu0 %v12604_v7  ;;  %v9012_v41 = vpop.f32.mrf.mxu1  ;;  %v18009_v7 = vld [vmem:[#allocation68_spill] sm:$0xff] }
 0x791   : > { %11670 = vmatmul.msk.f32.gmra.mxu1 %vm1215_vm2, %v9012_v41 }
 0x792   : > { %9724 = vmatpush.msra.mxu0 %v12605_v30 }
 0x793   : > { %7573 = vrot.lane.b32.xlu0 %v7485_v54, %s12750_s17 }
 0x794   : > { %7579 = vrot.lane.b32.xlu1 %v7488_v56, %s12750_s17 }
 0x796   : > { %v8988_v39 = vpop.f32.mrf.mxu0 }
 0x797   : > { %11668 = vmatmul.msk.f32.gmra.mxu0 %vm1215_vm2, %v8988_v39  ;;  %v8707_v4 = vpop.permute.xlu2 %8706 }
 0x798   : > { %8797 = vst.msk [vmem:[#allocation2 + $0x18] sm:$0xf] %vm8790_vm9, %v8707_v4  ;;  %v9106_v27 = vpop.f32.mrf.mxu1 }
 0x799   : > { %11677 = vmatmul.msk.f32.vlgmr.msrb.gmra.mxu1 %vm1215_vm2, %v9106_v27 }
 0x79a   : > { %11644 = vmatmul.msk.bf16.vlgmr.msrb.gmra.mxu3 %vm789_vm1, %v18002_v43 }
 0x79b   : > { %9152 = vmatpush.bf16.xpose.msrb.mxu3 %v9143_v21  ;;  %7577 = vrot.lane.b32.xlu0 %v7487_v10, %s12750_s17 }
 0x79e   : > { %v9082_v40 = vpop.f32.mrf.mxu0  ;;  %11647 = vmatmul.msk.bf16.vlgmr.msra.gmra.mxu2 %vm789_vm1, %v18004_v24 }
 0x79f   : > { %11675 = vmatmul.msk.f32.vlgmr.msrb.gmra.mxu0 %vm1215_vm2, %v9082_v40  ;;  %9233 = vmatpush.msra.mxu2 %v12534_v31 }
 0x7a0   : > { %v9108_v8 = vpop.f32.mrf.mxu1 }
 0x7a1   : > { %9234 = vmatpush.msra.mxu2 %v12535_v22  ;;  %11678 = vmatmul.msk.f32.gmra.mxu1 %vm1215_vm2, %v9108_v8 }
 0x7a6   : > { %v9084_v61 = vpop.f32.mrf.mxu0 }
 0x7a7   : > { %11676 = vmatmul.msk.f32.gmra.mxu0 %vm1215_vm2, %v9084_v61 }
 0x7a8   : > { %v9202_v55 = vpop.f32.mrf.mxu1 }
 0x7a9   : > { %11685 = vmatmul.msk.f32.vlgmr.msra.gmra.mxu1 %vm1215_vm2, %v9202_v55 }
 0x7aa   : > { %11648 = vmatmul.msk.bf16.vlgmr.msra.gmra.mxu3 %vm789_vm1, %v18006_v18 }
 0x7ab   : > { %9268 = vmatpush.msra.mxu3 %v12539_v1 }
 0x7ad   : > { %9269 = vmatpush.msra.mxu3 %v12540_v23 }
 0x7ae   : > { %v9178_v42 = vpop.f32.mrf.mxu0  ;;  %11651 = vmatmul.msk.bf16.vlgmr.msrb.gmra.mxu2 %vm789_vm1, %v18008_v19 }
 0x7af   : > { %11683 = vmatmul.msk.f32.vlgmr.msra.gmra.mxu0 %vm1215_vm2, %v9178_v42  ;;  %9373 = vmatpush.msrb.mxu2 %v12554_v35 }
 0x7b0   : > { %v9204_v45 = vpop.f32.mrf.mxu1 }
 0x7b1   : > { %9374 = vmatpush.msrb.mxu2 %v12555_v37  ;;  %11686 = vmatmul.msk.f32.gmra.mxu1 %vm1215_vm2, %v9204_v45 }
 0x7b5   : > { %v8703_v59 = vpop.permute.xlu0 %8702  ;;  %v8721_v29 = vpop.permute.xlu2 %8720 }
 0x7b6   : > { %8795 = vst.msk [vmem:[#allocation2 + $0x10] sm:$0xf] %vm8790_vm9, %v8703_v59  ;;  %v9180_v13 = vpop.f32.mrf.mxu0 }
 0x7b7   : > { %8804 = vst.msk [vmem:[#allocation2 + $0x34] sm:$0xf] %vm8790_vm9, %v8721_v29  ;;  %11684 = vmatmul.msk.f32.gmra.mxu0 %vm1215_vm2, %v9180_v13 }
 0x7ba   : > { %11652 = vmatmul.msk.bf16.vlgmr.msrb.gmra.mxu3 %vm789_vm1, %v18009_v7 }
 0x7bb   : > { %9408 = vmatpush.msrb.mxu3 %v12564_v15 }
 0x7bd   : > { %v8709_v46 = vpop.permute.xlu0 %8708  ;;  %v8723_v36 = vpop.permute.xlu2 %8722  ;;  %9409 = vmatpush.msrb.mxu3 %v12569_v26 }
 0x7be   : > { %8798 = vst.msk [vmem:[#allocation2 + $0x1c] sm:$0xf] %vm8790_vm9, %v8709_v46  ;;  %v8705_v3 = vpop.permute.xlu1 %8704  ;;  %v12565_v46 = vunpack.i.h.bf16 %v15603_v32 }
 0x7bf   : > { %8796 = vst.msk [vmem:[#allocation2 + $0x14] sm:$0xf] %vm8790_vm9, %v8705_v3  ;;  %v12570_v3 = vunpack.i.h.bf16 %v18010_v9 }
 0x7c0   : > { %8805 = vst.msk [vmem:[#allocation2 + $0x38] sm:$0xf] %vm8790_vm9, %v8723_v36 }
 0x7c1   : > { %v16356_v50 = vpop.f32.mrf.mxu2 }
 0x7c5   : > { %v7530_v30 = vpop.permute.xlu2 %7529 }
 0x7c6   : > { %v8719_v41 = vpop.permute.xlu1 %8718  ;;  %7624 = vst.msk [vmem:[#allocation2 + $0x8] sm:$0xf] %vm7621_vm8, %v7530_v30 }
 0x7c7   : > { %8803 = vst.msk [vmem:[#allocation2 + $0x30] sm:$0xf] %vm8790_vm9, %v8719_v41  ;;  %v8725_v54 = vpop.permute.xlu0 %8724 }
 0x7c8   : > { %8806 = vst.msk [vmem:[#allocation2 + $0x3c] sm:$0xf] %vm8790_vm9, %v8725_v54 }
 0x7c9   : > { %v16361_v56 = vpop.f32.mrf.mxu2 }
 0x7cd   : > { %v16363_v57 = vpop.f32.mrf.mxu3  ;;  %v7542_v4 = vpop.permute.xlu2 %7541 }
 0x7ce   : > { %v7528_v39 = vpop.permute.xlu1 %7527  ;;  %7630 = vst.msk [vmem:[#allocation2 + $0x20] sm:$0xf] %vm7621_vm8, %v7542_v4 }
 0x7cf   : > { %7623 = vst.msk [vmem:[#allocation2 + $0x4] sm:$0xf] %vm7621_vm8, %v7528_v39  ;;  %v7526_v27 = vpop.permute.xlu0 %7525 }
 0x7d0   : > { %7622 = vst.msk [vmem:[#allocation2] sm:$0xf] %vm7621_vm8, %v7526_v27 }
 0x7d1   : > { %v16368_v10 = vpop.f32.mrf.mxu2 }
 0x7d5   : > { %v16370_v6 = vpop.f32.mrf.mxu3 }
 0x7d7   : > { %v8739_v21 = vpop.permute.xlu0 %8738  ;;  %v8741_v43 = vpop.permute.xlu1 %8740 }
 0x7d8   : > { %8813 = vst.msk [vmem:[#allocation2 + $0x58] sm:$0xf] %vm8790_vm9, %v8739_v21 }
 0x7d9   : > { %v16373_v49 = vpop.f32.mrf.mxu2  ;;  %8814 = vst.msk [vmem:[#allocation2 + $0x5c] sm:$0xf] %vm8790_vm9, %v8741_v43 }
 0x7dd   : > { %v16376_v31 = vpop.f32.mrf.mxu3 }
 0x7e1   : > { %v16378_v40 = vpop.f32.mrf.mxu2 }
 0x7e5   : > { %v8751_v24 = vpop.permute.xlu0 %8750  ;;  %v16380_v22 = vpop.f32.mrf.mxu3 }
 0x7e6   : > { %8819 = vst.msk [vmem:[#allocation2 + $0x70] sm:$0xf] %vm8790_vm9, %v8751_v24  ;;  %v12579_v24 = vunpack.i.l.bf16 %v15624_v5 }
 0x7e9   : > { %v16383_v8 = vpop.f32.mrf.mxu2 }
 0x7ed   : > { %v16385_v61 = vpop.f32.mrf.mxu3  ;;  %v7532_v55 = vpop.permute.xlu0 %7531 }
 0x7ee   : > { %7625 = vst.msk [vmem:[#allocation2 + $0xc] sm:$0xf] %vm7621_vm8, %v7532_v55  ;;  %v8753_v51 = vpop.permute.xlu1 %8752 }
 0x7ef   : > { %8820 = vst.msk [vmem:[#allocation2 + $0x74] sm:$0xf] %vm8790_vm9, %v8753_v51 }
 0x7f1   : > { %v16389_v1 = vpop.f32.mrf.mxu2 }
 0x7f5   : > { %v16391_v18 = vpop.f32.mrf.mxu3  ;;  %v7544_v23 = vpop.permute.xlu0 %7543 }
 0x7f6   : > { %v9341_v12 = vpop.f32.mrf.mxu1  ;;  %7631 = vst.msk [vmem:[#allocation2 + $0x24] sm:$0xf] %vm7621_vm8, %v7544_v23  ;;  %v7548_v35 = vpop.permute.xlu1 %7547 }
 0x7f7   : > { %v9773_v42 = vmax.f32 %v9341_v12, 0.0  ;;  %7633 = vst.msk [vmem:[#allocation2 + $0x2c] sm:$0xf] %vm7621_vm8, %v7548_v35  ;;  %v18011_v35 = vld [vmem:[#allocation129_spill] sm:$0xff] }
 0x7f9   : > { %v9805_v19 = vpack.c.bf16 %v9773_v42, %v9773_v42  ;;  %v16395_v37 = vpop.f32.mrf.mxu2  ;;  %v12584_v42 = vunpack.i.l.bf16 %v18011_v35 }
 0x7fb   : > { %9875 = vrot.lane.b32.xlu1 %v9805_v19, %s12747_s18 }
 0x7fc   : > { %v9306_v45 = vpop.f32.mrf.mxu0 }
 0x7fd   : > { %v9771_v59 = vmax.f32 %v9306_v45, 0.0  ;;  %v16398_v29 = vpop.f32.mrf.mxu3  ;;  %v7546_v13 = vpop.permute.xlu0 %7545  ;;  %v12580_v45 = vunpack.i.h.bf16 %v15624_v5 }
 0x7fe   : > { %v9344_v7 = vpop.f32.mrf.mxu1  ;;  %7632 = vst.msk [vmem:[#allocation2 + $0x28] sm:$0xf] %vm7621_vm8, %v7546_v13  ;;  %v7576_v26 = vpop.permute.xlu1 %7575 }
 0x7ff   : > { %v9803_v15 = vpack.c.bf16 %v9771_v59, %v9771_v59  ;;  %7647 = vst.msk [vmem:[#allocation2 + $0x64] sm:$0xf] %vm7621_vm8, %v7576_v26  ;;  %v12585_v26 = vunpack.i.h.bf16 %v18011_v35 }
 0x801   : > { %9871 = vrot.lane.b32.xlu2 %v9803_v15, %s12747_s18  ;;  %v8842_v36 = vpop.f32.mrf.mxu2  ;;  %v9774_v15 = vmax.f32 %v9344_v7, 0.0 }
 0x802   : > { %11655 = vmatmul.msk.f32.vlgmr.msra.gmra.mxu2 %vm1215_vm2, %v8842_v36 }
 0x803   : > { %9513 = vmatpush.msra.mxu2 %v12565_v46 }
 0x804   : > { %v9309_v30 = vpop.f32.mrf.mxu0 }
 0x805   : > { %v9772_v41 = vmax.f32 %v9309_v30, 0.0  ;;  %9514 = vmatpush.msra.mxu2 %v12570_v3  ;;  %v16406_v54 = vpop.f32.mrf.mxu3  ;;  %v7574_v39 = vpop.permute.xlu0 %7573  ;;  %v9806_v30 = vpack.c.bf16 %v9774_v15, %v9774_v15 }
 0x806   : > { %v9481_v27 = vpop.f32.mrf.mxu1  ;;  %7646 = vst.msk [vmem:[#allocation2 + $0x60] sm:$0xf] %vm7621_vm8, %v7574_v39  ;;  %v7580_v21 = vpop.permute.xlu1 %7579 }
 0x807   : > { %v9804_v4 = vpack.c.bf16 %v9772_v41, %v9772_v41  ;;  %7649 = vst.msk [vmem:[#allocation2 + $0x6c] sm:$0xf] %vm7621_vm8, %v7580_v21  ;;  %v9781_v21 = vmax.f32 %v9481_v27, 0.0 }
 0x809   : > { %9873 = vrot.lane.b32.xlu0 %v9804_v4, %s12747_s18  ;;  %v8844_v32 = vpop.f32.mrf.mxu2 }
 0x80a   : > { %11656 = vmatmul.msk.f32.gmra.mxu2 %vm1215_vm2, %v8844_v32 }
 0x80c   : > { %v9446_v9 = vpop.f32.mrf.mxu0 }
 0x80d   : > { %v9779_v43 = vmax.f32 %v9446_v9, 0.0  ;;  %v8866_v55 = vpop.f32.mrf.mxu3  ;;  %v7578_v51 = vpop.permute.xlu0 %7577  ;;  %v12594_v9 = vunpack.i.l.bf16 %v15639_v17 }
 0x80e   : > { %v9484_v12 = vpop.f32.mrf.mxu1  ;;  %11657 = vmatmul.msk.f32.vlgmr.msra.gmra.mxu3 %vm1215_vm2, %v8866_v55  ;;  %7648 = vst.msk [vmem:[#allocation2 + $0x68] sm:$0xf] %vm7621_vm8, %v7578_v51  ;;  %v9813_v55 = vpack.c.bf16 %v9781_v21, %v9781_v21  ;;  %v12595_v51 = vunpack.i.h.bf16 %v15639_v17 }
 0x80f   : > { %v9811_v23 = vpack.c.bf16 %v9779_v43, %v9779_v43  ;;  %v9782_v19 = vmax.f32 %v9484_v12, 0.0  ;;  %9548 = vmatpush.msra.mxu3 %v12579_v24  ;;  %v8600_v43 = vmax.f32 %v16363_v57, 0.0  ;;  %v8607_v57 = vmax.f32 %v16373_v49, 0.0 }
 0x811   : > { %9887 = vrot.lane.b32.xlu2 %v9811_v23, %s12747_s18  ;;  %v9814_v59 = vpack.c.bf16 %v9782_v19, %v9782_v19  ;;  %9549 = vmatpush.msra.mxu3 %v12584_v42  ;;  %v8938_v13 = vpop.f32.mrf.mxu2  ;;  %v8632_v27 = vpack.c.bf16 %v8600_v43, %v8600_v43  ;;  %v8639_v42 = vpack.c.bf16 %v8607_v57, %v8607_v57  ;;  %v8625_v57 = vmax.f32 %v16406_v54, 0.0 }
 0x812   : > { %11663 = vmatmul.msk.f32.vlgmr.msrb.gmra.mxu2 %vm1215_vm2, %v8938_v13 }
 0x813   : > { %9653 = vmatpush.msrb.mxu2 %v12580_v45  ;;  %9893 = vrot.lane.b32.xlu1 %v9814_v59, %s12747_s18  ;;  %v8608_v59 = vmax.f32 %v16376_v31, 0.0 }
 0x814   : > { %v9449_v46 = vpop.f32.mrf.mxu0 }
 0x815   : > { %v9780_v36 = vmax.f32 %v9449_v46, 0.0  ;;  %9654 = vmatpush.msrb.mxu2 %v12585_v26  ;;  %v8868_v3 = vpop.f32.mrf.mxu3  ;;  %v8640_v49 = vpack.c.bf16 %v8608_v59, %v8608_v59  ;;  %v8598_v46 = vmax.f32 %v16356_v50, 0.0 }
 0x816   : > { %v9621_v39 = vpop.f32.mrf.mxu1  ;;  %11658 = vmatmul.msk.f32.gmra.mxu3 %vm1215_vm2, %v8868_v3 }
 0x817   : > { %v9812_v41 = vpack.c.bf16 %v9780_v36, %v9780_v36  ;;  %v9789_v5 = vmax.f32 %v9621_v39, 0.0  ;;  %v8630_v31 = vpack.c.bf16 %v8598_v46, %v8598_v46  ;;  %v11943_v46 = vld [vmem:[%s17265_s3] sm:$0xff] }
 0x819   : > { %9889 = vrot.lane.b32.xlu0 %v9812_v41, %s12747_s18  ;;  %9877 = vrot.lane.b32.xlu2 %v9806_v30, %s12747_s18  ;;  %v9821_v7 = vpack.c.bf16 %v9789_v5, %v9789_v5  ;;  %v8940_v4 = vpop.f32.mrf.mxu2  ;;  %v8622_v30 = vmax.f32 %v16389_v1, 0.0 }
 0x81a   : > { %11664 = vmatmul.msk.f32.gmra.mxu2 %vm1215_vm2, %v8940_v4  ;;  %v8599_v4 = vmax.f32 %v16361_v56, 0.0 }
 0x81b   : > { %9907 = vrot.lane.b32.xlu1 %v9821_v7, %s12747_s18  ;;  %v8654_v7 = vpack.c.bf16 %v8622_v30, %v8622_v30 }
 0x81c   : > { %v16426_v32 = vpop.f32.mrf.mxu0 }
 0x81d   : > { %v8962_v24 = vpop.f32.mrf.mxu3 }
 0x81e   : > { %11665 = vmatmul.msk.f32.vlgmr.msrb.gmra.mxu3 %vm1215_vm2, %v8962_v24  ;;  %v9624_v5 = vpop.f32.mrf.mxu1  ;;  %v8606_v24 = vmax.f32 %v16368_v10, 0.0  ;;  %v18012_v10 = vld [vmem:[#allocation96_spill] sm:$0xff] }
 0x81f   : > { %9688 = vmatpush.msrb.mxu3 %v12594_v9  ;;  %v9790_v21 = vmax.f32 %v9624_v5, 0.0  ;;  %v8631_v9 = vpack.c.bf16 %v8599_v4, %v8599_v4 }
 0x820   : > { %v8638_v56 = vpack.c.bf16 %v8606_v24, %v8606_v24 }
 0x821   : > { %9891 = vrot.lane.b32.xlu0 %v9813_v55, %s12747_s18  ;;  %9689 = vmatpush.msrb.mxu3 %v12595_v51  ;;  %v9034_v23 = vpop.f32.mrf.mxu2  ;;  %v9822_v43 = vpack.c.bf16 %v9790_v21, %v9790_v21  ;;  %v8601_v55 = vmax.f32 %v16370_v6, 0.0  ;;  %v2783_v6 = vmax.f32 %v18012_v10, 0.0 }
 0x822   : > { %11671 = vmatmul.msk.f32.vlgmr.msra.gmra.mxu2 %vm1215_vm2, %v9034_v23  ;;  %v8609_v23 = vmax.f32 %v16380_v22, 0.0  ;;  %v8624_v22 = vmax.f32 %v16398_v29, 0.0 }
 0x823   : > { %8698 = vrot.lane.b32.xlu1 %v8632_v27, %s12749_s16  ;;  %v8633_v27 = vpack.c.bf16 %v8601_v55, %v8601_v55 }
 0x824   : > { %v16435_v12 = vpop.f32.mrf.mxu0  ;;  %v8656_v59 = vpack.c.bf16 %v8624_v22, %v8624_v22 }
 0x825   : > { %v8964_v35 = vpop.f32.mrf.mxu3 }
 0x826   : > { %11666 = vmatmul.msk.f32.gmra.mxu3 %vm1215_vm2, %v8964_v35  ;;  %v8641_v35 = vpack.c.bf16 %v8609_v23, %v8609_v23 }
 0x829   : > { %v9036_v19 = vpop.f32.mrf.mxu2 }
 0x82a   : > { %11672 = vmatmul.msk.f32.gmra.mxu2 %vm1215_vm2, %v9036_v19  ;;  %v8623_v19 = vmax.f32 %v16395_v37, 0.0 }
 0x82b   : > { %8712 = vrot.lane.b32.xlu1 %v8639_v42, %s12749_s16  ;;  %v8657_v42 = vpack.c.bf16 %v8625_v57, %v8625_v57 }
 0x82c   : > { %v9726_v17 = vpop.f32.mrf.mxu0 }
 0x82d   : > { %v9795_v45 = vmax.f32 %v9726_v17, 0.0  ;;  %v9058_v13 = vpop.f32.mrf.mxu3  ;;  %v2815_v17 = vpack.c.bf16 %v2783_v6, %v2783_v6 }
 0x82e   : > { %11673 = vmatmul.msk.f32.vlgmr.msra.gmra.mxu3 %vm1215_vm2, %v9058_v13  ;;  %v11946_v13 = vld [vmem:[%s17265_s3 + $0x18] sm:$0xff] }
 0x82f   : > { %v9827_v15 = vpack.c.bf16 %v9795_v45, %v9795_v45  ;;  %v8655_v45 = vpack.c.bf16 %v8623_v19, %v8623_v19  ;;  %11979 = vmatpush.bf16.msra.mxu2 %v11946_v13  ;;  %11980 = vmatpush.bf16.msra.mxu3 %v11946_v13 }
 0x830   : > { %10192 = vmatpush.bf16.msrb.mxu0 %v11946_v13 }
 0x831   : > { %9919 = vrot.lane.b32.xlu2 %v9827_v15, %s12747_s18  ;;  %v9130_v26 = vpop.f32.mrf.mxu2  ;;  %v11945_v15 = vld [vmem:[%s17265_s3 + $0x10] sm:$0xff] }
 0x832   : > { %11679 = vmatmul.msk.f32.vlgmr.msrb.gmra.mxu2 %vm1215_vm2, %v9130_v26 }
 0x833   : > { %8714 = vrot.lane.b32.xlu1 %v8640_v49, %s12749_s16  ;;  %11981 = vmatpush.bf16.msra.mxu2 %v11945_v15  ;;  %v11944_v49 = vld [vmem:[%s17265_s3 + $0x8] sm:$0xff] }
 0x834   : > { %v9729_v36 = vpop.f32.mrf.mxu0  ;;  %11982 = vmatpush.bf16.msra.mxu3 %v11945_v15  ;;  %10193 = vmatpush.bf16.msrb.mxu0 %v11945_v15 }
 0x835   : > { %v9796_v3 = vmax.f32 %v9729_v36, 0.0  ;;  %v9060_v41 = vpop.f32.mrf.mxu3 }
 0x836   : > { %11674 = vmatmul.msk.f32.gmra.mxu3 %vm1215_vm2, %v9060_v41 }
 0x837   : > { %v9828_v39 = vpack.c.bf16 %v9796_v3, %v9796_v3  ;;  %11983 = vmatpush.bf16.msra.mxu2 %v11944_v49 }
 0x838   : > { %11984 = vmatpush.bf16.msra.mxu3 %v11944_v49  ;;  %10194 = vmatpush.bf16.msrb.mxu0 %v11944_v49 }
 0x839   : > { %9921 = vrot.lane.b32.xlu0 %v9828_v39, %s12747_s18  ;;  %8694 = vrot.lane.b32.xlu2 %v8630_v31, %s12749_s16  ;;  %v9132_v50 = vpop.f32.mrf.mxu2 }
 0x83a   : > { %11680 = vmatmul.msk.f32.gmra.mxu2 %vm1215_vm2, %v9132_v50 }
 0x83b   : > { %8742 = vrot.lane.b32.xlu1 %v8654_v7, %s12749_s16  ;;  %11985 = vmatpush.bf16.msra.mxu2 %v11943_v46  ;;  %v6276_v7 = vmax.f32 %v15923_v33, 0.0  ;;  %v6277_v33 = vmax.f32 %v15934_v48, 0.0 }
 0x83c   : > { %11986 = vmatpush.bf16.msra.mxu3 %v11943_v46  ;;  %10195 = vmatpush.bf16.msrb.mxu0 %v11943_v46 }
 0x83d   : > { %v9154_v1 = vpop.f32.mrf.mxu3  ;;  %v6309_v57 = vpack.c.bf16 %v6277_v33, %v6277_v33  ;;  %v18017_v33 = vld [vmem:[#allocation176_spill] sm:$0xff] }
 0x83e   : > { %11681 = vmatmul.msk.f32.vlgmr.msrb.gmra.mxu3 %vm1215_vm2, %v9154_v1  ;;  %v6308_v1 = vpack.c.bf16 %v6276_v7, %v6276_v7 }
 0x841   : > { %8696 = vrot.lane.b32.xlu0 %v8631_v9, %s12749_s16  ;;  %9909 = vrot.lane.b32.xlu2 %v9822_v43, %s12747_s18 }
 0x845   : > { %v9156_v51 = vpop.f32.mrf.mxu3 }
 0x846   : > { %11682 = vmatmul.msk.f32.gmra.mxu3 %vm1215_vm2, %v9156_v51 }
 0x849   : > { %8710 = vrot.lane.b32.xlu0 %v8638_v56, %s12749_s16  ;;  %8700 = vrot.lane.b32.xlu2 %v8633_v27, %s12749_s16 }
 0x851   : > { %8748 = vrot.lane.b32.xlu0 %v8657_v42, %s12749_s16  ;;  %8716 = vrot.lane.b32.xlu2 %v8641_v35, %s12749_s16  ;;  %v7446_v35 = vmax.f32 %v16188_v16, 0.0 }
 0x853   : > { %v7478_v48 = vpack.c.bf16 %v7446_v35, %v7446_v35 }
 0x859   : > { %2909 = vrot.lane.b32.xlu0 %v2815_v17, %s12759_s29  ;;  %8744 = vrot.lane.b32.xlu2 %v8655_v45, %s12749_s16 }
 0x85b   : > { %v9872_v54 = vpop.permute.xlu2 %9871 }
 0x85c   : > { %9964 = vst.msk [vmem:[#allocation2 + $0x10] sm:$0xf] %vm9959_vm10, %v9872_v54  ;;  %v18013_v54 = vld [vmem:[#allocation14_spill] sm:$0xff] }
 0x85d   : > { %v2784_v16 = vmax.f32 %v18013_v54, 0.0 }
 0x85f   : > { %v2816_v49 = vpack.c.bf16 %v2784_v16, %v2784_v16 }
 0x861   : > { %8746 = vrot.lane.b32.xlu2 %v8656_v59, %s12749_s16  ;;  %v8614_v59 = vmax.f32 %v16378_v40, 0.0  ;;  %v18014_v40 = vld [vmem:[#allocation139_spill] sm:$0xff] }
 0x863   : > { %v8646_v46 = vpack.c.bf16 %v8614_v59, %v8614_v59 }
 0x86b   : > { %v9888_v37 = vpop.permute.xlu2 %9887 }
 0x86c   : > { %9972 = vst.msk [vmem:[#allocation2 + $0x30] sm:$0xf] %vm9959_vm10, %v9888_v37 }
 0x86d   : > { %v9876_v29 = vpop.permute.xlu1 %9875 }
 0x86e   : > { %9966 = vst.msk [vmem:[#allocation2 + $0x18] sm:$0xf] %vm9959_vm10, %v9876_v29 }
 0x873   : > { %v9878_v26 = vpop.permute.xlu2 %9877 }
 0x874   : > { %9967 = vst.msk [vmem:[#allocation2 + $0x1c] sm:$0xf] %vm9959_vm10, %v9878_v26  ;;  %v7445_v26 = vmax.f32 %v16176_v34, 0.0 }
 0x87b   : > { %v9874_v36 = vpop.permute.xlu0 %9873 }
 0x87c   : > { %9965 = vst.msk [vmem:[#allocation2 + $0x14] sm:$0xf] %vm9959_vm10, %v9874_v36 }
 0x885   : > { %v9894_v3 = vpop.permute.xlu1 %9893  ;;  %v9236_v30 = vpop.f32.mrf.mxu2 }
 0x886   : > { %9975 = vst.msk [vmem:[#allocation2 + $0x3c] sm:$0xf] %vm9959_vm10, %v9894_v3  ;;  %v9767_v41 = vmax.f32 %v9236_v30, 0.0  ;;  %v3952_v30 = vmax.f32 %v18014_v40, 0.0 }
 0x888   : > { %v9799_v31 = vpack.c.bf16 %v9767_v41, %v9767_v41  ;;  %v18015_v41 = vld [vmem:[#allocation31_spill] sm:$0xff]  ;;  %v3984_v7 = vpack.c.bf16 %v3952_v30, %v3952_v30 }
 0x88a   : > { %9863 = vrot.lane.b32.xlu1 %v9799_v31, %s12747_s18  ;;  %v5122_v31 = vmax.f32 %v18015_v41, 0.0 }
 0x88b   : > { %v9890_v39 = vpop.permute.xlu0 %9889  ;;  %v9920_v5 = vpop.permute.xlu2 %9919 }
 0x88c   : > { %9973 = vst.msk [vmem:[#allocation2 + $0x34] sm:$0xf] %vm9959_vm10, %v9890_v39  ;;  %v7477_v39 = vpack.c.bf16 %v7445_v26, %v7445_v26  ;;  %v9761_v26 = vpop.f32.mrf.mxu1 }
 0x88d   : > { %9988 = vst.msk [vmem:[#allocation2 + $0x70] sm:$0xf] %vm9959_vm10, %v9920_v5  ;;  %v9908_v50 = vpop.permute.xlu1 %9907  ;;  %v9239_v4 = vpop.f32.mrf.mxu2 }
 0x88e   : > { %9982 = vst.msk [vmem:[#allocation2 + $0x58] sm:$0xf] %vm9959_vm10, %v9908_v50  ;;  %v9768_v21 = vmax.f32 %v9239_v4, 0.0  ;;  %v18016_v50 = vld [vmem:[#allocation144_spill] sm:$0xff] }
 0x88f   : > { %v3953_v4 = vmax.f32 %v18016_v50, 0.0 }
 0x890   : > { %v9800_v9 = vpack.c.bf16 %v9768_v21, %v9768_v21  ;;  %v5154_v21 = vpack.c.bf16 %v5122_v31, %v5122_v31 }
 0x891   : > { %v9271_v43 = vpop.f32.mrf.mxu3 }
 0x892   : > { %v9769_v24 = vmax.f32 %v9271_v43, 0.0  ;;  %6388 = vrot.lane.b32.xlu1 %v6308_v1, %s12753_s26  ;;  %9865 = vrot.lane.b32.xlu2 %v9800_v9, %s12747_s18  ;;  %v3985_v43 = vpack.c.bf16 %v3953_v4, %v3953_v4  ;;  %v9797_v4 = vmax.f32 %v9761_v26, 0.0  ;;  %v8616_v26 = vmax.f32 %v16385_v61, 0.0 }
 0x893   : > { %v9892_v55 = vpop.permute.xlu0 %9891  ;;  %v8695_v51 = vpop.permute.xlu2 %8694  ;;  %v11933_v56 = vld [vmem:[#allocation2 + $0x30] sm:$0xff] }
 0x894   : > { %9974 = vst.msk [vmem:[#allocation2 + $0x38] sm:$0xf] %vm9959_vm10, %v9892_v55  ;;  %v9801_v27 = vpack.c.bf16 %v9769_v24, %v9769_v24  ;;  %11773 = vmatmul.msk.bf16.vlgmr.msra.gmra.mxu2 %vm459_vm0, %v11933_v56  ;;  %v6290_v24 = vmax.f32 %v15705_v14, 0.0  ;;  %v8615_v55 = vmax.f32 %v16383_v8, 0.0  ;;  %v6291_v8 = vmax.f32 %v15725_v53, 0.0 }
 0x895   : > { %8791 = vst.msk [vmem:[#allocation2] sm:$0xf] %vm8790_vm9, %v8695_v51  ;;  %v8699_v23 = vpop.permute.xlu1 %8698  ;;  %v9376_v42 = vpop.f32.mrf.mxu2 }
 0x896   : > { %8793 = vst.msk [vmem:[#allocation2 + $0x8] sm:$0xf] %vm8790_vm9, %v8699_v23  ;;  %9867 = vrot.lane.b32.xlu0 %v9801_v27, %s12747_s18  ;;  %v9775_v17 = vmax.f32 %v9376_v42, 0.0  ;;  %v5121_v27 = vmax.f32 %v18017_v33, 0.0  ;;  %v6322_v23 = vpack.c.bf16 %v6290_v24, %v6290_v24  ;;  %v7460_v42 = vmax.f32 %v16039_v20, 0.0  ;;  %v18019_v33 = vld [vmem:[#allocation121_spill] sm:$0xff] }
 0x897   : > { %v8628_v20 = vmax.f32 %v16257_v2, 0.0  ;;  %v9829_v24 = vpack.c.bf16 %v9797_v4, %v9797_v4 }
 0x898   : > { %v9807_v13 = vpack.c.bf16 %v9775_v17, %v9775_v17  ;;  %v5153_v14 = vpack.c.bf16 %v5121_v27, %v5121_v27  ;;  %v7459_v17 = vmax.f32 %v16030_v44, 0.0  ;;  %v8629_v44 = vmax.f32 %v16267_v63, 0.0 }
 0x899   : > { %v9274_v10 = vpop.f32.mrf.mxu3  ;;  %v2772_v27 = vmax.f32 %v18019_v33, 0.0  ;;  %v18028_v33 = vld [vmem:[#allocation173_spill] sm:$0xff] }
 0x89a   : > { %v9770_v6 = vmax.f32 %v9274_v10, 0.0  ;;  %6390 = vrot.lane.b32.xlu2 %v6309_v57, %s12753_s26  ;;  %v8647_v57 = vpack.c.bf16 %v8615_v55, %v8615_v55  ;;  %v7491_v53 = vpack.c.bf16 %v7459_v17, %v7459_v17 }
 0x89b   : > { %v9910_v19 = vpop.permute.xlu2 %9909  ;;  %v11934_v15 = vld [vmem:[#allocation2 + $0x38] sm:$0xff] }
 0x89c   : > { %9983 = vst.msk [vmem:[#allocation2 + $0x5c] sm:$0xf] %vm9959_vm10, %v9910_v19  ;;  %v9802_v45 = vpack.c.bf16 %v9770_v6, %v9770_v6 }
 0x89d   : > { %v8713_v22 = vpop.permute.xlu1 %8712  ;;  %v9379_v36 = vpop.f32.mrf.mxu2 }
 0x89e   : > { %8800 = vst.msk [vmem:[#allocation2 + $0x24] sm:$0xf] %vm8790_vm9, %v8713_v22  ;;  %7559 = vrot.lane.b32.xlu0 %v7478_v48, %s12750_s17  ;;  %9869 = vrot.lane.b32.xlu1 %v9802_v45, %s12747_s18  ;;  %v6323_v48 = vpack.c.bf16 %v6291_v8, %v6291_v8  ;;  %v7492_v45 = vpack.c.bf16 %v7460_v42, %v7460_v42  ;;  %v9776_v22 = vmax.f32 %v9379_v36, 0.0  ;;  %v18021_v8 = vld [vmem:[#allocation159_spill] sm:$0xff] }
 0x89f   : > { %v3941_v42 = vmax.f32 %v18021_v8, 0.0 }
 0x8a1   : > { %v9411_v35 = vpop.f32.mrf.mxu3 }
 0x8a2   : > { %9879 = vrot.lane.b32.xlu2 %v9807_v13, %s12747_s18  ;;  %v8660_v13 = vpack.c.bf16 %v8628_v20, %v8628_v20 }
 0x8a3   : > { %v8701_v37 = vpop.permute.xlu2 %8700  ;;  %v11938_v29 = vld [vmem:[#allocation2 + $0x58] sm:$0xff] }
 0x8a4   : > { %8794 = vst.msk [vmem:[#allocation2 + $0xc] sm:$0xf] %vm8790_vm9, %v8701_v37  ;;  %11774 = vmatmul.msk.bf16.gmra.mxu2 %vm459_vm0, %v11934_v15  ;;  %11778 = vmatmul.msk.bf16.vlgmr.msra.gmra.mxu3 %vm459_vm0, %v11938_v29  ;;  %v9808_v37 = vpack.c.bf16 %v9776_v22, %v9776_v22  ;;  %v8661_v15 = vpack.c.bf16 %v8629_v44, %v8629_v44  ;;  %v9777_v29 = vmax.f32 %v9411_v35, 0.0 }
 0x8a5   : > { %v8715_v3 = vpop.permute.xlu1 %8714  ;;  %v9516_v9 = vpop.f32.mrf.mxu2  ;;  %v2804_v35 = vpack.c.bf16 %v2772_v27, %v2772_v27  ;;  %v5112_v27 = vmax.f32 %v18028_v33, 0.0  ;;  %v11811_v33 = vld [vmem:[%s17267_s5 + $0x38] sm:$0xf0] }
 0x8a6   : > { %8801 = vst.msk [vmem:[#allocation2 + $0x28] sm:$0xf] %vm8790_vm9, %v8715_v3  ;;  %8726 = vrot.lane.b32.xlu0 %v8646_v46, %s12749_s16  ;;  %2911 = vrot.lane.b32.xlu1 %v2816_v49, %s12759_s29  ;;  %v9783_v49 = vmax.f32 %v9516_v9, 0.0  ;;  %v9809_v36 = vpack.c.bf16 %v9777_v29, %v9777_v29  ;;  %v18018_v9 = vld [vmem:[#allocation117_spill] sm:$0xff] }
 0x8a8   : > { %v9815_v3 = vpack.c.bf16 %v9783_v49, %v9783_v49 }
 0x8a9   : > { %v9414_v54 = vpop.f32.mrf.mxu3 }
 0x8aa   : > { %7557 = vrot.lane.b32.xlu2 %v7477_v39, %s12750_s17  ;;  %v9778_v30 = vmax.f32 %v9414_v54, 0.0  ;;  %v18023_v54 = vld [vmem:[#allocation71_spill] sm:$0xff] }
 0x8ab   : > { %v9922_v34 = vpop.permute.xlu0 %9921  ;;  %v8717_v5 = vpop.permute.xlu2 %8716 }
 0x8ac   : > { %9989 = vst.msk [vmem:[#allocation2 + $0x74] sm:$0xf] %vm9959_vm10, %v9922_v34  ;;  %v9810_v39 = vpack.c.bf16 %v9778_v30, %v9778_v30 }
 0x8ad   : > { %8802 = vst.msk [vmem:[#allocation2 + $0x2c] sm:$0xf] %vm8790_vm9, %v8717_v5  ;;  %v8743_v1 = vpop.permute.xlu1 %8742  ;;  %v9519_v10 = vpop.f32.mrf.mxu2 }
 0x8ae   : > { %8815 = vst.msk [vmem:[#allocation2 + $0x60] sm:$0xf] %vm8790_vm9, %v8743_v1  ;;  %5249 = vrot.lane.b32.xlu0 %v5154_v21, %s12755_s20  ;;  %4078 = vrot.lane.b32.xlu1 %v3984_v7, %s12756_s23  ;;  %v9784_v40 = vmax.f32 %v9519_v10, 0.0  ;;  %v9764_v7 = vpop.f32.mrf.mxu1  ;;  %v3973_v10 = vpack.c.bf16 %v3941_v42, %v3941_v42  ;;  %v5144_v42 = vpack.c.bf16 %v5112_v27, %v5112_v27 }
 0x8af   : > { %v9798_v21 = vmax.f32 %v9764_v7, 0.0  ;;  %v18025_v7 = vld [vmem:[#allocation136_spill] sm:$0xff] }
 0x8b0   : > { %v9816_v41 = vpack.c.bf16 %v9784_v40, %v9784_v40 }
 0x8b1   : > { %v16551_v46 = vpop.f32.mrf.mxu3  ;;  %v9830_v55 = vpack.c.bf16 %v9798_v21, %v9798_v21 }
 0x8b2   : > { %4080 = vrot.lane.b32.xlu2 %v3985_v43, %s12756_s23  ;;  %v2771_v43 = vmax.f32 %v18018_v9, 0.0 }
 0x8b3   : > { %v8697_v51 = vpop.permute.xlu0 %8696  ;;  %v8745_v56 = vpop.permute.xlu2 %8744 }
 0x8b4   : > { %8792 = vst.msk [vmem:[#allocation2 + $0x4] sm:$0xf] %vm8790_vm9, %v8697_v51 }
 0x8b5   : > { %8816 = vst.msk [vmem:[#allocation2 + $0x64] sm:$0xf] %vm8790_vm9, %v8745_v56  ;;  %v9656_v59 = vpop.f32.mrf.mxu2  ;;  %v2803_v56 = vpack.c.bf16 %v2771_v43, %v2771_v43 }
 0x8b6   : > { %6416 = vrot.lane.b32.xlu0 %v6322_v23, %s12753_s26  ;;  %8728 = vrot.lane.b32.xlu1 %v8647_v57, %s12749_s16  ;;  %v9791_v34 = vmax.f32 %v9656_v59, 0.0  ;;  %v18020_v23 = vld [vmem:[#allocation156_spill] sm:$0xff]  ;;  %v6279_v59 = vmax.f32 %v15947_v28, 0.0 }
 0x8b7   : > { %v3940_v57 = vmax.f32 %v18020_v23, 0.0 }
 0x8b8   : > { %v9823_v1 = vpack.c.bf16 %v9791_v34, %v9791_v34 }
 0x8b9   : > { %v16557_v50 = vpop.f32.mrf.mxu3 }
 0x8ba   : > { %5247 = vrot.lane.b32.xlu2 %v5153_v14, %s12755_s20  ;;  %v3972_v14 = vpack.c.bf16 %v3940_v57, %v3940_v57  ;;  %v9786_v61 = vmax.f32 %v16557_v50, 0.0  ;;  %v3942_v50 = vmax.f32 %v18025_v7, 0.0 }
 0x8bb   : > { %v8711_v6 = vpop.permute.xlu0 %8710  ;;  %v8747_v19 = vpop.permute.xlu2 %8746 }
 0x8bc   : > { %8799 = vst.msk [vmem:[#allocation2 + $0x20] sm:$0xf] %vm8790_vm9, %v8711_v6  ;;  %v18022_v6 = vld [vmem:[#allocation91_spill] sm:$0xff]  ;;  %v3974_v43 = vpack.c.bf16 %v3942_v50, %v3942_v50 }
 0x8bd   : > { %8817 = vst.msk [vmem:[#allocation2 + $0x68] sm:$0xf] %vm8790_vm9, %v8747_v19  ;;  %v9659_v63 = vpop.f32.mrf.mxu2  ;;  %v5109_v19 = vmax.f32 %v18022_v6, 0.0 }
 0x8be   : > { %7587 = vrot.lane.b32.xlu0 %v7492_v45, %s12750_s17  ;;  %6418 = vrot.lane.b32.xlu1 %v6323_v48, %s12753_s26  ;;  %v9792_v31 = vmax.f32 %v9659_v63, 0.0 }
 0x8bf   : > { %v5141_v45 = vpack.c.bf16 %v5109_v19, %v5109_v19  ;;  %v6280_v19 = vmax.f32 %v15682_v60, 0.0 }
 0x8c0   : > { %v9824_v5 = vpack.c.bf16 %v9792_v31, %v9792_v31 }
 0x8c1   : > { %v9691_v51 = vpop.f32.mrf.mxu3 }
 0x8c2   : > { %7585 = vrot.lane.b32.xlu2 %v7491_v53, %s12750_s17  ;;  %v9793_v48 = vmax.f32 %v9691_v51, 0.0  ;;  %v18027_v51 = vld [vmem:[#allocation138_spill] sm:$0xff] }
 0x8c3   : > { %v8749_v16 = vpop.permute.xlu0 %8748 }
 0x8c4   : > { %8818 = vst.msk [vmem:[#allocation2 + $0x6c] sm:$0xf] %vm8790_vm9, %v8749_v16  ;;  %v9825_v53 = vpack.c.bf16 %v9793_v48, %v9793_v48  ;;  %v5110_v16 = vmax.f32 %v18023_v54, 0.0  ;;  %v7449_v48 = vmax.f32 %v16012_v11, 0.0 }
 0x8c6   : > { %9881 = vrot.lane.b32.xlu0 %v9808_v37, %s12747_s18  ;;  %8754 = vrot.lane.b32.xlu1 %v8660_v13, %s12749_s16  ;;  %v5142_v44 = vpack.c.bf16 %v5110_v16, %v5110_v16  ;;  %v6278_v37 = vmax.f32 %v15940_v62, 0.0  ;;  %v7481_v54 = vpack.c.bf16 %v7449_v48, %v7449_v48  ;;  %v7450_v16 = vmax.f32 %v16024_v47, 0.0 }
 0x8c8   : > { %v6310_v49 = vpack.c.bf16 %v6278_v37, %v6278_v37  ;;  %v8618_v37 = vmax.f32 %v16244_v52, 0.0 }
 0x8c9   : > { %v9694_v17 = vpop.f32.mrf.mxu3 }
 0x8ca   : > { %8756 = vrot.lane.b32.xlu2 %v8661_v15, %s12749_s16  ;;  %v9794_v20 = vmax.f32 %v9694_v17, 0.0  ;;  %v6311_v15 = vpack.c.bf16 %v6279_v59, %v6279_v59  ;;  %v8619_v59 = vmax.f32 %v16254_v38, 0.0  ;;  %v8650_v47 = vpack.c.bf16 %v8618_v37, %v8618_v37 }
 0x8cb   : > { %v2910_v2 = vpop.permute.xlu0 %2909  ;;  %v9787_v38 = vmax.f32 %v16426_v32, 0.0 }
 0x8cc   : > { %2976 = vst.msk [vmem:[#allocation2 + $0x78] sm:$0xf] %vm2945_vm4, %v2910_v2  ;;  %v9826_v13 = vpack.c.bf16 %v9794_v20, %v9794_v20  ;;  %v7447_v2 = vmax.f32 %v16191_v58, 0.0  ;;  %v8617_v58 = vmax.f32 %v16391_v18, 0.0  ;;  %v18024_v18 = vld [vmem:[#allocation53_spill] sm:$0xff]  ;;  %v6312_v20 = vpack.c.bf16 %v6280_v19, %v6280_v19 }
 0x8cd   : > { %v9819_v52 = vpack.c.bf16 %v9787_v38, %v9787_v38 }
 0x8ce   : > { %9883 = vrot.lane.b32.xlu0 %v9809_v36, %s12747_s18  ;;  %9895 = vrot.lane.b32.xlu1 %v9815_v3, %s12747_s18  ;;  %v7479_v28 = vpack.c.bf16 %v7447_v2, %v7447_v2  ;;  %v7448_v36 = vmax.f32 %v16203_v0, 0.0  ;;  %v8648_v3 = vpack.c.bf16 %v8616_v26, %v8616_v26  ;;  %v8649_v30 = vpack.c.bf16 %v8617_v58, %v8617_v58  ;;  %v11929_v26 = vld [vmem:[#allocation2 + $0x10] sm:$0xff]  ;;  %v11930_v58 = vld [vmem:[#allocation2 + $0x18] sm:$0xff] }
 0x8cf   : > { %v9785_v0 = vmax.f32 %v16551_v46, 0.0 }
 0x8d0   : > { %v7480_v63 = vpack.c.bf16 %v7448_v36, %v7448_v36 }
 0x8d1   : > { %v9817_v4 = vpack.c.bf16 %v9785_v0, %v9785_v0 }
 0x8d2   : > { %9897 = vrot.lane.b32.xlu2 %v9816_v41, %s12747_s18  ;;  %v9818_v41 = vpack.c.bf16 %v9786_v61, %v9786_v61 }
 0x8d6   : > { %9913 = vrot.lane.b32.xlu0 %v9824_v5, %s12747_s18  ;;  %9885 = vrot.lane.b32.xlu1 %v9810_v39, %s12747_s18  ;;  %v2773_v5 = vmax.f32 %v18024_v18, 0.0 }
 0x8d8   : > { %v2805_v21 = vpack.c.bf16 %v2773_v5, %v2773_v5 }
 0x8da   : > { %9911 = vrot.lane.b32.xlu2 %v9823_v1, %s12747_s18  ;;  %v18026_v1 = vld [vmem:[#allocation95_spill] sm:$0xff] }
 0x8db   : > { %v2774_v9 = vmax.f32 %v18026_v1, 0.0 }
 0x8de   : > { %9923 = vrot.lane.b32.xlu0 %v9829_v24, %s12747_s18  ;;  %9925 = vrot.lane.b32.xlu1 %v9830_v55, %s12747_s18  ;;  %v2806_v55 = vpack.c.bf16 %v2774_v9, %v2774_v9 }
 0x8e2   : > { %2885 = vrot.lane.b32.xlu2 %v2803_v56, %s12759_s29  ;;  %v3943_v56 = vmax.f32 %v18027_v51, 0.0 }
 0x8e6   : > { %2887 = vrot.lane.b32.xlu0 %v2804_v35, %s12759_s29  ;;  %4054 = vrot.lane.b32.xlu1 %v3972_v14, %s12756_s23  ;;  %v3975_v35 = vpack.c.bf16 %v3943_v56, %v3943_v56  ;;  %v18029_v14 = vld [vmem:[#allocation48_spill] sm:$0xff]  ;;  %v11953_v56 = vld [vmem:[%s17267_s5 + $0x34] sm:$0xf] }
 0x8e7   : > { %v5111_v8 = vmax.f32 %v18029_v14, 0.0  ;;  %v11814_v27 = vor.u32 %v11953_v56, %v11811_v33  ;;  %v11803_v14 = vld [vmem:[%s17267_s5 + $0x28] sm:$0xf0] }
 0x8e9   : > { %v5143_v6 = vpack.c.bf16 %v5111_v8, %v5111_v8  ;;  %10552 = vmatpush.bf16.msra.mxu0 %v11814_v27  ;;  %v12615_v27 = vld [vmem:[%s12903_s24 + $0x10] sm:$0xff] }
 0x8ea   : > { %4056 = vrot.lane.b32.xlu2 %v3973_v10, %s12756_s23 }
 0x8ec   : > { %v9866_v22 = vpop.permute.xlu2 %9865 }
 0x8ed   : > { %9961 = vst.msk [vmem:[#allocation2 + $0x4] sm:$0xf] %vm9959_vm10, %v9866_v22  ;;  %v6281_v22 = vmax.f32 %v15699_v25, 0.0  ;;  %v7482_v25 = vpack.c.bf16 %v7450_v16, %v7450_v16  ;;  %v11947_v16 = vld [vmem:[%s17267_s5 + $0x4] sm:$0xf] }
 0x8ee   : > { %5223 = vrot.lane.b32.xlu0 %v5141_v45, %s12755_s20  ;;  %9915 = vrot.lane.b32.xlu1 %v9825_v53, %s12747_s18 }
 0x8ef   : > { %v6313_v11 = vpack.c.bf16 %v6281_v22, %v6281_v22  ;;  %v11952_v22 = vld [vmem:[%s17267_s5 + $0x24] sm:$0xf0] }
 0x8f2   : > { %9917 = vrot.lane.b32.xlu2 %v9826_v13, %s12747_s18 }
 0x8f4   : > { %v6391_v29 = vpop.permute.xlu2 %6390 }
 0x8f5   : > { %6470 = vst.msk [vmem:[#allocation2 + $0x44] sm:$0xf] %vm6452_vm7, %v6391_v29 }
 0x8f6   : > { %6394 = vrot.lane.b32.xlu0 %v6311_v15, %s12753_s26  ;;  %5225 = vrot.lane.b32.xlu1 %v5142_v44, %s12755_s20  ;;  %v8651_v15 = vpack.c.bf16 %v8619_v59, %v8619_v59  ;;  %v11787_v59 = vld [vmem:[%s17267_s5 + $0x8] sm:$0xf0] }
 0x8fa   : > { %6392 = vrot.lane.b32.xlu2 %v6310_v49, %s12753_s26 }
 0x8fc   : > { %v9864_v62 = vpop.permute.xlu1 %9863  ;;  %v9880_v40 = vpop.permute.xlu2 %9879 }
 0x8fd   : > { %9960 = vst.msk [vmem:[#allocation2] sm:$0xf] %vm9959_vm10, %v9864_v62 }
 0x8fe   : > { %9968 = vst.msk [vmem:[#allocation2 + $0x20] sm:$0xf] %vm9959_vm10, %v9880_v40  ;;  %8730 = vrot.lane.b32.xlu0 %v8648_v3, %s12749_s16  ;;  %7561 = vrot.lane.b32.xlu1 %v7479_v28, %s12750_s17  ;;  %v9788_v28 = vmax.f32 %v16435_v12, 0.0 }
 0x900   : > { %v9820_v32 = vpack.c.bf16 %v9788_v28, %v9788_v28 }
 0x902   : > { %7563 = vrot.lane.b32.xlu2 %v7480_v63, %s12750_s17 }
 0x904   : > { %v6389_v31 = vpop.permute.xlu1 %6388  ;;  %v7558_v39 = vpop.permute.xlu2 %7557  ;;  %v11927_v34 = vld [vmem:[#allocation2] sm:$0xff] }
 0x905   : > { %6469 = vst.msk [vmem:[#allocation2 + $0x40] sm:$0xf] %vm6452_vm7, %v6389_v31  ;;  %11767 = vmatmul.msk.bf16.vlgmr.msrb.gmra.mxu0 %vm459_vm0, %v11927_v34 }
 0x906   : > { %7638 = vst.msk [vmem:[#allocation2 + $0x40] sm:$0xf] %vm7621_vm8, %v7558_v39  ;;  %9901 = vrot.lane.b32.xlu0 %v9818_v41, %s12747_s18  ;;  %8732 = vrot.lane.b32.xlu1 %v8649_v30, %s12749_s16 }
 0x908   : > { %v9868_v46 = vpop.permute.xlu0 %9867 }
 0x909   : > { %9962 = vst.msk [vmem:[#allocation2 + $0x8] sm:$0xf] %vm9959_vm10, %v9868_v46 }
 0x90a   : > { %9899 = vrot.lane.b32.xlu2 %v9817_v4, %s12747_s18 }
 0x90c   : > { %v4081_v24 = vpop.permute.xlu2 %4080 }
 0x90e   : > { %4058 = vrot.lane.b32.xlu0 %v3974_v43, %s12756_s23  ;;  %2889 = vrot.lane.b32.xlu1 %v2805_v21, %s12759_s29 }
 0x910   : > { %v7560_v23 = vpop.permute.xlu0 %7559  ;;  %v9870_v57 = vpop.permute.xlu1 %9869 }
 0x911   : > { %7639 = vst.msk [vmem:[#allocation2 + $0x44] sm:$0xf] %vm7621_vm8, %v7560_v23 }
 0x912   : > { %9963 = vst.msk [vmem:[#allocation2 + $0xc] sm:$0xf] %vm9959_vm10, %v9870_v57  ;;  %2891 = vrot.lane.b32.xlu2 %v2806_v55, %s12759_s29 }
 0x914   : > { %v5248_v10 = vpop.permute.xlu2 %5247 }
 0x916   : > { %5229 = vrot.lane.b32.xlu0 %v5144_v42, %s12755_s20  ;;  %4060 = vrot.lane.b32.xlu1 %v3975_v35, %s12756_s23  ;;  %v11951_v35 = vld [vmem:[%s17267_s5 + $0x24] sm:$0xf] }
 0x917   : > { %v11806_v8 = vor.u32 %v11951_v35, %v11803_v14 }
 0x918   : > { %v8727_v17 = vpop.permute.xlu0 %8726  ;;  %v2912_v45 = vpop.permute.xlu1 %2911 }
 0x919   : > { %8807 = vst.msk [vmem:[#allocation2 + $0x40] sm:$0xf] %vm8790_vm9, %v8727_v17  ;;  %v11928_v53 = vld [vmem:[#allocation2 + $0x8] sm:$0xff]  ;;  %10553 = vmatpush.bf16.msra.mxu0 %v11806_v8  ;;  %v11949_v17 = vld [vmem:[%s17267_s5 + $0x14] sm:$0xf] }
 0x91a   : > { %2977 = vst.msk [vmem:[#allocation2 + $0x7c] sm:$0xf] %vm2945_vm4, %v2912_v45  ;;  %5227 = vrot.lane.b32.xlu2 %v5143_v6, %s12755_s20  ;;  %11768 = vmatmul.msk.bf16.gmra.mxu0 %vm459_vm0, %v11928_v53  ;;  %v11954_v6 = vld [vmem:[%s17267_s5 + $0x34] sm:$0xf0]  ;;  %v11795_v45 = vld [vmem:[%s17267_s5 + $0x18] sm:$0xf0] }
 0x91b   : > { %4146 = vst.msk [vmem:[#allocation2 + $0x7c] sm:$0xf] %vm4114_vm5, %v4081_v24  ;;  %v11798_v53 = vor.u32 %v11949_v17, %v11795_v45  ;;  %v12617_v45 = vld [vmem:[%s12903_s24 + $0x20] sm:$0xff] }
 0x91c   : > { %v7586_v60 = vpop.permute.xlu2 %7585 }
 0x91d   : > { %10554 = vmatpush.bf16.msra.mxu0 %v11798_v53 }
 0x91e   : > { %7565 = vrot.lane.b32.xlu0 %v7481_v54, %s12750_s17  ;;  %6396 = vrot.lane.b32.xlu1 %v6312_v20, %s12753_s26  ;;  %v11801_v20 = vld [vmem:[%s17267_s5 + $0x20] sm:$0xf] }
 0x91f   : > { %v11802_v54 = vor.u32 %v11952_v22, %v11801_v20  ;;  %v12618_v20 = vld [vmem:[%s12903_s24 + $0x28] sm:$0xff] }
 0x920   : > { %v5250_v13 = vpop.permute.xlu0 %5249  ;;  %v4079_v44 = vpop.permute.xlu1 %4078 }
 0x921   : > { %5315 = vst.msk [vmem:[#allocation2 + $0x7c] sm:$0xf] %vm5283_vm6, %v5250_v13  ;;  %v11790_v13 = vor.u32 %v11947_v16, %v11787_v59 }
 0x922   : > { %4145 = vst.msk [vmem:[#allocation2 + $0x78] sm:$0xf] %vm4114_vm5, %v4079_v44  ;;  %6398 = vrot.lane.b32.xlu2 %v6313_v11, %s12753_s26  ;;  %v11793_v44 = vld [vmem:[%s17267_s5 + $0x10] sm:$0xf] }
 0x923   : > { %5314 = vst.msk [vmem:[#allocation2 + $0x78] sm:$0xf] %vm5283_vm6, %v5248_v10  ;;  %v11809_v10 = vld [vmem:[%s17267_s5 + $0x30] sm:$0xf]  ;;  %10555 = vmatpush.bf16.msra.mxu0 %v11790_v13 }
 0x924   : > { %v8757_v29 = vpop.permute.xlu2 %8756  ;;  %v11810_v48 = vor.u32 %v11954_v6, %v11809_v10 }
 0x926   : > { %8736 = vrot.lane.b32.xlu0 %v8651_v15, %s12749_s16  ;;  %7567 = vrot.lane.b32.xlu1 %v7482_v25, %s12750_s17  ;;  %v11950_v25 = vld [vmem:[%s17267_s5 + $0x14] sm:$0xf0]  ;;  %v11785_v15 = vld [vmem:[%s17267_s5] sm:$0xf]  ;;  %s11153_s17 = sshll.u32 %s17073_s25, 4  ;;  %s11154_s17 = int_to_ptr.vmem [resolvable:$true] %s11153_s17 }
 0x927   : > { %10463 = vmatpush.bf16.msrb.mxu3 %v11810_v48  ;;  %v11794_v37 = vor.u32 %v11950_v25, %v11793_v44  ;;  %v12619_v25 = vld [vmem:[%s12903_s24 + $0x30] sm:$0xff] }
 0x928   : > { %v6417_v49 = vpop.permute.xlu0 %6416  ;;  %v8729_v2 = vpop.permute.xlu1 %8728 }
 0x929   : > { %6483 = vst.msk [vmem:[#allocation2 + $0x78] sm:$0xf] %vm6452_vm7, %v6417_v49 }
 0x92a   : > { %7652 = vst.msk [vmem:[#allocation2 + $0x78] sm:$0xf] %vm7621_vm8, %v7586_v60  ;;  %8734 = vrot.lane.b32.xlu2 %v8650_v47, %s12749_s16  ;;  %11769 = vmatmul.msk.bf16.gmra.mxu0 %vm459_vm0, %v11929_v26  ;;  %s11152_s16 = scalar_lea.hbm %s17271_s9, %s11972_s19 }
 0x92b   : > { %8808 = vst.msk [vmem:[#allocation2 + $0x44] sm:$0xf] %vm8790_vm9, %v8729_v2  ;;  %10464 = vmatpush.bf16.msrb.mxu3 %v11802_v54  ;;  %v11941_v2 = vld [vmem:[#allocation2 + $0x70] sm:$0xff]  ;;  %s11155_s26 = sshll.u32 %s11152_s16, 4  ;;  %s11156_s26 = int_to_ptr.hbm [resolvable:$true] %s11155_s26 }
 0x92c   : > { %v9898_v36 = vpop.permute.xlu2 %9897  ;;  %s12689_s20 = sshra.s32 %s11156_s26, 4  ;;  %s12690_s20 = int_to_ptr.hbm [resolvable:$true] %s12689_s20 }
 0x92d   : > { %9977 = vst.msk [vmem:[#allocation2 + $0x44] sm:$0xf] %vm9959_vm10, %v9898_v36  ;;  %s12691_s23 = scalar_lea.hbm %s12690_s20, 256  ;;  %p12696_p0 = scmp.lt.s32.totalorder %s12690_s20, %s17271_s9 }
 0x92e   : > { %9903 = vrot.lane.b32.xlu1 %v9819_v52, %s12747_s18  ;;  %p12692_p6 = scmp.ne.s32.totalorder %s12690_s20, %s12691_s23  ;;  %p12697_p1 = scmp.lt.s32.totalorder %s12695_s28, %s12691_s23 }
 0x92f   : > { %10465 = vmatpush.bf16.msrb.mxu3 %v11794_v37 }
 0x930   : > { %v7588_v3 = vpop.permute.xlu0 %7587  ;;  %v6419_v62 = vpop.permute.xlu1 %6418  ;;  %p12693_p9 = pnand %p12692_p6, %p12861_p11  ;;  %p12698_p3 = por %p12697_p1, %p12696_p0 }
 0x931   : > { %6484 = vst.msk [vmem:[#allocation2 + $0x7c] sm:$0xf] %vm6452_vm7, %v6419_v62  ;;  %v16735_v62 = vld [vmem:[%s17266_s4] ss:$0 sm:$0xff] }
 0x932   : > { %7653 = vst.msk [vmem:[#allocation2 + $0x7c] sm:$0xf] %vm7621_vm8, %v7588_v3  ;;  %9905 = vrot.lane.b32.xlu2 %v9820_v32, %s12747_s18  ;;  %p12694_p13 = pneg %p12693_p9 }
 0x933   : > { %8822 = vst.msk [vmem:[#allocation2 + $0x7c] sm:$0xf] %vm8790_vm9, %v8757_v29  ;;  %v11948_v29 = vld [vmem:[%s17267_s5 + $0x4] sm:$0xf0] }
 0x934   : > { %v9912_v40 = vpop.permute.xlu2 %9911  ;;  %v11786_v47 = vor.u32 %v11948_v29, %v11785_v15  ;;  %v12620_v15 = vld [vmem:[%s12903_s24 + $0x38] sm:$0xff]  ;;  %p12699_p4 = pnand %p12698_p3, %p12694_p13 }
 0x935   : > { %9984 = vst.msk [vmem:[#allocation2 + $0x60] sm:$0xf] %vm9959_vm10, %v9912_v40 }
 0x936   : > { %10466 = vmatpush.bf16.msrb.mxu3 %v11786_v47 }
 0x938   : > { %v9882_v12 = vpop.permute.xlu0 %9881  ;;  %v8755_v63 = vpop.permute.xlu1 %8754 }
 0x939   : > { %9969 = vst.msk [vmem:[#allocation2 + $0x24] sm:$0xf] %vm9959_vm10, %v9882_v12 }
 0x93a   : > { %8821 = vst.msk [vmem:[#allocation2 + $0x78] sm:$0xf] %vm8790_vm9, %v8755_v63  ;;  %11770 = vmatmul.msk.bf16.gmra.mxu0 %vm459_vm0, %v11930_v58 }
 0x93c   : > { %v2886_v61 = vpop.permute.xlu2 %2885 }
 0x93d   : > { %2964 = vst.msk [vmem:[#allocation2 + $0x48] sm:$0xf] %vm2945_vm4, %v2886_v61 }
 0x940   : > { %v9884_v30 = vpop.permute.xlu0 %9883  ;;  %v9896_v0 = vpop.permute.xlu1 %9895  ;;  %v11931_v34 = vld [vmem:[#allocation2 + $0x20] sm:$0xff] }
 0x941   : > { %9970 = vst.msk [vmem:[#allocation2 + $0x28] sm:$0xf] %vm9959_vm10, %v9884_v30 }
 0x942   : > { %9976 = vst.msk [vmem:[#allocation2 + $0x40] sm:$0xf] %vm9959_vm10, %v9896_v0 }
 0x944   : > { %v4057_v41 = vpop.permute.xlu2 %4056 }
 0x948   : > { %v9914_v31 = vpop.permute.xlu0 %9913  ;;  %v9886_v39 = vpop.permute.xlu1 %9885 }
 0x949   : > { %9985 = vst.msk [vmem:[#allocation2 + $0x64] sm:$0xf] %vm9959_vm10, %v9914_v31  ;;  %v11935_v18 = vld [vmem:[#allocation2 + $0x40] sm:$0xff] }
 0x94a   : > { %9971 = vst.msk [vmem:[#allocation2 + $0x2c] sm:$0xf] %vm9959_vm10, %v9886_v39  ;;  %11771 = vmatmul.msk.bf16.gmra.mxu0 %vm459_vm0, %v11931_v34  ;;  %11775 = vmatmul.msk.bf16.gmra.mxu2 %vm459_vm0, %v11935_v18  ;;  %v12613_v18 = vld [vmem:[%s12903_s24] sm:$0xff] }
 0x94c   : > { %v9918_v5 = vpop.permute.xlu2 %9917 }
 0x94d   : > { %9987 = vst.msk [vmem:[#allocation2 + $0x6c] sm:$0xf] %vm9959_vm10, %v9918_v5 }
 0x950   : > { %v9924_v7 = vpop.permute.xlu0 %9923  ;;  %v9926_v50 = vpop.permute.xlu1 %9925  ;;  %v11939_v4 = vld [vmem:[#allocation2 + $0x60] sm:$0xff] }
 0x951   : > { %9990 = vst.msk [vmem:[#allocation2 + $0x78] sm:$0xf] %vm9959_vm10, %v9924_v7  ;;  %11779 = vmatmul.msk.bf16.gmra.mxu3 %vm459_vm0, %v11939_v4  ;;  %v11932_v9 = vld [vmem:[#allocation2 + $0x28] sm:$0xff] }
 0x952   : > { %9991 = vst.msk [vmem:[#allocation2 + $0x7c] sm:$0xf] %vm9959_vm10, %v9926_v50  ;;  %v12614_v7 = vld [vmem:[%s12903_s24 + $0x8] sm:$0xff] }
 0x954   : > { %v6393_v46 = vpop.permute.xlu2 %6392 }
 0x958   : > { %v2888_v21 = vpop.permute.xlu0 %2887  ;;  %v4055_v1 = vpop.permute.xlu1 %4054 }
 0x959   : > { %2965 = vst.msk [vmem:[#allocation2 + $0x4c] sm:$0xf] %vm2945_vm4, %v2888_v21  ;;  %v11942_v58 = vld [vmem:[#allocation2 + $0x78] sm:$0xff] }
 0x95a   : > { %4134 = vst.msk [vmem:[#allocation2 + $0x4c] sm:$0xf] %vm4114_vm5, %v4057_v41  ;;  %11772 = vmatmul.msk.bf16.gmra.mxu0 %vm459_vm0, %v11932_v9 }
 0x95b   : > { %4133 = vst.msk [vmem:[#allocation2 + $0x48] sm:$0xf] %vm4114_vm5, %v4055_v1 }
 0x95c   : > { %v7564_v43 = vpop.permute.xlu2 %7563 }
 0x960   : > { %v5224_v24 = vpop.permute.xlu0 %5223  ;;  %v9916_v55 = vpop.permute.xlu1 %9915 }
 0x961   : > { %5302 = vst.msk [vmem:[#allocation2 + $0x48] sm:$0xf] %vm5283_vm6, %v5224_v24 }
 0x962   : > { %6471 = vst.msk [vmem:[#allocation2 + $0x48] sm:$0xf] %vm6452_vm7, %v6393_v46 }
 0x963   : > { %9986 = vst.msk [vmem:[#allocation2 + $0x68] sm:$0xf] %vm9959_vm10, %v9916_v55 }
 0x964   : > { %v9900_v51 = vpop.permute.xlu2 %9899 }
 0x968   : > { %v6395_v23 = vpop.permute.xlu0 %6394  ;;  %v5226_v57 = vpop.permute.xlu1 %5225 }
 0x969   : > { %5303 = vst.msk [vmem:[#allocation2 + $0x4c] sm:$0xf] %vm5283_vm6, %v5226_v57  ;;  %v12616_v57 = vld [vmem:[%s12903_s24 + $0x18] sm:$0xff] }
 0x96a   : > { %6472 = vst.msk [vmem:[#allocation2 + $0x4c] sm:$0xf] %vm6452_vm7, %v6395_v23  ;;  %v11940_v42 = vld [vmem:[#allocation2 + $0x68] sm:$0xff] }
 0x96b   : > { %7641 = vst.msk [vmem:[#allocation2 + $0x4c] sm:$0xf] %vm7621_vm8, %v7564_v43  ;;  %11780 = vmatmul.msk.bf16.gmra.mxu3 %vm459_vm0, %v11940_v42 }
 0x96c   : > { %v2892_v19 = vpop.permute.xlu2 %2891 }
 0x96d   : > { %2967 = vst.msk [vmem:[#allocation2 + $0x54] sm:$0xf] %vm2945_vm4, %v2892_v19 }
 0x970   : > { %v8731_v60 = vpop.permute.xlu0 %8730  ;;  %v7562_v11 = vpop.permute.xlu1 %7561 }
 0x971   : > { %7640 = vst.msk [vmem:[#allocation2 + $0x48] sm:$0xf] %vm7621_vm8, %v7562_v11 }
 0x972   : > { %8809 = vst.msk [vmem:[#allocation2 + $0x48] sm:$0xf] %vm8790_vm9, %v8731_v60 }
 0x973   : > { %9978 = vst.msk [vmem:[#allocation2 + $0x48] sm:$0xf] %vm9959_vm10, %v9900_v51 }
 0x974   : > { %v5228_v26 = vpop.permute.xlu2 %5227 }
 0x978   : > { %v9902_v38 = vpop.permute.xlu0 %9901  ;;  %v8733_v49 = vpop.permute.xlu1 %8732 }
 0x979   : > { %8810 = vst.msk [vmem:[#allocation2 + $0x4c] sm:$0xf] %vm8790_vm9, %v8733_v49  ;;  %v16796_v49 = vpop.f32.mrf.mxu3 }
 0x97a   : > { %9979 = vst.msk [vmem:[#allocation2 + $0x4c] sm:$0xf] %vm9959_vm10, %v9902_v38 }
 0x97b   : > { %11781 = vmatmul.msk.bf16.gmra.mxu3 %vm459_vm0, %v11941_v2 }
 0x97c   : > { %v6399_v3 = vpop.permute.xlu2 %6398 }
 0x980   : > { %v4059_v52 = vpop.permute.xlu0 %4058  ;;  %v2890_v28 = vpop.permute.xlu1 %2889 }
 0x981   : > { %2966 = vst.msk [vmem:[#allocation2 + $0x50] sm:$0xf] %vm2945_vm4, %v2890_v28  ;;  %v11936_v36 = vld [vmem:[#allocation2 + $0x48] sm:$0xff] }
 0x982   : > { %4135 = vst.msk [vmem:[#allocation2 + $0x50] sm:$0xf] %vm4114_vm5, %v4059_v52  ;;  %11776 = vmatmul.msk.bf16.gmra.mxu2 %vm459_vm0, %v11936_v36  ;;  %v10197_v32 = vpop.f32.mrf.mxu0 }
 0x983   : > { %5304 = vst.msk [vmem:[#allocation2 + $0x50] sm:$0xf] %vm5283_vm6, %v5228_v26  ;;  %v10198_v63 = vadd.f32 %v16735_v62, %v10197_v32  ;;  %v16801_v32 = vpop.f32.mrf.mxu3 }
 0x984   : > { %v8735_v41 = vpop.permute.xlu2 %8734 }
 0x985   : > { %v10277_v30 = vmax.f32 %v10198_v63, 0.0 }
 0x987   : > { %v16744_v5 = vadd.f32 %v12613_v18, %v10277_v30 }
 0x988   : > { %v5230_v40 = vpop.permute.xlu0 %5229  ;;  %v4061_v12 = vpop.permute.xlu1 %4060 }
 0x989   : > { %4136 = vst.msk [vmem:[#allocation2 + $0x54] sm:$0xf] %vm4114_vm5, %v4061_v12  ;;  %v12622_v12 = vld [vmem:[%s12903_s24 + $0x48] sm:$0xff] }
 0x98a   : > { %5305 = vst.msk [vmem:[#allocation2 + $0x54] sm:$0xf] %vm5283_vm6, %v5230_v40  ;;  %v10199_v61 = vpop.f32.mrf.mxu0 }
 0x98b   : > { %6474 = vst.msk [vmem:[#allocation2 + $0x54] sm:$0xf] %vm6452_vm7, %v6399_v3  ;;  %11782 = vmatmul.msk.bf16.gmra.mxu3 %vm459_vm0, %v11942_v58  ;;  %v10200_v0 = vadd.f32 %v16735_v62, %v10199_v61  ;;  %v12621_v3 = vld [vmem:[%s12903_s24 + $0x40] sm:$0xff]  ;;  %v10227_v58 = vpop.f32.mrf.mxu2 }
 0x98c   : > { %v9906_v9 = vpop.permute.xlu2 %9905 }
 0x98d   : > { %v10278_v31 = vmax.f32 %v10200_v0, 0.0 }
 0x98f   : > { %v16747_v50 = vadd.f32 %v12614_v7, %v10278_v31 }
 0x990   : > { %v7566_v39 = vpop.permute.xlu0 %7565  ;;  %v6397_v34 = vpop.permute.xlu1 %6396 }
 0x991   : > { %6473 = vst.msk [vmem:[#allocation2 + $0x50] sm:$0xf] %vm6452_vm7, %v6397_v34  ;;  %v10341_v4 = vpack.c.bf16 %v16747_v50, %v16744_v5  ;;  %v11970_v34 = vld [vmem:[%s17269_s7 + $0x78] sm:$0xff] }
 0x992   : > { %7642 = vst.msk [vmem:[#allocation2 + $0x50] sm:$0xf] %vm7621_vm8, %v7566_v39  ;;  %10954 = vmatpush.bf16.msrb.mxu2 %v11970_v34  ;;  %v11955_v34 = vld [vmem:[%s17269_s7] sm:$0xff] }
 0x993   : > { %8811 = vst.msk [vmem:[#allocation2 + $0x50] sm:$0xf] %vm8790_vm9, %v8735_v41  ;;  %11831 = vmatmul.msk.bf16.vlgmr.msra.gmra.mxu0 %vm459_vm0, %v10341_v4  ;;  %v10229_v31 = vpop.f32.mrf.mxu2 }
 0x997   : > { %v10202_v1 = vpop.f32.mrf.mxu0 }
 0x998   : > { %v8737_v46 = vpop.permute.xlu0 %8736  ;;  %v7568_v21 = vpop.permute.xlu1 %7567  ;;  %v10203_v43 = vadd.f32 %v16735_v62, %v10202_v1 }
 0x999   : > { %7643 = vst.msk [vmem:[#allocation2 + $0x54] sm:$0xf] %vm7621_vm8, %v7568_v21  ;;  %v12623_v21 = vld [vmem:[%s12903_s24 + $0x50] sm:$0xff] }
 0x99a   : > { %8812 = vst.msk [vmem:[#allocation2 + $0x54] sm:$0xf] %vm8790_vm9, %v8737_v46  ;;  %v10279_v51 = vmax.f32 %v10203_v43, 0.0  ;;  %v11969_v46 = vld [vmem:[%s17269_s7 + $0x70] sm:$0xff] }
 0x99b   : > { %9981 = vst.msk [vmem:[#allocation2 + $0x54] sm:$0xf] %vm9959_vm10, %v9906_v9  ;;  %11815 = vmatmul.msk.bf16.vlgmr.msrb.gmra.mxu3 %vm459_vm0, %v10341_v4  ;;  %v12624_v9 = vld [vmem:[%s12903_s24 + $0x58] sm:$0xff]  ;;  %10955 = vmatpush.bf16.msrb.mxu2 %v11969_v46 }
 0x99c   : > { %v16763_v23 = vadd.f32 %v12615_v27, %v10279_v51  ;;  %v11968_v51 = vld [vmem:[%s17269_s7 + $0x68] sm:$0xff]  ;;  %v11962_v27 = vld [vmem:[%s17269_s7 + $0x38] sm:$0xff] }
 0x99d   : > { %10865 = vmatpush.bf16.msrb.mxu1 %v11962_v27 }
 0x99f   : > { %v10204_v55 = vpop.f32.mrf.mxu0  ;;  %10956 = vmatpush.bf16.msrb.mxu2 %v11968_v51 }
 0x9a0   : > { %v9904_v24 = vpop.permute.xlu1 %9903  ;;  %v10205_v56 = vadd.f32 %v16735_v62, %v10204_v55 }
 0x9a1   : > { %9980 = vst.msk [vmem:[#allocation2 + $0x50] sm:$0xf] %vm9959_vm10, %v9904_v24 }
 0x9a2   : > { %v10280_v33 = vmax.f32 %v10205_v56, 0.0  ;;  %v10232_v56 = vpop.f32.mrf.mxu2 }
 0x9a4   : > { %v16766_v35 = vadd.f32 %v12616_v57, %v10280_v33  ;;  %v10230_v33 = vadd.f32 %v16735_v62, %v10229_v31  ;;  %v11967_v57 = vld [vmem:[%s17269_s7 + $0x60] sm:$0xff] }
 0x9a5   : > { %10957 = vmatpush.bf16.msrb.mxu2 %v11967_v57  ;;  %v12630_v57 = vld [vmem:[%s12903_s24 + $0x80] sm:$0xff] }
 0x9a6   : > { %v10342_v14 = vpack.c.bf16 %v16766_v35, %v16763_v23 }
 0x9a7   : > { %v10207_v42 = vpop.f32.mrf.mxu0 }
 0x9a8   : > { %v11937_v8 = vld [vmem:[#allocation2 + $0x50] sm:$0xff]  ;;  %11832 = vmatmul.msk.bf16.gmra.mxu0 %vm459_vm0, %v10342_v14  ;;  %v10208_v10 = vadd.f32 %v16735_v62, %v10207_v42  ;;  %v10290_v42 = vmax.f32 %v10230_v33, 0.0 }
 0x9a9   : > { %11777 = vmatmul.msk.bf16.gmra.mxu2 %vm459_vm0, %v11937_v8 }
 0x9aa   : > { %v10281_v19 = vmax.f32 %v10208_v10, 0.0  ;;  %v11961_v10 = vld [vmem:[%s17269_s7 + $0x30] sm:$0xff] }
 0x9ab   : > { %11816 = vmatmul.msk.bf16.gmra.mxu3 %vm459_vm0, %v10342_v14  ;;  %v10228_v14 = vadd.f32 %v16735_v62, %v10227_v58  ;;  %10866 = vmatpush.bf16.msrb.mxu1 %v11961_v10  ;;  %v11956_v58 = vld [vmem:[%s17269_s7 + $0x8] sm:$0xff] }
 0x9ac   : > { %v16776_v53 = vadd.f32 %v12617_v45, %v10281_v19  ;;  %v10234_v45 = vpop.f32.mrf.mxu2 }
 0x9ad   : > { %v10289_v19 = vmax.f32 %v10228_v14, 0.0 }
 0x9af   : > { %v10209_v6 = vpop.f32.mrf.mxu0 }
 0x9b0   : > { %v10210_v48 = vadd.f32 %v16735_v62, %v10209_v6  ;;  %v11966_v6 = vld [vmem:[%s17269_s7 + $0x58] sm:$0xff] }
 0x9b1   : > { %10958 = vmatpush.bf16.msrb.mxu2 %v11966_v6 }
 0x9b2   : > { %v10282_v17 = vmax.f32 %v10210_v48, 0.0  ;;  %v12625_v48 = vld [vmem:[%s12903_s24 + $0x68] sm:$0xff] }
 0x9b4   : > { %v16779_v22 = vadd.f32 %v12618_v20, %v10282_v17  ;;  %v16855_v17 = vadd.f32 %v12625_v48, %v10290_v42  ;;  %v11960_v20 = vld [vmem:[%s17269_s7 + $0x28] sm:$0xff] }
 0x9b5   : > { %10867 = vmatpush.bf16.msrb.mxu1 %v11960_v20 }
 0x9b6   : > { %v10343_v54 = vpack.c.bf16 %v16779_v22, %v16776_v53 }
 0x9b7   : > { %v10212_v60 = vpop.f32.mrf.mxu0 }
 0x9b8   : > { %11833 = vmatmul.msk.bf16.gmra.mxu0 %vm459_vm0, %v10343_v54  ;;  %v10213_v11 = vadd.f32 %v16735_v62, %v10212_v60  ;;  %v12626_v60 = vld [vmem:[%s12903_s24 + $0x60] sm:$0xff] }
 0x9ba   : > { %v10283_v59 = vmax.f32 %v10213_v11, 0.0  ;;  %v16864_v11 = vadd.f32 %v12626_v60, %v10289_v19 }
 0x9bb   : > { %11817 = vmatmul.msk.bf16.gmra.mxu3 %vm459_vm0, %v10343_v54  ;;  %v11965_v54 = vld [vmem:[%s17269_s7 + $0x50] sm:$0xff] }
 0x9bc   : > { %v16788_v37 = vadd.f32 %v12619_v25, %v10283_v59  ;;  %10959 = vmatpush.bf16.msrb.mxu2 %v11965_v54  ;;  %v10347_v59 = vpack.c.bf16 %v16855_v17, %v16864_v11  ;;  %v10235_v25 = vadd.f32 %v16735_v62, %v10234_v45 }
 0x9bf   : > { %v10214_v16 = vpop.f32.mrf.mxu0 }
 0x9c0   : > { %v10215_v13 = vadd.f32 %v16735_v62, %v10214_v16 }
 0x9c2   : > { %v10284_v44 = vmax.f32 %v10215_v13, 0.0  ;;  %v11959_v13 = vld [vmem:[%s17269_s7 + $0x20] sm:$0xff] }
 0x9c3   : > { %10868 = vmatpush.bf16.msrb.mxu1 %v11959_v13 }
 0x9c4   : > { %v16791_v29 = vadd.f32 %v12620_v15, %v10284_v44  ;;  %v11964_v44 = vld [vmem:[%s17269_s7 + $0x48] sm:$0xff] }
 0x9c5   : > { %10960 = vmatpush.bf16.msrb.mxu2 %v11964_v44 }
 0x9c6   : > { %v10344_v47 = vpack.c.bf16 %v16791_v29, %v16788_v37 }
 0x9c7   : > { %v10217_v38 = vpop.f32.mrf.mxu0 }
 0x9c8   : > { %11834 = vmatmul.msk.bf16.gmra.mxu0 %vm459_vm0, %v10344_v47  ;;  %v10218_v2 = vadd.f32 %v16735_v62, %v10217_v38  ;;  %v11963_v38 = vld [vmem:[%s17269_s7 + $0x40] sm:$0xff] }
 0x9c9   : > { %10961 = vmatpush.bf16.msrb.mxu2 %v11963_v38  ;;  %v12631_v38 = vld [vmem:[%s12903_s24 + $0x98] sm:$0xff] }
 0x9ca   : > { %v10285_v52 = vmax.f32 %v10218_v2, 0.0  ;;  %v10233_v2 = vadd.f32 %v16735_v62, %v10232_v56  ;;  %v12629_v56 = vld [vmem:[%s12903_s24 + $0x88] sm:$0xff] }
 0x9cb   : > { %11818 = vmatmul.msk.bf16.gmra.mxu3 %vm459_vm0, %v10344_v47  ;;  %v11958_v47 = vld [vmem:[%s17269_s7 + $0x18] sm:$0xff] }
 0x9cc   : > { %v16804_v40 = vadd.f32 %v12621_v3, %v10285_v52  ;;  %10869 = vmatpush.bf16.msrb.mxu1 %v11958_v47  ;;  %v10292_v52 = vmax.f32 %v10235_v25, 0.0  ;;  %v12627_v3 = vld [vmem:[%s12903_s24 + $0x78] sm:$0xff] }
 0x9cd   : > { %v10237_v15 = vpop.f32.mrf.mxu2 }
 0x9cf   : > { %v10219_v26 = vpop.f32.mrf.mxu0 }
 0x9d0   : > { %v10220_v28 = vadd.f32 %v16735_v62, %v10219_v26 }
 0x9d2   : > { %v10286_v36 = vmax.f32 %v10220_v28, 0.0  ;;  %v11957_v28 = vld [vmem:[%s17269_s7 + $0x10] sm:$0xff] }
 0x9d3   : > { %10870 = vmatpush.bf16.msrb.mxu1 %v11957_v28 }
 0x9d4   : > { %v16807_v63 = vadd.f32 %v12622_v12, %v10286_v36  ;;  %v16813_v0 = vpop.f32.mrf.mxu3  ;;  %v10291_v36 = vmax.f32 %v10233_v2, 0.0  ;;  %v16892_v12 = vadd.f32 %v12627_v3, %v10292_v52  ;;  %v12632_v52 = vld [vmem:[%s12903_s24 + $0x90] sm:$0xff] }
 0x9d6   : > { %v10345_v61 = vpack.c.bf16 %v16807_v63, %v16804_v40 }
 0x9d7   : > { %v10222_v30 = vpop.f32.mrf.mxu0  ;;  %10871 = vmatpush.bf16.msrb.mxu1 %v11956_v58 }
 0x9d8   : > { %11835 = vmatmul.msk.bf16.gmra.mxu0 %vm459_vm0, %v10345_v61  ;;  %v10223_v41 = vadd.f32 %v16735_v62, %v10222_v30 }
 0x9da   : > { %v10287_v18 = vmax.f32 %v10223_v41, 0.0  ;;  %v10239_v41 = vpop.f32.mrf.mxu2 }
 0x9db   : > { %11819 = vmatmul.msk.bf16.gmra.mxu3 %vm459_vm0, %v10345_v61  ;;  %v12628_v61 = vld [vmem:[%s12903_s24 + $0x70] sm:$0xff]  ;;  %10872 = vmatpush.bf16.msrb.mxu1 %v11955_v34 }
 0x9dc   : > { %v16824_v1 = vadd.f32 %v12623_v21, %v10287_v18  ;;  %v16829_v24 = vpop.f32.mrf.mxu3  ;;  %v16898_v30 = vadd.f32 %v12628_v61, %v10291_v36  ;;  %v10240_v18 = vadd.f32 %v16735_v62, %v10239_v41 }
 0x9de   : > { %v10294_v21 = vmax.f32 %v10240_v18, 0.0 }
 0x9df   : > { %v10224_v39 = vpop.f32.mrf.mxu0 }
 0x9e0   : > { %v10225_v7 = vadd.f32 %v16735_v62, %v10224_v39  ;;  %v10348_v39 = vpack.c.bf16 %v16892_v12, %v16898_v30  ;;  %v16917_v33 = vadd.f32 %v12629_v56, %v10294_v21 }
 0x9e2   : > { %v10288_v4 = vmax.f32 %v10225_v7, 0.0  ;;  %v10238_v7 = vadd.f32 %v16735_v62, %v10237_v15 }
 0x9e4   : > { %v16827_v43 = vadd.f32 %v12624_v9, %v10288_v4  ;;  %v10293_v9 = vmax.f32 %v10238_v7, 0.0 }
 0x9e6   : > { %v10346_v55 = vpack.c.bf16 %v16827_v43, %v16824_v1  ;;  %v16922_v14 = vadd.f32 %v12630_v57, %v10293_v9 }
 0x9e8   : > { %11836 = vmatmul.msk.bf16.gmra.mxu0 %vm459_vm0, %v10346_v55  ;;  %v10349_v10 = vpack.c.bf16 %v16917_v33, %v16922_v14 }
 0x9eb   : > { %11820 = vmatmul.msk.bf16.gmra.mxu3 %vm459_vm0, %v10346_v55  ;;  %v10365_v55 = vld [vmem:[%s17268_s6] sm:$0x3] }
 0x9ec   : > { %v16919_v27 = vperm.slane %v10365_v55, 1  ;;  %v16934_v47 = vperm.slane %v10365_v55, 0 }
 0x9ee   : > { %v16846_v8 = vpop.f32.mrf.mxu3 }
 0x9f6   : > { %v16866_v16 = vpop.f32.mrf.mxu3 }
 0x9f8   : > { %11837 = vmatmul.msk.bf16.gmra.mxu0 %vm459_vm0, %v10347_v59 }
 0x9fb   : > { %11821 = vmatmul.msk.bf16.gmra.mxu3 %vm459_vm0, %v10347_v59 }
 0x9fe   : > { %v16886_v26 = vpop.f32.mrf.mxu3 }
 0xa05   : > { %v10242_v4 = vpop.f32.mrf.mxu2 }
 0xa06   : > { %v16900_v31 = vpop.f32.mrf.mxu3  ;;  %v10243_v59 = vadd.f32 %v16735_v62, %v10242_v4 }
 0xa08   : > { %11838 = vmatmul.msk.bf16.gmra.mxu0 %vm459_vm0, %v10348_v39  ;;  %v10295_v15 = vmax.f32 %v10243_v59, 0.0 }
 0xa0a   : > { %v16940_v28 = vadd.f32 %v12632_v52, %v10295_v15  ;;  %v12634_v15 = vld [vmem:[%s12903_s24 + $0xa8] sm:$0xff] }
 0xa0b   : > { %11822 = vmatmul.msk.bf16.gmra.mxu3 %vm459_vm0, %v10348_v39 }
 0xa0d   : > { %v10244_v6 = vpop.f32.mrf.mxu2 }
 0xa0e   : > { %v16911_v46 = vpop.f32.mrf.mxu3  ;;  %v10245_v20 = vadd.f32 %v16735_v62, %v10244_v6 }
 0xa10   : > { %v10557_v51 = vpop.f32.mrf.mxu0  ;;  %v10296_v25 = vmax.f32 %v10245_v20, 0.0 }
 0xa11   : > { %v10558_v19 = vadd.f32 %v10557_v51, %v16919_v27 }
 0xa12   : > { %v16937_v2 = vadd.f32 %v12631_v38, %v10296_v25 }
 0xa13   : > { %v10638_v54 = vmax.f32 %v10558_v19, 0.0 }
 0xa14   : > { %v10350_v61 = vpack.c.bf16 %v16937_v2, %v16940_v28 }
 0xa16   : > { %v16924_v42 = vpop.f32.mrf.mxu3 }
 0xa18   : > { %11839 = vmatmul.msk.bf16.gmra.mxu0 %vm459_vm0, %v10349_v10  ;;  %v10559_v48 = vpop.f32.mrf.mxu0 }
 0xa19   : > { %v10560_v45 = vadd.f32 %v10559_v48, %v16919_v27 }
 0xa1b   : > { %11823 = vmatmul.msk.bf16.gmra.mxu3 %vm459_vm0, %v10349_v10  ;;  %v10640_v60 = vmax.f32 %v10560_v45, 0.0 }
 0xa1d   : > { %v10702_v13 = vpack.c.bf16 %v10640_v60, %v10638_v54 }
 0xa1e   : > { %v10468_v44 = vpop.f32.mrf.mxu3 }
 0xa1f   : > { %10962 = vmatmul.bf16.vlgmr.msrb.gmra.mxu2 %v10702_v13  ;;  %v10469_v36 = vadd.f32 %v10468_v44, %v16934_v47  ;;  %v12633_v13 = vld [vmem:[%s12903_s24 + $0xa0] sm:$0xff] }
 0xa21   : > { %v10637_v39 = vmax.f32 %v10469_v36, 0.0 }
 0xa25   : > { %v10562_v58 = vpop.f32.mrf.mxu0 }
 0xa26   : > { %v10470_v3 = vpop.f32.mrf.mxu3  ;;  %v10563_v4 = vadd.f32 %v10562_v58, %v16919_v27 }
 0xa27   : > { %v10471_v41 = vadd.f32 %v10470_v3, %v16934_v47 }
 0xa28   : > { %11840 = vmatmul.msk.bf16.gmra.mxu0 %vm459_vm0, %v10350_v61  ;;  %v10642_v51 = vmax.f32 %v10563_v4, 0.0 }
 0xa29   : > { %v10639_v34 = vmax.f32 %v10471_v41, 0.0 }
 0xa2b   : > { %v10701_v18 = vpack.c.bf16 %v10639_v34, %v10637_v39  ;;  %11824 = vmatmul.msk.bf16.gmra.mxu3 %vm459_vm0, %v10350_v61  ;;  %v10255_v39 = vadd.f32 %v16735_v62, %v16801_v32 }
 0xa2c   : > { %v10247_v7 = vpop.f32.mrf.mxu2 }
 0xa2d   : > { %10873 = vmatmul.bf16.vlgmr.msrb.gmra.mxu1 %v10701_v18  ;;  %v10564_v9 = vpop.f32.mrf.mxu0  ;;  %v10248_v56 = vadd.f32 %v16735_v62, %v10247_v7  ;;  %v10253_v18 = vadd.f32 %v16735_v62, %v16796_v49 }
 0xa2e   : > { %v10473_v21 = vpop.f32.mrf.mxu3  ;;  %v10565_v55 = vadd.f32 %v10564_v9, %v16919_v27 }
 0xa2f   : > { %v10297_v19 = vmax.f32 %v10248_v56, 0.0  ;;  %v10474_v48 = vadd.f32 %v10473_v21, %v16934_v47  ;;  %v10300_v21 = vmax.f32 %v10255_v39, 0.0 }
 0xa30   : > { %v10644_v57 = vmax.f32 %v10565_v55, 0.0  ;;  %v10299_v55 = vmax.f32 %v10253_v18, 0.0 }
 0xa31   : > { %v16955_v44 = vadd.f32 %v12633_v13, %v10297_v19  ;;  %v10641_v25 = vmax.f32 %v10474_v48, 0.0  ;;  %v12636_v19 = vld [vmem:[%s12903_s24 + $0xb0] sm:$0xff] }
 0xa32   : > { %v10704_v10 = vpack.c.bf16 %v10644_v57, %v10642_v51  ;;  %v16976_v48 = vadd.f32 %v12636_v19, %v10299_v55  ;;  %v10265_v19 = vadd.f32 %v16735_v62, %v16866_v16 }
 0xa34   : > { %v10249_v6 = vpop.f32.mrf.mxu2  ;;  %10967 = vmatmul.bf16.gmra.mxu2 %v10704_v10  ;;  %v12635_v10 = vld [vmem:[%s12903_s24 + $0xb8] sm:$0xff] }
 0xa35   : > { %v10250_v45 = vadd.f32 %v16735_v62, %v10249_v6  ;;  %v10567_v54 = vpop.f32.mrf.mxu0  ;;  %v16972_v6 = vadd.f32 %v12635_v10, %v10300_v21  ;;  %v12638_v21 = vld [vmem:[%s12903_s24 + $0xc0] sm:$0xff] }
 0xa36   : > { %v10475_v20 = vpop.f32.mrf.mxu3  ;;  %v10568_v58 = vadd.f32 %v10567_v54, %v16919_v27 }
 0xa37   : > { %v10298_v60 = vmax.f32 %v10250_v45, 0.0  ;;  %v10476_v59 = vadd.f32 %v10475_v20, %v16934_v47  ;;  %v10352_v20 = vpack.c.bf16 %v16972_v6, %v16976_v48 }
 0xa38   : > { %v10646_v7 = vmax.f32 %v10568_v58, 0.0 }
 0xa39   : > { %v16958_v38 = vadd.f32 %v12634_v15, %v10298_v60  ;;  %v10643_v52 = vmax.f32 %v10476_v59, 0.0 }
 0xa3b   : > { %v10351_v36 = vpack.c.bf16 %v16958_v38, %v16955_v44  ;;  %v10703_v3 = vpack.c.bf16 %v10643_v52, %v10641_v25  ;;  %v10260_v25 = vadd.f32 %v16735_v62, %v16829_v24  ;;  %v10258_v52 = vadd.f32 %v16735_v62, %v16813_v0 }
 0xa3d   : > { %10878 = vmatmul.bf16.gmra.mxu1 %v10703_v3  ;;  %11825 = vmatmul.msk.bf16.gmra.mxu3 %vm459_vm0, %v10351_v36  ;;  %v10569_v41 = vpop.f32.mrf.mxu0  ;;  %v10302_v58 = vmax.f32 %v10260_v25, 0.0 }
 0xa3e   : > { %v10478_v61 = vpop.f32.mrf.mxu3  ;;  %11841 = vmatmul.msk.bf16.gmra.mxu0 %vm459_vm0, %v10351_v36  ;;  %v10570_v34 = vadd.f32 %v10569_v41, %v16919_v27  ;;  %v10301_v41 = vmax.f32 %v10258_v52, 0.0 }
 0xa3f   : > { %v10479_v51 = vadd.f32 %v10478_v61, %v16934_v47 }
 0xa40   : > { %v10648_v4 = vmax.f32 %v10570_v34, 0.0 }
 0xa41   : > { %v10645_v45 = vmax.f32 %v10479_v51, 0.0 }
 0xa42   : > { %v10706_v9 = vpack.c.bf16 %v10648_v4, %v10646_v7  ;;  %v12637_v7 = vld [vmem:[%s12903_s24 + $0xc8] sm:$0xff] }
 0xa43   : > { %v16990_v4 = vadd.f32 %v12637_v7, %v10302_v58  ;;  %v12640_v58 = vld [vmem:[%s12903_s24 + $0xd0] sm:$0xff] }
 0xa44   : > { %10972 = vmatmul.bf16.gmra.mxu2 %v10706_v9  ;;  %v16994_v9 = vadd.f32 %v12638_v21, %v10301_v41  ;;  %v10270_v21 = vadd.f32 %v16735_v62, %v16900_v31 }
 0xa45   : > { %v10572_v57 = vpop.f32.mrf.mxu0 }
 0xa46   : > { %v10480_v56 = vpop.f32.mrf.mxu3  ;;  %v10573_v60 = vadd.f32 %v10572_v57, %v16919_v27  ;;  %v10353_v51 = vpack.c.bf16 %v16990_v4, %v16994_v9 }
 0xa47   : > { %v10481_v32 = vadd.f32 %v10480_v56, %v16934_v47 }
 0xa48   : > { %v10650_v36 = vmax.f32 %v10573_v60, 0.0  ;;  %v10304_v60 = vmax.f32 %v10265_v19, 0.0 }
 0xa49   : > { %v10647_v49 = vmax.f32 %v10481_v32, 0.0 }
 0xa4b   : > { %v10705_v54 = vpack.c.bf16 %v10647_v49, %v10645_v45  ;;  %v10263_v49 = vadd.f32 %v16735_v62, %v16846_v8 }
 0xa4d   : > { %10883 = vmatmul.bf16.gmra.mxu1 %v10705_v54  ;;  %11826 = vmatmul.msk.bf16.gmra.mxu3 %vm459_vm0, %v10352_v20  ;;  %v10574_v13 = vpop.f32.mrf.mxu0 }
 0xa4e   : > { %v10483_v59 = vpop.f32.mrf.mxu3  ;;  %11842 = vmatmul.msk.bf16.gmra.mxu0 %vm459_vm0, %v10352_v20  ;;  %v10575_v15 = vadd.f32 %v10574_v13, %v16919_v27  ;;  %v10303_v13 = vmax.f32 %v10263_v49, 0.0 }
 0xa4f   : > { %v10484_v39 = vadd.f32 %v10483_v59, %v16934_v47 }
 0xa50   : > { %v10652_v3 = vmax.f32 %v10575_v15, 0.0 }
 0xa51   : > { %v10649_v55 = vmax.f32 %v10484_v39, 0.0 }
 0xa52   : > { %v10708_v61 = vpack.c.bf16 %v10652_v3, %v10650_v36  ;;  %v12639_v36 = vld [vmem:[%s12903_s24 + $0xd8] sm:$0xff] }
 0xa53   : > { %v17008_v3 = vadd.f32 %v12639_v36, %v10304_v60  ;;  %v12642_v60 = vld [vmem:[%s12903_s24 + $0xe0] sm:$0xff] }
 0xa54   : > { %10977 = vmatmul.bf16.gmra.mxu2 %v10708_v61  ;;  %v17012_v61 = vadd.f32 %v12640_v58, %v10303_v13  ;;  %v10275_v58 = vadd.f32 %v16735_v62, %v16924_v42 }
 0xa55   : > { %v10577_v18 = vpop.f32.mrf.mxu0 }
 0xa56   : > { %v10485_v34 = vpop.f32.mrf.mxu3  ;;  %v10578_v57 = vadd.f32 %v10577_v18, %v16919_v27  ;;  %v10354_v39 = vpack.c.bf16 %v17008_v3, %v17012_v61 }
 0xa57   : > { %v10486_v24 = vadd.f32 %v10485_v34, %v16934_v47 }
 0xa58   : > { %v10654_v20 = vmax.f32 %v10578_v57, 0.0  ;;  %v10306_v57 = vmax.f32 %v10270_v21, 0.0 }
 0xa59   : > { %v10651_v0 = vmax.f32 %v10486_v24, 0.0 }
 0xa5b   : > { %v10707_v56 = vpack.c.bf16 %v10651_v0, %v10649_v55  ;;  %v10268_v0 = vadd.f32 %v16735_v62, %v16886_v26 }
 0xa5d   : > { %10888 = vmatmul.bf16.gmra.mxu1 %v10707_v56  ;;  %11827 = vmatmul.msk.bf16.gmra.mxu3 %vm459_vm0, %v10353_v51  ;;  %v10579_v32 = vpop.f32.mrf.mxu0 }
 0xa5e   : > { %v10488_v10 = vpop.f32.mrf.mxu3  ;;  %11843 = vmatmul.msk.bf16.gmra.mxu0 %vm459_vm0, %v10353_v51  ;;  %v10580_v45 = vadd.f32 %v10579_v32, %v16919_v27  ;;  %v10305_v32 = vmax.f32 %v10268_v0, 0.0 }
 0xa5f   : > { %v10489_v25 = vadd.f32 %v10488_v10, %v16934_v47 }
 0xa60   : > { %v10656_v54 = vmax.f32 %v10580_v45, 0.0 }
 0xa61   : > { %v10653_v41 = vmax.f32 %v10489_v25, 0.0 }
 0xa62   : > { %v10710_v59 = vpack.c.bf16 %v10656_v54, %v10654_v20  ;;  %v12641_v20 = vld [vmem:[%s12903_s24 + $0xe8] sm:$0xff] }
 0xa63   : > { %v17026_v54 = vadd.f32 %v12641_v20, %v10306_v57  ;;  %v12644_v57 = vld [vmem:[%s12903_s24 + $0xf0] sm:$0xff] }
 0xa64   : > { %10982 = vmatmul.bf16.gmra.mxu2 %v10710_v59  ;;  %v17030_v59 = vadd.f32 %v12642_v60, %v10305_v32 }
 0xa65   : > { %v10582_v52 = vpop.f32.mrf.mxu0 }
 0xa66   : > { %v10490_v15 = vpop.f32.mrf.mxu3  ;;  %v10583_v18 = vadd.f32 %v10582_v52, %v16919_v27  ;;  %v10355_v25 = vpack.c.bf16 %v17026_v54, %v17030_v59 }
 0xa67   : > { %v10491_v16 = vadd.f32 %v10490_v15, %v16934_v47 }
 0xa68   : > { %v10658_v51 = vmax.f32 %v10583_v18, 0.0  ;;  %v10308_v18 = vmax.f32 %v10275_v58, 0.0 }
 0xa69   : > { %v10655_v8 = vmax.f32 %v10491_v16, 0.0 }
 0xa6b   : > { %v10709_v34 = vpack.c.bf16 %v10655_v8, %v10653_v41  ;;  %v10273_v8 = vadd.f32 %v16735_v62, %v16911_v46 }
 0xa6d   : > { %10893 = vmatmul.bf16.gmra.mxu1 %v10709_v34  ;;  %11828 = vmatmul.msk.bf16.gmra.mxu3 %vm459_vm0, %v10354_v39  ;;  %v10584_v24 = vpop.f32.mrf.mxu0 }
 0xa6e   : > { %v10493_v7 = vpop.f32.mrf.mxu3  ;;  %11844 = vmatmul.msk.bf16.gmra.mxu0 %vm459_vm0, %v10354_v39  ;;  %v10585_v55 = vadd.f32 %v10584_v24, %v16919_v27  ;;  %v10307_v24 = vmax.f32 %v10273_v8, 0.0 }
 0xa6f   : > { %v10494_v19 = vadd.f32 %v10493_v7, %v16934_v47 }
 0xa70   : > { %v10660_v56 = vmax.f32 %v10585_v55, 0.0 }
 0xa71   : > { %v10657_v13 = vmax.f32 %v10494_v19, 0.0 }
 0xa72   : > { %v10712_v10 = vpack.c.bf16 %v10660_v56, %v10658_v51  ;;  %v12643_v51 = vld [vmem:[%s12903_s24 + $0xf8] sm:$0xff] }
 0xa73   : > { %v17044_v56 = vadd.f32 %v12643_v51, %v10308_v18 }
 0xa74   : > { %10987 = vmatmul.bf16.gmra.mxu2 %v10712_v10  ;;  %v17048_v10 = vadd.f32 %v12644_v57, %v10307_v24 }
 0xa75   : > { %v10587_v49 = vpop.f32.mrf.mxu0 }
 0xa76   : > { %v10495_v45 = vpop.f32.mrf.mxu3  ;;  %v10588_v52 = vadd.f32 %v10587_v49, %v16919_v27  ;;  %v10356_v46 = vpack.c.bf16 %v17044_v56, %v17048_v10 }
 0xa77   : > { %v10496_v31 = vadd.f32 %v10495_v45, %v16934_v47 }
 0xa78   : > { %v10662_v39 = vmax.f32 %v10588_v52, 0.0 }
 0xa79   : > { %v10659_v26 = vmax.f32 %v10496_v31, 0.0 }
 0xa7b   : > { %v10711_v15 = vpack.c.bf16 %v10659_v26, %v10657_v13 }
 0xa7d   : > { %10898 = vmatmul.bf16.gmra.mxu1 %v10711_v15  ;;  %11829 = vmatmul.msk.bf16.gmra.mxu3 %vm459_vm0, %v10355_v25  ;;  %v10589_v16 = vpop.f32.mrf.mxu0 }
 0xa7e   : > { %v10498_v36 = vpop.f32.mrf.mxu3  ;;  %11845 = vmatmul.msk.bf16.gmra.mxu0 %vm459_vm0, %v10355_v25  ;;  %v10590_v41 = vadd.f32 %v10589_v16, %v16919_v27 }
 0xa7f   : > { %v10499_v21 = vadd.f32 %v10498_v36, %v16934_v47 }
 0xa80   : > { %v10664_v34 = vmax.f32 %v10590_v41, 0.0 }
 0xa81   : > { %v10661_v32 = vmax.f32 %v10499_v21, 0.0 }
 0xa82   : > { %v10714_v7 = vpack.c.bf16 %v10664_v34, %v10662_v39 }
 0xa84   : > { %10992 = vmatmul.bf16.gmra.mxu2 %v10714_v7 }
 0xa85   : > { %v10592_v0 = vpop.f32.mrf.mxu0 }
 0xa86   : > { %v10500_v55 = vpop.f32.mrf.mxu3  ;;  %v10593_v45 = vadd.f32 %v10592_v0, %v16919_v27 }
 0xa87   : > { %v10501_v42 = vadd.f32 %v10500_v55, %v16934_v47 }
 0xa88   : > { %v10666_v60 = vmax.f32 %v10593_v45, 0.0 }
 0xa89   : > { %v10663_v62 = vmax.f32 %v10501_v42, 0.0 }
 0xa8b   : > { %v10713_v19 = vpack.c.bf16 %v10663_v62, %v10661_v32  ;;  %v17065_v32 = vld [vmem:[%s17270_s8] ss:$0 sm:$0xff] }
 0xa8d   : > { %10903 = vmatmul.bf16.gmra.mxu1 %v10713_v19  ;;  %11830 = vmatmul.msk.bf16.gmra.mxu3 %vm459_vm0, %v10356_v46  ;;  %v10594_v20 = vpop.f32.mrf.mxu0 }
 0xa8e   : > { %v10503_v49 = vpop.f32.mrf.mxu3  ;;  %11846 = vmatmul.msk.bf16.gmra.mxu0 %vm459_vm0, %v10356_v46  ;;  %v10595_v31 = vadd.f32 %v10594_v20, %v16919_v27 }
 0xa8f   : > { %v10504_v25 = vadd.f32 %v10503_v49, %v16934_v47 }
 0xa90   : > { %v10668_v13 = vmax.f32 %v10595_v31, 0.0 }
 0xa91   : > { %v10665_v16 = vmax.f32 %v10504_v25, 0.0 }
 0xa92   : > { %v10716_v26 = vpack.c.bf16 %v10668_v13, %v10666_v60 }
 0xa94   : > { %10997 = vmatmul.bf16.gmra.mxu2 %v10716_v26 }
 0xa95   : > { %v10597_v52 = vpop.f32.mrf.mxu0 }
 0xa96   : > { %v10505_v15 = vpop.f32.mrf.mxu3  ;;  %v10598_v8 = vadd.f32 %v10597_v52, %v16919_v27 }
 0xa97   : > { %v10506_v36 = vadd.f32 %v10505_v15, %v16934_v47 }
 0xa98   : > { %v10670_v7 = vmax.f32 %v10598_v8, 0.0 }
 0xa99   : > { %v10667_v58 = vmax.f32 %v10506_v36, 0.0 }
 0xa9b   : > { %v10715_v41 = vpack.c.bf16 %v10667_v58, %v10665_v16 }
 0xa9d   : > { %10908 = vmatmul.bf16.gmra.mxu1 %v10715_v41  ;;  %v10599_v34 = vpop.f32.mrf.mxu0 }
 0xa9e   : > { %v10508_v39 = vpop.f32.mrf.mxu3  ;;  %v10600_v18 = vadd.f32 %v10599_v34, %v16919_v27 }
 0xa9f   : > { %v10509_v55 = vadd.f32 %v10508_v39, %v16934_v47 }
 0xaa0   : > { %v10672_v24 = vmax.f32 %v10600_v18, 0.0 }
 0xaa1   : > { %v10669_v62 = vmax.f32 %v10509_v55, 0.0 }
 0xaa2   : > { %v10718_v21 = vpack.c.bf16 %v10672_v24, %v10670_v7  ;;  %v10963_v0 = vpop.f32.mrf.mxu2 }
 0xaa4   : > { %11002 = vmatmul.bf16.gmra.mxu2 %v10718_v21 }
 0xaa5   : > { %v10602_v42 = vpop.f32.mrf.mxu0 }
 0xaa6   : > { %v10510_v51 = vpop.f32.mrf.mxu3  ;;  %v10603_v20 = vadd.f32 %v10602_v42, %v16919_v27 }
 0xaa7   : > { %v10511_v57 = vadd.f32 %v10510_v51, %v16934_v47 }
 0xaa8   : > { %v10674_v52 = vmax.f32 %v10603_v20, 0.0 }
 0xaa9   : > { %v10671_v46 = vmax.f32 %v10511_v57, 0.0 }
 0xaaa   : > { %v10874_v19 = vpop.f32.mrf.mxu1  ;;  %v10965_v15 = vpop.f32.mrf.mxu2 }
 0xaab   : > { %v10717_v45 = vpack.c.bf16 %v10671_v46, %v10669_v62  ;;  %v10875_v49 = vadd.f32 %v17065_v32, %v10874_v19 }
 0xaad   : > { %v10964_v31 = vadd.f32 %v10963_v0, %v10875_v49  ;;  %10913 = vmatmul.bf16.gmra.mxu1 %v10717_v45  ;;  %v10604_v13 = vpop.f32.mrf.mxu0 }
 0xaae   : > { %v10513_v60 = vpop.f32.mrf.mxu3  ;;  %v10605_v25 = vadd.f32 %v10604_v13, %v16919_v27 }
 0xaaf   : > { %v11043_v26 = vmax.f32 %v10964_v31, 0.0  ;;  %v10514_v39 = vadd.f32 %v10513_v60, %v16934_v47 }
 0xab0   : > { %v10676_v16 = vmax.f32 %v10605_v25, 0.0 }
 0xab1   : > { %v11075_v36 = vadd.f32 %v11043_v26, %v16744_v5  ;;  %v10673_v21 = vmax.f32 %v10514_v39, 0.0 }
 0xab2   : > { %v10876_v58 = vpop.f32.mrf.mxu1  ;;  %v10720_v41 = vpack.c.bf16 %v10676_v16, %v10674_v52 }
 0xab3   : > { %11107 = vst.msk [vmem:[%s17073_s25] sm:$0xff] %vm459_vm0, %v11075_v36  ;;  %v10877_v8 = vadd.f32 %v17065_v32, %v10876_v58 }
 0xab4   : > { %11007 = vmatmul.bf16.gmra.mxu2 %v10720_v41 }
 0xab5   : > { %v10966_v34 = vadd.f32 %v10965_v15, %v10877_v8 }
 0xab6   : > { %v10515_v18 = vpop.f32.mrf.mxu3 }
 0xab7   : > { %v11044_v7 = vmax.f32 %v10966_v34, 0.0  ;;  %v10516_v5 = vadd.f32 %v10515_v18, %v16934_v47  ;;  %v10968_v24 = vpop.f32.mrf.mxu2 }
 0xab9   : > { %v11076_v55 = vadd.f32 %v11044_v7, %v16747_v50  ;;  %v10675_v0 = vmax.f32 %v10516_v5, 0.0 }
 0xaba   : > { %v10879_v51 = vpop.f32.mrf.mxu1 }
 0xabb   : > { %11108 = vst.msk [vmem:[%s17073_s25 + $0x8] sm:$0xff] %vm459_vm0, %v11076_v55  ;;  %v10719_v42 = vpack.c.bf16 %v10675_v0, %v10673_v21  ;;  %v10880_v57 = vadd.f32 %v17065_v32, %v10879_v51  ;;  %v10607_v62 = vpop.f32.mrf.mxu0 }
 0xabc   : > { %v10608_v31 = vadd.f32 %v10607_v62, %v16919_v27 }
 0xabd   : > { %v10969_v46 = vadd.f32 %v10968_v24, %v10880_v57  ;;  %10918 = vmatmul.bf16.gmra.mxu1 %v10719_v42 }
 0xabe   : > { %v10678_v15 = vmax.f32 %v10608_v31, 0.0 }
 0xabf   : > { %v11045_v19 = vmax.f32 %v10969_v46, 0.0  ;;  %v10970_v45 = vpop.f32.mrf.mxu2 }
 0xac0   : > { %v10518_v49 = vpop.f32.mrf.mxu3 }
 0xac1   : > { %v11077_v20 = vadd.f32 %v11045_v19, %v16763_v23  ;;  %v10519_v36 = vadd.f32 %v10518_v49, %v16934_v47 }
 0xac2   : > { %v10881_v60 = vpop.f32.mrf.mxu1 }
 0xac3   : > { %11109 = vst.msk [vmem:[%s17073_s25 + $0x10] sm:$0xff] %vm459_vm0, %v11077_v20  ;;  %v10882_v50 = vadd.f32 %v17065_v32, %v10881_v60  ;;  %v10609_v13 = vpop.f32.mrf.mxu0  ;;  %v10677_v18 = vmax.f32 %v10519_v36, 0.0 }
 0xac4   : > { %v10610_v26 = vadd.f32 %v10609_v13, %v16919_v27 }
 0xac5   : > { %v10971_v25 = vadd.f32 %v10970_v45, %v10882_v50 }
 0xac6   : > { %v10680_v52 = vmax.f32 %v10610_v26, 0.0 }
 0xac7   : > { %v11046_v16 = vmax.f32 %v10971_v25, 0.0  ;;  %v10973_v41 = vpop.f32.mrf.mxu2 }
 0xac8   : > { %v10722_v58 = vpack.c.bf16 %v10680_v52, %v10678_v15  ;;  %v10520_v23 = vpop.f32.mrf.mxu3 }
 0xac9   : > { %v11078_v8 = vadd.f32 %v11046_v16, %v16766_v35  ;;  %v10521_v39 = vadd.f32 %v10520_v23, %v16934_v47 }
 0xaca   : > { %v10884_v34 = vpop.f32.mrf.mxu1  ;;  %11012 = vmatmul.bf16.gmra.mxu2 %v10722_v58 }
 0xacb   : > { %11110 = vst.msk [vmem:[%s17073_s25 + $0x18] sm:$0xff] %vm459_vm0, %v11078_v8  ;;  %v10679_v7 = vmax.f32 %v10521_v39, 0.0  ;;  %v10885_v5 = vadd.f32 %v17065_v32, %v10884_v34  ;;  %v10612_v24 = vpop.f32.mrf.mxu0 }
 0xacc   : > { %v10613_v57 = vadd.f32 %v10612_v24, %v16919_v27 }
 0xacd   : > { %v10721_v21 = vpack.c.bf16 %v10679_v7, %v10677_v18  ;;  %v10974_v55 = vadd.f32 %v10973_v41, %v10885_v5 }
 0xace   : > { %v10682_v20 = vmax.f32 %v10613_v57, 0.0 }
 0xacf   : > { %v11047_v0 = vmax.f32 %v10974_v55, 0.0  ;;  %10923 = vmatmul.bf16.gmra.mxu1 %v10721_v21  ;;  %v10975_v51 = vpop.f32.mrf.mxu2 }
 0xad0   : > { %v10523_v42 = vpop.f32.mrf.mxu3 }
 0xad1   : > { %v11079_v35 = vadd.f32 %v11047_v0, %v16776_v53  ;;  %v10524_v60 = vadd.f32 %v10523_v42, %v16934_v47 }
 0xad2   : > { %v10886_v62 = vpop.f32.mrf.mxu1 }
 0xad3   : > { %11111 = vst.msk [vmem:[%s17073_s25 + $0x20] sm:$0xff] %vm459_vm0, %v11079_v35  ;;  %v10887_v46 = vadd.f32 %v17065_v32, %v10886_v62  ;;  %v10614_v19 = vpop.f32.mrf.mxu0  ;;  %v10681_v36 = vmax.f32 %v10524_v60, 0.0 }
 0xad4   : > { %v10615_v45 = vadd.f32 %v10614_v19, %v16919_v27 }
 0xad5   : > { %v10976_v49 = vadd.f32 %v10975_v51, %v10887_v46 }
 0xad6   : > { %v10684_v31 = vmax.f32 %v10615_v45, 0.0 }
 0xad7   : > { %v11048_v50 = vmax.f32 %v10976_v49, 0.0  ;;  %v10978_v26 = vpop.f32.mrf.mxu2 }
 0xad8   : > { %v10724_v13 = vpack.c.bf16 %v10684_v31, %v10682_v20  ;;  %v10525_v53 = vpop.f32.mrf.mxu3 }
 0xad9   : > { %v11080_v25 = vadd.f32 %v11048_v50, %v16779_v22  ;;  %v10526_v15 = vadd.f32 %v10525_v53, %v16934_v47 }
 0xada   : > { %v10889_v52 = vpop.f32.mrf.mxu1  ;;  %11017 = vmatmul.bf16.gmra.mxu2 %v10724_v13 }
 0xadb   : > { %11112 = vst.msk [vmem:[%s17073_s25 + $0x28] sm:$0xff] %vm459_vm0, %v11080_v25  ;;  %v10683_v16 = vmax.f32 %v10526_v15, 0.0  ;;  %v10890_v58 = vadd.f32 %v17065_v32, %v10889_v52  ;;  %v10617_v41 = vpop.f32.mrf.mxu0 }
 0xadc   : > { %v10618_v7 = vadd.f32 %v10617_v41, %v16919_v27 }
 0xadd   : > { %v10723_v23 = vpack.c.bf16 %v10683_v16, %v10681_v36  ;;  %v10979_v8 = vadd.f32 %v10978_v26, %v10890_v58 }
 0xade   : > { %v10686_v51 = vmax.f32 %v10618_v7, 0.0 }
 0xadf   : > { %v11049_v39 = vmax.f32 %v10979_v8, 0.0  ;;  %10928 = vmatmul.bf16.gmra.mxu1 %v10723_v23  ;;  %v10980_v34 = vpop.f32.mrf.mxu2 }
 0xae0   : > { %v10528_v18 = vpop.f32.mrf.mxu3 }
 0xae1   : > { %v11081_v22 = vadd.f32 %v11049_v39, %v16788_v37  ;;  %v10529_v35 = vadd.f32 %v10528_v18, %v16934_v47 }
 0xae2   : > { %v10891_v5 = vpop.f32.mrf.mxu1 }
 0xae3   : > { %11113 = vst.msk [vmem:[%s17073_s25 + $0x30] sm:$0xff] %vm459_vm0, %v11081_v22  ;;  %v10892_v24 = vadd.f32 %v17065_v32, %v10891_v5  ;;  %v10619_v21 = vpop.f32.mrf.mxu0  ;;  %v10685_v20 = vmax.f32 %v10529_v35, 0.0 }
 0xae4   : > { %v10620_v55 = vadd.f32 %v10619_v21, %v16919_v27 }
 0xae5   : > { %v10981_v0 = vadd.f32 %v10980_v34, %v10892_v24 }
 0xae6   : > { %v10688_v42 = vmax.f32 %v10620_v55, 0.0 }
 0xae7   : > { %v11050_v57 = vmax.f32 %v10981_v0, 0.0  ;;  %v10983_v46 = vpop.f32.mrf.mxu2 }
 0xae8   : > { %v10726_v62 = vpack.c.bf16 %v10688_v42, %v10686_v51  ;;  %v10530_v37 = vpop.f32.mrf.mxu3 }
 0xae9   : > { %v11082_v19 = vadd.f32 %v11050_v57, %v16791_v29  ;;  %v10531_v45 = vadd.f32 %v10530_v37, %v16934_v47 }
 0xaea   : > { %v10894_v49 = vpop.f32.mrf.mxu1  ;;  %11022 = vmatmul.bf16.gmra.mxu2 %v10726_v62 }
 0xaeb   : > { %11114 = vst.msk [vmem:[%s17073_s25 + $0x38] sm:$0xff] %vm459_vm0, %v11082_v19  ;;  %v10687_v31 = vmax.f32 %v10531_v45, 0.0  ;;  %v10895_v60 = vadd.f32 %v17065_v32, %v10894_v49  ;;  %v10622_v50 = vpop.f32.mrf.mxu0 }
 0xaec   : > { %v10623_v52 = vadd.f32 %v10622_v50, %v16919_v27 }
 0xaed   : > { %v10725_v13 = vpack.c.bf16 %v10687_v31, %v10685_v20  ;;  %v10984_v26 = vadd.f32 %v10983_v46, %v10895_v60 }
 0xaee   : > { %v10690_v8 = vmax.f32 %v10623_v52, 0.0 }
 0xaef   : > { %v11051_v53 = vmax.f32 %v10984_v26, 0.0  ;;  %10933 = vmatmul.bf16.gmra.mxu1 %v10725_v13  ;;  %v10985_v25 = vpop.f32.mrf.mxu2 }
 0xaf0   : > { %v10533_v15 = vpop.f32.mrf.mxu3 }
 0xaf1   : > { %v11083_v29 = vadd.f32 %v11051_v53, %v16804_v40  ;;  %v10534_v34 = vadd.f32 %v10533_v15, %v16934_v47 }
 0xaf2   : > { %v10896_v36 = vpop.f32.mrf.mxu1 }
 0xaf3   : > { %11115 = vst.msk [vmem:[%s17073_s25 + $0x40] sm:$0xff] %vm459_vm0, %v11083_v29  ;;  %v10897_v16 = vadd.f32 %v17065_v32, %v10896_v36  ;;  %v10624_v58 = vpop.f32.mrf.mxu0  ;;  %v10689_v55 = vmax.f32 %v10534_v34, 0.0 }
 0xaf4   : > { %v10625_v41 = vadd.f32 %v10624_v58, %v16919_v27 }
 0xaf5   : > { %v10986_v23 = vadd.f32 %v10985_v25, %v10897_v16 }
 0xaf6   : > { %v10692_v39 = vmax.f32 %v10625_v41, 0.0 }
 0xaf7   : > { %v11052_v18 = vmax.f32 %v10986_v23, 0.0  ;;  %v10988_v7 = vpop.f32.mrf.mxu2 }
 0xaf8   : > { %v10728_v22 = vpack.c.bf16 %v10692_v39, %v10690_v8  ;;  %v10535_v40 = vpop.f32.mrf.mxu3 }
 0xaf9   : > { %v11084_v5 = vadd.f32 %v11052_v18, %v16807_v63  ;;  %v10536_v24 = vadd.f32 %v10535_v40, %v16934_v47 }
 0xafa   : > { %v10899_v21 = vpop.f32.mrf.mxu1  ;;  %11027 = vmatmul.bf16.gmra.mxu2 %v10728_v22 }
 0xafb   : > { %11116 = vst.msk [vmem:[%s17073_s25 + $0x48] sm:$0xff] %vm459_vm0, %v11084_v5  ;;  %v10691_v0 = vmax.f32 %v10536_v24, 0.0  ;;  %v10900_v51 = vadd.f32 %v17065_v32, %v10899_v21  ;;  %v10627_v42 = vpop.f32.mrf.mxu0 }
 0xafc   : > { %v10628_v19 = vadd.f32 %v10627_v42, %v16919_v27 }
 0xafd   : > { %v10727_v35 = vpack.c.bf16 %v10691_v0, %v10689_v55  ;;  %v10989_v57 = vadd.f32 %v10988_v7, %v10900_v51 }
 0xafe   : > { %v10694_v50 = vmax.f32 %v10628_v19, 0.0 }
 0xaff   : > { %v11053_v62 = vmax.f32 %v10989_v57, 0.0  ;;  %10938 = vmatmul.bf16.gmra.mxu1 %v10727_v35  ;;  %v10990_v46 = vpop.f32.mrf.mxu2 }
 0xb00   : > { %v10538_v37 = vpop.f32.mrf.mxu3 }
 0xb01   : > { %v11085_v63 = vadd.f32 %v11053_v62, %v16824_v1  ;;  %v10539_v26 = vadd.f32 %v10538_v37, %v16934_v47 }
 0xb02   : > { %v10901_v45 = vpop.f32.mrf.mxu1 }
 0xb03   : > { %11117 = vst.msk [vmem:[%s17073_s25 + $0x50] sm:$0xff] %vm459_vm0, %v11085_v63  ;;  %v10902_v49 = vadd.f32 %v17065_v32, %v10901_v45  ;;  %v10629_v20 = vpop.f32.mrf.mxu0  ;;  %v10693_v16 = vmax.f32 %v10539_v26, 0.0 }
 0xb04   : > { %v10630_v31 = vadd.f32 %v10629_v20, %v16919_v27 }
 0xb05   : > { %v10991_v60 = vadd.f32 %v10990_v46, %v10902_v49 }
 0xb06   : > { %v10696_v13 = vmax.f32 %v10630_v31, 0.0 }
 0xb07   : > { %v11054_v53 = vmax.f32 %v10991_v60, 0.0  ;;  %v10993_v15 = vpop.f32.mrf.mxu2 }
 0xb08   : > { %v10730_v25 = vpack.c.bf16 %v10696_v13, %v10694_v50  ;;  %v10540_v1 = vpop.f32.mrf.mxu3 }
 0xb09   : > { %v11086_v29 = vadd.f32 %v11054_v53, %v16827_v43  ;;  %v10541_v52 = vadd.f32 %v10540_v1, %v16934_v47 }
 0xb0a   : > { %v10904_v36 = vpop.f32.mrf.mxu1  ;;  %11032 = vmatmul.bf16.gmra.mxu2 %v10730_v25 }
 0xb0b   : > { %11118 = vst.msk [vmem:[%s17073_s25 + $0x58] sm:$0xff] %vm459_vm0, %v11086_v29  ;;  %v10695_v58 = vmax.f32 %v10541_v52, 0.0  ;;  %v10905_v41 = vadd.f32 %v17065_v32, %v10904_v36  ;;  %v10632_v23 = vpop.f32.mrf.mxu0 }
 0xb0c   : > { %v10633_v7 = vadd.f32 %v10632_v23, %v16919_v27 }
 0xb0d   : > { %v10729_v8 = vpack.c.bf16 %v10695_v58, %v10693_v16  ;;  %v10994_v39 = vadd.f32 %v10993_v15, %v10905_v41 }
 0xb0e   : > { %v10698_v0 = vmax.f32 %v10633_v7, 0.0 }
 0xb0f   : > { %v11055_v34 = vmax.f32 %v10994_v39, 0.0  ;;  %10943 = vmatmul.bf16.gmra.mxu1 %v10729_v8  ;;  %v10995_v18 = vpop.f32.mrf.mxu2 }
 0xb10   : > { %v10543_v22 = vpop.f32.mrf.mxu3 }
 0xb11   : > { %v11087_v43 = vadd.f32 %v11055_v34, %v16864_v11  ;;  %v10544_v42 = vadd.f32 %v10543_v22, %v16934_v47 }
 0xb12   : > { %v10906_v40 = vpop.f32.mrf.mxu1 }
 0xb13   : > { %11119 = vst.msk [vmem:[%s17073_s25 + $0x60] sm:$0xff] %vm459_vm0, %v11087_v43  ;;  %v10907_v5 = vadd.f32 %v17065_v32, %v10906_v40  ;;  %v10634_v24 = vpop.f32.mrf.mxu0  ;;  %v10697_v19 = vmax.f32 %v10544_v42, 0.0 }
 0xb14   : > { %v10635_v21 = vadd.f32 %v10634_v24, %v16919_v27 }
 0xb15   : > { %v10996_v55 = vadd.f32 %v10995_v18, %v10907_v5 }
 0xb16   : > { %v10700_v51 = vmax.f32 %v10635_v21, 0.0 }
 0xb17   : > { %v11056_v35 = vmax.f32 %v10996_v55, 0.0  ;;  %v10998_v62 = vpop.f32.mrf.mxu2 }
 0xb18   : > { %v10732_v57 = vpack.c.bf16 %v10700_v51, %v10698_v0  ;;  %v10545_v11 = vpop.f32.mrf.mxu3 }
 0xb19   : > { %v11088_v46 = vadd.f32 %v11056_v35, %v16855_v17  ;;  %v10546_v37 = vadd.f32 %v10545_v11, %v16934_v47 }
 0xb1a   : > { %v10909_v63 = vpop.f32.mrf.mxu1  ;;  %11037 = vmatmul.bf16.gmra.mxu2 %v10732_v57 }
 0xb1b   : > { %11120 = vst.msk [vmem:[%s17073_s25 + $0x68] sm:$0xff] %vm459_vm0, %v11088_v46  ;;  %v10699_v27 = vmax.f32 %v10546_v37, 0.0  ;;  %v10910_v45 = vadd.f32 %v17065_v32, %v10909_v63 }
 0xb1d   : > { %v10731_v49 = vpack.c.bf16 %v10699_v27, %v10697_v19  ;;  %v10999_v20 = vadd.f32 %v10998_v62, %v10910_v45 }
 0xb1f   : > { %v11057_v31 = vmax.f32 %v10999_v20, 0.0  ;;  %10948 = vmatmul.bf16.gmra.mxu1 %v10731_v49  ;;  %v11000_v60 = vpop.f32.mrf.mxu2 }
 0xb21   : > { %v11089_v50 = vadd.f32 %v11057_v31, %v16898_v30 }
 0xb22   : > { %v10911_v17 = vpop.f32.mrf.mxu1 }
 0xb23   : > { %11121 = vst.msk [vmem:[%s17073_s25 + $0x70] sm:$0xff] %vm459_vm0, %v11089_v50  ;;  %v10912_v47 = vadd.f32 %v17065_v32, %v10911_v17 }
 0xb25   : > { %v11001_v13 = vadd.f32 %v11000_v60, %v10912_v47 }
 0xb27   : > { %v11058_v26 = vmax.f32 %v11001_v13, 0.0  ;;  %v11003_v53 = vpop.f32.mrf.mxu2 }
 0xb29   : > { %v11090_v25 = vadd.f32 %v11058_v26, %v16892_v12 }
 0xb2a   : > { %v10914_v15 = vpop.f32.mrf.mxu1 }
 0xb2b   : > { %11122 = vst.msk [vmem:[%s17073_s25 + $0x78] sm:$0xff] %vm459_vm0, %v11090_v25  ;;  %v10915_v1 = vadd.f32 %v17065_v32, %v10914_v15 }
 0xb2d   : > { %v11004_v29 = vadd.f32 %v11003_v53, %v10915_v1 }
 0xb2f   : > { %v11059_v52 = vmax.f32 %v11004_v29, 0.0  ;;  %v11005_v30 = vpop.f32.mrf.mxu2 }
 0xb31   : > { %v11091_v36 = vadd.f32 %v11059_v52, %v16922_v14 }
 0xb32   : > { %v10916_v16 = vpop.f32.mrf.mxu1 }
 0xb33   : > { %11123 = vst.msk [vmem:[%s17073_s25 + $0x80] sm:$0xff] %vm459_vm0, %v11091_v36  ;;  %v10917_v58 = vadd.f32 %v17065_v32, %v10916_v16 }
 0xb35   : > { %v11006_v41 = vadd.f32 %v11005_v30, %v10917_v58 }
 0xb37   : > { %v11060_v23 = vmax.f32 %v11006_v41, 0.0  ;;  %v11008_v8 = vpop.f32.mrf.mxu2 }
 0xb39   : > { %v11092_v12 = vadd.f32 %v11060_v23, %v16917_v33 }
 0xb3a   : > { %v10919_v39 = vpop.f32.mrf.mxu1 }
 0xb3b   : > { %11124 = vst.msk [vmem:[%s17073_s25 + $0x88] sm:$0xff] %vm459_vm0, %v11092_v12  ;;  %v10920_v34 = vadd.f32 %v17065_v32, %v10919_v39 }
 0xb3d   : > { %v11009_v18 = vadd.f32 %v11008_v8, %v10920_v34 }
 0xb3f   : > { %v11061_v22 = vmax.f32 %v11009_v18, 0.0  ;;  %v11010_v40 = vpop.f32.mrf.mxu2 }
 0xb41   : > { %v11093_v14 = vadd.f32 %v11061_v22, %v16940_v28 }
 0xb42   : > { %v10921_v43 = vpop.f32.mrf.mxu1 }
 0xb43   : > { %11125 = vst.msk [vmem:[%s17073_s25 + $0x90] sm:$0xff] %vm459_vm0, %v11093_v14  ;;  %v10922_v7 = vadd.f32 %v17065_v32, %v10921_v43 }
 0xb45   : > { %v11011_v5 = vadd.f32 %v11010_v40, %v10922_v7 }
 0xb47   : > { %v11062_v24 = vmax.f32 %v11011_v5, 0.0 }
 0xb49   : > { %v11094_v33 = vadd.f32 %v11062_v24, %v16937_v2 }
 0xb4b   : > { %11126 = vst.msk [vmem:[%s17073_s25 + $0x98] sm:$0xff] %vm459_vm0, %v11094_v33 }
 0xb4c   : > { %v10924_v21 = vpop.f32.mrf.mxu1 }
 0xb4d   : > { %v10925_v55 = vadd.f32 %v17065_v32, %v10924_v21  ;;  %v11013_v0 = vpop.f32.mrf.mxu2 }
 0xb4f   : > { %v11014_v51 = vadd.f32 %v11013_v0, %v10925_v55 }
 0xb51   : > { %v11063_v28 = vmax.f32 %v11014_v51, 0.0 }
 0xb53   : > { %v11095_v42 = vadd.f32 %v11063_v28, %v16955_v44 }
 0xb54   : > { %v10926_v35 = vpop.f32.mrf.mxu1 }
 0xb55   : > { %11127 = vst.msk [vmem:[%s17073_s25 + $0xa0] sm:$0xff] %vm459_vm0, %v11095_v42  ;;  %v10927_v57 = vadd.f32 %v17065_v32, %v10926_v35  ;;  %v11015_v62 = vpop.f32.mrf.mxu2 }
 0xb57   : > { %v11016_v11 = vadd.f32 %v11015_v62, %v10927_v57 }
 0xb59   : > { %v11064_v2 = vmax.f32 %v11016_v11, 0.0 }
 0xb5b   : > { %v11096_v46 = vadd.f32 %v11064_v2, %v16958_v38 }
 0xb5c   : > { %v10929_v37 = vpop.f32.mrf.mxu1 }
 0xb5d   : > { %11128 = vst.msk [vmem:[%s17073_s25 + $0xa8] sm:$0xff] %vm459_vm0, %v11096_v46  ;;  %v10930_v63 = vadd.f32 %v17065_v32, %v10929_v37  ;;  %v11018_v19 = vpop.f32.mrf.mxu2 }
 0xb5f   : > { %v11019_v27 = vadd.f32 %v11018_v19, %v10930_v63 }
 0xb61   : > { %v11065_v44 = vmax.f32 %v11019_v27, 0.0 }
 0xb63   : > { %v11097_v45 = vadd.f32 %v11065_v44, %v16976_v48 }
 0xb64   : > { %v10931_v49 = vpop.f32.mrf.mxu1 }
 0xb65   : > { %11129 = vst.msk [vmem:[%s17073_s25 + $0xb0] sm:$0xff] %vm459_vm0, %v11097_v45  ;;  %v10932_v20 = vadd.f32 %v17065_v32, %v10931_v49  ;;  %v11020_v31 = vpop.f32.mrf.mxu2 }
 0xb67   : > { %v11021_v60 = vadd.f32 %v11020_v31, %v10932_v20 }
 0xb69   : > { %v11066_v38 = vmax.f32 %v11021_v60, 0.0 }
 0xb6b   : > { %v11098_v50 = vadd.f32 %v11066_v38, %v16972_v6 }
 0xb6c   : > { %v10934_v17 = vpop.f32.mrf.mxu1 }
 0xb6d   : > { %11130 = vst.msk [vmem:[%s17073_s25 + $0xb8] sm:$0xff] %vm459_vm0, %v11098_v50  ;;  %v10935_v47 = vadd.f32 %v17065_v32, %v10934_v17  ;;  %v11023_v13 = vpop.f32.mrf.mxu2 }
 0xb6f   : > { %v11024_v26 = vadd.f32 %v11023_v13, %v10935_v47 }
 0xb71   : > { %v11067_v48 = vmax.f32 %v11024_v26, 0.0 }
 0xb73   : > { %v11099_v53 = vadd.f32 %v11067_v48, %v16994_v9 }
 0xb74   : > { %v10936_v25 = vpop.f32.mrf.mxu1 }
 0xb75   : > { %11131 = vst.msk [vmem:[%s17073_s25 + $0xc0] sm:$0xff] %vm459_vm0, %v11099_v53  ;;  %v10937_v15 = vadd.f32 %v17065_v32, %v10936_v25  ;;  %v11025_v1 = vpop.f32.mrf.mxu2 }
 0xb77   : > { %v11026_v29 = vadd.f32 %v11025_v1, %v10937_v15 }
 0xb79   : > { %v11068_v6 = vmax.f32 %v11026_v29, 0.0 }
 0xb7b   : > { %v11100_v52 = vadd.f32 %v11068_v6, %v16990_v4 }
 0xb7c   : > { %v10939_v30 = vpop.f32.mrf.mxu1 }
 0xb7d   : > { %11132 = vst.msk [vmem:[%s17073_s25 + $0xc8] sm:$0xff] %vm459_vm0, %v11100_v52  ;;  %v10940_v36 = vadd.f32 %v17065_v32, %v10939_v30  ;;  %v11028_v16 = vpop.f32.mrf.mxu2 }
 0xb7f   : > { %v11029_v58 = vadd.f32 %v11028_v16, %v10940_v36 }
 0xb81   : > { %v11069_v9 = vmax.f32 %v11029_v58, 0.0 }
 0xb83   : > { %v11101_v41 = vadd.f32 %v11069_v9, %v17012_v61 }
 0xb84   : > { %v10941_v23 = vpop.f32.mrf.mxu1 }
 0xb85   : > { %11133 = vst.msk [vmem:[%s17073_s25 + $0xd0] sm:$0xff] %vm459_vm0, %v11101_v41  ;;  %v10942_v12 = vadd.f32 %v17065_v32, %v10941_v23  ;;  %v11030_v8 = vpop.f32.mrf.mxu2 }
 0xb87   : > { %v11031_v39 = vadd.f32 %v11030_v8, %v10942_v12 }
 0xb89   : > { %v11070_v4 = vmax.f32 %v11031_v39, 0.0 }
 0xb8b   : > { %v11102_v34 = vadd.f32 %v11070_v4, %v17008_v3 }
 0xb8c   : > { %v10944_v18 = vpop.f32.mrf.mxu1 }
 0xb8d   : > { %11134 = vst.msk [vmem:[%s17073_s25 + $0xd8] sm:$0xff] %vm459_vm0, %v11102_v34  ;;  %v10945_v22 = vadd.f32 %v17065_v32, %v10944_v18  ;;  %v11033_v14 = vpop.f32.mrf.mxu2 }
 0xb8f   : > { %v11034_v43 = vadd.f32 %v11033_v14, %v10945_v22 }
 0xb91   : > { %v11071_v61 = vmax.f32 %v11034_v43, 0.0 }
 0xb93   : > { %v11103_v7 = vadd.f32 %v11071_v61, %v17030_v59 }
 0xb94   : > { %v10946_v40 = vpop.f32.mrf.mxu1 }
 0xb95   : > { %11135 = vst.msk [vmem:[%s17073_s25 + $0xe0] sm:$0xff] %vm459_vm0, %v11103_v7  ;;  %v10947_v5 = vadd.f32 %v17065_v32, %v10946_v40  ;;  %v11035_v24 = vpop.f32.mrf.mxu2 }
 0xb97   : > { %v11036_v3 = vadd.f32 %v11035_v24, %v10947_v5 }
 0xb99   : > { %v11072_v33 = vmax.f32 %v11036_v3, 0.0 }
 0xb9b   : > { %v11104_v21 = vadd.f32 %v11072_v33, %v17026_v54 }
 0xb9c   : > { %v10949_v55 = vpop.f32.mrf.mxu1 }
 0xb9d   : > { %11136 = vst.msk [vmem:[%s17073_s25 + $0xe8] sm:$0xff] %vm459_vm0, %v11104_v21  ;;  %v10950_v0 = vadd.f32 %v17065_v32, %v10949_v55  ;;  %v11038_v51 = vpop.f32.mrf.mxu2 }
 0xb9f   : > { %v11039_v28 = vadd.f32 %v11038_v51, %v10950_v0 }
 0xba1   : > { %v11073_v59 = vmax.f32 %v11039_v28, 0.0 }
 0xba3   : > { %v11105_v42 = vadd.f32 %v11073_v59, %v17048_v10 }
 0xba4   : > { %v10951_v35 = vpop.f32.mrf.mxu1 }
 0xba5   : > { %11137 = vst.msk [vmem:[%s17073_s25 + $0xf0] sm:$0xff] %vm459_vm0, %v11105_v42  ;;  %v10952_v57 = vadd.f32 %v17065_v32, %v10951_v35  ;;  %v11040_v54 = vpop.f32.mrf.mxu2 }
 0xba7   : > { %v11041_v62 = vadd.f32 %v11040_v54, %v10952_v57 }
 0xba9   : > { %v11074_v11 = vmax.f32 %v11041_v62, 0.0 }
 0xbab   : > { %v11106_v2 = vadd.f32 %v11074_v11, %v17044_v56 }
 0xbad   : > { %11138 = vst.msk [vmem:[%s17073_s25 + $0xf8] sm:$0xff] %vm459_vm0, %v11106_v2 }
 0xbae   : > { %12702 = shalt.err (!%p12699_p4)
}
 0xbaf   : > { %s12760_s14 = smov 128  }
 0xbb0   : > { %11989 = dma.vmem_to_hbm [thread:$0]  (%p12861_p11), %s11154_s17, 4096, %s11156_s26, %s11140_s13, %s12760_s14, %s12760_s14, %s12759_s29  }
 0xbb1 PF: > { %s11170_s25 = sand.u32 1, %s12729_s30   ;;  %p18031_p7 = scmp.ge.s32.totalorder %s12741_s12, 2 }
 0xbb2   : > { %s11171_s11 = scalar_lea.sflag [#allocation5], %s11170_s25 }
 0xbb3   : > { %p11996_p5 = pnand %p18031_p7, %p12865_p12 }
 0xbb5   : > { %p11997_p8 = pneg %p11996_p5 }
 0xbb7   : > { %12724 = dma.done.wait (%p11997_p8), %s11171_s11, 4096  }
 0xbb8   : > { %12726 = vsyncadd (%p11997_p8), %s11171_s11, 4294963200  ;;  %s18032_s12 = sld [smem:[#allocation10_spill]]  ;;  %s18035_s30 = smov %s12733_s10 }
 0xbb9   : > { %s18033_s18 = sld [smem:[#allocation9_spill]] }
 0xbba   : > { %s18034_s11 = sld [smem:[#allocation11_spill]] }
 0xbbe   : > { %p22_p10 = scmp.ge.s32.totalorder %s18032_s12, 4  }
 0xbbf   : > { %s18036_s10 = smov %s18033_s18 }
 0xbc0   :  { %24 = sbr.rel (!%p22_p10) target bundleno = 5 (0x5), region = 101 }
 0xbc5   :  { %11177 = vsyncpa [#allocation4], 1 }
 0xbc6   :  { %11179 = vsyncpa [#allocation4 + $0x1], 1 }
 0xbc7   :  { %11180 = vsyncpa [#allocation5], 1 }
 0xbc8   :  { %11182 = vsyncpa [#allocation5 + $0x1], 1 }

</bundles_post_ra>
